<compile_context>
chip_gen: v7x
topology: tpu7x:2x2x1
jax: 0.10.0
libtpu: 0.0.40
codegen_flags: <defaults>
</compile_context>

<pallas_src>
import functools
import math

import jax
import jax.numpy as jnp
from jax import lax
from jax.experimental import pallas as pl
from jax.experimental.pallas import tpu as pltpu

LANE = 128      # vreg lane width
SUBLANE = 8     # f32 sublane count


def _round_up(x, m):
    return ((x + m - 1) // m) * m


# ------------------------------ Pallas kernel ------------------------------- #

def fused_lstm_model_kernel(*refs, T, Bp, Hp, L):
    """Whole LSTMModel forward in one kernel.

    refs layout (inputs, then output, then scratch):
      [0]              tok_ref : (T*Bp, 1) int32, time-major flattened tokens
      [1 + 3l + 0]     wih_l   : (Din_pad, 8Hp) bf16  input-projection weights,
                                 gate columns interleaved [i_f|i_b|f_f|f_b|g_f|g_b|o_f|o_b]
                                 (layer 0: embedding already folded in -> (Vp, 8Hp))
      [1 + 3l + 1]     bx_l    : (1, 8Hp) f32   b_ih+b_hh, same column layout
      [1 + 3l + 2]     whh_l   : (2Hp, 8Hp) bf16 block-structured recurrent weights
                                 (rows 0:Hp act on h_f, rows Hp:2Hp on h_b)
      [1+3L .. 1+3L+3] w1 (2Hp,128) bf16, b1 (1,128) f32, w2 (128,Op) bf16, b2 (1,Op) f32
      [1 + 3L + 4]     o_ref   : (Bp, Op) f32
      [scratch 0]      gx_scr  : (T*Bp, 8Hp) f32  hoisted gate pre-activations
      [scratch 1]      y_scr   : (T*Bp, 2Hp) f32  non-final layer outputs, time order
    """
    n_in = 1 + 3 * L + 4
    tok_ref = refs[0]
    layer_refs = refs[1:1 + 3 * L]
    w1_ref, b1_ref, w2_ref, b2_ref = refs[1 + 3 * L:n_in]
    o_ref = refs[n_in]
    gx_scr = refs[n_in + 1]
    y_scr = refs[n_in + 2]

    H2 = 2 * Hp          # concatenated [fwd | bwd] hidden width
    H8 = 8 * Hp          # one time-row of gate pre-activations

    zeros2 = jnp.zeros((Bp, H2), jnp.float32)

    # Lane mask selecting the forward-direction gate columns of the interleaved
    # layout.  Built once (hoisted) -> one cheap VPU select per step.
    col = lax.broadcasted_iota(jnp.int32, (Bp, H8), 1)
    fwd_cols = (col % H2) < Hp

    # Embedding folded into layer 0's input projection: one-hot(tokens) hits the
    # pre-folded (Vp, 8Hp) table with a single MXU call (no gather, no extra kernel).
    # TODO(synk): for large vocabularies switch to a scalar-prefetch row gather of
    # embedding rows instead of the one-hot matmul.
    Vp = layer_refs[0].shape[0]
    onehot = (tok_ref[...] ==
              lax.broadcasted_iota(jnp.int32, (T * Bp, Vp), 1)).astype(jnp.float32)
    x_in = onehot.astype(jnp.bfloat16)           # bf16 MXU operand

    h_cat = zeros2
    hb_last = jnp.zeros((Bp, Hp), jnp.float32)

    for l in range(L):
        wih = layer_refs[3 * l + 0][...]         # (Din_pad, 8Hp) bf16
        bx = layer_refs[3 * l + 1][...]          # (1, 8Hp)       f32
        whh = layer_refs[3 * l + 2][...]         # (2Hp, 8Hp)     bf16

        # Input projection for the whole sequence and BOTH directions, hoisted out
        # of the serial recurrence: one big bf16 MXU call, f32 accumulation, stored
        # into a tile-aligned VMEM scratch (row block s = time step s, Bp rows).
        # TODO(synk): at large T*Bp, compute this in time chunks (emit_pipeline) to
        # stay inside v7x's 64 MiB VMEM instead of materializing all of gx at once.
        gx_scr[...] = jnp.dot(x_in, wih, preferred_element_type=jnp.float32) + bx

        last = (l == L - 1)
        h_cat = zeros2
        c_cat = zeros2

        # Fused bidirectional recurrence: one block-structured matmul per step feeds
        # both direction chains; states live in registers across the unrolled loop.
        # TODO(synk): switch to a lax.fori_loop carry (unroll=2-4) once T > ~32 to
        # keep vreg pressure / compile time flat.
        for s in range(T):
            gf = gx_scr[s * Bp:(s + 1) * Bp, :]              # fwd input, time s
            gb = gx_scr[(T - 1 - s) * Bp:(T - s) * Bp, :]    # bwd input, time T-1-s
            g_pre = jnp.where(fwd_cols, gf, gb)
            if s > 0:   # h == 0 at s == 0 -> skip the recurrent matmul entirely
                g_pre = g_pre + jnp.dot(h_cat.astype(jnp.bfloat16), whh,
                                        preferred_element_type=jnp.float32)
            # Vreg-aligned gate blocks; sigmoid only over i|f|o, tanh only over g.
            i_c = jax.nn.sigmoid(g_pre[:, 0:H2])
            f_c = jax.nn.sigmoid(g_pre[:, H2:2 * H2])
            g_c = jnp.tanh(g_pre[:, 2 * H2:3 * H2])
            o_c = jax.nn.sigmoid(g_pre[:, 3 * H2:4 * H2])
            c_cat = f_c * c_cat + i_c * g_c                  # [c_f | c_b]
            h_cat = o_c * jnp.tanh(c_cat)                    # [h_f | h_b]

            if last:
                # Final layer: only lstm_out[:, -1, :] feeds the head.  The backward
                # direction's time-(T-1) output is its FIRST processed step (s == 0).
                if s == 0:
                    hb_last = h_cat[:, Hp:H2]
            else:
                # Layer output in time order; each store is a full (8,128) tile.
                y_scr[s * Bp:(s + 1) * Bp, 0:Hp] = h_cat[:, 0:Hp]
                y_scr[(T - 1 - s) * Bp:(T - s) * Bp, Hp:H2] = h_cat[:, Hp:H2]

        if not last:
            x_in = y_scr[...].astype(jnp.bfloat16)

    # Head: fc1 + ReLU + (dropout = identity in eval) + fc2, fused as the epilogue.
    # fc1(concat([h_f, h_b])) == h_f @ W1[:Hp] + h_b @ W1[Hp:].
    hid = (jnp.dot(h_cat[:, 0:Hp].astype(jnp.bfloat16), w1_ref[0:Hp, :],
                   preferred_element_type=jnp.float32)
           + jnp.dot(hb_last.astype(jnp.bfloat16), w1_ref[Hp:H2, :],
                     preferred_element_type=jnp.float32)
           + b1_ref[...])
    hid = jnp.maximum(hid, 0.0)
    # TODO(synk): dropout (inter-layer LSTM dropout and head dropout) is training-only;
    # the eval forward implemented here is identity.
    o_ref[...] = (jnp.dot(hid.astype(jnp.bfloat16), w2_ref[...],
                          preferred_element_type=jnp.float32) + b2_ref[...])


# --------------------------------- wrapper ---------------------------------- #

def lstm_model_forward(x_tokens, kp, *, out_dim):
    """Forward pass matching LSTMModel.forward (eval mode): one fused pallas_call."""
    B, T = x_tokens.shape
    layers = kp["layers"]
    L = len(layers)
    Hp = layers[-1]["whh"].shape[0] // 2
    Op = kp["w2"].shape[1]
    Bp = max(SUBLANE, _round_up(B, SUBLANE))

    # Pad the batch to a full sublane group; lay tokens out time-major so each
    # per-step row slab is a full tile.  Padding token id 0 is valid; padded batch
    # rows are computed independently and discarded.
    tok = jnp.zeros((Bp, T), jnp.int32).at[:B, :].set(x_tokens.astype(jnp.int32))
    tok_tm = jnp.transpose(tok).reshape(T * Bp, 1)

    flat_in = [tok_tm]
    for layer in layers:
        flat_in += [layer["wih"], layer["bx"], layer["whh"]]
    flat_in += [kp["w1"], kp["b1"], kp["w2"], kp["b2"]]

    vmem = pl.BlockSpec(memory_space=pltpu.MemorySpace.VMEM)
    # TODO(synk): for large batches, add a batch-tile grid axis with
    # dimension_semantics=("parallel",) to use both v7x TensorCores; with batch=2
    # (one padded 8-row tile) a grid only adds per-step overhead.
    out = pl.pallas_call(
        functools.partial(fused_lstm_model_kernel, T=T, Bp=Bp, Hp=Hp, L=L),
        out_shape=jax.ShapeDtypeStruct((Bp, Op), jnp.float32),
        in_specs=[vmem] * len(flat_in),
        out_specs=vmem,
        scratch_shapes=[
            pltpu.VMEM((T * Bp, 8 * Hp), jnp.float32),   # gate pre-activations
            pltpu.VMEM((T * Bp, 2 * Hp), jnp.float32),   # non-final layer outputs
        ],
    )(*flat_in)
    return out[:B, :out_dim]


# ----------------------------- param preparation ---------------------------- #

def init_params(key, vocab_size, embedding_dim, hidden_dim, num_layers, output_dim,
                bidirectional=True):
    """PyTorch-convention parameters (same shapes / init ranges as nn.LSTM / Linear)."""
    # TODO(synk): the fused kernel implements the bidirectional=True configuration only.
    assert bidirectional, "fused kernel implements bidirectional=True"
    keys = list(jax.random.split(key, 8 + 8 * num_layers))
    ki = iter(keys)
    params = {}
    params["embedding"] = jax.random.normal(next(ki), (vocab_size, embedding_dim),
                                            jnp.float32)
    k = 1.0 / math.sqrt(hidden_dim)
    lstm_layers = []
    in_dim = embedding_dim
    for _ in range(num_layers):
        layer = {}
        for d in ("fwd", "bwd"):
            w_ih = jax.random.uniform(next(ki), (4 * hidden_dim, in_dim),
                                      jnp.float32, -k, k)
            w_hh = jax.random.uniform(next(ki), (4 * hidden_dim, hidden_dim),
                                      jnp.float32, -k, k)
            b_ih = jax.random.uniform(next(ki), (4 * hidden_dim,), jnp.float32, -k, k)
            b_hh = jax.random.uniform(next(ki), (4 * hidden_dim,), jnp.float32, -k, k)
            layer[d] = (w_ih, w_hh, b_ih, b_hh)
        lstm_layers.append(layer)
        in_dim = hidden_dim * 2
    params["lstm"] = lstm_layers

    feat = hidden_dim * 2
    k1 = 1.0 / math.sqrt(feat)
    params["fc1_w"] = jax.random.uniform(next(ki), (128, feat), jnp.float32, -k1, k1)
    params["fc1_b"] = jax.random.uniform(next(ki), (128,), jnp.float32, -k1, k1)
    k2 = 1.0 / math.sqrt(128)
    params["fc2_w"] = jax.random.uniform(next(ki), (output_dim, 128), jnp.float32, -k2, k2)
    params["fc2_b"] = jax.random.uniform(next(ki), (output_dim,), jnp.float32, -k2, k2)
    return params


def prepare_params(params):
    """One-time re-layout into kernel layout.

    Hidden dim padded to a full lane group Hp; gate columns interleaved
    [i_f|i_b|f_f|f_b|g_f|g_b|o_f|o_b] (each block Hp lanes); recurrent weights
    block-structured over the concatenated [h_f|h_b] state; biases pre-summed;
    embedding folded into layer 0's projection; MXU operands cast to bf16.
    Padded hidden units see zero weights/biases and provably stay at h = c = 0.
    """
    emb = params["embedding"]
    V, _ = emb.shape
    H = params["lstm"][0]["fwd"][1].shape[1]          # w_hh: (4H, H)
    Hp = max(LANE, _round_up(H, LANE))
    Vp = max(SUBLANE, _round_up(V, SUBLANE))

    def scatter_cols(wT, d):
        # wT: (Din, 4H), gate column order i|f|g|o -> (Din, 8Hp) interleaved layout.
        Din = wT.shape[0]
        out = jnp.zeros((Din, 8 * Hp), jnp.float32)
        for g in range(4):
            dst = g * 2 * Hp + d * Hp
            out = out.at[:, dst:dst + H].set(wT[:, g * H:(g + 1) * H])
        return out

    def scatter_bias(b, d):
        out = jnp.zeros((8 * Hp,), jnp.float32)
        for g in range(4):
            dst = g * 2 * Hp + d * Hp
            out = out.at[dst:dst + H].set(b[g * H:(g + 1) * H])
        return out

    def pad_rows_2h(w):
        # (2H, N) -> (2Hp, N): fwd-hidden rows at [0:H], bwd-hidden rows at [Hp:Hp+H].
        out = jnp.zeros((2 * Hp, w.shape[1]), w.dtype)
        out = out.at[0:H, :].set(w[0:H, :])
        out = out.at[Hp:Hp + H, :].set(w[H:2 * H, :])
        return out

    kp_layers = []
    for l, layer in enumerate(params["lstm"]):
        w_ih_f, w_hh_f, b_ih_f, b_hh_f = layer["fwd"]
        w_ih_b, w_hh_b, b_ih_b, b_hh_b = layer["bwd"]

        wih_cols = scatter_cols(w_ih_f.T, 0) + scatter_cols(w_ih_b.T, 1)
        if l == 0:
            wih = jnp.zeros((Vp, 8 * Hp), jnp.float32).at[:V, :].set(emb @ wih_cols)
        else:
            wih = pad_rows_2h(wih_cols)

        bx = (scatter_bias(b_ih_f + b_hh_f, 0)
              + scatter_bias(b_ih_b + b_hh_b, 1)).reshape(1, -1)

        whh = jnp.zeros((2 * Hp, 8 * Hp), jnp.float32)
        whh = whh.at[0:H, :].set(scatter_cols(w_hh_f.T, 0))
        whh = whh.at[Hp:Hp + H, :].set(scatter_cols(w_hh_b.T, 1))

        kp_layers.append({
            "wih": wih.astype(jnp.bfloat16),
            "bx": bx,                                  # biases stay f32
            "whh": whh.astype(jnp.bfloat16),
        })

    F1 = params["fc1_w"].shape[0]                      # 128 in this model
    O = params["fc2_w"].shape[0]
    Op = max(LANE, _round_up(O, LANE))
    w1 = pad_rows_2h(params["fc1_w"].T).astype(jnp.bfloat16)            # (2Hp, 128)
    b1 = params["fc1_b"].reshape(1, -1)
    w2 = (jnp.zeros((F1, Op), jnp.float32)
          .at[:, :O].set(params["fc2_w"].T)).astype(jnp.bfloat16)       # (128, Op)
    b2 = jnp.zeros((1, Op), jnp.float32).at[0, :O].set(params["fc2_b"])

    return {"layers": kp_layers, "w1": w1, "b1": b1, "w2": w2, "b2": b2}


# ------------------------------ pure-JAX reference -------------------------- #

def reference_forward(x_tokens, params):
    """Direct (unfused, f32) JAX transcription of the PyTorch eval-mode forward."""
    h = params["embedding"][x_tokens]                                 # (B, T, E)
    B, T = x_tokens.shape
    for layer in params["lstm"]:
        outs = []
        for name, rev in (("fwd", False), ("bwd", True)):
            w_ih, w_hh, b_ih, b_hh = layer[name]
            Hd = w_hh.shape[1]
            seq = h[:, ::-1, :] if rev else h
            ht = jnp.zeros((B, Hd), jnp.float32)
            ct = jnp.zeros((B, Hd), jnp.float32)
            ys = []
            for t in range(T):
                g = seq[:, t, :] @ w_ih.T + ht @ w_hh.T + b_ih + b_hh
                i = jax.nn.sigmoid(g[:, 0:Hd])
                f = jax.nn.sigmoid(g[:, Hd:2 * Hd])
                gg = jnp.tanh(g[:, 2 * Hd:3 * Hd])
                o = jax.nn.sigmoid(g[:, 3 * Hd:4 * Hd])
                ct = f * ct + i * gg
                ht = o * jnp.tanh(ct)
                ys.append(ht)
            y = jnp.stack(ys, axis=1)                                 # (B, T, Hd)
            outs.append(y[:, ::-1, :] if rev else y)
        h = jnp.concatenate(outs, axis=-1)                            # (B, T, 2H)
    last = h[:, -1, :]
    hid = jnp.maximum(last @ params["fc1_w"].T + params["fc1_b"], 0.0)
    return hid @ params["fc2_w"].T + params["fc2_b"]


# ----------------------------------- main ------------------------------------ #

if __name__ == "__main__":
    vocab_size = 4        # A, C, G, U
    embedding_dim = 16
    hidden_dim = 32
    num_layers = 2
    output_dim = 1
    batch = 2
    seq_len = 8

    key = jax.random.PRNGKey(0)
    k_param, k_tok = jax.random.split(key)
    params = init_params(k_param, vocab_size, embedding_dim, hidden_dim,
                         num_layers, output_dim, bidirectional=True)
    kparams = prepare_params(params)
    x_tokens = jax.random.randint(k_tok, (batch, seq_len), 0, vocab_size,
                                  dtype=jnp.int32)

    fwd = jax.jit(functools.partial(lstm_model_forward, out_dim=output_dim))
    out = jax.block_until_ready(fwd(x_tokens, kparams))

    assert out.shape == (batch, output_dim), out.shape
    assert bool(jnp.all(jnp.isfinite(out)))

    ref = reference_forward(x_tokens, params)
    # bf16 MXU operands (f32 accumulation) introduce a small deviation vs the
    # all-f32 reference.
    assert bool(jnp.allclose(out, ref, rtol=2e-2, atol=2e-2)), (out, ref)
    print("KERNEL_OK")
</pallas_src>

<mosaic_0001>
module attributes {stable_mosaic.version = 11 : i64} {
  func.func @fused_lstm_model_kernel(%arg0: memref<64x1xi32, #tpu.memory_space<vmem>>, %arg1: memref<8x1024xbf16, #tpu.memory_space<vmem>>, %arg2: memref<1x1024xf32, #tpu.memory_space<vmem>>, %arg3: memref<256x1024xbf16, #tpu.memory_space<vmem>>, %arg4: memref<256x1024xbf16, #tpu.memory_space<vmem>>, %arg5: memref<1x1024xf32, #tpu.memory_space<vmem>>, %arg6: memref<256x1024xbf16, #tpu.memory_space<vmem>>, %arg7: memref<256x128xbf16, #tpu.memory_space<vmem>>, %arg8: memref<1x128xf32, #tpu.memory_space<vmem>>, %arg9: memref<128x128xbf16, #tpu.memory_space<vmem>>, %arg10: memref<1x128xf32, #tpu.memory_space<vmem>>, %arg11: memref<8x128xf32, #tpu.memory_space<vmem>>, %arg12: memref<64x1024xf32, #tpu.memory_space<vmem>>, %arg13: memref<64x256xf32, #tpu.memory_space<vmem>>) attributes {dimension_semantics = [], scalar_prefetch = 0 : i64, scratch_operands = 2 : i64, tpu.core_type = #tpu.core_type<tc>} {
    %cst = arith.constant 0.000000e+00 : f32
    %0 = vector.broadcast %cst : f32 to vector<8x256xf32>
    %1 = tpu.iota {dimensions = array<i32: 1>} : vector<8x1024xi32>
    %c256_i32 = arith.constant 256 : i32
    %c0_i32 = arith.constant 0 : i32
    %2 = arith.cmpi eq, %c256_i32, %c0_i32 : i32
    %c1_i32 = arith.constant 1 : i32
    %3 = arith.select %2, %c1_i32, %c256_i32 : i32
    %4 = vector.broadcast %3 : i32 to vector<8x1024xi32>
    %5 = arith.remsi %1, %4 : vector<8x1024xi32>
    %c0_i32_0 = arith.constant 0 : i32
    %6 = vector.broadcast %c0_i32_0 : i32 to vector<8x1024xi32>
    %7 = arith.cmpi ne, %5, %6 : vector<8x1024xi32>
    %c0_i32_1 = arith.constant 0 : i32
    %8 = vector.broadcast %c0_i32_1 : i32 to vector<8x1024xi32>
    %9 = arith.cmpi slt, %5, %8 : vector<8x1024xi32>
    %c0_i32_2 = arith.constant 0 : i32
    %10 = arith.cmpi slt, %3, %c0_i32_2 : i32
    %11 = vector.broadcast %10 : i1 to vector<8x1024xi1>
    %12 = vector.broadcast %11 : vector<8x1024xi1> to vector<8x1024xi1>
    %13 = arith.xori %9, %12 : vector<8x1024xi1>
    %14 = arith.andi %13, %7 : vector<8x1024xi1>
    %15 = vector.broadcast %3 : i32 to vector<8x1024xi32>
    %16 = arith.addi %5, %15 : vector<8x1024xi32>
    %17 = arith.select %14, %16, %5 : vector<8x1024xi1>, vector<8x1024xi32>
    %c128_i32 = arith.constant 128 : i32
    %18 = vector.broadcast %c128_i32 : i32 to vector<8x1024xi32>
    %19 = arith.cmpi slt, %17, %18 : vector<8x1024xi32>
    %c0 = arith.constant 0 : index
    %c0_3 = arith.constant 0 : index
    %20 = vector.load %arg0[%c0, %c0_3] : memref<64x1xi32, #tpu.memory_space<vmem>>, vector<64x1xi32>
    %21 = tpu.iota {dimensions = array<i32: 1>} : vector<64x8xi32>
    %22 = vector.broadcast %20 : vector<64x1xi32> to vector<64x8xi32>
    %23 = arith.cmpi eq, %22, %21 : vector<64x8xi32>
    %24 = arith.extui %23 : vector<64x8xi1> to vector<64x8xi32>
    %25 = arith.sitofp %24 : vector<64x8xi32> to vector<64x8xf32>
    %26 = arith.truncf %25 : vector<64x8xf32> to vector<64x8xbf16>
    %c0_4 = arith.constant 0 : index
    %c0_5 = arith.constant 0 : index
    %27 = vector.load %arg1[%c0_4, %c0_5] : memref<8x1024xbf16, #tpu.memory_space<vmem>>, vector<8x1024xbf16>
    %c0_6 = arith.constant 0 : index
    %c0_7 = arith.constant 0 : index
    %28 = vector.load %arg2[%c0_6, %c0_7] : memref<1x1024xf32, #tpu.memory_space<vmem>>, vector<1x1024xf32>
    %c0_8 = arith.constant 0 : index
    %c0_9 = arith.constant 0 : index
    %29 = vector.load %arg3[%c0_8, %c0_9] : memref<256x1024xbf16, #tpu.memory_space<vmem>>, vector<256x1024xbf16>
    %cst_10 = arith.constant dense<0.000000e+00> : vector<64x1024xf32>
    %30 = tpu.matmul %26, %27, %cst_10 {dimension_numbers = #tpu.dot_dimension_numbers<[1], [0], [0], [1], [0, 0, 1, 1], [], []>} : vector<64x8xbf16>, vector<8x1024xbf16>, vector<64x1024xf32> -> vector<64x1024xf32>
    %31 = vector.broadcast %28 : vector<1x1024xf32> to vector<64x1024xf32>
    %32 = arith.addf %30, %31 : vector<64x1024xf32>
    %c0_11 = arith.constant 0 : index
    %c0_12 = arith.constant 0 : index
    %33 = vector.load %arg12[%c0_11, %c0_12] : memref<64x1024xf32, #tpu.memory_space<vmem>>, vector<64x1024xf32>
    tpu.vector_store %arg12[%c0_11, %c0_12], %32 {strides = array<i32>} : memref<64x1024xf32, #tpu.memory_space<vmem>>, vector<64x1024xf32>,
    %c0_13 = arith.constant 0 : index
    %c0_14 = arith.constant 0 : index
    %34 = vector.load %arg12[%c0_13, %c0_14] : memref<64x1024xf32, #tpu.memory_space<vmem>>, vector<8x1024xf32>
    %c56 = arith.constant 56 : index
    %c0_15 = arith.constant 0 : index
    %35 = vector.load %arg12[%c56, %c0_15] : memref<64x1024xf32, #tpu.memory_space<vmem>>, vector<8x1024xf32>
    %36 = arith.select %19, %34, %35 : vector<8x1024xi1>, vector<8x1024xf32>
    %37 = vector.extract_strided_slice %36 {offsets = [0, 0], sizes = [8, 256], strides = [1, 1]} : vector<8x1024xf32> to vector<8x256xf32>
    %38 = arith.negf %37 : vector<8x256xf32>
    %39 = math.exp %38 : vector<8x256xf32>
    %cst_16 = arith.constant 1.000000e+00 : f32
    %40 = vector.broadcast %cst_16 : f32 to vector<8x256xf32>
    %41 = arith.addf %40, %39 : vector<8x256xf32>
    %42 = arith.divf %40, %41 : vector<8x256xf32>
    %43 = vector.extract_strided_slice %36 {offsets = [0, 256], sizes = [8, 256], strides = [1, 1]} : vector<8x1024xf32> to vector<8x256xf32>
    %44 = arith.negf %43 : vector<8x256xf32>
    %45 = math.exp %44 : vector<8x256xf32>
    %cst_17 = arith.constant 1.000000e+00 : f32
    %46 = vector.broadcast %cst_17 : f32 to vector<8x256xf32>
    %47 = arith.addf %46, %45 : vector<8x256xf32>
    %48 = arith.divf %46, %47 : vector<8x256xf32>
    %49 = vector.extract_strided_slice %36 {offsets = [0, 512], sizes = [8, 256], strides = [1, 1]} : vector<8x1024xf32> to vector<8x256xf32>
    %50 = math.tanh %49 : vector<8x256xf32>
    %51 = vector.extract_strided_slice %36 {offsets = [0, 768], sizes = [8, 256], strides = [1, 1]} : vector<8x1024xf32> to vector<8x256xf32>
    %52 = arith.negf %51 : vector<8x256xf32>
    %53 = math.exp %52 : vector<8x256xf32>
    %cst_18 = arith.constant 1.000000e+00 : f32
    %54 = vector.broadcast %cst_18 : f32 to vector<8x256xf32>
    %55 = arith.addf %54, %53 : vector<8x256xf32>
    %56 = arith.divf %54, %55 : vector<8x256xf32>
    %57 = arith.mulf %48, %0 : vector<8x256xf32>
    %58 = arith.mulf %42, %50 : vector<8x256xf32>
    %59 = arith.addf %57, %58 : vector<8x256xf32>
    %60 = math.tanh %59 : vector<8x256xf32>
    %61 = arith.mulf %56, %60 : vector<8x256xf32>
    %62 = vector.extract_strided_slice %61 {offsets = [0, 0], sizes = [8, 128], strides = [1, 1]} : vector<8x256xf32> to vector<8x128xf32>
    %c0_19 = arith.constant 0 : index
    %c0_20 = arith.constant 0 : index
    %63 = vector.load %arg13[%c0_19, %c0_20] : memref<64x256xf32, #tpu.memory_space<vmem>>, vector<8x128xf32>
    tpu.vector_store %arg13[%c0_19, %c0_20], %62 {strides = array<i32>} : memref<64x256xf32, #tpu.memory_space<vmem>>, vector<8x128xf32>,
    %64 = vector.extract_strided_slice %61 {offsets = [0, 128], sizes = [8, 128], strides = [1, 1]} : vector<8x256xf32> to vector<8x128xf32>
    %c56_21 = arith.constant 56 : index
    %c128 = arith.constant 128 : index
    %65 = vector.load %arg13[%c56_21, %c128] : memref<64x256xf32, #tpu.memory_space<vmem>>, vector<8x128xf32>
    tpu.vector_store %arg13[%c56_21, %c128], %64 {strides = array<i32>} : memref<64x256xf32, #tpu.memory_space<vmem>>, vector<8x128xf32>,
    %c8 = arith.constant 8 : index
    %c0_22 = arith.constant 0 : index
    %66 = vector.load %arg12[%c8, %c0_22] : memref<64x1024xf32, #tpu.memory_space<vmem>>, vector<8x1024xf32>
    %c48 = arith.constant 48 : index
    %c0_23 = arith.constant 0 : index
    %67 = vector.load %arg12[%c48, %c0_23] : memref<64x1024xf32, #tpu.memory_space<vmem>>, vector<8x1024xf32>
    %68 = arith.select %19, %66, %67 : vector<8x1024xi1>, vector<8x1024xf32>
    %69 = arith.truncf %61 : vector<8x256xf32> to vector<8x256xbf16>
    %cst_24 = arith.constant dense<0.000000e+00> : vector<8x1024xf32>
    %70 = tpu.matmul %69, %29, %cst_24 {dimension_numbers = #tpu.dot_dimension_numbers<[1], [0], [0], [1], [0, 0, 1, 1], [], []>} : vector<8x256xbf16>, vector<256x1024xbf16>, vector<8x1024xf32> -> vector<8x1024xf32>
    %71 = arith.addf %68, %70 : vector<8x1024xf32>
    %72 = vector.extract_strided_slice %71 {offsets = [0, 0], sizes = [8, 256], strides = [1, 1]} : vector<8x1024xf32> to vector<8x256xf32>
    %73 = arith.negf %72 : vector<8x256xf32>
    %74 = math.exp %73 : vector<8x256xf32>
    %cst_25 = arith.constant 1.000000e+00 : f32
    %75 = vector.broadcast %cst_25 : f32 to vector<8x256xf32>
    %76 = arith.addf %75, %74 : vector<8x256xf32>
    %77 = arith.divf %75, %76 : vector<8x256xf32>
    %78 = vector.extract_strided_slice %71 {offsets = [0, 256], sizes = [8, 256], strides = [1, 1]} : vector<8x1024xf32> to vector<8x256xf32>
    %79 = arith.negf %78 : vector<8x256xf32>
    %80 = math.exp %79 : vector<8x256xf32>
    %cst_26 = arith.constant 1.000000e+00 : f32
    %81 = vector.broadcast %cst_26 : f32 to vector<8x256xf32>
    %82 = arith.addf %81, %80 : vector<8x256xf32>
    %83 = arith.divf %81, %82 : vector<8x256xf32>
    %84 = vector.extract_strided_slice %71 {offsets = [0, 512], sizes = [8, 256], strides = [1, 1]} : vector<8x1024xf32> to vector<8x256xf32>
    %85 = math.tanh %84 : vector<8x256xf32>
    %86 = vector.extract_strided_slice %71 {offsets = [0, 768], sizes = [8, 256], strides = [1, 1]} : vector<8x1024xf32> to vector<8x256xf32>
    %87 = arith.negf %86 : vector<8x256xf32>
    %88 = math.exp %87 : vector<8x256xf32>
    %cst_27 = arith.constant 1.000000e+00 : f32
    %89 = vector.broadcast %cst_27 : f32 to vector<8x256xf32>
    %90 = arith.addf %89, %88 : vector<8x256xf32>
    %91 = arith.divf %89, %90 : vector<8x256xf32>
    %92 = arith.mulf %83, %59 : vector<8x256xf32>
    %93 = arith.mulf %77, %85 : vector<8x256xf32>
    %94 = arith.addf %92, %93 : vector<8x256xf32>
    %95 = math.tanh %94 : vector<8x256xf32>
    %96 = arith.mulf %91, %95 : vector<8x256xf32>
    %97 = vector.extract_strided_slice %96 {offsets = [0, 0], sizes = [8, 128], strides = [1, 1]} : vector<8x256xf32> to vector<8x128xf32>
    %c8_28 = arith.constant 8 : index
    %c0_29 = arith.constant 0 : index
    %98 = vector.load %arg13[%c8_28, %c0_29] : memref<64x256xf32, #tpu.memory_space<vmem>>, vector<8x128xf32>
    tpu.vector_store %arg13[%c8_28, %c0_29], %97 {strides = array<i32>} : memref<64x256xf32, #tpu.memory_space<vmem>>, vector<8x128xf32>,
    %99 = vector.extract_strided_slice %96 {offsets = [0, 128], sizes = [8, 128], strides = [1, 1]} : vector<8x256xf32> to vector<8x128xf32>
    %c48_30 = arith.constant 48 : index
    %c128_31 = arith.constant 128 : index
    %100 = vector.load %arg13[%c48_30, %c128_31] : memref<64x256xf32, #tpu.memory_space<vmem>>, vector<8x128xf32>
    tpu.vector_store %arg13[%c48_30, %c128_31], %99 {strides = array<i32>} : memref<64x256xf32, #tpu.memory_space<vmem>>, vector<8x128xf32>,
    %c16 = arith.constant 16 : index
    %c0_32 = arith.constant 0 : index
    %101 = vector.load %arg12[%c16, %c0_32] : memref<64x1024xf32, #tpu.memory_space<vmem>>, vector<8x1024xf32>
    %c40 = arith.constant 40 : index
    %c0_33 = arith.constant 0 : index
    %102 = vector.load %arg12[%c40, %c0_33] : memref<64x1024xf32, #tpu.memory_space<vmem>>, vector<8x1024xf32>
    %103 = arith.select %19, %101, %102 : vector<8x1024xi1>, vector<8x1024xf32>
    %104 = arith.truncf %96 : vector<8x256xf32> to vector<8x256xbf16>
    %cst_34 = arith.constant dense<0.000000e+00> : vector<8x1024xf32>
    %105 = tpu.matmul %104, %29, %cst_34 {dimension_numbers = #tpu.dot_dimension_numbers<[1], [0], [0], [1], [0, 0, 1, 1], [], []>} : vector<8x256xbf16>, vector<256x1024xbf16>, vector<8x1024xf32> -> vector<8x1024xf32>
    %106 = arith.addf %103, %105 : vector<8x1024xf32>
    %107 = vector.extract_strided_slice %106 {offsets = [0, 0], sizes = [8, 256], strides = [1, 1]} : vector<8x1024xf32> to vector<8x256xf32>
    %108 = arith.negf %107 : vector<8x256xf32>
    %109 = math.exp %108 : vector<8x256xf32>
    %cst_35 = arith.constant 1.000000e+00 : f32
    %110 = vector.broadcast %cst_35 : f32 to vector<8x256xf32>
    %111 = arith.addf %110, %109 : vector<8x256xf32>
    %112 = arith.divf %110, %111 : vector<8x256xf32>
    %113 = vector.extract_strided_slice %106 {offsets = [0, 256], sizes = [8, 256], strides = [1, 1]} : vector<8x1024xf32> to vector<8x256xf32>
    %114 = arith.negf %113 : vector<8x256xf32>
    %115 = math.exp %114 : vector<8x256xf32>
    %cst_36 = arith.constant 1.000000e+00 : f32
    %116 = vector.broadcast %cst_36 : f32 to vector<8x256xf32>
    %117 = arith.addf %116, %115 : vector<8x256xf32>
    %118 = arith.divf %116, %117 : vector<8x256xf32>
    %119 = vector.extract_strided_slice %106 {offsets = [0, 512], sizes = [8, 256], strides = [1, 1]} : vector<8x1024xf32> to vector<8x256xf32>
    %120 = math.tanh %119 : vector<8x256xf32>
    %121 = vector.extract_strided_slice %106 {offsets = [0, 768], sizes = [8, 256], strides = [1, 1]} : vector<8x1024xf32> to vector<8x256xf32>
    %122 = arith.negf %121 : vector<8x256xf32>
    %123 = math.exp %122 : vector<8x256xf32>
    %cst_37 = arith.constant 1.000000e+00 : f32
    %124 = vector.broadcast %cst_37 : f32 to vector<8x256xf32>
    %125 = arith.addf %124, %123 : vector<8x256xf32>
    %126 = arith.divf %124, %125 : vector<8x256xf32>
    %127 = arith.mulf %118, %94 : vector<8x256xf32>
    %128 = arith.mulf %112, %120 : vector<8x256xf32>
    %129 = arith.addf %127, %128 : vector<8x256xf32>
    %130 = math.tanh %129 : vector<8x256xf32>
    %131 = arith.mulf %126, %130 : vector<8x256xf32>
    %132 = vector.extract_strided_slice %131 {offsets = [0, 0], sizes = [8, 128], strides = [1, 1]} : vector<8x256xf32> to vector<8x128xf32>
    %c16_38 = arith.constant 16 : index
    %c0_39 = arith.constant 0 : index
    %133 = vector.load %arg13[%c16_38, %c0_39] : memref<64x256xf32, #tpu.memory_space<vmem>>, vector<8x128xf32>
    tpu.vector_store %arg13[%c16_38, %c0_39], %132 {strides = array<i32>} : memref<64x256xf32, #tpu.memory_space<vmem>>, vector<8x128xf32>,
    %134 = vector.extract_strided_slice %131 {offsets = [0, 128], sizes = [8, 128], strides = [1, 1]} : vector<8x256xf32> to vector<8x128xf32>
    %c40_40 = arith.constant 40 : index
    %c128_41 = arith.constant 128 : index
    %135 = vector.load %arg13[%c40_40, %c128_41] : memref<64x256xf32, #tpu.memory_space<vmem>>, vector<8x128xf32>
    tpu.vector_store %arg13[%c40_40, %c128_41], %134 {strides = array<i32>} : memref<64x256xf32, #tpu.memory_space<vmem>>, vector<8x128xf32>,
    %c24 = arith.constant 24 : index
    %c0_42 = arith.constant 0 : index
    %136 = vector.load %arg12[%c24, %c0_42] : memref<64x1024xf32, #tpu.memory_space<vmem>>, vector<8x1024xf32>
    %c32 = arith.constant 32 : index
    %c0_43 = arith.constant 0 : index
    %137 = vector.load %arg12[%c32, %c0_43] : memref<64x1024xf32, #tpu.memory_space<vmem>>, vector<8x1024xf32>
    %138 = arith.select %19, %136, %137 : vector<8x1024xi1>, vector<8x1024xf32>
    %139 = arith.truncf %131 : vector<8x256xf32> to vector<8x256xbf16>
    %cst_44 = arith.constant dense<0.000000e+00> : vector<8x1024xf32>
    %140 = tpu.matmul %139, %29, %cst_44 {dimension_numbers = #tpu.dot_dimension_numbers<[1], [0], [0], [1], [0, 0, 1, 1], [], []>} : vector<8x256xbf16>, vector<256x1024xbf16>, vector<8x1024xf32> -> vector<8x1024xf32>
    %141 = arith.addf %138, %140 : vector<8x1024xf32>
    %142 = vector.extract_strided_slice %141 {offsets = [0, 0], sizes = [8, 256], strides = [1, 1]} : vector<8x1024xf32> to vector<8x256xf32>
    %143 = arith.negf %142 : vector<8x256xf32>
    %144 = math.exp %143 : vector<8x256xf32>
    %cst_45 = arith.constant 1.000000e+00 : f32
    %145 = vector.broadcast %cst_45 : f32 to vector<8x256xf32>
    %146 = arith.addf %145, %144 : vector<8x256xf32>
    %147 = arith.divf %145, %146 : vector<8x256xf32>
    %148 = vector.extract_strided_slice %141 {offsets = [0, 256], sizes = [8, 256], strides = [1, 1]} : vector<8x1024xf32> to vector<8x256xf32>
    %149 = arith.negf %148 : vector<8x256xf32>
    %150 = math.exp %149 : vector<8x256xf32>
    %cst_46 = arith.constant 1.000000e+00 : f32
    %151 = vector.broadcast %cst_46 : f32 to vector<8x256xf32>
    %152 = arith.addf %151, %150 : vector<8x256xf32>
    %153 = arith.divf %151, %152 : vector<8x256xf32>
    %154 = vector.extract_strided_slice %141 {offsets = [0, 512], sizes = [8, 256], strides = [1, 1]} : vector<8x1024xf32> to vector<8x256xf32>
    %155 = math.tanh %154 : vector<8x256xf32>
    %156 = vector.extract_strided_slice %141 {offsets = [0, 768], sizes = [8, 256], strides = [1, 1]} : vector<8x1024xf32> to vector<8x256xf32>
    %157 = arith.negf %156 : vector<8x256xf32>
    %158 = math.exp %157 : vector<8x256xf32>
    %cst_47 = arith.constant 1.000000e+00 : f32
    %159 = vector.broadcast %cst_47 : f32 to vector<8x256xf32>
    %160 = arith.addf %159, %158 : vector<8x256xf32>
    %161 = arith.divf %159, %160 : vector<8x256xf32>
    %162 = arith.mulf %153, %129 : vector<8x256xf32>
    %163 = arith.mulf %147, %155 : vector<8x256xf32>
    %164 = arith.addf %162, %163 : vector<8x256xf32>
    %165 = math.tanh %164 : vector<8x256xf32>
    %166 = arith.mulf %161, %165 : vector<8x256xf32>
    %167 = vector.extract_strided_slice %166 {offsets = [0, 0], sizes = [8, 128], strides = [1, 1]} : vector<8x256xf32> to vector<8x128xf32>
    %c24_48 = arith.constant 24 : index
    %c0_49 = arith.constant 0 : index
    %168 = vector.load %arg13[%c24_48, %c0_49] : memref<64x256xf32, #tpu.memory_space<vmem>>, vector<8x128xf32>
    tpu.vector_store %arg13[%c24_48, %c0_49], %167 {strides = array<i32>} : memref<64x256xf32, #tpu.memory_space<vmem>>, vector<8x128xf32>,
    %169 = vector.extract_strided_slice %166 {offsets = [0, 128], sizes = [8, 128], strides = [1, 1]} : vector<8x256xf32> to vector<8x128xf32>
    %c32_50 = arith.constant 32 : index
    %c128_51 = arith.constant 128 : index
    %170 = vector.load %arg13[%c32_50, %c128_51] : memref<64x256xf32, #tpu.memory_space<vmem>>, vector<8x128xf32>
    tpu.vector_store %arg13[%c32_50, %c128_51], %169 {strides = array<i32>} : memref<64x256xf32, #tpu.memory_space<vmem>>, vector<8x128xf32>,
    %c32_52 = arith.constant 32 : index
    %c0_53 = arith.constant 0 : index
    %171 = vector.load %arg12[%c32_52, %c0_53] : memref<64x1024xf32, #tpu.memory_space<vmem>>, vector<8x1024xf32>
    %c24_54 = arith.constant 24 : index
    %c0_55 = arith.constant 0 : index
    %172 = vector.load %arg12[%c24_54, %c0_55] : memref<64x1024xf32, #tpu.memory_space<vmem>>, vector<8x1024xf32>
    %173 = arith.select %19, %171, %172 : vector<8x1024xi1>, vector<8x1024xf32>
    %174 = arith.truncf %166 : vector<8x256xf32> to vector<8x256xbf16>
    %cst_56 = arith.constant dense<0.000000e+00> : vector<8x1024xf32>
    %175 = tpu.matmul %174, %29, %cst_56 {dimension_numbers = #tpu.dot_dimension_numbers<[1], [0], [0], [1], [0, 0, 1, 1], [], []>} : vector<8x256xbf16>, vector<256x1024xbf16>, vector<8x1024xf32> -> vector<8x1024xf32>
    %176 = arith.addf %173, %175 : vector<8x1024xf32>
    %177 = vector.extract_strided_slice %176 {offsets = [0, 0], sizes = [8, 256], strides = [1, 1]} : vector<8x1024xf32> to vector<8x256xf32>
    %178 = arith.negf %177 : vector<8x256xf32>
    %179 = math.exp %178 : vector<8x256xf32>
    %cst_57 = arith.constant 1.000000e+00 : f32
    %180 = vector.broadcast %cst_57 : f32 to vector<8x256xf32>
    %181 = arith.addf %180, %179 : vector<8x256xf32>
    %182 = arith.divf %180, %181 : vector<8x256xf32>
    %183 = vector.extract_strided_slice %176 {offsets = [0, 256], sizes = [8, 256], strides = [1, 1]} : vector<8x1024xf32> to vector<8x256xf32>
    %184 = arith.negf %183 : vector<8x256xf32>
    %185 = math.exp %184 : vector<8x256xf32>
    %cst_58 = arith.constant 1.000000e+00 : f32
    %186 = vector.broadcast %cst_58 : f32 to vector<8x256xf32>
    %187 = arith.addf %186, %185 : vector<8x256xf32>
    %188 = arith.divf %186, %187 : vector<8x256xf32>
    %189 = vector.extract_strided_slice %176 {offsets = [0, 512], sizes = [8, 256], strides = [1, 1]} : vector<8x1024xf32> to vector<8x256xf32>
    %190 = math.tanh %189 : vector<8x256xf32>
    %191 = vector.extract_strided_slice %176 {offsets = [0, 768], sizes = [8, 256], strides = [1, 1]} : vector<8x1024xf32> to vector<8x256xf32>
    %192 = arith.negf %191 : vector<8x256xf32>
    %193 = math.exp %192 : vector<8x256xf32>
    %cst_59 = arith.constant 1.000000e+00 : f32
    %194 = vector.broadcast %cst_59 : f32 to vector<8x256xf32>
    %195 = arith.addf %194, %193 : vector<8x256xf32>
    %196 = arith.divf %194, %195 : vector<8x256xf32>
    %197 = arith.mulf %188, %164 : vector<8x256xf32>
    %198 = arith.mulf %182, %190 : vector<8x256xf32>
    %199 = arith.addf %197, %198 : vector<8x256xf32>
    %200 = math.tanh %199 : vector<8x256xf32>
    %201 = arith.mulf %196, %200 : vector<8x256xf32>
    %202 = vector.extract_strided_slice %201 {offsets = [0, 0], sizes = [8, 128], strides = [1, 1]} : vector<8x256xf32> to vector<8x128xf32>
    %c32_60 = arith.constant 32 : index
    %c0_61 = arith.constant 0 : index
    %203 = vector.load %arg13[%c32_60, %c0_61] : memref<64x256xf32, #tpu.memory_space<vmem>>, vector<8x128xf32>
    tpu.vector_store %arg13[%c32_60, %c0_61], %202 {strides = array<i32>} : memref<64x256xf32, #tpu.memory_space<vmem>>, vector<8x128xf32>,
    %204 = vector.extract_strided_slice %201 {offsets = [0, 128], sizes = [8, 128], strides = [1, 1]} : vector<8x256xf32> to vector<8x128xf32>
    %c24_62 = arith.constant 24 : index
    %c128_63 = arith.constant 128 : index
    %205 = vector.load %arg13[%c24_62, %c128_63] : memref<64x256xf32, #tpu.memory_space<vmem>>, vector<8x128xf32>
    tpu.vector_store %arg13[%c24_62, %c128_63], %204 {strides = array<i32>} : memref<64x256xf32, #tpu.memory_space<vmem>>, vector<8x128xf32>,
    %c40_64 = arith.constant 40 : index
    %c0_65 = arith.constant 0 : index
    %206 = vector.load %arg12[%c40_64, %c0_65] : memref<64x1024xf32, #tpu.memory_space<vmem>>, vector<8x1024xf32>
    %c16_66 = arith.constant 16 : index
    %c0_67 = arith.constant 0 : index
    %207 = vector.load %arg12[%c16_66, %c0_67] : memref<64x1024xf32, #tpu.memory_space<vmem>>, vector<8x1024xf32>
    %208 = arith.select %19, %206, %207 : vector<8x1024xi1>, vector<8x1024xf32>
    %209 = arith.truncf %201 : vector<8x256xf32> to vector<8x256xbf16>
    %cst_68 = arith.constant dense<0.000000e+00> : vector<8x1024xf32>
    %210 = tpu.matmul %209, %29, %cst_68 {dimension_numbers = #tpu.dot_dimension_numbers<[1], [0], [0], [1], [0, 0, 1, 1], [], []>} : vector<8x256xbf16>, vector<256x1024xbf16>, vector<8x1024xf32> -> vector<8x1024xf32>
    %211 = arith.addf %208, %210 : vector<8x1024xf32>
    %212 = vector.extract_strided_slice %211 {offsets = [0, 0], sizes = [8, 256], strides = [1, 1]} : vector<8x1024xf32> to vector<8x256xf32>
    %213 = arith.negf %212 : vector<8x256xf32>
    %214 = math.exp %213 : vector<8x256xf32>
    %cst_69 = arith.constant 1.000000e+00 : f32
    %215 = vector.broadcast %cst_69 : f32 to vector<8x256xf32>
    %216 = arith.addf %215, %214 : vector<8x256xf32>
    %217 = arith.divf %215, %216 : vector<8x256xf32>
    %218 = vector.extract_strided_slice %211 {offsets = [0, 256], sizes = [8, 256], strides = [1, 1]} : vector<8x1024xf32> to vector<8x256xf32>
    %219 = arith.negf %218 : vector<8x256xf32>
    %220 = math.exp %219 : vector<8x256xf32>
    %cst_70 = arith.constant 1.000000e+00 : f32
    %221 = vector.broadcast %cst_70 : f32 to vector<8x256xf32>
    %222 = arith.addf %221, %220 : vector<8x256xf32>
    %223 = arith.divf %221, %222 : vector<8x256xf32>
    %224 = vector.extract_strided_slice %211 {offsets = [0, 512], sizes = [8, 256], strides = [1, 1]} : vector<8x1024xf32> to vector<8x256xf32>
    %225 = math.tanh %224 : vector<8x256xf32>
    %226 = vector.extract_strided_slice %211 {offsets = [0, 768], sizes = [8, 256], strides = [1, 1]} : vector<8x1024xf32> to vector<8x256xf32>
    %227 = arith.negf %226 : vector<8x256xf32>
    %228 = math.exp %227 : vector<8x256xf32>
    %cst_71 = arith.constant 1.000000e+00 : f32
    %229 = vector.broadcast %cst_71 : f32 to vector<8x256xf32>
    %230 = arith.addf %229, %228 : vector<8x256xf32>
    %231 = arith.divf %229, %230 : vector<8x256xf32>
    %232 = arith.mulf %223, %199 : vector<8x256xf32>
    %233 = arith.mulf %217, %225 : vector<8x256xf32>
    %234 = arith.addf %232, %233 : vector<8x256xf32>
    %235 = math.tanh %234 : vector<8x256xf32>
    %236 = arith.mulf %231, %235 : vector<8x256xf32>
    %237 = vector.extract_strided_slice %236 {offsets = [0, 0], sizes = [8, 128], strides = [1, 1]} : vector<8x256xf32> to vector<8x128xf32>
    %c40_72 = arith.constant 40 : index
    %c0_73 = arith.constant 0 : index
    %238 = vector.load %arg13[%c40_72, %c0_73] : memref<64x256xf32, #tpu.memory_space<vmem>>, vector<8x128xf32>
    tpu.vector_store %arg13[%c40_72, %c0_73], %237 {strides = array<i32>} : memref<64x256xf32, #tpu.memory_space<vmem>>, vector<8x128xf32>,
    %239 = vector.extract_strided_slice %236 {offsets = [0, 128], sizes = [8, 128], strides = [1, 1]} : vector<8x256xf32> to vector<8x128xf32>
    %c16_74 = arith.constant 16 : index
    %c128_75 = arith.constant 128 : index
    %240 = vector.load %arg13[%c16_74, %c128_75] : memref<64x256xf32, #tpu.memory_space<vmem>>, vector<8x128xf32>
    tpu.vector_store %arg13[%c16_74, %c128_75], %239 {strides = array<i32>} : memref<64x256xf32, #tpu.memory_space<vmem>>, vector<8x128xf32>,
    %c48_76 = arith.constant 48 : index
    %c0_77 = arith.constant 0 : index
    %241 = vector.load %arg12[%c48_76, %c0_77] : memref<64x1024xf32, #tpu.memory_space<vmem>>, vector<8x1024xf32>
    %c8_78 = arith.constant 8 : index
    %c0_79 = arith.constant 0 : index
    %242 = vector.load %arg12[%c8_78, %c0_79] : memref<64x1024xf32, #tpu.memory_space<vmem>>, vector<8x1024xf32>
    %243 = arith.select %19, %241, %242 : vector<8x1024xi1>, vector<8x1024xf32>
    %244 = arith.truncf %236 : vector<8x256xf32> to vector<8x256xbf16>
    %cst_80 = arith.constant dense<0.000000e+00> : vector<8x1024xf32>
    %245 = tpu.matmul %244, %29, %cst_80 {dimension_numbers = #tpu.dot_dimension_numbers<[1], [0], [0], [1], [0, 0, 1, 1], [], []>} : vector<8x256xbf16>, vector<256x1024xbf16>, vector<8x1024xf32> -> vector<8x1024xf32>
    %246 = arith.addf %243, %245 : vector<8x1024xf32>
    %247 = vector.extract_strided_slice %246 {offsets = [0, 0], sizes = [8, 256], strides = [1, 1]} : vector<8x1024xf32> to vector<8x256xf32>
    %248 = arith.negf %247 : vector<8x256xf32>
    %249 = math.exp %248 : vector<8x256xf32>
    %cst_81 = arith.constant 1.000000e+00 : f32
    %250 = vector.broadcast %cst_81 : f32 to vector<8x256xf32>
    %251 = arith.addf %250, %249 : vector<8x256xf32>
    %252 = arith.divf %250, %251 : vector<8x256xf32>
    %253 = vector.extract_strided_slice %246 {offsets = [0, 256], sizes = [8, 256], strides = [1, 1]} : vector<8x1024xf32> to vector<8x256xf32>
    %254 = arith.negf %253 : vector<8x256xf32>
    %255 = math.exp %254 : vector<8x256xf32>
    %cst_82 = arith.constant 1.000000e+00 : f32
    %256 = vector.broadcast %cst_82 : f32 to vector<8x256xf32>
    %257 = arith.addf %256, %255 : vector<8x256xf32>
    %258 = arith.divf %256, %257 : vector<8x256xf32>
    %259 = vector.extract_strided_slice %246 {offsets = [0, 512], sizes = [8, 256], strides = [1, 1]} : vector<8x1024xf32> to vector<8x256xf32>
    %260 = math.tanh %259 : vector<8x256xf32>
    %261 = vector.extract_strided_slice %246 {offsets = [0, 768], sizes = [8, 256], strides = [1, 1]} : vector<8x1024xf32> to vector<8x256xf32>
    %262 = arith.negf %261 : vector<8x256xf32>
    %263 = math.exp %262 : vector<8x256xf32>
    %cst_83 = arith.constant 1.000000e+00 : f32
    %264 = vector.broadcast %cst_83 : f32 to vector<8x256xf32>
    %265 = arith.addf %264, %263 : vector<8x256xf32>
    %266 = arith.divf %264, %265 : vector<8x256xf32>
    %267 = arith.mulf %258, %234 : vector<8x256xf32>
    %268 = arith.mulf %252, %260 : vector<8x256xf32>
    %269 = arith.addf %267, %268 : vector<8x256xf32>
    %270 = math.tanh %269 : vector<8x256xf32>
    %271 = arith.mulf %266, %270 : vector<8x256xf32>
    %272 = vector.extract_strided_slice %271 {offsets = [0, 0], sizes = [8, 128], strides = [1, 1]} : vector<8x256xf32> to vector<8x128xf32>
    %c48_84 = arith.constant 48 : index
    %c0_85 = arith.constant 0 : index
    %273 = vector.load %arg13[%c48_84, %c0_85] : memref<64x256xf32, #tpu.memory_space<vmem>>, vector<8x128xf32>
    tpu.vector_store %arg13[%c48_84, %c0_85], %272 {strides = array<i32>} : memref<64x256xf32, #tpu.memory_space<vmem>>, vector<8x128xf32>,
    %274 = vector.extract_strided_slice %271 {offsets = [0, 128], sizes = [8, 128], strides = [1, 1]} : vector<8x256xf32> to vector<8x128xf32>
    %c8_86 = arith.constant 8 : index
    %c128_87 = arith.constant 128 : index
    %275 = vector.load %arg13[%c8_86, %c128_87] : memref<64x256xf32, #tpu.memory_space<vmem>>, vector<8x128xf32>
    tpu.vector_store %arg13[%c8_86, %c128_87], %274 {strides = array<i32>} : memref<64x256xf32, #tpu.memory_space<vmem>>, vector<8x128xf32>,
    %c56_88 = arith.constant 56 : index
    %c0_89 = arith.constant 0 : index
    %276 = vector.load %arg12[%c56_88, %c0_89] : memref<64x1024xf32, #tpu.memory_space<vmem>>, vector<8x1024xf32>
    %c0_90 = arith.constant 0 : index
    %c0_91 = arith.constant 0 : index
    %277 = vector.load %arg12[%c0_90, %c0_91] : memref<64x1024xf32, #tpu.memory_space<vmem>>, vector<8x1024xf32>
    %278 = arith.select %19, %276, %277 : vector<8x1024xi1>, vector<8x1024xf32>
    %279 = arith.truncf %271 : vector<8x256xf32> to vector<8x256xbf16>
    %cst_92 = arith.constant dense<0.000000e+00> : vector<8x1024xf32>
    %280 = tpu.matmul %279, %29, %cst_92 {dimension_numbers = #tpu.dot_dimension_numbers<[1], [0], [0], [1], [0, 0, 1, 1], [], []>} : vector<8x256xbf16>, vector<256x1024xbf16>, vector<8x1024xf32> -> vector<8x1024xf32>
    %281 = arith.addf %278, %280 : vector<8x1024xf32>
    %282 = vector.extract_strided_slice %281 {offsets = [0, 0], sizes = [8, 256], strides = [1, 1]} : vector<8x1024xf32> to vector<8x256xf32>
    %283 = arith.negf %282 : vector<8x256xf32>
    %284 = math.exp %283 : vector<8x256xf32>
    %cst_93 = arith.constant 1.000000e+00 : f32
    %285 = vector.broadcast %cst_93 : f32 to vector<8x256xf32>
    %286 = arith.addf %285, %284 : vector<8x256xf32>
    %287 = arith.divf %285, %286 : vector<8x256xf32>
    %288 = vector.extract_strided_slice %281 {offsets = [0, 256], sizes = [8, 256], strides = [1, 1]} : vector<8x1024xf32> to vector<8x256xf32>
    %289 = arith.negf %288 : vector<8x256xf32>
    %290 = math.exp %289 : vector<8x256xf32>
    %cst_94 = arith.constant 1.000000e+00 : f32
    %291 = vector.broadcast %cst_94 : f32 to vector<8x256xf32>
    %292 = arith.addf %291, %290 : vector<8x256xf32>
    %293 = arith.divf %291, %292 : vector<8x256xf32>
    %294 = vector.extract_strided_slice %281 {offsets = [0, 512], sizes = [8, 256], strides = [1, 1]} : vector<8x1024xf32> to vector<8x256xf32>
    %295 = math.tanh %294 : vector<8x256xf32>
    %296 = vector.extract_strided_slice %281 {offsets = [0, 768], sizes = [8, 256], strides = [1, 1]} : vector<8x1024xf32> to vector<8x256xf32>
    %297 = arith.negf %296 : vector<8x256xf32>
    %298 = math.exp %297 : vector<8x256xf32>
    %cst_95 = arith.constant 1.000000e+00 : f32
    %299 = vector.broadcast %cst_95 : f32 to vector<8x256xf32>
    %300 = arith.addf %299, %298 : vector<8x256xf32>
    %301 = arith.divf %299, %300 : vector<8x256xf32>
    %302 = arith.mulf %293, %269 : vector<8x256xf32>
    %303 = arith.mulf %287, %295 : vector<8x256xf32>
    %304 = arith.addf %302, %303 : vector<8x256xf32>
    %305 = math.tanh %304 : vector<8x256xf32>
    %306 = arith.mulf %301, %305 : vector<8x256xf32>
    %307 = vector.extract_strided_slice %306 {offsets = [0, 0], sizes = [8, 128], strides = [1, 1]} : vector<8x256xf32> to vector<8x128xf32>
    %c56_96 = arith.constant 56 : index
    %c0_97 = arith.constant 0 : index
    %308 = vector.load %arg13[%c56_96, %c0_97] : memref<64x256xf32, #tpu.memory_space<vmem>>, vector<8x128xf32>
    tpu.vector_store %arg13[%c56_96, %c0_97], %307 {strides = array<i32>} : memref<64x256xf32, #tpu.memory_space<vmem>>, vector<8x128xf32>,
    %309 = vector.extract_strided_slice %306 {offsets = [0, 128], sizes = [8, 128], strides = [1, 1]} : vector<8x256xf32> to vector<8x128xf32>
    %c0_98 = arith.constant 0 : index
    %c128_99 = arith.constant 128 : index
    %310 = vector.load %arg13[%c0_98, %c128_99] : memref<64x256xf32, #tpu.memory_space<vmem>>, vector<8x128xf32>
    tpu.vector_store %arg13[%c0_98, %c128_99], %309 {strides = array<i32>} : memref<64x256xf32, #tpu.memory_space<vmem>>, vector<8x128xf32>,
    %c0_100 = arith.constant 0 : index
    %c0_101 = arith.constant 0 : index
    %311 = vector.load %arg13[%c0_100, %c0_101] : memref<64x256xf32, #tpu.memory_space<vmem>>, vector<64x256xf32>
    %312 = arith.truncf %311 : vector<64x256xf32> to vector<64x256xbf16>
    %c0_102 = arith.constant 0 : index
    %c0_103 = arith.constant 0 : index
    %313 = vector.load %arg4[%c0_102, %c0_103] : memref<256x1024xbf16, #tpu.memory_space<vmem>>, vector<256x1024xbf16>
    %c0_104 = arith.constant 0 : index
    %c0_105 = arith.constant 0 : index
    %314 = vector.load %arg5[%c0_104, %c0_105] : memref<1x1024xf32, #tpu.memory_space<vmem>>, vector<1x1024xf32>
    %c0_106 = arith.constant 0 : index
    %c0_107 = arith.constant 0 : index
    %315 = vector.load %arg6[%c0_106, %c0_107] : memref<256x1024xbf16, #tpu.memory_space<vmem>>, vector<256x1024xbf16>
    %cst_108 = arith.constant dense<0.000000e+00> : vector<64x1024xf32>
    %316 = tpu.matmul %312, %313, %cst_108 {dimension_numbers = #tpu.dot_dimension_numbers<[1], [0], [0], [1], [0, 0, 1, 1], [], []>} : vector<64x256xbf16>, vector<256x1024xbf16>, vector<64x1024xf32> -> vector<64x1024xf32>
    %317 = vector.broadcast %314 : vector<1x1024xf32> to vector<64x1024xf32>
    %318 = arith.addf %316, %317 : vector<64x1024xf32>
    %c0_109 = arith.constant 0 : index
    %c0_110 = arith.constant 0 : index
    %319 = vector.load %arg12[%c0_109, %c0_110] : memref<64x1024xf32, #tpu.memory_space<vmem>>, vector<64x1024xf32>
    tpu.vector_store %arg12[%c0_109, %c0_110], %318 {strides = array<i32>} : memref<64x1024xf32, #tpu.memory_space<vmem>>, vector<64x1024xf32>,
    %c0_111 = arith.constant 0 : index
    %c0_112 = arith.constant 0 : index
    %320 = vector.load %arg12[%c0_111, %c0_112] : memref<64x1024xf32, #tpu.memory_space<vmem>>, vector<8x1024xf32>
    %c56_113 = arith.constant 56 : index
    %c0_114 = arith.constant 0 : index
    %321 = vector.load %arg12[%c56_113, %c0_114] : memref<64x1024xf32, #tpu.memory_space<vmem>>, vector<8x1024xf32>
    %322 = arith.select %19, %320, %321 : vector<8x1024xi1>, vector<8x1024xf32>
    %323 = vector.extract_strided_slice %322 {offsets = [0, 0], sizes = [8, 256], strides = [1, 1]} : vector<8x1024xf32> to vector<8x256xf32>
    %324 = arith.negf %323 : vector<8x256xf32>
    %325 = math.exp %324 : vector<8x256xf32>
    %cst_115 = arith.constant 1.000000e+00 : f32
    %326 = vector.broadcast %cst_115 : f32 to vector<8x256xf32>
    %327 = arith.addf %326, %325 : vector<8x256xf32>
    %328 = arith.divf %326, %327 : vector<8x256xf32>
    %329 = vector.extract_strided_slice %322 {offsets = [0, 256], sizes = [8, 256], strides = [1, 1]} : vector<8x1024xf32> to vector<8x256xf32>
    %330 = arith.negf %329 : vector<8x256xf32>
    %331 = math.exp %330 : vector<8x256xf32>
    %cst_116 = arith.constant 1.000000e+00 : f32
    %332 = vector.broadcast %cst_116 : f32 to vector<8x256xf32>
    %333 = arith.addf %332, %331 : vector<8x256xf32>
    %334 = arith.divf %332, %333 : vector<8x256xf32>
    %335 = vector.extract_strided_slice %322 {offsets = [0, 512], sizes = [8, 256], strides = [1, 1]} : vector<8x1024xf32> to vector<8x256xf32>
    %336 = math.tanh %335 : vector<8x256xf32>
    %337 = vector.extract_strided_slice %322 {offsets = [0, 768], sizes = [8, 256], strides = [1, 1]} : vector<8x1024xf32> to vector<8x256xf32>
    %338 = arith.negf %337 : vector<8x256xf32>
    %339 = math.exp %338 : vector<8x256xf32>
    %cst_117 = arith.constant 1.000000e+00 : f32
    %340 = vector.broadcast %cst_117 : f32 to vector<8x256xf32>
    %341 = arith.addf %340, %339 : vector<8x256xf32>
    %342 = arith.divf %340, %341 : vector<8x256xf32>
    %343 = arith.mulf %334, %0 : vector<8x256xf32>
    %344 = arith.mulf %328, %336 : vector<8x256xf32>
    %345 = arith.addf %343, %344 : vector<8x256xf32>
    %346 = math.tanh %345 : vector<8x256xf32>
    %347 = arith.mulf %342, %346 : vector<8x256xf32>
    %348 = vector.extract_strided_slice %347 {offsets = [0, 128], sizes = [8, 128], strides = [1, 1]} : vector<8x256xf32> to vector<8x128xf32>
    %c8_118 = arith.constant 8 : index
    %c0_119 = arith.constant 0 : index
    %349 = vector.load %arg12[%c8_118, %c0_119] : memref<64x1024xf32, #tpu.memory_space<vmem>>, vector<8x1024xf32>
    %c48_120 = arith.constant 48 : index
    %c0_121 = arith.constant 0 : index
    %350 = vector.load %arg12[%c48_120, %c0_121] : memref<64x1024xf32, #tpu.memory_space<vmem>>, vector<8x1024xf32>
    %351 = arith.select %19, %349, %350 : vector<8x1024xi1>, vector<8x1024xf32>
    %352 = arith.truncf %347 : vector<8x256xf32> to vector<8x256xbf16>
    %cst_122 = arith.constant dense<0.000000e+00> : vector<8x1024xf32>
    %353 = tpu.matmul %352, %315, %cst_122 {dimension_numbers = #tpu.dot_dimension_numbers<[1], [0], [0], [1], [0, 0, 1, 1], [], []>} : vector<8x256xbf16>, vector<256x1024xbf16>, vector<8x1024xf32> -> vector<8x1024xf32>
    %354 = arith.addf %351, %353 : vector<8x1024xf32>
    %355 = vector.extract_strided_slice %354 {offsets = [0, 0], sizes = [8, 256], strides = [1, 1]} : vector<8x1024xf32> to vector<8x256xf32>
    %356 = arith.negf %355 : vector<8x256xf32>
    %357 = math.exp %356 : vector<8x256xf32>
    %cst_123 = arith.constant 1.000000e+00 : f32
    %358 = vector.broadcast %cst_123 : f32 to vector<8x256xf32>
    %359 = arith.addf %358, %357 : vector<8x256xf32>
    %360 = arith.divf %358, %359 : vector<8x256xf32>
    %361 = vector.extract_strided_slice %354 {offsets = [0, 256], sizes = [8, 256], strides = [1, 1]} : vector<8x1024xf32> to vector<8x256xf32>
    %362 = arith.negf %361 : vector<8x256xf32>
    %363 = math.exp %362 : vector<8x256xf32>
    %cst_124 = arith.constant 1.000000e+00 : f32
    %364 = vector.broadcast %cst_124 : f32 to vector<8x256xf32>
    %365 = arith.addf %364, %363 : vector<8x256xf32>
    %366 = arith.divf %364, %365 : vector<8x256xf32>
    %367 = vector.extract_strided_slice %354 {offsets = [0, 512], sizes = [8, 256], strides = [1, 1]} : vector<8x1024xf32> to vector<8x256xf32>
    %368 = math.tanh %367 : vector<8x256xf32>
    %369 = vector.extract_strided_slice %354 {offsets = [0, 768], sizes = [8, 256], strides = [1, 1]} : vector<8x1024xf32> to vector<8x256xf32>
    %370 = arith.negf %369 : vector<8x256xf32>
    %371 = math.exp %370 : vector<8x256xf32>
    %cst_125 = arith.constant 1.000000e+00 : f32
    %372 = vector.broadcast %cst_125 : f32 to vector<8x256xf32>
    %373 = arith.addf %372, %371 : vector<8x256xf32>
    %374 = arith.divf %372, %373 : vector<8x256xf32>
    %375 = arith.mulf %366, %345 : vector<8x256xf32>
    %376 = arith.mulf %360, %368 : vector<8x256xf32>
    %377 = arith.addf %375, %376 : vector<8x256xf32>
    %378 = math.tanh %377 : vector<8x256xf32>
    %379 = arith.mulf %374, %378 : vector<8x256xf32>
    %c16_126 = arith.constant 16 : index
    %c0_127 = arith.constant 0 : index
    %380 = vector.load %arg12[%c16_126, %c0_127] : memref<64x1024xf32, #tpu.memory_space<vmem>>, vector<8x1024xf32>
    %c40_128 = arith.constant 40 : index
    %c0_129 = arith.constant 0 : index
    %381 = vector.load %arg12[%c40_128, %c0_129] : memref<64x1024xf32, #tpu.memory_space<vmem>>, vector<8x1024xf32>
    %382 = arith.select %19, %380, %381 : vector<8x1024xi1>, vector<8x1024xf32>
    %383 = arith.truncf %379 : vector<8x256xf32> to vector<8x256xbf16>
    %cst_130 = arith.constant dense<0.000000e+00> : vector<8x1024xf32>
    %384 = tpu.matmul %383, %315, %cst_130 {dimension_numbers = #tpu.dot_dimension_numbers<[1], [0], [0], [1], [0, 0, 1, 1], [], []>} : vector<8x256xbf16>, vector<256x1024xbf16>, vector<8x1024xf32> -> vector<8x1024xf32>
    %385 = arith.addf %382, %384 : vector<8x1024xf32>
    %386 = vector.extract_strided_slice %385 {offsets = [0, 0], sizes = [8, 256], strides = [1, 1]} : vector<8x1024xf32> to vector<8x256xf32>
    %387 = arith.negf %386 : vector<8x256xf32>
    %388 = math.exp %387 : vector<8x256xf32>
    %cst_131 = arith.constant 1.000000e+00 : f32
    %389 = vector.broadcast %cst_131 : f32 to vector<8x256xf32>
    %390 = arith.addf %389, %388 : vector<8x256xf32>
    %391 = arith.divf %389, %390 : vector<8x256xf32>
    %392 = vector.extract_strided_slice %385 {offsets = [0, 256], sizes = [8, 256], strides = [1, 1]} : vector<8x1024xf32> to vector<8x256xf32>
    %393 = arith.negf %392 : vector<8x256xf32>
    %394 = math.exp %393 : vector<8x256xf32>
    %cst_132 = arith.constant 1.000000e+00 : f32
    %395 = vector.broadcast %cst_132 : f32 to vector<8x256xf32>
    %396 = arith.addf %395, %394 : vector<8x256xf32>
    %397 = arith.divf %395, %396 : vector<8x256xf32>
    %398 = vector.extract_strided_slice %385 {offsets = [0, 512], sizes = [8, 256], strides = [1, 1]} : vector<8x1024xf32> to vector<8x256xf32>
    %399 = math.tanh %398 : vector<8x256xf32>
    %400 = vector.extract_strided_slice %385 {offsets = [0, 768], sizes = [8, 256], strides = [1, 1]} : vector<8x1024xf32> to vector<8x256xf32>
    %401 = arith.negf %400 : vector<8x256xf32>
    %402 = math.exp %401 : vector<8x256xf32>
    %cst_133 = arith.constant 1.000000e+00 : f32
    %403 = vector.broadcast %cst_133 : f32 to vector<8x256xf32>
    %404 = arith.addf %403, %402 : vector<8x256xf32>
    %405 = arith.divf %403, %404 : vector<8x256xf32>
    %406 = arith.mulf %397, %377 : vector<8x256xf32>
    %407 = arith.mulf %391, %399 : vector<8x256xf32>
    %408 = arith.addf %406, %407 : vector<8x256xf32>
    %409 = math.tanh %408 : vector<8x256xf32>
    %410 = arith.mulf %405, %409 : vector<8x256xf32>
    %c24_134 = arith.constant 24 : index
    %c0_135 = arith.constant 0 : index
    %411 = vector.load %arg12[%c24_134, %c0_135] : memref<64x1024xf32, #tpu.memory_space<vmem>>, vector<8x1024xf32>
    %c32_136 = arith.constant 32 : index
    %c0_137 = arith.constant 0 : index
    %412 = vector.load %arg12[%c32_136, %c0_137] : memref<64x1024xf32, #tpu.memory_space<vmem>>, vector<8x1024xf32>
    %413 = arith.select %19, %411, %412 : vector<8x1024xi1>, vector<8x1024xf32>
    %414 = arith.truncf %410 : vector<8x256xf32> to vector<8x256xbf16>
    %cst_138 = arith.constant dense<0.000000e+00> : vector<8x1024xf32>
    %415 = tpu.matmul %414, %315, %cst_138 {dimension_numbers = #tpu.dot_dimension_numbers<[1], [0], [0], [1], [0, 0, 1, 1], [], []>} : vector<8x256xbf16>, vector<256x1024xbf16>, vector<8x1024xf32> -> vector<8x1024xf32>
    %416 = arith.addf %413, %415 : vector<8x1024xf32>
    %417 = vector.extract_strided_slice %416 {offsets = [0, 0], sizes = [8, 256], strides = [1, 1]} : vector<8x1024xf32> to vector<8x256xf32>
    %418 = arith.negf %417 : vector<8x256xf32>
    %419 = math.exp %418 : vector<8x256xf32>
    %cst_139 = arith.constant 1.000000e+00 : f32
    %420 = vector.broadcast %cst_139 : f32 to vector<8x256xf32>
    %421 = arith.addf %420, %419 : vector<8x256xf32>
    %422 = arith.divf %420, %421 : vector<8x256xf32>
    %423 = vector.extract_strided_slice %416 {offsets = [0, 256], sizes = [8, 256], strides = [1, 1]} : vector<8x1024xf32> to vector<8x256xf32>
    %424 = arith.negf %423 : vector<8x256xf32>
    %425 = math.exp %424 : vector<8x256xf32>
    %cst_140 = arith.constant 1.000000e+00 : f32
    %426 = vector.broadcast %cst_140 : f32 to vector<8x256xf32>
    %427 = arith.addf %426, %425 : vector<8x256xf32>
    %428 = arith.divf %426, %427 : vector<8x256xf32>
    %429 = vector.extract_strided_slice %416 {offsets = [0, 512], sizes = [8, 256], strides = [1, 1]} : vector<8x1024xf32> to vector<8x256xf32>
    %430 = math.tanh %429 : vector<8x256xf32>
    %431 = vector.extract_strided_slice %416 {offsets = [0, 768], sizes = [8, 256], strides = [1, 1]} : vector<8x1024xf32> to vector<8x256xf32>
    %432 = arith.negf %431 : vector<8x256xf32>
    %433 = math.exp %432 : vector<8x256xf32>
    %cst_141 = arith.constant 1.000000e+00 : f32
    %434 = vector.broadcast %cst_141 : f32 to vector<8x256xf32>
    %435 = arith.addf %434, %433 : vector<8x256xf32>
    %436 = arith.divf %434, %435 : vector<8x256xf32>
    %437 = arith.mulf %428, %408 : vector<8x256xf32>
    %438 = arith.mulf %422, %430 : vector<8x256xf32>
    %439 = arith.addf %437, %438 : vector<8x256xf32>
    %440 = math.tanh %439 : vector<8x256xf32>
    %441 = arith.mulf %436, %440 : vector<8x256xf32>
    %c32_142 = arith.constant 32 : index
    %c0_143 = arith.constant 0 : index
    %442 = vector.load %arg12[%c32_142, %c0_143] : memref<64x1024xf32, #tpu.memory_space<vmem>>, vector<8x1024xf32>
    %c24_144 = arith.constant 24 : index
    %c0_145 = arith.constant 0 : index
    %443 = vector.load %arg12[%c24_144, %c0_145] : memref<64x1024xf32, #tpu.memory_space<vmem>>, vector<8x1024xf32>
    %444 = arith.select %19, %442, %443 : vector<8x1024xi1>, vector<8x1024xf32>
    %445 = arith.truncf %441 : vector<8x256xf32> to vector<8x256xbf16>
    %cst_146 = arith.constant dense<0.000000e+00> : vector<8x1024xf32>
    %446 = tpu.matmul %445, %315, %cst_146 {dimension_numbers = #tpu.dot_dimension_numbers<[1], [0], [0], [1], [0, 0, 1, 1], [], []>} : vector<8x256xbf16>, vector<256x1024xbf16>, vector<8x1024xf32> -> vector<8x1024xf32>
    %447 = arith.addf %444, %446 : vector<8x1024xf32>
    %448 = vector.extract_strided_slice %447 {offsets = [0, 0], sizes = [8, 256], strides = [1, 1]} : vector<8x1024xf32> to vector<8x256xf32>
    %449 = arith.negf %448 : vector<8x256xf32>
    %450 = math.exp %449 : vector<8x256xf32>
    %cst_147 = arith.constant 1.000000e+00 : f32
    %451 = vector.broadcast %cst_147 : f32 to vector<8x256xf32>
    %452 = arith.addf %451, %450 : vector<8x256xf32>
    %453 = arith.divf %451, %452 : vector<8x256xf32>
    %454 = vector.extract_strided_slice %447 {offsets = [0, 256], sizes = [8, 256], strides = [1, 1]} : vector<8x1024xf32> to vector<8x256xf32>
    %455 = arith.negf %454 : vector<8x256xf32>
    %456 = math.exp %455 : vector<8x256xf32>
    %cst_148 = arith.constant 1.000000e+00 : f32
    %457 = vector.broadcast %cst_148 : f32 to vector<8x256xf32>
    %458 = arith.addf %457, %456 : vector<8x256xf32>
    %459 = arith.divf %457, %458 : vector<8x256xf32>
    %460 = vector.extract_strided_slice %447 {offsets = [0, 512], sizes = [8, 256], strides = [1, 1]} : vector<8x1024xf32> to vector<8x256xf32>
    %461 = math.tanh %460 : vector<8x256xf32>
    %462 = vector.extract_strided_slice %447 {offsets = [0, 768], sizes = [8, 256], strides = [1, 1]} : vector<8x1024xf32> to vector<8x256xf32>
    %463 = arith.negf %462 : vector<8x256xf32>
    %464 = math.exp %463 : vector<8x256xf32>
    %cst_149 = arith.constant 1.000000e+00 : f32
    %465 = vector.broadcast %cst_149 : f32 to vector<8x256xf32>
    %466 = arith.addf %465, %464 : vector<8x256xf32>
    %467 = arith.divf %465, %466 : vector<8x256xf32>
    %468 = arith.mulf %459, %439 : vector<8x256xf32>
    %469 = arith.mulf %453, %461 : vector<8x256xf32>
    %470 = arith.addf %468, %469 : vector<8x256xf32>
    %471 = math.tanh %470 : vector<8x256xf32>
    %472 = arith.mulf %467, %471 : vector<8x256xf32>
    %c40_150 = arith.constant 40 : index
    %c0_151 = arith.constant 0 : index
    %473 = vector.load %arg12[%c40_150, %c0_151] : memref<64x1024xf32, #tpu.memory_space<vmem>>, vector<8x1024xf32>
    %c16_152 = arith.constant 16 : index
    %c0_153 = arith.constant 0 : index
    %474 = vector.load %arg12[%c16_152, %c0_153] : memref<64x1024xf32, #tpu.memory_space<vmem>>, vector<8x1024xf32>
    %475 = arith.select %19, %473, %474 : vector<8x1024xi1>, vector<8x1024xf32>
    %476 = arith.truncf %472 : vector<8x256xf32> to vector<8x256xbf16>
    %cst_154 = arith.constant dense<0.000000e+00> : vector<8x1024xf32>
    %477 = tpu.matmul %476, %315, %cst_154 {dimension_numbers = #tpu.dot_dimension_numbers<[1], [0], [0], [1], [0, 0, 1, 1], [], []>} : vector<8x256xbf16>, vector<256x1024xbf16>, vector<8x1024xf32> -> vector<8x1024xf32>
    %478 = arith.addf %475, %477 : vector<8x1024xf32>
    %479 = vector.extract_strided_slice %478 {offsets = [0, 0], sizes = [8, 256], strides = [1, 1]} : vector<8x1024xf32> to vector<8x256xf32>
    %480 = arith.negf %479 : vector<8x256xf32>
    %481 = math.exp %480 : vector<8x256xf32>
    %cst_155 = arith.constant 1.000000e+00 : f32
    %482 = vector.broadcast %cst_155 : f32 to vector<8x256xf32>
    %483 = arith.addf %482, %481 : vector<8x256xf32>
    %484 = arith.divf %482, %483 : vector<8x256xf32>
    %485 = vector.extract_strided_slice %478 {offsets = [0, 256], sizes = [8, 256], strides = [1, 1]} : vector<8x1024xf32> to vector<8x256xf32>
    %486 = arith.negf %485 : vector<8x256xf32>
    %487 = math.exp %486 : vector<8x256xf32>
    %cst_156 = arith.constant 1.000000e+00 : f32
    %488 = vector.broadcast %cst_156 : f32 to vector<8x256xf32>
    %489 = arith.addf %488, %487 : vector<8x256xf32>
    %490 = arith.divf %488, %489 : vector<8x256xf32>
    %491 = vector.extract_strided_slice %478 {offsets = [0, 512], sizes = [8, 256], strides = [1, 1]} : vector<8x1024xf32> to vector<8x256xf32>
    %492 = math.tanh %491 : vector<8x256xf32>
    %493 = vector.extract_strided_slice %478 {offsets = [0, 768], sizes = [8, 256], strides = [1, 1]} : vector<8x1024xf32> to vector<8x256xf32>
    %494 = arith.negf %493 : vector<8x256xf32>
    %495 = math.exp %494 : vector<8x256xf32>
    %cst_157 = arith.constant 1.000000e+00 : f32
    %496 = vector.broadcast %cst_157 : f32 to vector<8x256xf32>
    %497 = arith.addf %496, %495 : vector<8x256xf32>
    %498 = arith.divf %496, %497 : vector<8x256xf32>
    %499 = arith.mulf %490, %470 : vector<8x256xf32>
    %500 = arith.mulf %484, %492 : vector<8x256xf32>
    %501 = arith.addf %499, %500 : vector<8x256xf32>
    %502 = math.tanh %501 : vector<8x256xf32>
    %503 = arith.mulf %498, %502 : vector<8x256xf32>
    %c48_158 = arith.constant 48 : index
    %c0_159 = arith.constant 0 : index
    %504 = vector.load %arg12[%c48_158, %c0_159] : memref<64x1024xf32, #tpu.memory_space<vmem>>, vector<8x1024xf32>
    %c8_160 = arith.constant 8 : index
    %c0_161 = arith.constant 0 : index
    %505 = vector.load %arg12[%c8_160, %c0_161] : memref<64x1024xf32, #tpu.memory_space<vmem>>, vector<8x1024xf32>
    %506 = arith.select %19, %504, %505 : vector<8x1024xi1>, vector<8x1024xf32>
    %507 = arith.truncf %503 : vector<8x256xf32> to vector<8x256xbf16>
    %cst_162 = arith.constant dense<0.000000e+00> : vector<8x1024xf32>
    %508 = tpu.matmul %507, %315, %cst_162 {dimension_numbers = #tpu.dot_dimension_numbers<[1], [0], [0], [1], [0, 0, 1, 1], [], []>} : vector<8x256xbf16>, vector<256x1024xbf16>, vector<8x1024xf32> -> vector<8x1024xf32>
    %509 = arith.addf %506, %508 : vector<8x1024xf32>
    %510 = vector.extract_strided_slice %509 {offsets = [0, 0], sizes = [8, 256], strides = [1, 1]} : vector<8x1024xf32> to vector<8x256xf32>
    %511 = arith.negf %510 : vector<8x256xf32>
    %512 = math.exp %511 : vector<8x256xf32>
    %cst_163 = arith.constant 1.000000e+00 : f32
    %513 = vector.broadcast %cst_163 : f32 to vector<8x256xf32>
    %514 = arith.addf %513, %512 : vector<8x256xf32>
    %515 = arith.divf %513, %514 : vector<8x256xf32>
    %516 = vector.extract_strided_slice %509 {offsets = [0, 256], sizes = [8, 256], strides = [1, 1]} : vector<8x1024xf32> to vector<8x256xf32>
    %517 = arith.negf %516 : vector<8x256xf32>
    %518 = math.exp %517 : vector<8x256xf32>
    %cst_164 = arith.constant 1.000000e+00 : f32
    %519 = vector.broadcast %cst_164 : f32 to vector<8x256xf32>
    %520 = arith.addf %519, %518 : vector<8x256xf32>
    %521 = arith.divf %519, %520 : vector<8x256xf32>
    %522 = vector.extract_strided_slice %509 {offsets = [0, 512], sizes = [8, 256], strides = [1, 1]} : vector<8x1024xf32> to vector<8x256xf32>
    %523 = math.tanh %522 : vector<8x256xf32>
    %524 = vector.extract_strided_slice %509 {offsets = [0, 768], sizes = [8, 256], strides = [1, 1]} : vector<8x1024xf32> to vector<8x256xf32>
    %525 = arith.negf %524 : vector<8x256xf32>
    %526 = math.exp %525 : vector<8x256xf32>
    %cst_165 = arith.constant 1.000000e+00 : f32
    %527 = vector.broadcast %cst_165 : f32 to vector<8x256xf32>
    %528 = arith.addf %527, %526 : vector<8x256xf32>
    %529 = arith.divf %527, %528 : vector<8x256xf32>
    %530 = arith.mulf %521, %501 : vector<8x256xf32>
    %531 = arith.mulf %515, %523 : vector<8x256xf32>
    %532 = arith.addf %530, %531 : vector<8x256xf32>
    %533 = math.tanh %532 : vector<8x256xf32>
    %534 = arith.mulf %529, %533 : vector<8x256xf32>
    %c56_166 = arith.constant 56 : index
    %c0_167 = arith.constant 0 : index
    %535 = vector.load %arg12[%c56_166, %c0_167] : memref<64x1024xf32, #tpu.memory_space<vmem>>, vector<8x1024xf32>
    %c0_168 = arith.constant 0 : index
    %c0_169 = arith.constant 0 : index
    %536 = vector.load %arg12[%c0_168, %c0_169] : memref<64x1024xf32, #tpu.memory_space<vmem>>, vector<8x1024xf32>
    %537 = arith.select %19, %535, %536 : vector<8x1024xi1>, vector<8x1024xf32>
    %538 = arith.truncf %534 : vector<8x256xf32> to vector<8x256xbf16>
    %cst_170 = arith.constant dense<0.000000e+00> : vector<8x1024xf32>
    %539 = tpu.matmul %538, %315, %cst_170 {dimension_numbers = #tpu.dot_dimension_numbers<[1], [0], [0], [1], [0, 0, 1, 1], [], []>} : vector<8x256xbf16>, vector<256x1024xbf16>, vector<8x1024xf32> -> vector<8x1024xf32>
    %540 = arith.addf %537, %539 : vector<8x1024xf32>
    %541 = vector.extract_strided_slice %540 {offsets = [0, 0], sizes = [8, 256], strides = [1, 1]} : vector<8x1024xf32> to vector<8x256xf32>
    %542 = arith.negf %541 : vector<8x256xf32>
    %543 = math.exp %542 : vector<8x256xf32>
    %cst_171 = arith.constant 1.000000e+00 : f32
    %544 = vector.broadcast %cst_171 : f32 to vector<8x256xf32>
    %545 = arith.addf %544, %543 : vector<8x256xf32>
    %546 = arith.divf %544, %545 : vector<8x256xf32>
    %547 = vector.extract_strided_slice %540 {offsets = [0, 256], sizes = [8, 256], strides = [1, 1]} : vector<8x1024xf32> to vector<8x256xf32>
    %548 = arith.negf %547 : vector<8x256xf32>
    %549 = math.exp %548 : vector<8x256xf32>
    %cst_172 = arith.constant 1.000000e+00 : f32
    %550 = vector.broadcast %cst_172 : f32 to vector<8x256xf32>
    %551 = arith.addf %550, %549 : vector<8x256xf32>
    %552 = arith.divf %550, %551 : vector<8x256xf32>
    %553 = vector.extract_strided_slice %540 {offsets = [0, 512], sizes = [8, 256], strides = [1, 1]} : vector<8x1024xf32> to vector<8x256xf32>
    %554 = math.tanh %553 : vector<8x256xf32>
    %555 = vector.extract_strided_slice %540 {offsets = [0, 768], sizes = [8, 256], strides = [1, 1]} : vector<8x1024xf32> to vector<8x256xf32>
    %556 = arith.negf %555 : vector<8x256xf32>
    %557 = math.exp %556 : vector<8x256xf32>
    %cst_173 = arith.constant 1.000000e+00 : f32
    %558 = vector.broadcast %cst_173 : f32 to vector<8x256xf32>
    %559 = arith.addf %558, %557 : vector<8x256xf32>
    %560 = arith.divf %558, %559 : vector<8x256xf32>
    %561 = arith.mulf %552, %532 : vector<8x256xf32>
    %562 = arith.mulf %546, %554 : vector<8x256xf32>
    %563 = arith.addf %561, %562 : vector<8x256xf32>
    %564 = math.tanh %563 : vector<8x256xf32>
    %565 = arith.mulf %560, %564 : vector<8x256xf32>
    %566 = vector.extract_strided_slice %565 {offsets = [0, 0], sizes = [8, 128], strides = [1, 1]} : vector<8x256xf32> to vector<8x128xf32>
    %567 = arith.truncf %566 : vector<8x128xf32> to vector<8x128xbf16>
    %c0_174 = arith.constant 0 : index
    %c0_175 = arith.constant 0 : index
    %568 = vector.load %arg7[%c0_174, %c0_175] : memref<256x128xbf16, #tpu.memory_space<vmem>>, vector<128x128xbf16>
    %cst_176 = arith.constant dense<0.000000e+00> : vector<8x128xf32>
    %569 = tpu.matmul %567, %568, %cst_176 {dimension_numbers = #tpu.dot_dimension_numbers<[1], [0], [0], [1], [0, 0, 1, 1], [], []>} : vector<8x128xbf16>, vector<128x128xbf16>, vector<8x128xf32> -> vector<8x128xf32>
    %570 = arith.truncf %348 : vector<8x128xf32> to vector<8x128xbf16>
    %c128_177 = arith.constant 128 : index
    %c0_178 = arith.constant 0 : index
    %571 = vector.load %arg7[%c128_177, %c0_178] : memref<256x128xbf16, #tpu.memory_space<vmem>>, vector<128x128xbf16>
    %cst_179 = arith.constant dense<0.000000e+00> : vector<8x128xf32>
    %572 = tpu.matmul %570, %571, %cst_179 {dimension_numbers = #tpu.dot_dimension_numbers<[1], [0], [0], [1], [0, 0, 1, 1], [], []>} : vector<8x128xbf16>, vector<128x128xbf16>, vector<8x128xf32> -> vector<8x128xf32>
    %573 = arith.addf %569, %572 : vector<8x128xf32>
    %c0_180 = arith.constant 0 : index
    %c0_181 = arith.constant 0 : index
    %574 = vector.load %arg8[%c0_180, %c0_181] : memref<1x128xf32, #tpu.memory_space<vmem>>, vector<1x128xf32>
    %575 = vector.broadcast %574 : vector<1x128xf32> to vector<8x128xf32>
    %576 = arith.addf %573, %575 : vector<8x128xf32>
    %cst_182 = arith.constant 0.000000e+00 : f32
    %577 = vector.broadcast %cst_182 : f32 to vector<8x128xf32>
    %578 = arith.maximumf %576, %577 : vector<8x128xf32>
    %579 = arith.truncf %578 : vector<8x128xf32> to vector<8x128xbf16>
    %c0_183 = arith.constant 0 : index
    %c0_184 = arith.constant 0 : index
    %580 = vector.load %arg9[%c0_183, %c0_184] : memref<128x128xbf16, #tpu.memory_space<vmem>>, vector<128x128xbf16>
    %cst_185 = arith.constant dense<0.000000e+00> : vector<8x128xf32>
    %581 = tpu.matmul %579, %580, %cst_185 {dimension_numbers = #tpu.dot_dimension_numbers<[1], [0], [0], [1], [0, 0, 1, 1], [], []>} : vector<8x128xbf16>, vector<128x128xbf16>, vector<8x128xf32> -> vector<8x128xf32>
    %c0_186 = arith.constant 0 : index
    %c0_187 = arith.constant 0 : index
    %582 = vector.load %arg10[%c0_186, %c0_187] : memref<1x128xf32, #tpu.memory_space<vmem>>, vector<1x128xf32>
    %583 = vector.broadcast %582 : vector<1x128xf32> to vector<8x128xf32>
    %584 = arith.addf %581, %583 : vector<8x128xf32>
    %c0_188 = arith.constant 0 : index
    %c0_189 = arith.constant 0 : index
    %585 = vector.load %arg11[%c0_188, %c0_189] : memref<8x128xf32, #tpu.memory_space<vmem>>, vector<8x128xf32>
    tpu.vector_store %arg11[%c0_188, %c0_189], %584 {strides = array<i32>} : memref<8x128xf32, #tpu.memory_space<vmem>>, vector<8x128xf32>,
    return
  }
}

</mosaic_0001>

<bundles_post_ra>
// kernel: lstm_model_forward.1
= control target key start
LH: loop header
LB: loop body
LE: loop exit
PB: predicated region body
PF: predicated region fallthrough
CT: control target
= control target key end

     0   :  { %16 = vsyncpa [#allocation5], 0  ;;  %s12136_s0 = inlined_call_operand.vmem [shape: s32[64,1], index: 0, kind: input, shape index: {}]   ;;  %s12137_s1 = inlined_call_operand.hbm [shape: bf16[8,1024], index: 1, kind: input, shape index: {}]   ;;  %s12138_s2 = inlined_call_operand.hbm [shape: f32[1,1024], index: 2, kind: input, shape index: {}]   ;;  %s12139_s3 = inlined_call_operand.hbm [shape: bf16[256,1024], index: 3, kind: input, shape index: {}]   ;;  %s12140_s4 = inlined_call_operand.hbm [shape: bf16[256,1024], index: 4, kind: input, shape index: {}]   ;;  %s12141_s5 = inlined_call_operand.hbm [shape: f32[1,1024], index: 5, kind: input, shape index: {}]   ;;  %s12142_s6 = inlined_call_operand.hbm [shape: bf16[256,1024], index: 6, kind: input, shape index: {}]   ;;  %s12143_s7 = inlined_call_operand.vmem [shape: bf16[256,128], index: 7, kind: input, shape index: {}]   ;;  %s12144_s8 = inlined_call_operand.vmem [shape: f32[1,128], index: 8, kind: input, shape index: {}]   ;;  %s12145_s9 = inlined_call_operand.hbm [shape: bf16[128,128], index: 9, kind: input, shape index: {}]   ;;  %s12146_s10 = inlined_call_operand.vmem [shape: f32[1,128], index: 10, kind: input, shape index: {}]   ;;  %s12147_s11 = inlined_call_operand.vmem [shape: f32[8,128], index: 11, kind: output, shape index: {}]  }
   0x1   :  { %17 = vsyncpa [#allocation7], 0 }
   0x2   :  { %18 = vsyncpa [#allocation10], 0 }
   0x3   :  { %19 = vsyncpa [#allocation13], 0  ;;  %s8664_s17 = smov [#allocation6]   ;;  %s8502_s21 = scalar_lea.hbm %s12138_s2, 128 }
   0x4   :  { %s38_s18 = sshll.u32 %s8664_s17, 4  ;;  %p8503_p0 = scmp.ne.s32.totalorder %s12138_s2, %s8502_s21  ;;  %s39_s18 = int_to_ptr.vmem [resolvable:$true] %s38_s18 }
   0x5   :  { %p8506_p1 = scmp.lt.u32.totalorder %s8502_s21, %s12138_s2 }
   0x7   :  { %p8508_p2 = pnand %p8506_p1, %p8503_p0 }
   0x9   :  { %8511 = shalt.err (!%p8508_p2)
}
   0xa   :  { %s8512_s26 = scalar_lea.vmem %s39_s18, 128  ;;  %p8517_p4 = scmp.lt.s32.totalorder %s39_s18, %s39_s18 }
   0xb   :  { %p8513_p3 = scmp.ne.s32.totalorder %s39_s18, %s8512_s26  ;;  %p8518_p5 = scmp.lt.s32.totalorder %s8512_s26, %s8512_s26 }
   0xd   :  { %p8519_p6 = por %p8518_p5, %p8517_p4 }
   0xf   :  { %p8520_p7 = pnand %p8519_p6, %p8513_p3 }
  0x11   :  { %8523 = shalt.err (!%p8520_p7)
}
  0x12   :  { %41 = dma.hbm_to_vmem [thread:$0]  %s12138_s2, 128, %s39_s18, [#allocation7]  }
  0x13   :  { %s8665_s29 = smov [#allocation9]   ;;  %s8666_s12 = smov [#allocation12]  }
  0x14   :  { %s59_s30 = sshll.u32 %s8665_s29, 4  ;;  %s81_s13 = sshll.u32 %s8666_s12, 4  ;;  %s60_s30 = int_to_ptr.vmem [resolvable:$true] %s59_s30  ;;  %s82_s13 = int_to_ptr.vmem [resolvable:$true] %s81_s13 }
  0x15   :  { %s8524_s16 = scalar_lea.hbm %s12140_s4, 16384 }
  0x16   :  { %p8525_p8 = scmp.ne.s32.totalorder %s12140_s4, %s8524_s16  ;;  %p8528_p9 = scmp.lt.u32.totalorder %s8524_s16, %s12140_s4 }
  0x18   :  { %p8530_p10 = pnand %p8528_p9, %p8525_p8 }
  0x1a   :  { %8533 = shalt.err (!%p8530_p10)
}
  0x1b   :  { %s8534_s2 = scalar_lea.vmem %s60_s30, 16384  ;;  %p8539_p12 = scmp.lt.s32.totalorder %s60_s30, %s60_s30 }
  0x1c   :  { %p8535_p11 = scmp.ne.s32.totalorder %s60_s30, %s8534_s2  ;;  %p8540_p13 = scmp.lt.s32.totalorder %s8534_s2, %s8534_s2 }
  0x1e   :  { %p8541_p0 = por %p8540_p13, %p8539_p12 }
  0x20   :  { %p8542_p1 = pnand %p8541_p0, %p8535_p11 }
  0x22   :  { %8545 = shalt.err (!%p8542_p1)
}
  0x23   :  { %s8667_s18 = smov 512   ;;  %s8668_s22 = smov 32  }
  0x24   :  { %65 = dma.hbm_to_vmem [thread:$0]  %s12140_s4, 16384, %s60_s30, [#allocation10], %s8667_s18, %s8667_s18, %s8668_s22  }
  0x25   :  { %s8546_s27 = scalar_lea.hbm %s12142_s6, 16384 }
  0x26   :  { %p8547_p2 = scmp.ne.s32.totalorder %s12142_s6, %s8546_s27  ;;  %p8550_p3 = scmp.lt.u32.totalorder %s8546_s27, %s12142_s6 }
  0x28   :  { %p8552_p4 = pnand %p8550_p3, %p8547_p2 }
  0x2a   :  { %8555 = shalt.err (!%p8552_p4)
}
  0x2b   :  { %s8556_s15 = scalar_lea.vmem %s82_s13, 16384  ;;  %p8561_p6 = scmp.lt.s32.totalorder %s82_s13, %s82_s13 }
  0x2c   :  { %p8557_p5 = scmp.ne.s32.totalorder %s82_s13, %s8556_s15  ;;  %p8562_p7 = scmp.lt.s32.totalorder %s8556_s15, %s8556_s15 }
  0x2e   :  { %p8563_p8 = por %p8562_p7, %p8561_p6 }
  0x30   :  { %p8564_p9 = pnand %p8563_p8, %p8557_p5 }
  0x32   :  { %8567 = shalt.err (!%p8564_p9)
}
  0x33   :  { %87 = dma.hbm_to_vmem [thread:$0]  %s12142_s6, 16384, %s82_s13, [#allocation13], %s8667_s18, %s8667_s18, %s8668_s22  }
  0x34   :  { %s8669_s16 = smov [#allocation4]   ;;  %s8670_s19 = smov [#allocation8]  }
  0x35   :  { %s28_s17 = sshll.u32 %s8669_s16, 4  ;;  %s47_s20 = sshll.u32 %s8670_s19, 4  ;;  %s29_s17 = int_to_ptr.vmem [resolvable:$true] %s28_s17  ;;  %s48_s20 = int_to_ptr.vmem [resolvable:$true] %s47_s20 }
  0x36   :  { %s8568_s23 = scalar_lea.hbm %s12137_s1, 512 }
  0x37   :  { %p8569_p10 = scmp.ne.s32.totalorder %s12137_s1, %s8568_s23  ;;  %p8572_p11 = scmp.lt.u32.totalorder %s8568_s23, %s12137_s1 }
  0x39   :  { %p8574_p12 = pnand %p8572_p11, %p8569_p10 }
  0x3b   :  { %8577 = shalt.err (!%p8574_p12)
}
  0x3c   :  { %s8578_s6 = scalar_lea.vmem %s29_s17, 512  ;;  %p8583_p0 = scmp.lt.s32.totalorder %s29_s17, %s29_s17 }
  0x3d   :  { %p8579_p13 = scmp.ne.s32.totalorder %s29_s17, %s8578_s6  ;;  %p8584_p1 = scmp.lt.s32.totalorder %s8578_s6, %s8578_s6 }
  0x3f   :  { %p8585_p2 = por %p8584_p1, %p8583_p0 }
  0x41   :  { %p8586_p3 = pnand %p8585_p2, %p8579_p13 }
  0x43   :  { %8589 = shalt.err (!%p8586_p3)
}
  0x44   :  { %31 = dma.hbm_to_vmem [thread:$0]  %s12137_s1, 512, %s29_s17, [#allocation5]  }
  0x45   :  { %s8590_s14 = scalar_lea.hbm %s12139_s3, 16384 }
  0x46   :  { %p8591_p4 = scmp.ne.s32.totalorder %s12139_s3, %s8590_s14  ;;  %p8594_p5 = scmp.lt.u32.totalorder %s8590_s14, %s12139_s3 }
  0x48   :  { %p8596_p6 = pnand %p8594_p5, %p8591_p4 }
  0x4a   :  { %8599 = shalt.err (!%p8596_p6)
}
  0x4b   :  { %s8600_s19 = scalar_lea.vmem %s48_s20, 16384  ;;  %p8605_p8 = scmp.lt.s32.totalorder %s48_s20, %s48_s20 }
  0x4c   :  { %p8601_p7 = scmp.ne.s32.totalorder %s48_s20, %s8600_s19  ;;  %p8606_p9 = scmp.lt.s32.totalorder %s8600_s19, %s8600_s19 }
  0x4e   :  { %p8607_p10 = por %p8606_p9, %p8605_p8 }
  0x50   :  { %p8608_p11 = pnand %p8607_p10, %p8601_p7 }
  0x52   :  { %8611 = shalt.err (!%p8608_p11)
}
  0x53   :  { %53 = dma.hbm_to_vmem [thread:$0]  %s12139_s3, 16384, %s48_s20, [#allocation7], %s8667_s18, %s8667_s18, %s8668_s22  }
  0x54   :  { %s8671_s21 = smov [#allocation11]   ;;  %s8672_s23 = smov [#allocation14]  }
  0x55   :  { %s72_s2 = sshll.u32 %s8671_s21, 4  ;;  %s97_s24 = sshll.u32 %s8672_s23, 4  ;;  %s73_s2 = int_to_ptr.vmem [resolvable:$true] %s72_s2  ;;  %s98_s24 = int_to_ptr.vmem [resolvable:$true] %s97_s24 }
  0x56   :  { %s8612_s27 = scalar_lea.hbm %s12141_s5, 128 }
  0x57   :  { %p8613_p12 = scmp.ne.s32.totalorder %s12141_s5, %s8612_s27  ;;  %p8616_p13 = scmp.lt.u32.totalorder %s8612_s27, %s12141_s5 }
  0x59   :  { %p8618_p0 = pnand %p8616_p13, %p8613_p12 }
  0x5b   :  { %8621 = shalt.err (!%p8618_p0)
}
  0x5c   :  { %s8622_s3 = scalar_lea.vmem %s73_s2, 128  ;;  %p8627_p2 = scmp.lt.s32.totalorder %s73_s2, %s73_s2 }
  0x5d   :  { %p8623_p1 = scmp.ne.s32.totalorder %s73_s2, %s8622_s3  ;;  %p8628_p3 = scmp.lt.s32.totalorder %s8622_s3, %s8622_s3 }
  0x5f   :  { %p8629_p4 = por %p8628_p3, %p8627_p2 }
  0x61   :  { %p8630_p5 = pnand %p8629_p4, %p8623_p1 }
  0x63   :  { %8633 = shalt.err (!%p8630_p5)
}
  0x64   :  { %75 = dma.hbm_to_vmem [thread:$0]  %s12141_s5, 128, %s73_s2, [#allocation10]  }
  0x65   :  { %s8634_s14 = scalar_lea.hbm %s12145_s9, 1024 }
  0x66   :  { %p8635_p6 = scmp.ne.s32.totalorder %s12145_s9, %s8634_s14  ;;  %p8638_p7 = scmp.lt.u32.totalorder %s8634_s14, %s12145_s9 }
  0x68   :  { %p8640_p8 = pnand %p8638_p7, %p8635_p6 }
  0x6a   :  { %8643 = shalt.err (!%p8640_p8)
}
  0x6b   :  { %s8644_s19 = scalar_lea.vmem %s98_s24, 1024  ;;  %p8649_p10 = scmp.lt.s32.totalorder %s98_s24, %s98_s24 }
  0x6c   :  { %p8645_p9 = scmp.ne.s32.totalorder %s98_s24, %s8644_s19  ;;  %p8650_p11 = scmp.lt.s32.totalorder %s8644_s19, %s8644_s19 }
  0x6e   :  { %p8651_p12 = por %p8650_p11, %p8649_p10 }
  0x70   :  { %p8652_p13 = pnand %p8651_p12, %p8645_p9 }
  0x72   :  { %8655 = shalt.err (!%p8652_p13)
}
  0x73   :  { %s8673_s5 = smov 64   ;;  %s8674_s1 = smov 4  }
  0x74   :  { %103 = dma.hbm_to_vmem [thread:$0]  %s12145_s9, 1024, %s98_s24, [#allocation13], %s8673_s5, %s8673_s5, %s8674_s1  }
  0x75   :  { %8656 = dma.done.wait [#allocation5], 512  }
  0x76   :  { %8657 = vsyncadd [#allocation5], 4294966784 }
  0x77   :  { %8658 = dma.done.wait [#allocation7], 16512  }
  0x78   :  { %8659 = vsyncadd [#allocation7], 4294950784 }
  0x79   :  { %8660 = dma.done.wait [#allocation10], 16512  }
  0x7a   :  { %8661 = vsyncadd [#allocation10], 4294950784 }
  0x7b   :  { %8662 = dma.done.wait [#allocation13], 17408  }
  0x7c   :  { %8663 = vsyncadd [#allocation13], 4294949888  ;;  %v8675_v0 = vmov 0   ;;  %v247_v1 = vld [vmem:[%s12136_s0 + $0x30] sm:$0xff]  ;;  %v245_v2 = vld [vmem:[%s12136_s0 + $0x20] sm:$0xff]  ;;  %vm508_vm0 = vcmask 1043456   ;;  %v12150_v17 = vlaneseq }
  0x7d   :  { %7973 = vset.pattern.permute.xlu1 %v8675_v0  ;;  %7972 = vset.pattern.permute.xlu0 %v8675_v0  ;;  %v248_v3 = vld [vmem:[%s12136_s0 + $0x38] sm:$0xff]  ;;  %v246_v4 = vld [vmem:[%s12136_s0 + $0x28] sm:$0xff]  ;;  %v301_v5 = vld [vmem:[#allocation4] sm:$0xff]  ;;  %v12148_v25 = vmov 0.0   ;;  %vm495_vm3 = vcmask 64512   ;;  %vm8677_vm10 = vmmov 0  }
  0x7e   :  { %585 = vmatprep.mubr.bf16.mxu1 %v8675_v0  ;;  %565 = vmatprep.mubr.bf16.mxu0 %v8675_v0  ;;  %v7339_v6 = vcombine.high %v301_v5, %v301_v5  ;;  %v7338_v7 = vcombine.low %v301_v5, %v301_v5  ;;  %v242_v8 = vld [vmem:[%s12136_s0 + $0x8] sm:$0xff]  ;;  %v241_v9 = vld [vmem:[%s12136_s0] sm:$0xff]  ;;  %v244_v12 = vld [vmem:[%s12136_s0 + $0x18] sm:$0xff]  ;;  %v129_v18 = vand.u32 127, %v12150_v17 }
  0x7f   :  { %268 = vperm.xlu1 %7973, %v247_v1   ;;  %262 = vperm.xlu0 %7972, %v245_v2   ;;  %v302_v11 = vld [vmem:[#allocation4 + $0x8] sm:$0xff]  ;;  %v243_v13 = vld [vmem:[%s12136_s0 + $0x10] sm:$0xff]  ;;  %v304_v24 = vld [vmem:[#allocation4 + $0x18] sm:$0xff] }
  0x80   :  { %v510_v10 = vsel %vm508_vm0, %v7338_v7, 0  ;;  %7956 = vmatprep.subr.msk.bf16.mxu1 %vm508_vm0, %v7339_v6  ;;  %7346 = vmatprep.subr.msk.bf16.mxu0 %vm508_vm0, %v7339_v6  ;;  %v7341_v14 = vcombine.high %v302_v11, %v302_v11  ;;  %v303_v15 = vld [vmem:[#allocation4 + $0x10] sm:$0xff]  ;;  %v7340_v21 = vcombine.low %v302_v11, %v302_v11  ;;  %v7345_v30 = vcombine.high %v304_v24, %v304_v24  ;;  %v306_v48 = vld [vmem:[#allocation8] sm:$0xff] }
  0x81   :  { %7957 = vmatpush1.bf16.msra.mxu1 %v510_v10  ;;  %534 = vmatpush1.bf16.msra.mxu0 %v510_v10  ;;  %v7343_v16 = vcombine.high %v303_v15, %v303_v15  ;;  %v7342_v31 = vcombine.low %v303_v15, %v303_v15  ;;  %v7344_v46 = vcombine.low %v304_v24, %v304_v24  ;;  %v310_v49 = vld [vmem:[#allocation8 + $0x20] sm:$0xff]  ;;  %v307_v50 = vld [vmem:[#allocation8 + $0x8] sm:$0xff] }
  0x82   :  { %7351 = vmatprep.subr.msk.bf16.mxu1 %vm508_vm0, %v7341_v14  ;;  %v516_v29 = vsel %vm508_vm0, %v7340_v21, 0  ;;  %v8907_v51 = vcombine.high %v306_v48, %v310_v49  ;;  %v311_v52 = vld [vmem:[#allocation8 + $0x28] sm:$0xff]  ;;  %v8911_v54 = vcombine.low %v306_v48, %v310_v49  ;;  %v314_v56 = vld [vmem:[#allocation8 + $0x40] sm:$0xff] }
  0x83   :  { %271 = vperm.xlu1 %7973, %v248_v3   ;;  %265 = vperm.xlu0 %7972, %v246_v4   ;;  %v522_v37 = vsel %vm508_vm0, %v7342_v31, 0  ;;  %v528_v47 = vsel %vm508_vm0, %v7344_v46, 0  ;;  %v8909_v53 = vcombine.high %v307_v50, %v311_v52  ;;  %v8913_v55 = vcombine.low %v307_v50, %v311_v52  ;;  %v318_v57 = vld [vmem:[#allocation8 + $0x60] sm:$0xff]  ;;  %v315_v58 = vld [vmem:[#allocation8 + $0x48] sm:$0xff] }
  0x84   :  { %7356 = vmatprep.subr.msk.bf16.mxu0 %vm508_vm0, %v7343_v16  ;;  %12703 = vst [vmem:[#allocation19_spill] sm:$0xff] %v8907_v51  ;;  %12705 = vst [vmem:[#allocation21_spill] sm:$0xff] %v8911_v54  ;;  %v8919_v59 = vcombine.high %v314_v56, %v318_v57  ;;  %v319_v60 = vld [vmem:[#allocation8 + $0x68] sm:$0xff]  ;;  %v8923_v62 = vcombine.low %v314_v56, %v318_v57  ;;  %v326_v1 = vld [vmem:[#allocation8 + $0xa0] sm:$0xff] }
  0x85   :  { %12704 = vst [vmem:[#allocation20_spill] sm:$0xff] %v8909_v53  ;;  %12706 = vst [vmem:[#allocation22_spill] sm:$0xff] %v8913_v55  ;;  %v8921_v61 = vcombine.high %v315_v58, %v319_v60  ;;  %v8925_v63 = vcombine.low %v315_v58, %v319_v60  ;;  %v323_v2 = vld [vmem:[#allocation8 + $0x88] sm:$0xff]  ;;  %v338_v16 = vld [vmem:[#allocation8 + $0x100] sm:$0xff] }
  0x86   :  { %12707 = vst [vmem:[#allocation23_spill] sm:$0xff] %v8919_v59  ;;  %12709 = vst [vmem:[#allocation25_spill] sm:$0xff] %v8923_v62  ;;  %v327_v4 = vld [vmem:[#allocation8 + $0xa8] sm:$0xff]  ;;  %v370_v50 = vld [vmem:[#allocation8 + $0x200] sm:$0xff] }
  0x87   :  { %253 = vperm.xlu1 %7973, %v242_v8   ;;  %250 = vperm.xlu0 %7972, %v241_v9   ;;  %12708 = vst [vmem:[#allocation24_spill] sm:$0xff] %v8921_v61  ;;  %12710 = vst [vmem:[#allocation26_spill] sm:$0xff] %v8925_v63  ;;  %v8933_v5 = vcombine.high %v323_v2, %v327_v4  ;;  %v8937_v7 = vcombine.low %v323_v2, %v327_v4  ;;  %v330_v8 = vld [vmem:[#allocation8 + $0xc0] sm:$0xff]  ;;  %v331_v10 = vld [vmem:[#allocation8 + $0xc8] sm:$0xff] }
  0x88   :  { %v334_v9 = vld [vmem:[#allocation8 + $0xe0] sm:$0xff]  ;;  %v343_v21 = vld [vmem:[#allocation8 + $0x128] sm:$0xff] }
  0x89   :  { %12712 = vst [vmem:[#allocation28_spill] sm:$0xff] %v8933_v5  ;;  %12714 = vst [vmem:[#allocation30_spill] sm:$0xff] %v8937_v7  ;;  %v8943_v11 = vcombine.high %v330_v8, %v334_v9  ;;  %v8947_v14 = vcombine.low %v330_v8, %v334_v9  ;;  %v367_v46 = vld [vmem:[#allocation8 + $0x1e8] sm:$0xff]  ;;  %v374_v52 = vld [vmem:[#allocation8 + $0x220] sm:$0xff] }
  0x8a   :  { %v371_v56 = vld [vmem:[#allocation8 + $0x208] sm:$0xff]  ;;  %v9003_v57 = vcombine.high %v370_v50, %v374_v52  ;;  %v378_v2 = vld [vmem:[#allocation8 + $0x240] sm:$0xff] }
  0x8b   :  { %259 = vperm.xlu1 %7973, %v244_v12   ;;  %256 = vperm.xlu0 %7972, %v243_v13   ;;  %12715 = vst [vmem:[#allocation31_spill] sm:$0xff] %v8943_v11  ;;  %v335_v12 = vld [vmem:[#allocation8 + $0xe8] sm:$0xff]  ;;  %12717 = vst [vmem:[#allocation33_spill] sm:$0xff] %v8947_v14  ;;  %v382_v4 = vld [vmem:[#allocation8 + $0x260] sm:$0xff] }
  0x8c   :  { %v8945_v13 = vcombine.high %v331_v10, %v335_v12  ;;  %v8949_v15 = vcombine.low %v331_v10, %v335_v12  ;;  %12735 = vst [vmem:[#allocation51_spill] sm:$0xff] %v9003_v57  ;;  %v375_v58 = vld [vmem:[#allocation8 + $0x228] sm:$0xff]  ;;  %v9015_v9 = vcombine.high %v378_v2, %v382_v4 }
  0x8d   :  { %v9005_v60 = vcombine.high %v371_v56, %v375_v58  ;;  %v379_v8 = vld [vmem:[#allocation8 + $0x248] sm:$0xff] }
  0x8e   :  { %12716 = vst [vmem:[#allocation32_spill] sm:$0xff] %v8945_v13  ;;  %12718 = vst [vmem:[#allocation34_spill] sm:$0xff] %v8949_v15  ;;  %v383_v10 = vld [vmem:[#allocation8 + $0x268] sm:$0xff] }
  0x8f   :  { %12736 = vst [vmem:[#allocation52_spill] sm:$0xff] %v9005_v60  ;;  %12739 = vst [vmem:[#allocation55_spill] sm:$0xff] %v9015_v9  ;;  %v9017_v12 = vcombine.high %v379_v8, %v383_v10  ;;  %v419_v17 = vld [vmem:[#allocation8 + $0x388] sm:$0xff] }
  0x91   :  { %12740 = vst [vmem:[#allocation56_spill] sm:$0xff] %v9017_v12 }
  0xfe   :  { %v269_v19 = vpop.permute.xlu1 %268  ;;  %v263_v20 = vpop.permute.xlu0 %262 }
  0xff   :  { %vm277_vm1 = vcmp.eq.s32.totalorder %v263_v20, %v129_v18  ;;  %vm279_vm4 = vcmp.eq.s32.totalorder %v269_v19, %v129_v18  ;;  %v339_v19 = vld [vmem:[#allocation8 + $0x108] sm:$0xff] }
 0x100   :  { %v7334_v26 = vsel %vm277_vm1, 1.0, %v12148_v25  ;;  %v7336_v38 = vsel %vm279_vm4, 1.0, %v12148_v25  ;;  %v8961_v24 = vcombine.low %v339_v19, %v343_v21 }
 0x102   :  { %v272_v22 = vpop.permute.xlu1 %271  ;;  %v266_v23 = vpop.permute.xlu0 %265  ;;  %12722 = vst [vmem:[#allocation38_spill] sm:$0xff] %v8961_v24 }
 0x103   :  { %vm278_vm2 = vcmp.eq.s32.totalorder %v266_v23, %v129_v18  ;;  %vm280_vm5 = vcmp.eq.s32.totalorder %v272_v22, %v129_v18  ;;  %v8957_v22 = vcombine.high %v339_v19, %v343_v21  ;;  %v386_v19 = vld [vmem:[#allocation8 + $0x280] sm:$0xff] }
 0x104   :  { %v7335_v27 = vsel %vm278_vm2, 1.0, %v12148_v25  ;;  %v7337_v39 = vsel %vm280_vm5, 1.0, %v12148_v25  ;;  %v390_v21 = vld [vmem:[#allocation8 + $0x2a0] sm:$0xff] }
 0x105   :  { %v299_v28 = vpack.c.bf16 %v7335_v27, %v7334_v26  ;;  %v300_v42 = vpack.c.bf16 %v7337_v39, %v7336_v38  ;;  %12720 = vst [vmem:[#allocation36_spill] sm:$0xff] %v8957_v22  ;;  %v346_v26 = vld [vmem:[#allocation8 + $0x140] sm:$0xff]  ;;  %v359_v38 = vld [vmem:[#allocation8 + $0x1a8] sm:$0xff] }
 0x106   :  { %v254_v32 = vpop.permute.xlu1 %253  ;;  %v251_v33 = vpop.permute.xlu0 %250  ;;  %v350_v27 = vld [vmem:[#allocation8 + $0x160] sm:$0xff] }
 0x107   :  { %vm274_vm6 = vcmp.eq.s32.totalorder %v254_v32, %v129_v18  ;;  %vm273_vm7 = vcmp.eq.s32.totalorder %v251_v33, %v129_v18  ;;  %7349 = vmatmul.mubr.msk.bf16.vlgmr.msra.gmra.mrb[0].mxu1 %vm495_vm3, %v299_v28  ;;  %v8971_v32 = vcombine.low %v346_v26, %v350_v27 }
 0x108   :  { %v7331_v34 = vsel %vm274_vm6, 1.0, %v12148_v25  ;;  %v7330_v35 = vsel %vm273_vm7, 1.0, %v12148_v25  ;;  %607 = vmatpush1.bf16.msra.mxu1 %v516_v29  ;;  %595 = vmatprep.mubr.bf16.mxu1 %v8675_v0  ;;  %v8967_v29 = vcombine.high %v346_v26, %v350_v27  ;;  %v387_v26 = vld [vmem:[#allocation8 + $0x288] sm:$0xff]  ;;  %v9027_v27 = vcombine.high %v386_v19, %v390_v21 }
 0x109   :  { %v297_v36 = vpack.c.bf16 %v7331_v34, %v7330_v35  ;;  %7361 = vmatprep.subr.msk.bf16.mxu1 %vm508_vm0, %v7345_v30  ;;  %v351_v30 = vld [vmem:[#allocation8 + $0x168] sm:$0xff]  ;;  %12725 = vst [vmem:[#allocation41_spill] sm:$0xff] %v8971_v32  ;;  %v354_v34 = vld [vmem:[#allocation8 + $0x180] sm:$0xff] }
 0x10a   :  { %v260_v40 = vpop.permute.xlu1 %259  ;;  %v257_v41 = vpop.permute.xlu0 %256  ;;  %12723 = vst [vmem:[#allocation39_spill] sm:$0xff] %v8967_v29  ;;  %v358_v35 = vld [vmem:[#allocation8 + $0x1a0] sm:$0xff]  ;;  %12743 = vst [vmem:[#allocation59_spill] sm:$0xff] %v9027_v27 }
 0x10b   :  { %vm276_vm8 = vcmp.eq.s32.totalorder %v260_v40, %v129_v18  ;;  %vm275_vm9 = vcmp.eq.s32.totalorder %v257_v41, %v129_v18  ;;  %7347 = vmatmul.mubr.msk.bf16.vlgmr.msra.gmra.mrb[0].mxu0 %vm495_vm3, %v297_v36  ;;  %v342_v18 = vld [vmem:[#allocation8 + $0x120] sm:$0xff]  ;;  %v8983_v40 = vcombine.low %v354_v34, %v358_v35 }
 0x10c   :  { %575 = vmatprep.mubr.bf16.mxu0 %v8675_v0  ;;  %680 = vmatpush1.bf16.msra.mxu0 %v522_v37  ;;  %v7333_v43 = vsel %vm276_vm8, 1.0, %v12148_v25  ;;  %v7332_v44 = vsel %vm275_vm9, 1.0, %v12148_v25  ;;  %v8955_v20 = vcombine.high %v338_v16, %v342_v18  ;;  %v8959_v23 = vcombine.low %v338_v16, %v342_v18 }
 0x10d   :  { %v298_v45 = vpack.c.bf16 %v7333_v43, %v7332_v44  ;;  %1629 = vmatprep.subr.bf16.mxu0 %v8907_v51  ;;  %v8979_v37 = vcombine.high %v354_v34, %v358_v35  ;;  %12729 = vst [vmem:[#allocation45_spill] sm:$0xff] %v8983_v40  ;;  %v366_v43 = vld [vmem:[#allocation8 + $0x1e0] sm:$0xff]  ;;  %v363_v44 = vld [vmem:[#allocation8 + $0x1c8] sm:$0xff]  ;;  %v9019_v16 = vcombine.low %v378_v2, %v382_v4 }
 0x10e   :  { %12719 = vst [vmem:[#allocation35_spill] sm:$0xff] %v8955_v20  ;;  %12721 = vst [vmem:[#allocation37_spill] sm:$0xff] %v8959_v23  ;;  %v8997_v49 = vcombine.low %v363_v44, %v367_v46  ;;  %v9021_v18 = vcombine.low %v379_v8, %v383_v10  ;;  %v9031_v34 = vcombine.low %v386_v19, %v390_v21  ;;  %v403_v2 = vld [vmem:[#allocation8 + $0x308] sm:$0xff] }
 0x10f   :  { %7350 = vmatmul.mubr.msk.bf16.gmra.mrb[4].mxu1 %vm495_vm3, %v300_v42  ;;  %12727 = vst [vmem:[#allocation43_spill] sm:$0xff] %v8979_v37  ;;  %12741 = vst [vmem:[#allocation57_spill] sm:$0xff] %v9019_v16  ;;  %v407_v8 = vld [vmem:[#allocation8 + $0x328] sm:$0xff] }
 0x110   :  { %638 = vmatprep.mubr.bf16.mxu1 %v8675_v0  ;;  %12734 = vst [vmem:[#allocation50_spill] sm:$0xff] %v8997_v49  ;;  %12742 = vst [vmem:[#allocation58_spill] sm:$0xff] %v9021_v18  ;;  %v9053_v10 = vcombine.high %v403_v2, %v407_v8  ;;  %v9057_v21 = vcombine.low %v403_v2, %v407_v8 }
 0x111   :  { %12745 = vst [vmem:[#allocation61_spill] sm:$0xff] %v9031_v34 }
 0x112   :  { %12752 = vst [vmem:[#allocation68_spill] sm:$0xff] %v9053_v10  ;;  %12754 = vst [vmem:[#allocation70_spill] sm:$0xff] %v9057_v21 }
 0x113   :  { %7348 = vmatmul.mubr.msk.bf16.gmra.mrb[4].mxu0 %vm495_vm3, %v298_v45 }
 0x114   :  { %711 = vmatprep.mubr.bf16.mxu0 %v8675_v0 }
 0x117   :  { %7352 = vmatmul.mubr.msk.bf16.vlgmr.msra.gmra.mrb[8].mxu1 %vm495_vm3, %v297_v36 }
 0x118   :  { %753 = vmatpush1.bf16.msra.mxu1 %v528_v47  ;;  %648 = vmatprep.mubr.bf16.mxu1 %v8675_v0  ;;  %v8993_v47 = vcombine.high %v363_v44, %v367_v46  ;;  %v399_v44 = vld [vmem:[#allocation8 + $0x2e8] sm:$0xff] }
 0x119   :  { %1670 = vmatprep.subr.bf16.mxu1 %v8909_v53 }
 0x11a   :  { %12732 = vst [vmem:[#allocation48_spill] sm:$0xff] %v8993_v47 }
 0x11b   :  { %7357 = vmatmul.mubr.msk.bf16.vlgmr.msra.gmra.mrb[8].mxu0 %vm495_vm3, %v297_v36 }
 0x11c   :  { %721 = vmatprep.mubr.bf16.mxu0 %v8675_v0  ;;  %1630 = vmatpush1.bf16.msra.mxu0 %v8911_v54 }
 0x11d   :  { %1631 = vmatprep.subr.bf16.mxu0 %v8919_v59 }
 0x11f   :  { %7353 = vmatmul.mubr.msk.bf16.gmra.mrb[12].mxu1 %vm495_vm3, %v298_v45 }
 0x120   :  { %658 = vmatprep.mubr.bf16.mxu1 %v8675_v0  ;;  %1632 = vmatpush1.bf16.msra.mxu0 %v8923_v62 }
 0x123   :  { %7358 = vmatmul.mubr.msk.bf16.gmra.mrb[12].mxu0 %vm495_vm3, %v298_v45 }
 0x124   :  { %731 = vmatprep.mubr.bf16.mxu0 %v8675_v0 }
 0x127   :  { %7354 = vmatmul.mubr.msk.bf16.gmra.mrb[16].mxu1 %vm495_vm3, %v299_v28 }
 0x128   :  { %668 = vmatprep.mubr.bf16.mxu1 %v8675_v0 }
 0x12b   :  { %7359 = vmatmul.mubr.msk.bf16.gmra.mrb[16].mxu0 %vm495_vm3, %v299_v28 }
 0x12c   :  { %741 = vmatprep.mubr.bf16.mxu0 %v8675_v0 }
 0x12f   :  { %7355 = vmatmul.mubr.msk.bf16.gmra.mrb[20].mxu1 %vm495_vm3, %v300_v42 }
 0x130   :  { %784 = vmatprep.mubr.bf16.mxu1 %v8675_v0 }
 0x133   :  { %7360 = vmatmul.mubr.msk.bf16.gmra.mrb[20].mxu0 %vm495_vm3, %v300_v42 }
 0x137   :  { %7362 = vmatmul.mubr.msk.bf16.vlgmr.msra.gmra.mrb[24].mxu1 %vm495_vm3, %v297_v36  ;;  %v355_v36 = vld [vmem:[#allocation8 + $0x188] sm:$0xff] }
 0x138   :  { %794 = vmatprep.mubr.bf16.mxu1 %v8675_v0  ;;  %1671 = vmatpush1.bf16.msra.mxu1 %v8913_v55  ;;  %v8981_v39 = vcombine.high %v355_v36, %v359_v38  ;;  %v8985_v41 = vcombine.low %v355_v36, %v359_v38  ;;  %v394_v36 = vld [vmem:[#allocation8 + $0x2c0] sm:$0xff] }
 0x139   :  { %1672 = vmatprep.subr.bf16.mxu1 %v8921_v61  ;;  %v398_v38 = vld [vmem:[#allocation8 + $0x2e0] sm:$0xff] }
 0x13a   :  { %12728 = vst [vmem:[#allocation44_spill] sm:$0xff] %v8981_v39  ;;  %12730 = vst [vmem:[#allocation46_spill] sm:$0xff] %v8985_v41 }
 0x13c   :  { %1673 = vmatpush1.bf16.msra.mxu1 %v8925_v63 }
 0x13d   :  { %1674 = vmatprep.subr.bf16.mxu1 %v8933_v5 }
 0x13f   :  { %7363 = vmatmul.mubr.msk.bf16.gmra.mrb[28].mxu1 %vm495_vm3, %v298_v45 }
 0x140   :  { %804 = vmatprep.mubr.bf16.mxu1 %v8675_v0  ;;  %1675 = vmatpush1.bf16.msra.mxu1 %v8937_v7 }
 0x141   :  { %1676 = vmatprep.subr.bf16.mxu1 %v8945_v13 }
 0x144   :  { %1677 = vmatpush1.bf16.msra.mxu1 %v8949_v15 }
 0x145   :  { %1678 = vmatprep.subr.bf16.mxu1 %v8957_v22 }
 0x147   :  { %7364 = vmatmul.mubr.msk.bf16.gmra.mrb[32].mxu1 %vm495_vm3, %v299_v28  ;;  %v347_v28 = vld [vmem:[#allocation8 + $0x148] sm:$0xff] }
 0x148   :  { %814 = vmatprep.mubr.bf16.mxu1 %v8675_v0  ;;  %v322_v0 = vld [vmem:[#allocation8 + $0x80] sm:$0xff]  ;;  %1679 = vmatpush1.bf16.msra.mxu1 %v8961_v24  ;;  %v8969_v31 = vcombine.high %v347_v28, %v351_v30  ;;  %v8973_v33 = vcombine.low %v347_v28, %v351_v30  ;;  %v391_v28 = vld [vmem:[#allocation8 + $0x2a8] sm:$0xff] }
 0x149   :  { %v8931_v3 = vcombine.high %v322_v0, %v326_v1  ;;  %v8935_v6 = vcombine.low %v322_v0, %v326_v1  ;;  %v9007_v0 = vcombine.low %v370_v50, %v374_v52  ;;  %v9009_v1 = vcombine.low %v371_v56, %v375_v58  ;;  %v402_v56 = vld [vmem:[#allocation8 + $0x300] sm:$0xff] }
 0x14a   :  { %12724 = vst [vmem:[#allocation40_spill] sm:$0xff] %v8969_v31  ;;  %12726 = vst [vmem:[#allocation42_spill] sm:$0xff] %v8973_v33  ;;  %1680 = vmatprep.subr.bf16.mxu1 %v8969_v31  ;;  %v9029_v30 = vcombine.high %v387_v26, %v391_v28  ;;  %v9033_v35 = vcombine.low %v387_v26, %v391_v28  ;;  %v9043_v50 = vcombine.low %v394_v36, %v398_v38  ;;  %v406_v58 = vld [vmem:[#allocation8 + $0x320] sm:$0xff] }
 0x14b   :  { %12711 = vst [vmem:[#allocation27_spill] sm:$0xff] %v8931_v3  ;;  %12713 = vst [vmem:[#allocation29_spill] sm:$0xff] %v8935_v6  ;;  %1633 = vmatprep.subr.bf16.mxu0 %v8931_v3  ;;  %v9051_v4 = vcombine.high %v402_v56, %v406_v58  ;;  %v9055_v19 = vcombine.low %v402_v56, %v406_v58  ;;  %v410_v26 = vld [vmem:[#allocation8 + $0x340] sm:$0xff] }
 0x14c   :  { %1634 = vmatpush1.bf16.msra.mxu0 %v8935_v6  ;;  %1681 = vmatpush1.bf16.msra.mxu1 %v8973_v33  ;;  %12737 = vst [vmem:[#allocation53_spill] sm:$0xff] %v9007_v0  ;;  %12738 = vst [vmem:[#allocation54_spill] sm:$0xff] %v9009_v1  ;;  %v414_v28 = vld [vmem:[#allocation8 + $0x360] sm:$0xff] }
 0x14d   :  { %1635 = vmatprep.subr.bf16.mxu0 %v8943_v11  ;;  %1682 = vmatprep.subr.bf16.mxu1 %v8981_v39  ;;  %12744 = vst [vmem:[#allocation60_spill] sm:$0xff] %v9029_v30  ;;  %12746 = vst [vmem:[#allocation62_spill] sm:$0xff] %v9033_v35  ;;  %v418_v56 = vld [vmem:[#allocation8 + $0x380] sm:$0xff] }
 0x14e   :  { %12749 = vst [vmem:[#allocation65_spill] sm:$0xff] %v9043_v50  ;;  %12751 = vst [vmem:[#allocation67_spill] sm:$0xff] %v9051_v4  ;;  %v422_v58 = vld [vmem:[#allocation8 + $0x3a0] sm:$0xff] }
 0x14f   :  { %7365 = vmatmul.mubr.msk.bf16.gmra.mrb[36].mxu1 %vm495_vm3, %v300_v42  ;;  %v362_v42 = vld [vmem:[#allocation8 + $0x1c0] sm:$0xff]  ;;  %12753 = vst [vmem:[#allocation69_spill] sm:$0xff] %v9055_v19  ;;  %v9071_v25 = vcombine.high %v418_v56, %v422_v58 }
 0x150   :  { %1636 = vmatpush1.bf16.msra.mxu0 %v8947_v14  ;;  %1683 = vmatpush1.bf16.msra.mxu1 %v8985_v41  ;;  %v8991_v45 = vcombine.high %v362_v42, %v366_v43  ;;  %v8995_v48 = vcombine.low %v362_v42, %v366_v43  ;;  %v395_v42 = vld [vmem:[#allocation8 + $0x2c8] sm:$0xff]  ;;  %v9039_v43 = vcombine.high %v394_v36, %v398_v38 }
 0x151   :  { %1637 = vmatprep.subr.bf16.mxu0 %v8955_v20  ;;  %1684 = vmatprep.subr.bf16.mxu1 %v8993_v47  ;;  %v9041_v46 = vcombine.high %v395_v42, %v399_v44  ;;  %v9045_v52 = vcombine.low %v395_v42, %v399_v44  ;;  %v411_v36 = vld [vmem:[#allocation8 + $0x348] sm:$0xff]  ;;  %v9063_v38 = vcombine.high %v410_v26, %v414_v28 }
 0x152   :  { %12731 = vst [vmem:[#allocation47_spill] sm:$0xff] %v8991_v45  ;;  %12733 = vst [vmem:[#allocation49_spill] sm:$0xff] %v8995_v48  ;;  %v415_v42 = vld [vmem:[#allocation8 + $0x368] sm:$0xff]  ;;  %v9065_v44 = vcombine.low %v410_v26, %v414_v28  ;;  %v9078_v26 = vcombine.low %v418_v56, %v422_v58  ;;  %v309_v58 = vld [vmem:[#allocation8 + $0x18] sm:$0xff] }
 0x153   :  { %12747 = vst [vmem:[#allocation63_spill] sm:$0xff] %v9039_v43  ;;  %12748 = vst [vmem:[#allocation64_spill] sm:$0xff] %v9041_v46  ;;  %v9067_v2 = vcombine.high %v411_v36, %v415_v42  ;;  %v9069_v8 = vcombine.low %v411_v36, %v415_v42 }
 0x154   :  { %1638 = vmatpush1.bf16.msra.mxu0 %v8959_v23  ;;  %1685 = vmatpush1.bf16.msra.mxu1 %v8997_v49  ;;  %12750 = vst [vmem:[#allocation66_spill] sm:$0xff] %v9045_v52  ;;  %12755 = vst [vmem:[#allocation71_spill] sm:$0xff] %v9063_v38 }
 0x155   :  { %1639 = vmatprep.subr.bf16.mxu0 %v8967_v29  ;;  %1686 = vmatprep.subr.bf16.mxu1 %v9005_v60  ;;  %12756 = vst [vmem:[#allocation72_spill] sm:$0xff] %v9065_v44  ;;  %12757 = vst [vmem:[#allocation73_spill] sm:$0xff] %v9067_v2 }
 0x156   :  { %12758 = vst [vmem:[#allocation74_spill] sm:$0xff] %v9069_v8  ;;  %12759 = vst [vmem:[#allocation75_spill] sm:$0xff] %v9071_v25 }
 0x157   :  { %12761 = vst [vmem:[#allocation77_spill] sm:$0xff] %v9078_v26 }
 0x158   :  { %1640 = vmatpush1.bf16.msra.mxu0 %v8971_v32  ;;  %1687 = vmatpush1.bf16.msra.mxu1 %v9009_v1 }
 0x159   :  { %1641 = vmatprep.subr.bf16.mxu0 %v8979_v37  ;;  %1688 = vmatprep.subr.bf16.mxu1 %v9017_v12 }
 0x15c   :  { %1642 = vmatpush1.bf16.msra.mxu0 %v8983_v40  ;;  %1689 = vmatpush1.bf16.msra.mxu1 %v9021_v18 }
 0x15d   :  { %1643 = vmatprep.subr.bf16.mxu0 %v8991_v45  ;;  %1690 = vmatprep.subr.bf16.mxu1 %v9029_v30 }
 0x160   :  { %1644 = vmatpush1.bf16.msra.mxu0 %v8995_v48  ;;  %1691 = vmatpush1.bf16.msra.mxu1 %v9033_v35 }
 0x161   :  { %1645 = vmatprep.subr.bf16.mxu0 %v9003_v57  ;;  %1692 = vmatprep.subr.bf16.mxu1 %v9041_v46 }
 0x164   :  { %1646 = vmatpush1.bf16.msra.mxu0 %v9007_v0  ;;  %1693 = vmatpush1.bf16.msra.mxu1 %v9045_v52  ;;  %v427_v52 = vld [vmem:[#allocation8 + $0x3c8] sm:$0xff] }
 0x165   :  { %1647 = vmatprep.subr.bf16.mxu0 %v9015_v9  ;;  %1694 = vmatprep.subr.bf16.mxu1 %v9053_v10  ;;  %v426_v10 = vld [vmem:[#allocation8 + $0x3c0] sm:$0xff] }
 0x168   :  { %1648 = vmatpush1.bf16.msra.mxu0 %v9019_v16  ;;  %1695 = vmatpush1.bf16.msra.mxu1 %v9057_v21  ;;  %v430_v21 = vld [vmem:[#allocation8 + $0x3e0] sm:$0xff] }
 0x169   :  { %1649 = vmatprep.subr.bf16.mxu0 %v9027_v27  ;;  %1696 = vmatprep.subr.bf16.mxu1 %v9067_v2  ;;  %v9084_v36 = vcombine.high %v426_v10, %v430_v21 }
 0x16b   :  { %12763 = vst [vmem:[#allocation79_spill] sm:$0xff] %v9084_v36 }
 0x16c   :  { %1650 = vmatpush1.bf16.msra.mxu0 %v9031_v34  ;;  %1697 = vmatpush1.bf16.msra.mxu1 %v9069_v8 }
 0x16d   :  { %1651 = vmatprep.subr.bf16.mxu0 %v9039_v43 }
 0x170   :  { %1652 = vmatpush1.bf16.msra.mxu0 %v9043_v50  ;;  %v431_v50 = vld [vmem:[#allocation8 + $0x3e8] sm:$0xff] }
 0x171   :  { %1653 = vmatprep.subr.bf16.mxu0 %v9051_v4  ;;  %v9087_v42 = vcombine.high %v427_v52, %v431_v50  ;;  %v9094_v56 = vcombine.low %v427_v52, %v431_v50  ;;  %v12771_v52 = vlaneseq }
 0x173   :  { %12764 = vst [vmem:[#allocation80_spill] sm:$0xff] %v9087_v42  ;;  %12766 = vst [vmem:[#allocation82_spill] sm:$0xff] %v9094_v56 }
 0x174   :  { %1654 = vmatpush1.bf16.msra.mxu0 %v9055_v19  ;;  %v423_v19 = vld [vmem:[#allocation8 + $0x3a8] sm:$0xff] }
 0x175   :  { %1655 = vmatprep.subr.bf16.mxu0 %v9063_v38  ;;  %v9074_v4 = vcombine.high %v419_v17, %v423_v19  ;;  %v9082_v28 = vcombine.low %v419_v17, %v423_v19  ;;  %v9090_v38 = vcombine.low %v426_v10, %v430_v21  ;;  %v308_v17 = vld [vmem:[#allocation8 + $0x10] sm:$0xff] }
 0x176   :  { %v312_v19 = vld [vmem:[#allocation8 + $0x30] sm:$0xff] }
 0x177   :  { %12760 = vst [vmem:[#allocation76_spill] sm:$0xff] %v9074_v4  ;;  %12762 = vst [vmem:[#allocation78_spill] sm:$0xff] %v9082_v28  ;;  %1698 = vmatprep.subr.bf16.mxu1 %v9074_v4  ;;  %v9099_v4 = vcombine.high %v308_v17, %v312_v19  ;;  %v9103_v21 = vcombine.low %v308_v17, %v312_v19 }
 0x178   :  { %1656 = vmatpush1.bf16.msra.mxu0 %v9065_v44  ;;  %12765 = vst [vmem:[#allocation81_spill] sm:$0xff] %v9090_v38  ;;  %1699 = vmatpush1.bf16.msra.mxu1 %v9082_v28 }
 0x179   :  { %1657 = vmatprep.subr.bf16.mxu0 %v9071_v25  ;;  %1700 = vmatprep.subr.bf16.mxu1 %v9087_v42  ;;  %12767 = vst [vmem:[#allocation83_spill] sm:$0xff] %v9099_v4  ;;  %12769 = vst [vmem:[#allocation85_spill] sm:$0xff] %v9103_v21 }
 0x17c   :  { %1658 = vmatpush1.bf16.msra.mxu0 %v9078_v26  ;;  %1701 = vmatpush1.bf16.msra.mxu1 %v9094_v56  ;;  %v313_v26 = vld [vmem:[#allocation8 + $0x38] sm:$0xff] }
 0x17d   :  { %1659 = vmatprep.subr.bf16.mxu0 %v9084_v36  ;;  %v9101_v10 = vcombine.high %v309_v58, %v313_v26  ;;  %v9106_v50 = vcombine.low %v309_v58, %v313_v26  ;;  %v9113_v36 = vld [vmem:[#allocation6] sm:$0xff] }
 0x17f   :  { %12768 = vst [vmem:[#allocation84_spill] sm:$0xff] %v9101_v10  ;;  %12770 = vst [vmem:[#allocation86_spill] sm:$0xff] %v9106_v50  ;;  %1752 = vmatprep.subr.bf16.mxu1 %v9101_v10 }
 0x180   :  { %1660 = vmatpush1.bf16.msra.mxu0 %v9090_v38  ;;  %v9110_v38 = vshrl.u32 %v12771_v52, 7 }
 0x181   :  { %1711 = vmatprep.subr.bf16.mxu0 %v9099_v4 }
 0x182   :  { %12772 = vst [vmem:[#allocation87_spill] sm:$0xff] %v9110_v38  ;;  %v12187_v42 = vsub.s32 0, %v9110_v38  ;;  %v12192_v56 = vsub.s32 1, %v9110_v38 }
 0x184   :  { %v438_v17 = vrot.slane %v9113_v36, %v12187_v42  ;;  %v9122_v26 = vrot.slane %v9113_v36, %v12192_v56 }
 0x1da   :  { %v587_v19 = vpop.f32.mrb[0].mxu1 }
 0x1db   :  { %v9124_v58 = vadd.f32 %v587_v19, %v438_v17  ;;  %v589_v52 = vpop.f32.mrb[1].mxu1 }
 0x1dc   :  { %v9127_v10 = vadd.f32 %v589_v52, %v9122_v26  ;;  %v591_v4 = vpop.f32.mrb[2].mxu1 }
 0x1dd   :  { %12773 = vst [vmem:[#allocation88_spill] sm:$0xff] %v9124_v58  ;;  %v9129_v28 = vadd.f32 %v591_v4, %v438_v17  ;;  %v593_v25 = vpop.f32.mrb[3].mxu1 }
 0x1de   :  { %12774 = vst [vmem:[#allocation89_spill] sm:$0xff] %v9127_v10  ;;  %v9132_v8 = vadd.f32 %v593_v25, %v9122_v26  ;;  %v567_v42 = vpop.f32.mrb[0].mxu0  ;;  %v12197_v10 = vsub.s32 2, %v9110_v38 }
 0x1df   :  { %12775 = vst [vmem:[#allocation90_spill] sm:$0xff] %v9129_v28  ;;  %v568_v44 = vadd.f32 %v567_v42, %v438_v17  ;;  %v569_v2 = vpop.f32.mrb[1].mxu0 }
 0x1e0   :  { %12776 = vst [vmem:[#allocation91_spill] sm:$0xff] %v9132_v8  ;;  %v9135_v56 = vadd.f32 %v569_v2, %v9122_v26  ;;  %v571_v46 = vpop.f32.mrb[2].mxu0 }
 0x1e1   :  { %v7366_v19 = vmul.f32 -1.442695, %v568_v44  ;;  %v9137_v58 = vadd.f32 %v571_v46, %v438_v17  ;;  %v573_v43 = vpop.f32.mrb[3].mxu0 }
 0x1e2   :  { %12777 = vst [vmem:[#allocation92_spill] sm:$0xff] %v9135_v56  ;;  %v9140_v52 = vadd.f32 %v573_v43, %v9122_v26  ;;  %v597_v4 = vpop.f32.mrb[4].mxu1  ;;  %v12198_v56 = vsub.s32 3, %v9110_v38 }
 0x1e3   :  { %12778 = vst [vmem:[#allocation93_spill] sm:$0xff] %v9137_v58  ;;  %8006 = vpow2.f32 %v7366_v19  ;;  %v9142_v28 = vadd.f32 %v597_v4, %v438_v17  ;;  %v599_v25 = vpop.f32.mrb[5].mxu1  ;;  %v9156_v19 = vrot.slane %v9113_v36, %v12197_v10 }
 0x1e4   :  { %12779 = vst [vmem:[#allocation94_spill] sm:$0xff] %v9140_v52  ;;  %v9146_v42 = vadd.f32 %v599_v25, %v9122_v26  ;;  %v601_v2 = vpop.f32.mrb[6].mxu1 }
 0x1e5   :  { %12780 = vst [vmem:[#allocation95_spill] sm:$0xff] %v9142_v28  ;;  %v9149_v44 = vadd.f32 %v601_v2, %v438_v17  ;;  %v603_v46 = vpop.f32.mrb[7].mxu1  ;;  %v9165_v2 = vrot.slane %v9113_v36, %v12198_v56 }
 0x1e6   :  { %12781 = vst [vmem:[#allocation96_spill] sm:$0xff] %v9146_v42  ;;  %v577_v8 = vpop.f32.mrb[4].mxu0 }
 0x1e7   :  { %12782 = vst [vmem:[#allocation97_spill] sm:$0xff] %v9149_v44  ;;  %v9151_v58 = vadd.f32 %v577_v8, %v438_v17  ;;  %v579_v43 = vpop.f32.mrb[5].mxu0  ;;  %v12205_v8 = vsub.s32 5, %v9110_v38 }
 0x1e8   :  { %v9160_v25 = vadd.f32 %v579_v43, %v9122_v26  ;;  %v581_v52 = vpop.f32.mrb[6].mxu0  ;;  %v12787_v43 = vsub.s32 4, %v9110_v38 }
 0x1e9   :  { %12783 = vst [vmem:[#allocation98_spill] sm:$0xff] %v9151_v58  ;;  %v9168_v44 = vadd.f32 %v581_v52, %v438_v17  ;;  %v583_v28 = vpop.f32.mrb[7].mxu0  ;;  %v9185_v17 = vrot.slane %v9113_v36, %v12205_v8 }
 0x1ea   :  { %12784 = vst [vmem:[#allocation99_spill] sm:$0xff] %v9160_v25  ;;  %v9171_v58 = vadd.f32 %v583_v28, %v9122_v26  ;;  %v640_v10 = vpop.f32.mrb[8].mxu1  ;;  %v9177_v25 = vrot.slane %v9113_v36, %v12787_v43 }
 0x1eb   :  { %12785 = vst [vmem:[#allocation100_spill] sm:$0xff] %v9168_v44  ;;  %v641_v4 = vadd.f32 %v640_v10, %v9156_v19  ;;  %v642_v42 = vpop.f32.mrb[9].mxu1 }
 0x1ec   :  { %12786 = vst [vmem:[#allocation101_spill] sm:$0xff] %v9171_v58  ;;  %v9180_v56 = vadd.f32 %v642_v42, %v9165_v2  ;;  %v644_v35 = vpop.f32.mrb[10].mxu1 }
 0x1ed   :  { %v8007_v28 = vpop.eup %8006  ;;  %v7368_v52 = vmul.f32 -1.442695, %v641_v4  ;;  %v9188_v58 = vadd.f32 %v644_v35, %v9156_v19  ;;  %v646_v10 = vpop.f32.mrb[11].mxu1 }
 0x1ee   :  { %12788 = vst [vmem:[#allocation102_spill] sm:$0xff] %v9180_v56  ;;  %v919_v44 = vadd.f32 1.0, %v8007_v28  ;;  %v9191_v34 = vadd.f32 %v646_v10, %v9165_v2  ;;  %v713_v43 = vpop.f32.mrb[8].mxu0  ;;  %v604_v28 = vadd.f32 %v603_v46, %v9122_v26 }
 0x1ef   :  { %12789 = vst [vmem:[#allocation103_spill] sm:$0xff] %v9188_v58  ;;  %8008 = vpow2.f32 %v7368_v52  ;;  %v714_v42 = vadd.f32 %v713_v43, %v9177_v25  ;;  %v715_v56 = vpop.f32.mrb[9].mxu0 }
 0x1f0   :  { %12790 = vst [vmem:[#allocation104_spill] sm:$0xff] %v9191_v34  ;;  %8010 = vrcp.f32 %v919_v44  ;;  %v9195_v30 = vadd.f32 %v715_v56, %v9185_v17  ;;  %v717_v8 = vpop.f32.mrb[10].mxu0 }
 0x1f1   :  { %8012 = vtanh.f32 %v714_v42  ;;  %v9198_v4 = vadd.f32 %v717_v8, %v9177_v25  ;;  %v719_v35 = vpop.f32.mrb[11].mxu0 }
 0x1f2   :  { %12791 = vst [vmem:[#allocation105_spill] sm:$0xff] %v9195_v30  ;;  %v9202_v10 = vadd.f32 %v719_v35, %v9185_v17  ;;  %v650_v34 = vpop.f32.mrb[12].mxu1  ;;  %v7367_v30 = vmul.f32 -1.442695, %v604_v28 }
 0x1f3   :  { %12792 = vst [vmem:[#allocation106_spill] sm:$0xff] %v9198_v4  ;;  %v9205_v52 = vadd.f32 %v650_v34, %v9156_v19  ;;  %v652_v43 = vpop.f32.mrb[13].mxu1 }
 0x1f4   :  { %12793 = vst [vmem:[#allocation107_spill] sm:$0xff] %v9202_v10  ;;  %v9208_v44 = vadd.f32 %v652_v43, %v9165_v2  ;;  %v654_v56 = vpop.f32.mrb[14].mxu1  ;;  %8014 = vpow2.f32 %v7367_v30 }
 0x1f5   :  { %12794 = vst [vmem:[#allocation108_spill] sm:$0xff] %v9205_v52  ;;  %v9211_v42 = vadd.f32 %v654_v56, %v9156_v19  ;;  %v656_v8 = vpop.f32.mrb[15].mxu1 }
 0x1f6   :  { %12795 = vst [vmem:[#allocation109_spill] sm:$0xff] %v9208_v44  ;;  %v9214_v4 = vadd.f32 %v656_v8, %v9165_v2  ;;  %v723_v26 = vpop.f32.mrb[12].mxu0 }
 0x1f7   :  { %12796 = vst [vmem:[#allocation110_spill] sm:$0xff] %v9211_v42  ;;  %v9217_v46 = vadd.f32 %v723_v26, %v9177_v25  ;;  %v725_v35 = vpop.f32.mrb[13].mxu0 }
 0x1f8   :  { %12797 = vst [vmem:[#allocation111_spill] sm:$0xff] %v9214_v4  ;;  %v9220_v34 = vadd.f32 %v725_v35, %v9185_v17  ;;  %v727_v10 = vpop.f32.mrb[14].mxu0 }
 0x1f9   :  { %12798 = vst [vmem:[#allocation112_spill] sm:$0xff] %v9217_v46  ;;  %v8009_v43 = vpop.eup %8008  ;;  %v9223_v44 = vadd.f32 %v727_v10, %v9177_v25  ;;  %v729_v56 = vpop.f32.mrb[15].mxu0 }
 0x1fa   :  { %12799 = vst [vmem:[#allocation113_spill] sm:$0xff] %v9220_v34  ;;  %v8011_v42 = vpop.eup %8010  ;;  %v931_v28 = vadd.f32 1.0, %v8009_v43  ;;  %v9226_v8 = vadd.f32 %v729_v56, %v9185_v17  ;;  %v660_v4 = vpop.f32.mrb[16].mxu1 }
 0x1fb   :  { %12800 = vst [vmem:[#allocation114_spill] sm:$0xff] %v9223_v44  ;;  %v8013_v52 = vpop.eup %8012  ;;  %v9229_v26 = vadd.f32 %v660_v4, %v9156_v19  ;;  %v662_v46 = vpop.f32.mrb[17].mxu1 }
 0x1fc   :  { %12801 = vst [vmem:[#allocation115_spill] sm:$0xff] %v9226_v8  ;;  %8016 = vrcp.f32 %v931_v28  ;;  %v953_v35 = vmul.f32 %v8013_v52, %v8011_v42  ;;  %v9232_v34 = vadd.f32 %v662_v46, %v9165_v2  ;;  %v664_v10 = vpop.f32.mrb[18].mxu1 }
 0x1fd   :  { %12802 = vst [vmem:[#allocation116_spill] sm:$0xff] %v9229_v26  ;;  %v9235_v44 = vadd.f32 %v664_v10, %v9156_v19  ;;  %v666_v30 = vpop.f32.mrb[19].mxu1 }
 0x1fe   :  { %12803 = vst [vmem:[#allocation117_spill] sm:$0xff] %v9232_v34  ;;  %v9238_v43 = vadd.f32 %v666_v30, %v9165_v2  ;;  %v733_v56 = vpop.f32.mrb[16].mxu0  ;;  %v8015_v34 = vpop.eup %8014 }
 0x1ff   :  { %12804 = vst [vmem:[#allocation118_spill] sm:$0xff] %v9235_v44  ;;  %v9241_v8 = vadd.f32 %v733_v56, %v9177_v25  ;;  %v735_v4 = vpop.f32.mrb[17].mxu0 }
 0x200   :  { %12805 = vst [vmem:[#allocation119_spill] sm:$0xff] %v9238_v43  ;;  %v9244_v26 = vadd.f32 %v735_v4, %v9185_v17  ;;  %v737_v52 = vpop.f32.mrb[18].mxu0  ;;  %v920_v43 = vadd.f32 1.0, %v8015_v34 }
 0x201   :  { %12806 = vst [vmem:[#allocation120_spill] sm:$0xff] %v9241_v8  ;;  %v9247_v42 = vadd.f32 %v737_v52, %v9177_v25  ;;  %v739_v46 = vpop.f32.mrb[19].mxu0 }
 0x202   :  { %12807 = vst [vmem:[#allocation121_spill] sm:$0xff] %v9244_v26  ;;  %v9250_v28 = vadd.f32 %v739_v46, %v9185_v17  ;;  %v670_v10 = vpop.f32.mrb[20].mxu1 }
 0x203   :  { %12808 = vst [vmem:[#allocation122_spill] sm:$0xff] %v9247_v42  ;;  %v9253_v30 = vadd.f32 %v670_v10, %v9156_v19  ;;  %v672_v44 = vpop.f32.mrb[21].mxu1 }
 0x204   :  { %12809 = vst [vmem:[#allocation123_spill] sm:$0xff] %v9250_v28  ;;  %v9256_v56 = vadd.f32 %v672_v44, %v9165_v2  ;;  %v674_v8 = vpop.f32.mrb[22].mxu1  ;;  %v12210_v44 = vsub.s32 6, %v9110_v38 }
 0x205   :  { %12810 = vst [vmem:[#allocation124_spill] sm:$0xff] %v9253_v30  ;;  %v9260_v26 = vadd.f32 %v674_v8, %v9156_v19  ;;  %v676_v52 = vpop.f32.mrb[23].mxu1  ;;  %v12815_v19 = vsub.s32 7, %v9110_v38 }
 0x206   :  { %12811 = vst [vmem:[#allocation125_spill] sm:$0xff] %v9256_v56  ;;  %v8017_v42 = vpop.eup %8016  ;;  %v677_v46 = vadd.f32 %v676_v52, %v9165_v2  ;;  %v743_v28 = vpop.f32.mrb[20].mxu0 }
 0x207   :  { %12812 = vst [vmem:[#allocation126_spill] sm:$0xff] %v9260_v26  ;;  %v951_v58 = vmul.f32 0.0, %v8017_v42  ;;  %v9264_v10 = vadd.f32 %v743_v28, %v9177_v25  ;;  %v745_v30 = vpop.f32.mrb[21].mxu0  ;;  %v466_v8 = vrot.slane %v9113_v36, %v12815_v19 }
 0x208   :  { %v7369_v56 = vmul.f32 -1.442695, %v677_v46  ;;  %v9268_v27 = vadd.f32 %v745_v30, %v9185_v17  ;;  %v747_v4 = vpop.f32.mrb[22].mxu0  ;;  %v462_v30 = vrot.slane %v9113_v36, %v12210_v44 }
 0x209   :  { %12813 = vst [vmem:[#allocation127_spill] sm:$0xff] %v9264_v10  ;;  %v9273_v26 = vadd.f32 %v953_v35, %v951_v58  ;;  %v9276_v2 = vadd.f32 %v747_v4, %v9177_v25  ;;  %v749_v34 = vpop.f32.mrb[23].mxu0 }
 0x20a   :  { %12814 = vst [vmem:[#allocation128_spill] sm:$0xff] %v9268_v27  ;;  %8018 = vpow2.f32 %v7369_v56  ;;  %v750_v42 = vadd.f32 %v749_v34, %v9185_v17  ;;  %v786_v28 = vpop.f32.mrb[24].mxu1 }
 0x20b   :  { %12816 = vst [vmem:[#allocation129_spill] sm:$0xff] %v9276_v2  ;;  %8020 = vrcp.f32 %v920_v43  ;;  %v788_v52 = vpop.f32.mrb[25].mxu1 }
 0x20c   :  { %8022 = vtanh.f32 %v750_v42  ;;  %v9282_v46 = vadd.f32 %v788_v52, %v466_v8  ;;  %v790_v19 = vpop.f32.mrb[26].mxu1 }
 0x20d   :  { %v9284_v58 = vadd.f32 %v790_v19, %v462_v30  ;;  %v792_v35 = vpop.f32.mrb[27].mxu1 }
 0x20e   :  { %12817 = vst [vmem:[#allocation130_spill] sm:$0xff] %v9282_v46  ;;  %v9286_v25 = vadd.f32 %v792_v35, %v466_v8 }
 0x20f   :  { %12818 = vst [vmem:[#allocation131_spill] sm:$0xff] %v9284_v58 }
 0x210   :  { %12819 = vst [vmem:[#allocation132_spill] sm:$0xff] %v9286_v25  ;;  %v787_v25 = vadd.f32 %v786_v28, %v462_v30 }
 0x212   :  { %v796_v4 = vpop.f32.mrb[28].mxu1 }
 0x213   :  { %v9288_v56 = vadd.f32 %v796_v4, %v462_v30  ;;  %v798_v17 = vpop.f32.mrb[29].mxu1 }
 0x214   :  { %v8019_v34 = vpop.eup %8018  ;;  %v9290_v43 = vadd.f32 %v798_v17, %v466_v8  ;;  %v800_v38 = vpop.f32.mrb[30].mxu1 }
 0x215   :  { %12820 = vst [vmem:[#allocation133_spill] sm:$0xff] %v9288_v56  ;;  %v8021_v2 = vpop.eup %8020  ;;  %v932_v36 = vadd.f32 1.0, %v8019_v34  ;;  %v9292_v44 = vadd.f32 %v800_v38, %v462_v30  ;;  %v802_v42 = vpop.f32.mrb[31].mxu1  ;;  %v7370_v38 = vmul.f32 -1.442695, %v787_v25 }
 0x216   :  { %12821 = vst [vmem:[#allocation134_spill] sm:$0xff] %v9290_v43  ;;  %v8023_v52 = vpop.eup %8022  ;;  %v9294_v46 = vadd.f32 %v802_v42, %v466_v8 }
 0x217   :  { %12822 = vst [vmem:[#allocation135_spill] sm:$0xff] %v9292_v44  ;;  %8024 = vrcp.f32 %v932_v36  ;;  %v954_v19 = vmul.f32 %v8023_v52, %v8021_v2 }
 0x218   :  { %12823 = vst [vmem:[#allocation136_spill] sm:$0xff] %v9294_v46  ;;  %8026 = vpow2.f32 %v7370_v38 }
 0x21a   :  { %v806_v35 = vpop.f32.mrb[32].mxu1 }
 0x21b   :  { %v9296_v10 = vadd.f32 %v806_v35, %v462_v30  ;;  %v808_v4 = vpop.f32.mrb[33].mxu1 }
 0x21c   :  { %v9298_v56 = vadd.f32 %v808_v4, %v466_v8  ;;  %v810_v17 = vpop.f32.mrb[34].mxu1 }
 0x21d   :  { %12824 = vst [vmem:[#allocation137_spill] sm:$0xff] %v9296_v10  ;;  %v9300_v43 = vadd.f32 %v810_v17, %v462_v30  ;;  %v812_v27 = vpop.f32.mrb[35].mxu1 }
 0x21e   :  { %12825 = vst [vmem:[#allocation138_spill] sm:$0xff] %v9298_v56  ;;  %v9302_v34 = vadd.f32 %v812_v27, %v466_v8  ;;  %v336_v56 = vld [vmem:[#allocation8 + $0xf0] sm:$0xff] }
 0x21f   :  { %12826 = vst [vmem:[#allocation139_spill] sm:$0xff] %v9300_v43 }
 0x220   :  { %12827 = vst [vmem:[#allocation140_spill] sm:$0xff] %v9302_v34  ;;  %v333_v34 = vld [vmem:[#allocation8 + $0xd8] sm:$0xff] }
 0x221   :  { %v8025_v44 = vpop.eup %8024 }
 0x222   :  { %v952_v58 = vmul.f32 0.0, %v8025_v44  ;;  %v816_v42 = vpop.f32.mrb[36].mxu1  ;;  %v8027_v27 = vpop.eup %8026 }
 0x223   :  { %v9304_v36 = vadd.f32 %v816_v42, %v462_v30  ;;  %v818_v2 = vpop.f32.mrb[37].mxu1  ;;  %v945_v25 = vadd.f32 1.0, %v8027_v27  ;;  %v324_v27 = vld [vmem:[#allocation8 + $0x90] sm:$0xff] }
 0x224   :  { %v9306_v28 = vadd.f32 %v954_v19, %v952_v58  ;;  %v9308_v52 = vadd.f32 %v818_v2, %v466_v8  ;;  %v820_v35 = vpop.f32.mrb[38].mxu1 }
 0x225   :  { %12828 = vst [vmem:[#allocation141_spill] sm:$0xff] %v9304_v36  ;;  %v9310_v4 = vadd.f32 %v820_v35, %v462_v30  ;;  %v822_v17 = vpop.f32.mrb[39].mxu1  ;;  %v321_v35 = vld [vmem:[#allocation8 + $0x78] sm:$0xff]  ;;  %v332_v36 = vld [vmem:[#allocation8 + $0xd0] sm:$0xff] }
 0x226   :  { %v823_v43 = vadd.f32 %v822_v17, %v466_v8  ;;  %v316_v8 = vld [vmem:[#allocation8 + $0x50] sm:$0xff] }
 0x227   :  { %12829 = vst [vmem:[#allocation142_spill] sm:$0xff] %v9310_v4 }
 0x228   :  { %v7371_v46 = vmul.f32 -1.442695, %v823_v43  ;;  %v317_v43 = vld [vmem:[#allocation8 + $0x58] sm:$0xff] }
 0x22a   :  { %8028 = vpow2.f32 %v7371_v46  ;;  %v320_v46 = vld [vmem:[#allocation8 + $0x70] sm:$0xff] }
 0x22b   :  { %8030 = vrcp.f32 %v945_v25  ;;  %v9324_v25 = vcombine.high %v316_v8, %v320_v46 }
 0x22c   :  { %8032 = vtanh.f32 %v9273_v26 }
 0x22d   :  { %8034 = vtanh.f32 %v9306_v28  ;;  %12832 = vst [vmem:[#allocation145_spill] sm:$0xff] %v9324_v25 }
 0x234   :  { %v8029_v10 = vpop.eup %8028 }
 0x235   :  { %v946_v44 = vadd.f32 1.0, %v8029_v10  ;;  %v8031_v58 = vpop.eup %8030 }
 0x236   :  { %v8033_v19 = vpop.eup %8032 }
 0x237   :  { %8036 = vrcp.f32 %v946_v44  ;;  %v8035_v38 = vpop.eup %8034  ;;  %v9314_v30 = vmul.f32 %v8033_v19, %v8031_v58  ;;  %v9326_v44 = vcombine.high %v317_v43, %v321_v35  ;;  %v328_v58 = vld [vmem:[#allocation8 + $0xb0] sm:$0xff]  ;;  %v325_v19 = vld [vmem:[#allocation8 + $0x98] sm:$0xff] }
 0x239   :  { %12830 = vst [vmem:[#allocation143_spill] sm:$0xff] %v9314_v30  ;;  %v9322_v10 = vpack.c.bf16 %v9314_v30, %v9314_v30  ;;  %12833 = vst [vmem:[#allocation146_spill] sm:$0xff] %v9326_v44  ;;  %v9336_v30 = vcombine.high %v324_v27, %v328_v58 }
 0x23b   :  { %12836 = vst [vmem:[#allocation149_spill] sm:$0xff] %v9336_v30 }
 0x241   :  { %v8037_v42 = vpop.eup %8036 }
 0x242   :  { %v9316_v2 = vmul.f32 %v8037_v42, %v8035_v38  ;;  %v329_v38 = vld [vmem:[#allocation8 + $0xb8] sm:$0xff]  ;;  %v9332_v42 = vcombine.low %v316_v8, %v320_v46  ;;  %v9344_v8 = vcombine.low %v324_v27, %v328_v58  ;;  %v9356_v27 = vcombine.low %v332_v36, %v336_v56 }
 0x243   :  { %v9338_v4 = vcombine.high %v325_v19, %v329_v38  ;;  %v9346_v46 = vcombine.low %v325_v19, %v329_v38 }
 0x244   :  { %12831 = vst [vmem:[#allocation144_spill] sm:$0xff] %v9316_v2  ;;  %v988_v17 = vpack.c.bf16 %v9316_v2, %v9316_v2  ;;  %12834 = vst [vmem:[#allocation147_spill] sm:$0xff] %v9332_v42  ;;  %v9334_v2 = vcombine.low %v317_v43, %v321_v35  ;;  %v9350_v43 = vcombine.high %v332_v36, %v336_v56 }
 0x245   :  { %12837 = vst [vmem:[#allocation150_spill] sm:$0xff] %v9338_v4  ;;  %12838 = vst [vmem:[#allocation151_spill] sm:$0xff] %v9344_v8 }
 0x246   :  { %1661 = vmatprep.mubr.bf16.mxu0 %v988_v17  ;;  %1702 = vmatprep.mubr.bf16.mxu1 %v988_v17  ;;  %12835 = vst [vmem:[#allocation148_spill] sm:$0xff] %v9334_v2  ;;  %12839 = vst [vmem:[#allocation152_spill] sm:$0xff] %v9346_v46 }
 0x247   :  { %1662 = vmatmul.mubr.bf16.vlgmr.msra.gmra.mrb[24].mxu0 %v9322_v10  ;;  %1703 = vmatmul.mubr.bf16.vlgmr.msra.gmra.mrb[40].mxu1 %v9322_v10  ;;  %12840 = vst [vmem:[#allocation153_spill] sm:$0xff] %v9350_v43  ;;  %12842 = vst [vmem:[#allocation155_spill] sm:$0xff] %v9356_v27 }
 0x248   :  { %1712 = vmatpush1.bf16.msra.mxu0 %v9103_v21  ;;  %1753 = vmatpush1.bf16.msra.mxu1 %v9106_v50  ;;  %v337_v21 = vld [vmem:[#allocation8 + $0xf8] sm:$0xff] }
 0x249   :  { %1743 = vmatprep.mubr.bf16.mxu0 %v988_v17  ;;  %1784 = vmatprep.mubr.bf16.mxu1 %v988_v17  ;;  %v9352_v35 = vcombine.high %v333_v34, %v337_v21  ;;  %v340_v17 = vld [vmem:[#allocation8 + $0x110] sm:$0xff]  ;;  %v345_v50 = vld [vmem:[#allocation8 + $0x138] sm:$0xff]  ;;  %v9358_v58 = vcombine.low %v333_v34, %v337_v21 }
 0x24a   :  { %1713 = vmatprep.subr.bf16.mxu0 %v9324_v25  ;;  %1754 = vmatprep.subr.bf16.mxu1 %v9326_v44  ;;  %v344_v44 = vld [vmem:[#allocation8 + $0x130] sm:$0xff]  ;;  %v341_v25 = vld [vmem:[#allocation8 + $0x118] sm:$0xff] }
 0x24b   :  { %12841 = vst [vmem:[#allocation154_spill] sm:$0xff] %v9352_v35  ;;  %12843 = vst [vmem:[#allocation156_spill] sm:$0xff] %v9358_v58  ;;  %v9362_v19 = vcombine.high %v340_v17, %v344_v44  ;;  %v9364_v38 = vcombine.high %v341_v25, %v345_v50  ;;  %v9368_v56 = vcombine.low %v340_v17, %v344_v44 }
 0x24c   :  { %1714 = vmatpush1.bf16.msra.mxu0 %v9332_v42  ;;  %1755 = vmatpush1.bf16.msra.mxu1 %v9334_v2  ;;  %v349_v2 = vld [vmem:[#allocation8 + $0x158] sm:$0xff]  ;;  %v9370_v21 = vcombine.low %v341_v25, %v345_v50 }
 0x24d   :  { %1715 = vmatprep.subr.bf16.mxu0 %v9336_v30  ;;  %1756 = vmatprep.subr.bf16.mxu1 %v9338_v4  ;;  %12844 = vst [vmem:[#allocation157_spill] sm:$0xff] %v9362_v19  ;;  %12845 = vst [vmem:[#allocation158_spill] sm:$0xff] %v9364_v38  ;;  %v348_v4 = vld [vmem:[#allocation8 + $0x150] sm:$0xff]  ;;  %v353_v42 = vld [vmem:[#allocation8 + $0x178] sm:$0xff] }
 0x24e   :  { %v352_v30 = vld [vmem:[#allocation8 + $0x170] sm:$0xff]  ;;  %12846 = vst [vmem:[#allocation159_spill] sm:$0xff] %v9368_v56  ;;  %12847 = vst [vmem:[#allocation160_spill] sm:$0xff] %v9370_v21  ;;  %v9376_v36 = vcombine.high %v349_v2, %v353_v42  ;;  %v9382_v50 = vcombine.low %v349_v2, %v353_v42 }
 0x24f   :  { %v9374_v34 = vcombine.high %v348_v4, %v352_v30  ;;  %v9380_v44 = vcombine.low %v348_v4, %v352_v30 }
 0x250   :  { %1716 = vmatpush1.bf16.msra.mxu0 %v9344_v8  ;;  %1757 = vmatpush1.bf16.msra.mxu1 %v9346_v46  ;;  %12849 = vst [vmem:[#allocation162_spill] sm:$0xff] %v9376_v36  ;;  %v357_v46 = vld [vmem:[#allocation8 + $0x198] sm:$0xff]  ;;  %12851 = vst [vmem:[#allocation164_spill] sm:$0xff] %v9382_v50 }
 0x251   :  { %1717 = vmatprep.subr.bf16.mxu0 %v9350_v43  ;;  %1758 = vmatprep.subr.bf16.mxu1 %v9352_v35  ;;  %12848 = vst [vmem:[#allocation161_spill] sm:$0xff] %v9374_v34  ;;  %v356_v35 = vld [vmem:[#allocation8 + $0x190] sm:$0xff]  ;;  %v361_v8 = vld [vmem:[#allocation8 + $0x1b8] sm:$0xff]  ;;  %12850 = vst [vmem:[#allocation163_spill] sm:$0xff] %v9380_v44 }
 0x252   :  { %v360_v43 = vld [vmem:[#allocation8 + $0x1b0] sm:$0xff]  ;;  %v9388_v17 = vcombine.high %v357_v46, %v361_v8  ;;  %v9394_v30 = vcombine.low %v357_v46, %v361_v8 }
 0x253   :  { %v9386_v25 = vcombine.high %v356_v35, %v360_v43  ;;  %v9392_v4 = vcombine.low %v356_v35, %v360_v43 }
 0x254   :  { %1718 = vmatpush1.bf16.msra.mxu0 %v9356_v27  ;;  %1759 = vmatpush1.bf16.msra.mxu1 %v9358_v58  ;;  %12853 = vst [vmem:[#allocation166_spill] sm:$0xff] %v9388_v17  ;;  %v365_v58 = vld [vmem:[#allocation8 + $0x1d8] sm:$0xff]  ;;  %12855 = vst [vmem:[#allocation168_spill] sm:$0xff] %v9394_v30 }
 0x255   :  { %1719 = vmatprep.subr.bf16.mxu0 %v9362_v19  ;;  %1760 = vmatprep.subr.bf16.mxu1 %v9364_v38  ;;  %12852 = vst [vmem:[#allocation165_spill] sm:$0xff] %v9386_v25  ;;  %v364_v38 = vld [vmem:[#allocation8 + $0x1d0] sm:$0xff]  ;;  %v369_v27 = vld [vmem:[#allocation8 + $0x1f8] sm:$0xff]  ;;  %12854 = vst [vmem:[#allocation167_spill] sm:$0xff] %v9392_v4 }
 0x256   :  { %v368_v19 = vld [vmem:[#allocation8 + $0x1f0] sm:$0xff]  ;;  %v9400_v42 = vcombine.high %v365_v58, %v369_v27  ;;  %v9406_v8 = vcombine.low %v365_v58, %v369_v27 }
 0x257   :  { %v9398_v2 = vcombine.high %v364_v38, %v368_v19  ;;  %v9404_v43 = vcombine.low %v364_v38, %v368_v19 }
 0x258   :  { %1720 = vmatpush1.bf16.msra.mxu0 %v9368_v56  ;;  %1761 = vmatpush1.bf16.msra.mxu1 %v9370_v21  ;;  %12857 = vst [vmem:[#allocation170_spill] sm:$0xff] %v9400_v42  ;;  %v373_v21 = vld [vmem:[#allocation8 + $0x218] sm:$0xff]  ;;  %12859 = vst [vmem:[#allocation172_spill] sm:$0xff] %v9406_v8 }
 0x259   :  { %1721 = vmatprep.subr.bf16.mxu0 %v9374_v34  ;;  %1762 = vmatprep.subr.bf16.mxu1 %v9376_v36  ;;  %12856 = vst [vmem:[#allocation169_spill] sm:$0xff] %v9398_v2  ;;  %v372_v36 = vld [vmem:[#allocation8 + $0x210] sm:$0xff]  ;;  %v377_v56 = vld [vmem:[#allocation8 + $0x238] sm:$0xff]  ;;  %12858 = vst [vmem:[#allocation171_spill] sm:$0xff] %v9404_v43 }
 0x25a   :  { %v376_v34 = vld [vmem:[#allocation8 + $0x230] sm:$0xff]  ;;  %v9412_v35 = vcombine.high %v373_v21, %v377_v56  ;;  %v9418_v27 = vcombine.low %v373_v21, %v377_v56 }
 0x25b   :  { %v9410_v46 = vcombine.high %v372_v36, %v376_v34  ;;  %v9416_v19 = vcombine.low %v372_v36, %v376_v34 }
 0x25c   :  { %1722 = vmatpush1.bf16.msra.mxu0 %v9380_v44  ;;  %1763 = vmatpush1.bf16.msra.mxu1 %v9382_v50  ;;  %12861 = vst [vmem:[#allocation174_spill] sm:$0xff] %v9412_v35  ;;  %v381_v50 = vld [vmem:[#allocation8 + $0x258] sm:$0xff]  ;;  %12863 = vst [vmem:[#allocation176_spill] sm:$0xff] %v9418_v27 }
 0x25d   :  { %1723 = vmatprep.subr.bf16.mxu0 %v9386_v25  ;;  %1764 = vmatprep.subr.bf16.mxu1 %v9388_v17  ;;  %12860 = vst [vmem:[#allocation173_spill] sm:$0xff] %v9410_v46  ;;  %v380_v17 = vld [vmem:[#allocation8 + $0x250] sm:$0xff]  ;;  %v385_v44 = vld [vmem:[#allocation8 + $0x278] sm:$0xff]  ;;  %12862 = vst [vmem:[#allocation175_spill] sm:$0xff] %v9416_v19 }
 0x25e   :  { %v384_v25 = vld [vmem:[#allocation8 + $0x270] sm:$0xff]  ;;  %v9424_v38 = vcombine.high %v381_v50, %v385_v44  ;;  %v9430_v56 = vcombine.low %v381_v50, %v385_v44 }
 0x25f   :  { %v9422_v58 = vcombine.high %v380_v17, %v384_v25  ;;  %v9428_v34 = vcombine.low %v380_v17, %v384_v25 }
 0x260   :  { %1724 = vmatpush1.bf16.msra.mxu0 %v9392_v4  ;;  %1765 = vmatpush1.bf16.msra.mxu1 %v9394_v30  ;;  %12865 = vst [vmem:[#allocation178_spill] sm:$0xff] %v9424_v38  ;;  %v389_v30 = vld [vmem:[#allocation8 + $0x298] sm:$0xff]  ;;  %12867 = vst [vmem:[#allocation180_spill] sm:$0xff] %v9430_v56 }
 0x261   :  { %1725 = vmatprep.subr.bf16.mxu0 %v9398_v2  ;;  %1766 = vmatprep.subr.bf16.mxu1 %v9400_v42  ;;  %12864 = vst [vmem:[#allocation177_spill] sm:$0xff] %v9422_v58  ;;  %v388_v42 = vld [vmem:[#allocation8 + $0x290] sm:$0xff]  ;;  %v393_v4 = vld [vmem:[#allocation8 + $0x2b8] sm:$0xff]  ;;  %12866 = vst [vmem:[#allocation179_spill] sm:$0xff] %v9428_v34 }
 0x262   :  { %v392_v2 = vld [vmem:[#allocation8 + $0x2b0] sm:$0xff]  ;;  %v9436_v36 = vcombine.high %v389_v30, %v393_v4  ;;  %v9442_v44 = vcombine.low %v389_v30, %v393_v4 }
 0x263   :  { %v9434_v21 = vcombine.high %v388_v42, %v392_v2  ;;  %v9440_v25 = vcombine.low %v388_v42, %v392_v2 }
 0x264   :  { %1726 = vmatpush1.bf16.msra.mxu0 %v9404_v43  ;;  %1767 = vmatpush1.bf16.msra.mxu1 %v9406_v8  ;;  %12869 = vst [vmem:[#allocation182_spill] sm:$0xff] %v9436_v36  ;;  %v397_v8 = vld [vmem:[#allocation8 + $0x2d8] sm:$0xff]  ;;  %12871 = vst [vmem:[#allocation184_spill] sm:$0xff] %v9442_v44 }
 0x265   :  { %1727 = vmatprep.subr.bf16.mxu0 %v9410_v46  ;;  %1768 = vmatprep.subr.bf16.mxu1 %v9412_v35  ;;  %12868 = vst [vmem:[#allocation181_spill] sm:$0xff] %v9434_v21  ;;  %v396_v35 = vld [vmem:[#allocation8 + $0x2d0] sm:$0xff]  ;;  %v401_v43 = vld [vmem:[#allocation8 + $0x2f8] sm:$0xff]  ;;  %12870 = vst [vmem:[#allocation183_spill] sm:$0xff] %v9440_v25 }
 0x266   :  { %v400_v46 = vld [vmem:[#allocation8 + $0x2f0] sm:$0xff]  ;;  %v9448_v17 = vcombine.high %v397_v8, %v401_v43  ;;  %v9454_v4 = vcombine.low %v397_v8, %v401_v43 }
 0x267   :  { %v9446_v50 = vcombine.high %v396_v35, %v400_v46  ;;  %v9452_v2 = vcombine.low %v396_v35, %v400_v46 }
 0x268   :  { %1728 = vmatpush1.bf16.msra.mxu0 %v9416_v19  ;;  %1769 = vmatpush1.bf16.msra.mxu1 %v9418_v27  ;;  %12873 = vst [vmem:[#allocation186_spill] sm:$0xff] %v9448_v17  ;;  %v405_v27 = vld [vmem:[#allocation8 + $0x318] sm:$0xff]  ;;  %12875 = vst [vmem:[#allocation188_spill] sm:$0xff] %v9454_v4 }
 0x269   :  { %1729 = vmatprep.subr.bf16.mxu0 %v9422_v58  ;;  %1770 = vmatprep.subr.bf16.mxu1 %v9424_v38  ;;  %12872 = vst [vmem:[#allocation185_spill] sm:$0xff] %v9446_v50  ;;  %v404_v38 = vld [vmem:[#allocation8 + $0x310] sm:$0xff]  ;;  %v409_v19 = vld [vmem:[#allocation8 + $0x338] sm:$0xff]  ;;  %12874 = vst [vmem:[#allocation187_spill] sm:$0xff] %v9452_v2 }
 0x26a   :  { %v408_v58 = vld [vmem:[#allocation8 + $0x330] sm:$0xff]  ;;  %v9460_v42 = vcombine.high %v405_v27, %v409_v19  ;;  %v9466_v43 = vcombine.low %v405_v27, %v409_v19 }
 0x26b   :  { %v9458_v30 = vcombine.high %v404_v38, %v408_v58  ;;  %v9464_v46 = vcombine.low %v404_v38, %v408_v58 }
 0x26c   :  { %1730 = vmatpush1.bf16.msra.mxu0 %v9428_v34  ;;  %1771 = vmatpush1.bf16.msra.mxu1 %v9430_v56  ;;  %12877 = vst [vmem:[#allocation190_spill] sm:$0xff] %v9460_v42  ;;  %v413_v56 = vld [vmem:[#allocation8 + $0x358] sm:$0xff]  ;;  %12879 = vst [vmem:[#allocation192_spill] sm:$0xff] %v9466_v43 }
 0x26d   :  { %1731 = vmatprep.subr.bf16.mxu0 %v9434_v21  ;;  %1772 = vmatprep.subr.bf16.mxu1 %v9436_v36  ;;  %12876 = vst [vmem:[#allocation189_spill] sm:$0xff] %v9458_v30  ;;  %v412_v36 = vld [vmem:[#allocation8 + $0x350] sm:$0xff]  ;;  %v417_v34 = vld [vmem:[#allocation8 + $0x378] sm:$0xff]  ;;  %12878 = vst [vmem:[#allocation191_spill] sm:$0xff] %v9464_v46 }
 0x26e   :  { %v416_v21 = vld [vmem:[#allocation8 + $0x370] sm:$0xff]  ;;  %v9472_v35 = vcombine.high %v413_v56, %v417_v34  ;;  %v9478_v19 = vcombine.low %v413_v56, %v417_v34 }
 0x26f   :  { %v9470_v8 = vcombine.high %v412_v36, %v416_v21  ;;  %v9476_v58 = vcombine.low %v412_v36, %v416_v21 }
 0x270   :  { %1732 = vmatpush1.bf16.msra.mxu0 %v9440_v25  ;;  %1773 = vmatpush1.bf16.msra.mxu1 %v9442_v44  ;;  %12881 = vst [vmem:[#allocation194_spill] sm:$0xff] %v9472_v35  ;;  %v421_v44 = vld [vmem:[#allocation8 + $0x398] sm:$0xff]  ;;  %12883 = vst [vmem:[#allocation196_spill] sm:$0xff] %v9478_v19 }
 0x271   :  { %1733 = vmatprep.subr.bf16.mxu0 %v9446_v50  ;;  %1774 = vmatprep.subr.bf16.mxu1 %v9448_v17  ;;  %12880 = vst [vmem:[#allocation193_spill] sm:$0xff] %v9470_v8  ;;  %v420_v17 = vld [vmem:[#allocation8 + $0x390] sm:$0xff]  ;;  %v425_v25 = vld [vmem:[#allocation8 + $0x3b8] sm:$0xff]  ;;  %12882 = vst [vmem:[#allocation195_spill] sm:$0xff] %v9476_v58 }
 0x272   :  { %v424_v50 = vld [vmem:[#allocation8 + $0x3b0] sm:$0xff]  ;;  %v9484_v38 = vcombine.high %v421_v44, %v425_v25  ;;  %v9490_v34 = vcombine.low %v421_v44, %v425_v25  ;;  %v12894_v44 = vld [vmem:[#allocation61_spill] sm:$0xff] }
 0x273   :  { %v9482_v27 = vcombine.high %v420_v17, %v424_v50  ;;  %v9488_v21 = vcombine.low %v420_v17, %v424_v50  ;;  %v12893_v25 = vld [vmem:[#allocation60_spill] sm:$0xff]  ;;  %v12895_v50 = vld [vmem:[#allocation62_spill] sm:$0xff]  ;;  %v12896_v17 = vld [vmem:[#allocation63_spill] sm:$0xff] }
 0x274   :  { %1734 = vmatpush1.bf16.msra.mxu0 %v9452_v2  ;;  %1775 = vmatpush1.bf16.msra.mxu1 %v9454_v4  ;;  %12885 = vst [vmem:[#allocation198_spill] sm:$0xff] %v9484_v38  ;;  %v429_v4 = vld [vmem:[#allocation8 + $0x3d8] sm:$0xff]  ;;  %12887 = vst [vmem:[#allocation200_spill] sm:$0xff] %v9490_v34 }
 0x275   :  { %1735 = vmatprep.subr.bf16.mxu0 %v9458_v30  ;;  %1776 = vmatprep.subr.bf16.mxu1 %v9460_v42  ;;  %12884 = vst [vmem:[#allocation197_spill] sm:$0xff] %v9482_v27  ;;  %v428_v42 = vld [vmem:[#allocation8 + $0x3d0] sm:$0xff]  ;;  %v433_v2 = vld [vmem:[#allocation8 + $0x3f8] sm:$0xff]  ;;  %12886 = vst [vmem:[#allocation199_spill] sm:$0xff] %v9488_v21 }
 0x276   :  { %v432_v30 = vld [vmem:[#allocation8 + $0x3f0] sm:$0xff]  ;;  %v9496_v36 = vcombine.high %v429_v4, %v433_v2 }
 0x277   :  { %v9494_v56 = vcombine.high %v428_v42, %v432_v30 }
 0x278   :  { %1736 = vmatpush1.bf16.msra.mxu0 %v9464_v46  ;;  %1777 = vmatpush1.bf16.msra.mxu1 %v9466_v43  ;;  %12889 = vst [vmem:[#allocation202_spill] sm:$0xff] %v9496_v36 }
 0x279   :  { %1737 = vmatprep.subr.bf16.mxu0 %v9470_v8  ;;  %1778 = vmatprep.subr.bf16.mxu1 %v9472_v35  ;;  %12888 = vst [vmem:[#allocation201_spill] sm:$0xff] %v9494_v56  ;;  %v9500_v35 = vcombine.low %v428_v42, %v432_v30  ;;  %v12899_v30 = vld [vmem:[#allocation66_spill] sm:$0xff]  ;;  %v12900_v42 = vld [vmem:[#allocation67_spill] sm:$0xff] }
 0x27b   :  { %12890 = vst [vmem:[#allocation203_spill] sm:$0xff] %v9500_v35 }
 0x27c   :  { %1738 = vmatpush1.bf16.msra.mxu0 %v9476_v58  ;;  %1779 = vmatpush1.bf16.msra.mxu1 %v9478_v19  ;;  %v9502_v58 = vcombine.low %v429_v4, %v433_v2  ;;  %v12897_v2 = vld [vmem:[#allocation64_spill] sm:$0xff]  ;;  %v12898_v4 = vld [vmem:[#allocation65_spill] sm:$0xff] }
 0x27d   :  { %1739 = vmatprep.subr.bf16.mxu0 %v9482_v27  ;;  %1780 = vmatprep.subr.bf16.mxu1 %v9484_v38 }
 0x27e   :  { %12891 = vst [vmem:[#allocation204_spill] sm:$0xff] %v9502_v58 }
 0x280   :  { %1740 = vmatpush1.bf16.msra.mxu0 %v9488_v21  ;;  %1781 = vmatpush1.bf16.msra.mxu1 %v9490_v34 }
 0x281   :  { %1741 = vmatprep.subr.bf16.mxu0 %v9494_v56  ;;  %1782 = vmatprep.subr.bf16.mxu1 %v9496_v36 }
 0x284   :  { %1742 = vmatpush1.bf16.msra.mxu0 %v9500_v35  ;;  %1783 = vmatpush1.bf16.msra.mxu1 %v9502_v58 }
 0x285   :  { %1877 = vmatprep.subr.bf16.mxu0 %v8907_v51  ;;  %1918 = vmatprep.subr.bf16.mxu1 %v8909_v53 }
 0x287   :  { %1744 = vmatmul.mubr.bf16.vlgmr.msra.gmra.mrb[28].mxu0 %v9322_v10  ;;  %1785 = vmatmul.mubr.bf16.vlgmr.msra.gmra.mrb[44].mxu1 %v9322_v10  ;;  %v12892_v10 = vld [vmem:[#allocation59_spill] sm:$0xff] }
 0x288   :  { %1878 = vmatpush1.bf16.msra.mxu0 %v8911_v54  ;;  %1919 = vmatpush1.bf16.msra.mxu1 %v8913_v55 }
 0x289   :  { %1879 = vmatprep.subr.bf16.mxu0 %v8919_v59  ;;  %1920 = vmatprep.subr.bf16.mxu1 %v8921_v61 }
 0x28c   :  { %1880 = vmatpush1.bf16.msra.mxu0 %v8923_v62  ;;  %1921 = vmatpush1.bf16.msra.mxu1 %v8925_v63 }
 0x28d   :  { %1881 = vmatprep.subr.bf16.mxu0 %v8931_v3  ;;  %1922 = vmatprep.subr.bf16.mxu1 %v8933_v5 }
 0x290   :  { %1882 = vmatpush1.bf16.msra.mxu0 %v8935_v6  ;;  %1923 = vmatpush1.bf16.msra.mxu1 %v8937_v7 }
 0x291   :  { %1883 = vmatprep.subr.bf16.mxu0 %v8943_v11  ;;  %1924 = vmatprep.subr.bf16.mxu1 %v8945_v13 }
 0x294   :  { %1884 = vmatpush1.bf16.msra.mxu0 %v8947_v14  ;;  %1925 = vmatpush1.bf16.msra.mxu1 %v8949_v15 }
 0x295   :  { %1885 = vmatprep.subr.bf16.mxu0 %v8955_v20  ;;  %1926 = vmatprep.subr.bf16.mxu1 %v8957_v22 }
 0x298   :  { %1886 = vmatpush1.bf16.msra.mxu0 %v8959_v23  ;;  %1927 = vmatpush1.bf16.msra.mxu1 %v8961_v24 }
 0x299   :  { %1887 = vmatprep.subr.bf16.mxu0 %v8967_v29  ;;  %1928 = vmatprep.subr.bf16.mxu1 %v8969_v31 }
 0x29c   :  { %1888 = vmatpush1.bf16.msra.mxu0 %v8971_v32  ;;  %1929 = vmatpush1.bf16.msra.mxu1 %v8973_v33 }
 0x29d   :  { %1889 = vmatprep.subr.bf16.mxu0 %v8979_v37  ;;  %1930 = vmatprep.subr.bf16.mxu1 %v8981_v39 }
 0x2a0   :  { %1890 = vmatpush1.bf16.msra.mxu0 %v8983_v40  ;;  %1931 = vmatpush1.bf16.msra.mxu1 %v8985_v41 }
 0x2a1   :  { %1891 = vmatprep.subr.bf16.mxu0 %v8991_v45  ;;  %1932 = vmatprep.subr.bf16.mxu1 %v8993_v47 }
 0x2a4   :  { %1892 = vmatpush1.bf16.msra.mxu0 %v8995_v48  ;;  %1933 = vmatpush1.bf16.msra.mxu1 %v8997_v49 }
 0x2a5   :  { %1893 = vmatprep.subr.bf16.mxu0 %v9003_v57  ;;  %1934 = vmatprep.subr.bf16.mxu1 %v9005_v60  ;;  %v12921_v60 = vld [vmem:[#allocation125_spill] sm:$0xff] }
 0x2a8   :  { %1894 = vmatpush1.bf16.msra.mxu0 %v9007_v0  ;;  %1935 = vmatpush1.bf16.msra.mxu1 %v9009_v1  ;;  %v12920_v0 = vld [vmem:[#allocation96_spill] sm:$0xff] }
 0x2a9   :  { %1895 = vmatprep.subr.bf16.mxu0 %v9015_v9  ;;  %1936 = vmatprep.subr.bf16.mxu1 %v9017_v12  ;;  %v12918_v12 = vld [vmem:[#allocation93_spill] sm:$0xff]  ;;  %v12919_v9 = vld [vmem:[#allocation103_spill] sm:$0xff] }
 0x2ac   :  { %1896 = vmatpush1.bf16.msra.mxu0 %v9019_v16  ;;  %1937 = vmatpush1.bf16.msra.mxu1 %v9021_v18  ;;  %v12901_v16 = vld [vmem:[#allocation68_spill] sm:$0xff]  ;;  %v12902_v18 = vld [vmem:[#allocation69_spill] sm:$0xff] }
 0x2ad   :  { %1897 = vmatprep.subr.bf16.mxu0 %v12892_v10  ;;  %1938 = vmatprep.subr.bf16.mxu1 %v12893_v25  ;;  %v12903_v10 = vld [vmem:[#allocation70_spill] sm:$0xff]  ;;  %v12904_v25 = vld [vmem:[#allocation71_spill] sm:$0xff] }
 0x2b0   :  { %1898 = vmatpush1.bf16.msra.mxu0 %v12894_v44  ;;  %1939 = vmatpush1.bf16.msra.mxu1 %v12895_v50  ;;  %v12905_v44 = vld [vmem:[#allocation73_spill] sm:$0xff]  ;;  %v12906_v50 = vld [vmem:[#allocation72_spill] sm:$0xff] }
 0x2b1   :  { %1899 = vmatprep.subr.bf16.mxu0 %v12896_v17  ;;  %1940 = vmatprep.subr.bf16.mxu1 %v12897_v2  ;;  %v12907_v17 = vld [vmem:[#allocation74_spill] sm:$0xff]  ;;  %v12908_v2 = vld [vmem:[#allocation75_spill] sm:$0xff] }
 0x2b4   :  { %1900 = vmatpush1.bf16.msra.mxu0 %v12898_v4  ;;  %1941 = vmatpush1.bf16.msra.mxu1 %v12899_v30  ;;  %v12909_v4 = vld [vmem:[#allocation76_spill] sm:$0xff]  ;;  %v12910_v30 = vld [vmem:[#allocation77_spill] sm:$0xff] }
 0x2b5   :  { %1901 = vmatprep.subr.bf16.mxu0 %v12900_v42  ;;  %1942 = vmatprep.subr.bf16.mxu1 %v12901_v16  ;;  %v12911_v42 = vld [vmem:[#allocation78_spill] sm:$0xff]  ;;  %v12912_v16 = vld [vmem:[#allocation79_spill] sm:$0xff] }
 0x2b8   :  { %1902 = vmatpush1.bf16.msra.mxu0 %v12902_v18  ;;  %1943 = vmatpush1.bf16.msra.mxu1 %v12903_v10  ;;  %v12913_v18 = vld [vmem:[#allocation80_spill] sm:$0xff]  ;;  %v12914_v10 = vld [vmem:[#allocation81_spill] sm:$0xff] }
 0x2b9   :  { %1903 = vmatprep.subr.bf16.mxu0 %v12904_v25  ;;  %1944 = vmatprep.subr.bf16.mxu1 %v12905_v44  ;;  %v12915_v25 = vld [vmem:[#allocation82_spill] sm:$0xff]  ;;  %v12916_v44 = vld [vmem:[#allocation83_spill] sm:$0xff] }
 0x2bc   :  { %1904 = vmatpush1.bf16.msra.mxu0 %v12906_v50  ;;  %1945 = vmatpush1.bf16.msra.mxu1 %v12907_v17  ;;  %v12917_v50 = vld [vmem:[#allocation84_spill] sm:$0xff] }
 0x2bd   :  { %1905 = vmatprep.subr.bf16.mxu0 %v12908_v2  ;;  %1946 = vmatprep.subr.bf16.mxu1 %v12909_v4 }
 0x2c0   :  { %1906 = vmatpush1.bf16.msra.mxu0 %v12910_v30  ;;  %1947 = vmatpush1.bf16.msra.mxu1 %v12911_v42 }
 0x2c1   :  { %1907 = vmatprep.subr.bf16.mxu0 %v12912_v16  ;;  %1948 = vmatprep.subr.bf16.mxu1 %v12913_v18 }
 0x2c4   :  { %1908 = vmatpush1.bf16.msra.mxu0 %v12914_v10  ;;  %1949 = vmatpush1.bf16.msra.mxu1 %v12915_v25 }
 0x2c5   :  { %1959 = vmatprep.subr.bf16.mxu0 %v12916_v44  ;;  %2000 = vmatprep.subr.bf16.mxu1 %v12917_v50 }
 0x31a   :  { %v1663_v17 = vpop.f32.mrb[24].mxu0  ;;  %v1704_v2 = vpop.f32.mrb[40].mxu1 }
 0x31b   :  { %v1793_v4 = vadd.f32 %v1663_v17, %v12918_v12  ;;  %v1795_v30 = vadd.f32 %v1704_v2, %v12919_v9  ;;  %v1665_v1 = vpop.f32.mrb[25].mxu0  ;;  %v1706_v42 = vpop.f32.mrb[41].mxu1 }
 0x31c   :  { %v1794_v16 = vadd.f32 %v1665_v1, %v12920_v0  ;;  %v1796_v18 = vadd.f32 %v1706_v42, %v12921_v60  ;;  %v1667_v57 = vpop.f32.mrb[26].mxu0  ;;  %v1708_v10 = vpop.f32.mrb[42].mxu1 }
 0x31d   :  { %v1668_v49 = vpop.f32.mrb[27].mxu0  ;;  %v1709_v25 = vpop.f32.mrb[43].mxu1  ;;  %v7500_v48 = vmul.f32 -1.442695, %v1793_v4  ;;  %v7502_v44 = vmul.f32 -1.442695, %v1795_v30 }
 0x31e   :  { %v7501_v47 = vmul.f32 -1.442695, %v1794_v16  ;;  %v7503_v50 = vmul.f32 -1.442695, %v1796_v18  ;;  %v12922_v10 = vld [vmem:[#allocation106_spill] sm:$0xff]  ;;  %v12923_v18 = vld [vmem:[#allocation131_spill] sm:$0xff] }
 0x31f   :  { %8038 = vpow2.f32 %v7500_v48 }
 0x320   :  { %8040 = vpow2.f32 %v7502_v44  ;;  %v12924_v44 = vld [vmem:[#allocation128_spill] sm:$0xff] }
 0x321   :  { %8042 = vpow2.f32 %v7501_v47 }
 0x322   :  { %8044 = vpow2.f32 %v7503_v50 }
 0x329   :  { %v8039_v12 = vpop.eup %8038 }
 0x32a   :  { %v8041_v9 = vpop.eup %8040  ;;  %v1807_v45 = vadd.f32 1.0, %v8039_v12 }
 0x32b   :  { %v8043_v17 = vpop.eup %8042  ;;  %v1819_v0 = vadd.f32 1.0, %v8041_v9 }
 0x32c   :  { %v8045_v2 = vpop.eup %8044  ;;  %v1808_v1 = vadd.f32 1.0, %v8043_v17  ;;  %8046 = vrcp.f32 %v1807_v45 }
 0x32d   :  { %v1820_v60 = vadd.f32 1.0, %v8045_v2  ;;  %8048 = vrcp.f32 %v1819_v0 }
 0x32e   :  { %8050 = vrcp.f32 %v1808_v1 }
 0x32f   :  { %8052 = vrcp.f32 %v1820_v60 }
 0x336   :  { %v8047_v2 = vpop.eup %8046 }
 0x337   :  { %v8049_v0 = vpop.eup %8048 }
 0x338   :  { %v8051_v1 = vpop.eup %8050 }
 0x35a   :  { %v1745_v49 = vpop.f32.mrb[28].mxu0  ;;  %v1786_v57 = vpop.f32.mrb[44].mxu1 }
 0x35b   :  { %v1797_v16 = vadd.f32 %v1745_v49, %v12922_v10  ;;  %v1799_v48 = vadd.f32 %v1786_v57, %v12923_v18  ;;  %v1747_v25 = vpop.f32.mrb[29].mxu0  ;;  %v1788_v47 = vpop.f32.mrb[45].mxu1  ;;  %v1839_v10 = vmul.f32 %v8049_v0, %v9273_v26  ;;  %v12928_v0 = vld [vmem:[#allocation86_spill] sm:$0xff] }
 0x35c   :  { %v1798_v50 = vadd.f32 %v1747_v25, %v12924_v44  ;;  %v1800_v4 = vadd.f32 %v1788_v47, %v9308_v52  ;;  %v1749_v30 = vpop.f32.mrb[30].mxu0  ;;  %v1790_v42 = vpop.f32.mrb[46].mxu1 }
 0x35d   :  { %8054 = vtanh.f32 %v1797_v16  ;;  %v7504_v12 = vmul.f32 -1.442695, %v1799_v48  ;;  %v1750_v45 = vpop.f32.mrb[31].mxu0  ;;  %v1791_v9 = vpop.f32.mrb[47].mxu1 }
 0x35e   :  { %8056 = vtanh.f32 %v1798_v50  ;;  %v7505_v17 = vmul.f32 -1.442695, %v1800_v4  ;;  %v8053_v49 = vpop.eup %8052 }
 0x35f   :  { %8058 = vpow2.f32 %v7504_v12  ;;  %v1840_v25 = vmul.f32 %v8053_v49, %v9306_v28  ;;  %v12930_v49 = vld [vmem:[#allocation146_spill] sm:$0xff] }
 0x360   :  { %8060 = vpow2.f32 %v7505_v17 }
 0x367   :  { %v8055_v57 = vpop.eup %8054 }
 0x368   :  { %v8057_v60 = vpop.eup %8056  ;;  %v1841_v18 = vmul.f32 %v8055_v57, %v8047_v2  ;;  %v12927_v2 = vld [vmem:[#allocation85_spill] sm:$0xff]  ;;  %v12931_v57 = vld [vmem:[#allocation147_spill] sm:$0xff] }
 0x369   :  { %v8059_v52 = vpop.eup %8058  ;;  %v1842_v16 = vmul.f32 %v8057_v60, %v8051_v1  ;;  %v12929_v1 = vld [vmem:[#allocation145_spill] sm:$0xff]  ;;  %v12932_v60 = vld [vmem:[#allocation148_spill] sm:$0xff] }
 0x36a   :  { %v8061_v48 = vpop.eup %8060  ;;  %v9586_v47 = vadd.f32 %v1841_v18, %v1839_v10  ;;  %v1833_v44 = vadd.f32 1.0, %v8059_v52  ;;  %v12933_v10 = vld [vmem:[#allocation149_spill] sm:$0xff]  ;;  %v12934_v18 = vld [vmem:[#allocation150_spill] sm:$0xff]  ;;  %v12935_v52 = vld [vmem:[#allocation151_spill] sm:$0xff] }
 0x36b   :  { %v9588_v50 = vadd.f32 %v1842_v16, %v1840_v25  ;;  %v1834_v4 = vadd.f32 1.0, %v8061_v48  ;;  %v12936_v25 = vld [vmem:[#allocation152_spill] sm:$0xff]  ;;  %v12937_v16 = vld [vmem:[#allocation153_spill] sm:$0xff]  ;;  %v12938_v48 = vld [vmem:[#allocation154_spill] sm:$0xff] }
 0x36c   :  { %8062 = vtanh.f32 %v9586_v47 }
 0x36d   :  { %8064 = vrcp.f32 %v1833_v44  ;;  %v12939_v44 = vld [vmem:[#allocation155_spill] sm:$0xff] }
 0x36e   :  { %8066 = vtanh.f32 %v9588_v50 }
 0x36f   :  { %8068 = vrcp.f32 %v1834_v4  ;;  %v12940_v4 = vld [vmem:[#allocation156_spill] sm:$0xff] }
 0x376   :  { %v8063_v30 = vpop.eup %8062 }
 0x377   :  { %v8065_v26 = vpop.eup %8064 }
 0x378   :  { %v8067_v42 = vpop.eup %8066  ;;  %v9592_v45 = vmul.f32 %v8065_v26, %v8063_v30  ;;  %v12941_v30 = vld [vmem:[#allocation157_spill] sm:$0xff]  ;;  %v12942_v26 = vld [vmem:[#allocation158_spill] sm:$0xff] }
 0x379   :  { %v8069_v12 = vpop.eup %8068 }
 0x37a   :  { %12925 = vst [vmem:[#allocation93_spill] sm:$0xff] %v9592_v45  ;;  %v9594_v28 = vmul.f32 %v8069_v12, %v8067_v42  ;;  %v9600_v17 = vpack.c.bf16 %v9592_v45, %v9592_v45  ;;  %v12943_v42 = vld [vmem:[#allocation159_spill] sm:$0xff]  ;;  %v12944_v12 = vld [vmem:[#allocation160_spill] sm:$0xff] }
 0x37b   :  { %v12947_v45 = vld [vmem:[#allocation163_spill] sm:$0xff] }
 0x37c   :  { %12926 = vst [vmem:[#allocation103_spill] sm:$0xff] %v9594_v28  ;;  %v1876_v9 = vpack.c.bf16 %v9594_v28, %v9594_v28  ;;  %v12946_v28 = vld [vmem:[#allocation162_spill] sm:$0xff] }
 0x37e   :  { %1909 = vmatprep.mubr.bf16.mxu0 %v1876_v9  ;;  %1950 = vmatprep.mubr.bf16.mxu1 %v1876_v9 }
 0x37f   :  { %1910 = vmatmul.mubr.bf16.vlgmr.msra.gmra.mrb[32].mxu0 %v9600_v17  ;;  %1951 = vmatmul.mubr.bf16.vlgmr.msra.gmra.mrb[48].mxu1 %v9600_v17 }
 0x380   :  { %1960 = vmatpush1.bf16.msra.mxu0 %v12927_v2  ;;  %2001 = vmatpush1.bf16.msra.mxu1 %v12928_v0 }
 0x381   :  { %1991 = vmatprep.mubr.bf16.mxu0 %v1876_v9  ;;  %2032 = vmatprep.mubr.bf16.mxu1 %v1876_v9  ;;  %v12945_v9 = vld [vmem:[#allocation161_spill] sm:$0xff] }
 0x382   :  { %1961 = vmatprep.subr.bf16.mxu0 %v12929_v1  ;;  %2002 = vmatprep.subr.bf16.mxu1 %v12930_v49 }
 0x384   :  { %1962 = vmatpush1.bf16.msra.mxu0 %v12931_v57  ;;  %2003 = vmatpush1.bf16.msra.mxu1 %v12932_v60 }
 0x385   :  { %1963 = vmatprep.subr.bf16.mxu0 %v12933_v10  ;;  %2004 = vmatprep.subr.bf16.mxu1 %v12934_v18 }
 0x388   :  { %1964 = vmatpush1.bf16.msra.mxu0 %v12935_v52  ;;  %2005 = vmatpush1.bf16.msra.mxu1 %v12936_v25 }
 0x389   :  { %1965 = vmatprep.subr.bf16.mxu0 %v12937_v16  ;;  %2006 = vmatprep.subr.bf16.mxu1 %v12938_v48  ;;  %v12948_v16 = vld [vmem:[#allocation164_spill] sm:$0xff]  ;;  %v12949_v48 = vld [vmem:[#allocation165_spill] sm:$0xff] }
 0x38c   :  { %1966 = vmatpush1.bf16.msra.mxu0 %v12939_v44  ;;  %2007 = vmatpush1.bf16.msra.mxu1 %v12940_v4  ;;  %v12950_v44 = vld [vmem:[#allocation166_spill] sm:$0xff]  ;;  %v12951_v4 = vld [vmem:[#allocation167_spill] sm:$0xff] }
 0x38d   :  { %1967 = vmatprep.subr.bf16.mxu0 %v12941_v30  ;;  %2008 = vmatprep.subr.bf16.mxu1 %v12942_v26  ;;  %v12952_v30 = vld [vmem:[#allocation168_spill] sm:$0xff]  ;;  %v12953_v26 = vld [vmem:[#allocation169_spill] sm:$0xff] }
 0x390   :  { %1968 = vmatpush1.bf16.msra.mxu0 %v12943_v42  ;;  %2009 = vmatpush1.bf16.msra.mxu1 %v12944_v12  ;;  %v12954_v42 = vld [vmem:[#allocation170_spill] sm:$0xff]  ;;  %v12955_v12 = vld [vmem:[#allocation171_spill] sm:$0xff] }
 0x391   :  { %1969 = vmatprep.subr.bf16.mxu0 %v12945_v9  ;;  %2010 = vmatprep.subr.bf16.mxu1 %v12946_v28  ;;  %v12956_v9 = vld [vmem:[#allocation172_spill] sm:$0xff]  ;;  %v12957_v28 = vld [vmem:[#allocation173_spill] sm:$0xff] }
 0x394   :  { %1970 = vmatpush1.bf16.msra.mxu0 %v12947_v45  ;;  %2011 = vmatpush1.bf16.msra.mxu1 %v12948_v16  ;;  %v12958_v45 = vld [vmem:[#allocation174_spill] sm:$0xff]  ;;  %v12959_v16 = vld [vmem:[#allocation175_spill] sm:$0xff] }
 0x395   :  { %1971 = vmatprep.subr.bf16.mxu0 %v12949_v48  ;;  %2012 = vmatprep.subr.bf16.mxu1 %v12950_v44  ;;  %v12960_v48 = vld [vmem:[#allocation176_spill] sm:$0xff]  ;;  %v12961_v44 = vld [vmem:[#allocation177_spill] sm:$0xff] }
 0x398   :  { %1972 = vmatpush1.bf16.msra.mxu0 %v12951_v4  ;;  %2013 = vmatpush1.bf16.msra.mxu1 %v12952_v30  ;;  %v12962_v4 = vld [vmem:[#allocation178_spill] sm:$0xff]  ;;  %v12963_v30 = vld [vmem:[#allocation179_spill] sm:$0xff] }
 0x399   :  { %1973 = vmatprep.subr.bf16.mxu0 %v12953_v26  ;;  %2014 = vmatprep.subr.bf16.mxu1 %v12954_v42  ;;  %v12964_v26 = vld [vmem:[#allocation180_spill] sm:$0xff]  ;;  %v12965_v42 = vld [vmem:[#allocation181_spill] sm:$0xff] }
 0x39c   :  { %1974 = vmatpush1.bf16.msra.mxu0 %v12955_v12  ;;  %2015 = vmatpush1.bf16.msra.mxu1 %v12956_v9  ;;  %v12966_v12 = vld [vmem:[#allocation182_spill] sm:$0xff]  ;;  %v12967_v9 = vld [vmem:[#allocation183_spill] sm:$0xff] }
 0x39d   :  { %1975 = vmatprep.subr.bf16.mxu0 %v12957_v28  ;;  %2016 = vmatprep.subr.bf16.mxu1 %v12958_v45  ;;  %v12968_v28 = vld [vmem:[#allocation184_spill] sm:$0xff]  ;;  %v12969_v45 = vld [vmem:[#allocation185_spill] sm:$0xff] }
 0x3a0   :  { %1976 = vmatpush1.bf16.msra.mxu0 %v12959_v16  ;;  %2017 = vmatpush1.bf16.msra.mxu1 %v12960_v48  ;;  %v12970_v16 = vld [vmem:[#allocation186_spill] sm:$0xff]  ;;  %v12971_v48 = vld [vmem:[#allocation187_spill] sm:$0xff] }
 0x3a1   :  { %1977 = vmatprep.subr.bf16.mxu0 %v12961_v44  ;;  %2018 = vmatprep.subr.bf16.mxu1 %v12962_v4  ;;  %v12972_v44 = vld [vmem:[#allocation188_spill] sm:$0xff]  ;;  %v12973_v4 = vld [vmem:[#allocation189_spill] sm:$0xff] }
 0x3a4   :  { %1978 = vmatpush1.bf16.msra.mxu0 %v12963_v30  ;;  %2019 = vmatpush1.bf16.msra.mxu1 %v12964_v26  ;;  %v12974_v30 = vld [vmem:[#allocation190_spill] sm:$0xff] }
 0x3a5   :  { %1979 = vmatprep.subr.bf16.mxu0 %v12965_v42  ;;  %2020 = vmatprep.subr.bf16.mxu1 %v12966_v12 }
 0x3a8   :  { %1980 = vmatpush1.bf16.msra.mxu0 %v12967_v9  ;;  %2021 = vmatpush1.bf16.msra.mxu1 %v12968_v28  ;;  %v12975_v9 = vld [vmem:[#allocation194_spill] sm:$0xff]  ;;  %v12976_v28 = vld [vmem:[#allocation195_spill] sm:$0xff] }
 0x3a9   :  { %1981 = vmatprep.subr.bf16.mxu0 %v12969_v45  ;;  %2022 = vmatprep.subr.bf16.mxu1 %v12970_v16 }
 0x3ac   :  { %1982 = vmatpush1.bf16.msra.mxu0 %v12971_v48  ;;  %2023 = vmatpush1.bf16.msra.mxu1 %v12972_v44 }
 0x3ad   :  { %1983 = vmatprep.subr.bf16.mxu0 %v12973_v4  ;;  %2024 = vmatprep.subr.bf16.mxu1 %v12974_v30 }
 0x3b0   :  { %1984 = vmatpush1.bf16.msra.mxu0 %v9464_v46  ;;  %2025 = vmatpush1.bf16.msra.mxu1 %v9466_v43 }
 0x3b1   :  { %1985 = vmatprep.subr.bf16.mxu0 %v9470_v8  ;;  %2026 = vmatprep.subr.bf16.mxu1 %v12975_v9 }
 0x3b4   :  { %1986 = vmatpush1.bf16.msra.mxu0 %v12976_v28  ;;  %2027 = vmatpush1.bf16.msra.mxu1 %v9478_v19 }
 0x3b5   :  { %1987 = vmatprep.subr.bf16.mxu0 %v9482_v27  ;;  %2028 = vmatprep.subr.bf16.mxu1 %v9484_v38 }
 0x3b8   :  { %1988 = vmatpush1.bf16.msra.mxu0 %v9488_v21  ;;  %2029 = vmatpush1.bf16.msra.mxu1 %v9490_v34 }
 0x3b9   :  { %1989 = vmatprep.subr.bf16.mxu0 %v9494_v56  ;;  %2030 = vmatprep.subr.bf16.mxu1 %v9496_v36 }
 0x3bc   :  { %1990 = vmatpush1.bf16.msra.mxu0 %v9500_v35  ;;  %2031 = vmatpush1.bf16.msra.mxu1 %v9502_v58 }
 0x3bd   :  { %2125 = vmatprep.subr.bf16.mxu0 %v8907_v51  ;;  %2166 = vmatprep.subr.bf16.mxu1 %v8909_v53 }
 0x3bf   :  { %1992 = vmatmul.mubr.bf16.vlgmr.msra.gmra.mrb[36].mxu0 %v9600_v17  ;;  %2033 = vmatmul.mubr.bf16.vlgmr.msra.gmra.mrb[52].mxu1 %v9600_v17  ;;  %v12977_v17 = vld [vmem:[#allocation47_spill] sm:$0xff] }
 0x3c0   :  { %2126 = vmatpush1.bf16.msra.mxu0 %v8911_v54  ;;  %2167 = vmatpush1.bf16.msra.mxu1 %v8913_v55 }
 0x3c1   :  { %2127 = vmatprep.subr.bf16.mxu0 %v8919_v59  ;;  %2168 = vmatprep.subr.bf16.mxu1 %v8921_v61 }
 0x3c4   :  { %2128 = vmatpush1.bf16.msra.mxu0 %v8923_v62  ;;  %2169 = vmatpush1.bf16.msra.mxu1 %v8925_v63 }
 0x3c5   :  { %2129 = vmatprep.subr.bf16.mxu0 %v8931_v3  ;;  %2170 = vmatprep.subr.bf16.mxu1 %v8933_v5 }
 0x3c8   :  { %2130 = vmatpush1.bf16.msra.mxu0 %v8935_v6  ;;  %2171 = vmatpush1.bf16.msra.mxu1 %v8937_v7 }
 0x3c9   :  { %2131 = vmatprep.subr.bf16.mxu0 %v8943_v11  ;;  %2172 = vmatprep.subr.bf16.mxu1 %v8945_v13  ;;  %v13018_v13 = vld [vmem:[#allocation119_spill] sm:$0xff] }
 0x3cc   :  { %2132 = vmatpush1.bf16.msra.mxu0 %v8947_v14  ;;  %2173 = vmatpush1.bf16.msra.mxu1 %v8949_v15  ;;  %v13017_v14 = vld [vmem:[#allocation91_spill] sm:$0xff] }
 0x3cd   :  { %2133 = vmatprep.subr.bf16.mxu0 %v8955_v20  ;;  %2174 = vmatprep.subr.bf16.mxu1 %v8957_v22  ;;  %v13015_v22 = vld [vmem:[#allocation98_spill] sm:$0xff]  ;;  %v13016_v20 = vld [vmem:[#allocation108_spill] sm:$0xff] }
 0x3d0   :  { %2134 = vmatpush1.bf16.msra.mxu0 %v8959_v23  ;;  %2175 = vmatpush1.bf16.msra.mxu1 %v8961_v24  ;;  %v12978_v23 = vld [vmem:[#allocation48_spill] sm:$0xff]  ;;  %v12979_v24 = vld [vmem:[#allocation49_spill] sm:$0xff] }
 0x3d1   :  { %2135 = vmatprep.subr.bf16.mxu0 %v8967_v29  ;;  %2176 = vmatprep.subr.bf16.mxu1 %v8969_v31  ;;  %v12980_v29 = vld [vmem:[#allocation50_spill] sm:$0xff]  ;;  %v12981_v31 = vld [vmem:[#allocation51_spill] sm:$0xff] }
 0x3d4   :  { %2136 = vmatpush1.bf16.msra.mxu0 %v8971_v32  ;;  %2177 = vmatpush1.bf16.msra.mxu1 %v8973_v33  ;;  %v12982_v32 = vld [vmem:[#allocation52_spill] sm:$0xff]  ;;  %v12983_v33 = vld [vmem:[#allocation53_spill] sm:$0xff] }
 0x3d5   :  { %2137 = vmatprep.subr.bf16.mxu0 %v8979_v37  ;;  %2178 = vmatprep.subr.bf16.mxu1 %v8981_v39  ;;  %v12984_v37 = vld [vmem:[#allocation54_spill] sm:$0xff]  ;;  %v12985_v39 = vld [vmem:[#allocation55_spill] sm:$0xff] }
 0x3d8   :  { %2138 = vmatpush1.bf16.msra.mxu0 %v8983_v40  ;;  %2179 = vmatpush1.bf16.msra.mxu1 %v8985_v41  ;;  %v12986_v40 = vld [vmem:[#allocation56_spill] sm:$0xff]  ;;  %v12987_v41 = vld [vmem:[#allocation57_spill] sm:$0xff] }
 0x3d9   :  { %2139 = vmatprep.subr.bf16.mxu0 %v12977_v17  ;;  %2180 = vmatprep.subr.bf16.mxu1 %v12978_v23  ;;  %v12988_v17 = vld [vmem:[#allocation58_spill] sm:$0xff]  ;;  %v12989_v23 = vld [vmem:[#allocation59_spill] sm:$0xff] }
 0x3dc   :  { %2140 = vmatpush1.bf16.msra.mxu0 %v12979_v24  ;;  %2181 = vmatpush1.bf16.msra.mxu1 %v12980_v29  ;;  %v12990_v24 = vld [vmem:[#allocation60_spill] sm:$0xff]  ;;  %v12991_v29 = vld [vmem:[#allocation61_spill] sm:$0xff] }
 0x3dd   :  { %2141 = vmatprep.subr.bf16.mxu0 %v12981_v31  ;;  %2182 = vmatprep.subr.bf16.mxu1 %v12982_v32  ;;  %v12992_v31 = vld [vmem:[#allocation62_spill] sm:$0xff]  ;;  %v12993_v32 = vld [vmem:[#allocation63_spill] sm:$0xff] }
 0x3e0   :  { %2142 = vmatpush1.bf16.msra.mxu0 %v12983_v33  ;;  %2183 = vmatpush1.bf16.msra.mxu1 %v12984_v37  ;;  %v12994_v33 = vld [vmem:[#allocation64_spill] sm:$0xff]  ;;  %v12995_v37 = vld [vmem:[#allocation65_spill] sm:$0xff] }
 0x3e1   :  { %2143 = vmatprep.subr.bf16.mxu0 %v12985_v39  ;;  %2184 = vmatprep.subr.bf16.mxu1 %v12986_v40  ;;  %v12996_v39 = vld [vmem:[#allocation66_spill] sm:$0xff]  ;;  %v12997_v40 = vld [vmem:[#allocation67_spill] sm:$0xff] }
 0x3e4   :  { %2144 = vmatpush1.bf16.msra.mxu0 %v12987_v41  ;;  %2185 = vmatpush1.bf16.msra.mxu1 %v12988_v17  ;;  %v12998_v41 = vld [vmem:[#allocation68_spill] sm:$0xff]  ;;  %v12999_v17 = vld [vmem:[#allocation69_spill] sm:$0xff] }
 0x3e5   :  { %2145 = vmatprep.subr.bf16.mxu0 %v12989_v23  ;;  %2186 = vmatprep.subr.bf16.mxu1 %v12990_v24  ;;  %v13000_v23 = vld [vmem:[#allocation70_spill] sm:$0xff]  ;;  %v13001_v24 = vld [vmem:[#allocation71_spill] sm:$0xff] }
 0x3e8   :  { %2146 = vmatpush1.bf16.msra.mxu0 %v12991_v29  ;;  %2187 = vmatpush1.bf16.msra.mxu1 %v12992_v31  ;;  %v13002_v29 = vld [vmem:[#allocation73_spill] sm:$0xff]  ;;  %v13003_v31 = vld [vmem:[#allocation72_spill] sm:$0xff] }
 0x3e9   :  { %2147 = vmatprep.subr.bf16.mxu0 %v12993_v32  ;;  %2188 = vmatprep.subr.bf16.mxu1 %v12994_v33  ;;  %v13004_v32 = vld [vmem:[#allocation74_spill] sm:$0xff]  ;;  %v13005_v33 = vld [vmem:[#allocation75_spill] sm:$0xff] }
 0x3ec   :  { %2148 = vmatpush1.bf16.msra.mxu0 %v12995_v37  ;;  %2189 = vmatpush1.bf16.msra.mxu1 %v12996_v39  ;;  %v13006_v37 = vld [vmem:[#allocation76_spill] sm:$0xff]  ;;  %v13007_v39 = vld [vmem:[#allocation77_spill] sm:$0xff] }
 0x3ed   :  { %2149 = vmatprep.subr.bf16.mxu0 %v12997_v40  ;;  %2190 = vmatprep.subr.bf16.mxu1 %v12998_v41  ;;  %v13008_v40 = vld [vmem:[#allocation78_spill] sm:$0xff]  ;;  %v13009_v41 = vld [vmem:[#allocation79_spill] sm:$0xff] }
 0x3f0   :  { %2150 = vmatpush1.bf16.msra.mxu0 %v12999_v17  ;;  %2191 = vmatpush1.bf16.msra.mxu1 %v13000_v23  ;;  %v13010_v17 = vld [vmem:[#allocation80_spill] sm:$0xff]  ;;  %v13011_v23 = vld [vmem:[#allocation81_spill] sm:$0xff] }
 0x3f1   :  { %2151 = vmatprep.subr.bf16.mxu0 %v13001_v24  ;;  %2192 = vmatprep.subr.bf16.mxu1 %v13002_v29  ;;  %v13012_v24 = vld [vmem:[#allocation82_spill] sm:$0xff]  ;;  %v13013_v29 = vld [vmem:[#allocation83_spill] sm:$0xff] }
 0x3f4   :  { %2152 = vmatpush1.bf16.msra.mxu0 %v13003_v31  ;;  %2193 = vmatpush1.bf16.msra.mxu1 %v13004_v32  ;;  %v13014_v31 = vld [vmem:[#allocation84_spill] sm:$0xff] }
 0x3f5   :  { %2153 = vmatprep.subr.bf16.mxu0 %v13005_v33  ;;  %2194 = vmatprep.subr.bf16.mxu1 %v13006_v37 }
 0x3f8   :  { %2154 = vmatpush1.bf16.msra.mxu0 %v13007_v39  ;;  %2195 = vmatpush1.bf16.msra.mxu1 %v13008_v40 }
 0x3f9   :  { %2155 = vmatprep.subr.bf16.mxu0 %v13009_v41  ;;  %2196 = vmatprep.subr.bf16.mxu1 %v13010_v17 }
 0x3fc   :  { %2156 = vmatpush1.bf16.msra.mxu0 %v13011_v23  ;;  %2197 = vmatpush1.bf16.msra.mxu1 %v13012_v24 }
 0x3fd   :  { %2207 = vmatprep.subr.bf16.mxu0 %v13013_v29  ;;  %2248 = vmatprep.subr.bf16.mxu1 %v13014_v31 }
 0x452   :  { %v1911_v32 = vpop.f32.mrb[32].mxu0  ;;  %v1952_v33 = vpop.f32.mrb[48].mxu1 }
 0x453   :  { %v2041_v37 = vadd.f32 %v1911_v32, %v13015_v22  ;;  %v2043_v39 = vadd.f32 %v1952_v33, %v13016_v20  ;;  %v1913_v15 = vpop.f32.mrb[33].mxu0  ;;  %v1954_v40 = vpop.f32.mrb[49].mxu1 }
 0x454   :  { %v2042_v41 = vadd.f32 %v1913_v15, %v13017_v14  ;;  %v2044_v17 = vadd.f32 %v1954_v40, %v13018_v13  ;;  %v1915_v11 = vpop.f32.mrb[34].mxu0  ;;  %v1956_v23 = vpop.f32.mrb[50].mxu1  ;;  %v13022_v40 = vld [vmem:[#allocation140_spill] sm:$0xff] }
 0x455   :  { %v1916_v7 = vpop.f32.mrb[35].mxu0  ;;  %v1957_v24 = vpop.f32.mrb[51].mxu1  ;;  %v7506_v6 = vmul.f32 -1.442695, %v2041_v37  ;;  %v7508_v29 = vmul.f32 -1.442695, %v2043_v39 }
 0x456   :  { %v7507_v5 = vmul.f32 -1.442695, %v2042_v41  ;;  %v7509_v31 = vmul.f32 -1.442695, %v2044_v17  ;;  %v13019_v23 = vld [vmem:[#allocation112_spill] sm:$0xff]  ;;  %v13020_v37 = vld [vmem:[#allocation133_spill] sm:$0xff] }
 0x457   :  { %8070 = vpow2.f32 %v7506_v6 }
 0x458   :  { %8072 = vpow2.f32 %v7508_v29 }
 0x459   :  { %8074 = vpow2.f32 %v7507_v5 }
 0x45a   :  { %8076 = vpow2.f32 %v7509_v31  ;;  %v13021_v31 = vld [vmem:[#allocation123_spill] sm:$0xff] }
 0x461   :  { %v8071_v22 = vpop.eup %8070 }
 0x462   :  { %v8073_v20 = vpop.eup %8072  ;;  %v2055_v3 = vadd.f32 1.0, %v8071_v22 }
 0x463   :  { %v8075_v32 = vpop.eup %8074  ;;  %v2067_v14 = vadd.f32 1.0, %v8073_v20 }
 0x464   :  { %v8077_v33 = vpop.eup %8076  ;;  %v2056_v15 = vadd.f32 1.0, %v8075_v32  ;;  %8078 = vrcp.f32 %v2055_v3 }
 0x465   :  { %v2068_v13 = vadd.f32 1.0, %v8077_v33  ;;  %8080 = vrcp.f32 %v2067_v14 }
 0x466   :  { %8082 = vrcp.f32 %v2056_v15 }
 0x467   :  { %8084 = vrcp.f32 %v2068_v13 }
 0x46e   :  { %v8079_v14 = vpop.eup %8078 }
 0x46f   :  { %v8081_v15 = vpop.eup %8080 }
 0x492   :  { %v1993_v7 = vpop.f32.mrb[36].mxu0  ;;  %v2034_v11 = vpop.f32.mrb[52].mxu1 }
 0x493   :  { %v2045_v24 = vadd.f32 %v1993_v7, %v13019_v23  ;;  %v2047_v6 = vadd.f32 %v2034_v11, %v13020_v37  ;;  %v1995_v29 = vpop.f32.mrb[37].mxu0  ;;  %v2036_v5 = vpop.f32.mrb[53].mxu1  ;;  %v2087_v37 = vmul.f32 %v8081_v15, %v9586_v47  ;;  %v13025_v15 = vld [vmem:[#allocation153_spill] sm:$0xff] }
 0x494   :  { %v2046_v39 = vadd.f32 %v1995_v29, %v13021_v31  ;;  %v2048_v41 = vadd.f32 %v2036_v5, %v13022_v40  ;;  %v1997_v17 = vpop.f32.mrb[38].mxu0  ;;  %v2038_v22 = vpop.f32.mrb[54].mxu1 }
 0x495   :  { %8086 = vtanh.f32 %v2045_v24  ;;  %v7510_v20 = vmul.f32 -1.442695, %v2047_v6  ;;  %v1998_v3 = vpop.f32.mrb[39].mxu0  ;;  %v2039_v32 = vpop.f32.mrb[55].mxu1 }
 0x496   :  { %8088 = vtanh.f32 %v2046_v39  ;;  %v7511_v33 = vmul.f32 -1.442695, %v2048_v41  ;;  %v8083_v7 = vpop.eup %8082 }
 0x497   :  { %8090 = vpow2.f32 %v7510_v20  ;;  %v8085_v11 = vpop.eup %8084 }
 0x498   :  { %8092 = vpow2.f32 %v7511_v33  ;;  %v2088_v31 = vmul.f32 %v8085_v11, %v9588_v50  ;;  %v13027_v11 = vld [vmem:[#allocation155_spill] sm:$0xff] }
 0x49f   :  { %v8087_v23 = vpop.eup %8086 }
 0x4a0   :  { %v8089_v13 = vpop.eup %8088  ;;  %v2089_v29 = vmul.f32 %v8087_v23, %v8079_v14  ;;  %v13028_v23 = vld [vmem:[#allocation156_spill] sm:$0xff] }
 0x4a1   :  { %v8091_v5 = vpop.eup %8090  ;;  %v2090_v24 = vmul.f32 %v8089_v13, %v8083_v7  ;;  %v13026_v7 = vld [vmem:[#allocation154_spill] sm:$0xff]  ;;  %v13029_v13 = vld [vmem:[#allocation157_spill] sm:$0xff] }
 0x4a2   :  { %v8093_v6 = vpop.eup %8092  ;;  %v9744_v40 = vadd.f32 %v2089_v29, %v2087_v37  ;;  %v2081_v39 = vadd.f32 1.0, %v8091_v5  ;;  %v13030_v37 = vld [vmem:[#allocation158_spill] sm:$0xff]  ;;  %v13031_v29 = vld [vmem:[#allocation159_spill] sm:$0xff]  ;;  %v13032_v5 = vld [vmem:[#allocation160_spill] sm:$0xff] }
 0x4a3   :  { %v9746_v41 = vadd.f32 %v2090_v24, %v2088_v31  ;;  %v2082_v17 = vadd.f32 1.0, %v8093_v6  ;;  %v13033_v31 = vld [vmem:[#allocation161_spill] sm:$0xff]  ;;  %v13034_v24 = vld [vmem:[#allocation162_spill] sm:$0xff]  ;;  %v13035_v6 = vld [vmem:[#allocation163_spill] sm:$0xff] }
 0x4a4   :  { %8094 = vtanh.f32 %v9744_v40 }
 0x4a5   :  { %8096 = vrcp.f32 %v2081_v39  ;;  %v13036_v39 = vld [vmem:[#allocation164_spill] sm:$0xff] }
 0x4a6   :  { %8098 = vtanh.f32 %v9746_v41 }
 0x4a7   :  { %8100 = vrcp.f32 %v2082_v17  ;;  %v13037_v17 = vld [vmem:[#allocation165_spill] sm:$0xff] }
 0x4ae   :  { %v8095_v22 = vpop.eup %8094 }
 0x4af   :  { %v8097_v47 = vpop.eup %8096 }
 0x4b0   :  { %v8099_v20 = vpop.eup %8098  ;;  %v9750_v32 = vmul.f32 %v8097_v47, %v8095_v22  ;;  %v13038_v22 = vld [vmem:[#allocation166_spill] sm:$0xff]  ;;  %v13039_v47 = vld [vmem:[#allocation167_spill] sm:$0xff] }
 0x4b1   :  { %v8101_v3 = vpop.eup %8100 }
 0x4b2   :  { %13023 = vst [vmem:[#allocation96_spill] sm:$0xff] %v9750_v32  ;;  %v9752_v50 = vmul.f32 %v8101_v3, %v8099_v20  ;;  %v9758_v14 = vpack.c.bf16 %v9750_v32, %v9750_v32  ;;  %v13040_v20 = vld [vmem:[#allocation168_spill] sm:$0xff]  ;;  %v13041_v3 = vld [vmem:[#allocation169_spill] sm:$0xff] }
 0x4b3   :  { %v13044_v32 = vld [vmem:[#allocation172_spill] sm:$0xff] }
 0x4b4   :  { %13024 = vst [vmem:[#allocation125_spill] sm:$0xff] %v9752_v50  ;;  %v2124_v33 = vpack.c.bf16 %v9752_v50, %v9752_v50  ;;  %v13043_v50 = vld [vmem:[#allocation171_spill] sm:$0xff] }
 0x4b6   :  { %2157 = vmatprep.mubr.bf16.mxu0 %v2124_v33  ;;  %2198 = vmatprep.mubr.bf16.mxu1 %v2124_v33 }
 0x4b7   :  { %2158 = vmatmul.mubr.bf16.vlgmr.msra.gmra.mrb[40].mxu0 %v9758_v14  ;;  %2199 = vmatmul.mubr.bf16.vlgmr.msra.gmra.mrb[56].mxu1 %v9758_v14 }
 0x4b8   :  { %2208 = vmatpush1.bf16.msra.mxu0 %v12927_v2  ;;  %2249 = vmatpush1.bf16.msra.mxu1 %v12928_v0 }
 0x4b9   :  { %2239 = vmatprep.mubr.bf16.mxu0 %v2124_v33  ;;  %2280 = vmatprep.mubr.bf16.mxu1 %v2124_v33  ;;  %v13042_v33 = vld [vmem:[#allocation170_spill] sm:$0xff] }
 0x4ba   :  { %2209 = vmatprep.subr.bf16.mxu0 %v12929_v1  ;;  %2250 = vmatprep.subr.bf16.mxu1 %v12930_v49 }
 0x4bc   :  { %2210 = vmatpush1.bf16.msra.mxu0 %v12931_v57  ;;  %2251 = vmatpush1.bf16.msra.mxu1 %v12932_v60 }
 0x4bd   :  { %2211 = vmatprep.subr.bf16.mxu0 %v12933_v10  ;;  %2252 = vmatprep.subr.bf16.mxu1 %v12934_v18 }
 0x4c0   :  { %2212 = vmatpush1.bf16.msra.mxu0 %v12935_v52  ;;  %2253 = vmatpush1.bf16.msra.mxu1 %v12936_v25 }
 0x4c1   :  { %2213 = vmatprep.subr.bf16.mxu0 %v13025_v15  ;;  %2254 = vmatprep.subr.bf16.mxu1 %v13026_v7 }
 0x4c4   :  { %2214 = vmatpush1.bf16.msra.mxu0 %v13027_v11  ;;  %2255 = vmatpush1.bf16.msra.mxu1 %v13028_v23 }
 0x4c5   :  { %2215 = vmatprep.subr.bf16.mxu0 %v13029_v13  ;;  %2256 = vmatprep.subr.bf16.mxu1 %v13030_v37 }
 0x4c8   :  { %2216 = vmatpush1.bf16.msra.mxu0 %v13031_v29  ;;  %2257 = vmatpush1.bf16.msra.mxu1 %v13032_v5 }
 0x4c9   :  { %2217 = vmatprep.subr.bf16.mxu0 %v13033_v31  ;;  %2258 = vmatprep.subr.bf16.mxu1 %v13034_v24  ;;  %v13045_v24 = vld [vmem:[#allocation173_spill] sm:$0xff] }
 0x4cc   :  { %2218 = vmatpush1.bf16.msra.mxu0 %v13035_v6  ;;  %2259 = vmatpush1.bf16.msra.mxu1 %v13036_v39  ;;  %v13046_v6 = vld [vmem:[#allocation174_spill] sm:$0xff]  ;;  %v13047_v39 = vld [vmem:[#allocation175_spill] sm:$0xff] }
 0x4cd   :  { %2219 = vmatprep.subr.bf16.mxu0 %v13037_v17  ;;  %2260 = vmatprep.subr.bf16.mxu1 %v13038_v22  ;;  %v13048_v17 = vld [vmem:[#allocation176_spill] sm:$0xff]  ;;  %v13049_v22 = vld [vmem:[#allocation177_spill] sm:$0xff] }
 0x4d0   :  { %2220 = vmatpush1.bf16.msra.mxu0 %v13039_v47  ;;  %2261 = vmatpush1.bf16.msra.mxu1 %v13040_v20  ;;  %v13050_v47 = vld [vmem:[#allocation178_spill] sm:$0xff]  ;;  %v13051_v20 = vld [vmem:[#allocation179_spill] sm:$0xff] }
 0x4d1   :  { %2221 = vmatprep.subr.bf16.mxu0 %v13041_v3  ;;  %2262 = vmatprep.subr.bf16.mxu1 %v13042_v33 }
 0x4d4   :  { %2222 = vmatpush1.bf16.msra.mxu0 %v13043_v50  ;;  %2263 = vmatpush1.bf16.msra.mxu1 %v13044_v32  ;;  %v13052_v32 = vld [vmem:[#allocation183_spill] sm:$0xff] }
 0x4d5   :  { %2223 = vmatprep.subr.bf16.mxu0 %v13045_v24  ;;  %2264 = vmatprep.subr.bf16.mxu1 %v13046_v6  ;;  %v13053_v24 = vld [vmem:[#allocation184_spill] sm:$0xff] }
 0x4d8   :  { %2224 = vmatpush1.bf16.msra.mxu0 %v13047_v39  ;;  %2265 = vmatpush1.bf16.msra.mxu1 %v13048_v17 }
 0x4d9   :  { %2225 = vmatprep.subr.bf16.mxu0 %v13049_v22  ;;  %2266 = vmatprep.subr.bf16.mxu1 %v13050_v47 }
 0x4dc   :  { %2226 = vmatpush1.bf16.msra.mxu0 %v13051_v20  ;;  %2267 = vmatpush1.bf16.msra.mxu1 %v12964_v26 }
 0x4dd   :  { %2227 = vmatprep.subr.bf16.mxu0 %v12965_v42  ;;  %2268 = vmatprep.subr.bf16.mxu1 %v12966_v12 }
 0x4e0   :  { %2228 = vmatpush1.bf16.msra.mxu0 %v13052_v32  ;;  %2269 = vmatpush1.bf16.msra.mxu1 %v13053_v24 }
 0x4e1   :  { %2229 = vmatprep.subr.bf16.mxu0 %v12969_v45  ;;  %2270 = vmatprep.subr.bf16.mxu1 %v12970_v16 }
 0x4e4   :  { %2230 = vmatpush1.bf16.msra.mxu0 %v12971_v48  ;;  %2271 = vmatpush1.bf16.msra.mxu1 %v12972_v44 }
 0x4e5   :  { %2231 = vmatprep.subr.bf16.mxu0 %v12973_v4  ;;  %2272 = vmatprep.subr.bf16.mxu1 %v12974_v30 }
 0x4e8   :  { %2232 = vmatpush1.bf16.msra.mxu0 %v9464_v46  ;;  %2273 = vmatpush1.bf16.msra.mxu1 %v9466_v43 }
 0x4e9   :  { %2233 = vmatprep.subr.bf16.mxu0 %v9470_v8  ;;  %2274 = vmatprep.subr.bf16.mxu1 %v12975_v9 }
 0x4ec   :  { %2234 = vmatpush1.bf16.msra.mxu0 %v12976_v28  ;;  %2275 = vmatpush1.bf16.msra.mxu1 %v9478_v19 }
 0x4ed   :  { %2235 = vmatprep.subr.bf16.mxu0 %v9482_v27  ;;  %2276 = vmatprep.subr.bf16.mxu1 %v9484_v38  ;;  %v13115_v38 = vld [vmem:[#allocation117_spill] sm:$0xff] }
 0x4f0   :  { %2236 = vmatpush1.bf16.msra.mxu0 %v9488_v21  ;;  %2277 = vmatpush1.bf16.msra.mxu1 %v9490_v34  ;;  %v13114_v21 = vld [vmem:[#allocation89_spill] sm:$0xff] }
 0x4f1   :  { %2237 = vmatprep.subr.bf16.mxu0 %v9494_v56  ;;  %2278 = vmatprep.subr.bf16.mxu1 %v9496_v36  ;;  %v13112_v36 = vld [vmem:[#allocation100_spill] sm:$0xff]  ;;  %v13113_v56 = vld [vmem:[#allocation110_spill] sm:$0xff] }
 0x4f4   :  { %2238 = vmatpush1.bf16.msra.mxu0 %v9500_v35  ;;  %2279 = vmatpush1.bf16.msra.mxu1 %v9502_v58  ;;  %v13054_v58 = vld [vmem:[#allocation27_spill] sm:$0xff]  ;;  %v13057_v35 = vld [vmem:[#allocation30_spill] sm:$0xff] }
 0x4f5   :  { %2373 = vmatprep.subr.bf16.mxu0 %v8907_v51  ;;  %2414 = vmatprep.subr.bf16.mxu1 %v8909_v53  ;;  %v13055_v51 = vld [vmem:[#allocation28_spill] sm:$0xff]  ;;  %v13056_v53 = vld [vmem:[#allocation29_spill] sm:$0xff] }
 0x4f7   :  { %2240 = vmatmul.mubr.bf16.vlgmr.msra.gmra.mrb[44].mxu0 %v9758_v14  ;;  %2281 = vmatmul.mubr.bf16.vlgmr.msra.gmra.mrb[60].mxu1 %v9758_v14  ;;  %v13058_v14 = vld [vmem:[#allocation31_spill] sm:$0xff] }
 0x4f8   :  { %2374 = vmatpush1.bf16.msra.mxu0 %v8911_v54  ;;  %2415 = vmatpush1.bf16.msra.mxu1 %v8913_v55  ;;  %v13059_v54 = vld [vmem:[#allocation32_spill] sm:$0xff]  ;;  %v13060_v55 = vld [vmem:[#allocation33_spill] sm:$0xff] }
 0x4f9   :  { %2375 = vmatprep.subr.bf16.mxu0 %v8919_v59  ;;  %2416 = vmatprep.subr.bf16.mxu1 %v8921_v61  ;;  %v13061_v59 = vld [vmem:[#allocation34_spill] sm:$0xff]  ;;  %v13062_v61 = vld [vmem:[#allocation35_spill] sm:$0xff] }
 0x4fc   :  { %2376 = vmatpush1.bf16.msra.mxu0 %v8923_v62  ;;  %2417 = vmatpush1.bf16.msra.mxu1 %v8925_v63  ;;  %v13063_v62 = vld [vmem:[#allocation36_spill] sm:$0xff]  ;;  %v13064_v63 = vld [vmem:[#allocation37_spill] sm:$0xff] }
 0x4fd   :  { %2377 = vmatprep.subr.bf16.mxu0 %v13054_v58  ;;  %2418 = vmatprep.subr.bf16.mxu1 %v13055_v51  ;;  %v13065_v58 = vld [vmem:[#allocation38_spill] sm:$0xff]  ;;  %v13066_v51 = vld [vmem:[#allocation39_spill] sm:$0xff] }
 0x500   :  { %2378 = vmatpush1.bf16.msra.mxu0 %v13056_v53  ;;  %2419 = vmatpush1.bf16.msra.mxu1 %v13057_v35  ;;  %v13067_v53 = vld [vmem:[#allocation40_spill] sm:$0xff]  ;;  %v13068_v35 = vld [vmem:[#allocation41_spill] sm:$0xff] }
 0x501   :  { %2379 = vmatprep.subr.bf16.mxu0 %v13058_v14  ;;  %2420 = vmatprep.subr.bf16.mxu1 %v13059_v54  ;;  %v13069_v14 = vld [vmem:[#allocation42_spill] sm:$0xff]  ;;  %v13070_v54 = vld [vmem:[#allocation43_spill] sm:$0xff] }
 0x504   :  { %2380 = vmatpush1.bf16.msra.mxu0 %v13060_v55  ;;  %2421 = vmatpush1.bf16.msra.mxu1 %v13061_v59  ;;  %v13071_v55 = vld [vmem:[#allocation44_spill] sm:$0xff]  ;;  %v13072_v59 = vld [vmem:[#allocation45_spill] sm:$0xff] }
 0x505   :  { %2381 = vmatprep.subr.bf16.mxu0 %v13062_v61  ;;  %2422 = vmatprep.subr.bf16.mxu1 %v13063_v62  ;;  %v13073_v61 = vld [vmem:[#allocation46_spill] sm:$0xff]  ;;  %v13074_v62 = vld [vmem:[#allocation47_spill] sm:$0xff] }
 0x508   :  { %2382 = vmatpush1.bf16.msra.mxu0 %v13064_v63  ;;  %2423 = vmatpush1.bf16.msra.mxu1 %v13065_v58  ;;  %v13075_v63 = vld [vmem:[#allocation48_spill] sm:$0xff]  ;;  %v13076_v58 = vld [vmem:[#allocation49_spill] sm:$0xff] }
 0x509   :  { %2383 = vmatprep.subr.bf16.mxu0 %v13066_v51  ;;  %2424 = vmatprep.subr.bf16.mxu1 %v13067_v53  ;;  %v13077_v51 = vld [vmem:[#allocation50_spill] sm:$0xff]  ;;  %v13078_v53 = vld [vmem:[#allocation51_spill] sm:$0xff] }
 0x50c   :  { %2384 = vmatpush1.bf16.msra.mxu0 %v13068_v35  ;;  %2425 = vmatpush1.bf16.msra.mxu1 %v13069_v14  ;;  %v13079_v35 = vld [vmem:[#allocation52_spill] sm:$0xff]  ;;  %v13080_v14 = vld [vmem:[#allocation53_spill] sm:$0xff] }
 0x50d   :  { %2385 = vmatprep.subr.bf16.mxu0 %v13070_v54  ;;  %2426 = vmatprep.subr.bf16.mxu1 %v13071_v55  ;;  %v13081_v54 = vld [vmem:[#allocation54_spill] sm:$0xff]  ;;  %v13082_v55 = vld [vmem:[#allocation55_spill] sm:$0xff] }
 0x510   :  { %2386 = vmatpush1.bf16.msra.mxu0 %v13072_v59  ;;  %2427 = vmatpush1.bf16.msra.mxu1 %v13073_v61  ;;  %v13083_v59 = vld [vmem:[#allocation56_spill] sm:$0xff]  ;;  %v13084_v61 = vld [vmem:[#allocation57_spill] sm:$0xff] }
 0x511   :  { %2387 = vmatprep.subr.bf16.mxu0 %v13074_v62  ;;  %2428 = vmatprep.subr.bf16.mxu1 %v13075_v63  ;;  %v13085_v62 = vld [vmem:[#allocation58_spill] sm:$0xff]  ;;  %v13086_v63 = vld [vmem:[#allocation59_spill] sm:$0xff] }
 0x514   :  { %2388 = vmatpush1.bf16.msra.mxu0 %v13076_v58  ;;  %2429 = vmatpush1.bf16.msra.mxu1 %v13077_v51  ;;  %v13087_v58 = vld [vmem:[#allocation60_spill] sm:$0xff]  ;;  %v13088_v51 = vld [vmem:[#allocation61_spill] sm:$0xff] }
 0x515   :  { %2389 = vmatprep.subr.bf16.mxu0 %v13078_v53  ;;  %2430 = vmatprep.subr.bf16.mxu1 %v13079_v35  ;;  %v13089_v53 = vld [vmem:[#allocation62_spill] sm:$0xff]  ;;  %v13090_v35 = vld [vmem:[#allocation63_spill] sm:$0xff] }
 0x518   :  { %2390 = vmatpush1.bf16.msra.mxu0 %v13080_v14  ;;  %2431 = vmatpush1.bf16.msra.mxu1 %v13081_v54  ;;  %v13091_v14 = vld [vmem:[#allocation64_spill] sm:$0xff]  ;;  %v13092_v54 = vld [vmem:[#allocation65_spill] sm:$0xff] }
 0x519   :  { %2391 = vmatprep.subr.bf16.mxu0 %v13082_v55  ;;  %2432 = vmatprep.subr.bf16.mxu1 %v13083_v59  ;;  %v13093_v55 = vld [vmem:[#allocation66_spill] sm:$0xff]  ;;  %v13094_v59 = vld [vmem:[#allocation67_spill] sm:$0xff] }
 0x51c   :  { %2392 = vmatpush1.bf16.msra.mxu0 %v13084_v61  ;;  %2433 = vmatpush1.bf16.msra.mxu1 %v13085_v62  ;;  %v13095_v61 = vld [vmem:[#allocation68_spill] sm:$0xff]  ;;  %v13096_v62 = vld [vmem:[#allocation69_spill] sm:$0xff] }
 0x51d   :  { %2393 = vmatprep.subr.bf16.mxu0 %v13086_v63  ;;  %2434 = vmatprep.subr.bf16.mxu1 %v13087_v58  ;;  %v13097_v63 = vld [vmem:[#allocation70_spill] sm:$0xff]  ;;  %v13098_v58 = vld [vmem:[#allocation71_spill] sm:$0xff] }
 0x520   :  { %2394 = vmatpush1.bf16.msra.mxu0 %v13088_v51  ;;  %2435 = vmatpush1.bf16.msra.mxu1 %v13089_v53  ;;  %v13099_v51 = vld [vmem:[#allocation73_spill] sm:$0xff]  ;;  %v13100_v53 = vld [vmem:[#allocation72_spill] sm:$0xff] }
 0x521   :  { %2395 = vmatprep.subr.bf16.mxu0 %v13090_v35  ;;  %2436 = vmatprep.subr.bf16.mxu1 %v13091_v14  ;;  %v13101_v35 = vld [vmem:[#allocation74_spill] sm:$0xff]  ;;  %v13102_v14 = vld [vmem:[#allocation75_spill] sm:$0xff] }
 0x524   :  { %2396 = vmatpush1.bf16.msra.mxu0 %v13092_v54  ;;  %2437 = vmatpush1.bf16.msra.mxu1 %v13093_v55  ;;  %v13103_v54 = vld [vmem:[#allocation76_spill] sm:$0xff]  ;;  %v13104_v55 = vld [vmem:[#allocation77_spill] sm:$0xff] }
 0x525   :  { %2397 = vmatprep.subr.bf16.mxu0 %v13094_v59  ;;  %2438 = vmatprep.subr.bf16.mxu1 %v13095_v61  ;;  %v13105_v59 = vld [vmem:[#allocation78_spill] sm:$0xff]  ;;  %v13106_v61 = vld [vmem:[#allocation79_spill] sm:$0xff] }
 0x528   :  { %2398 = vmatpush1.bf16.msra.mxu0 %v13096_v62  ;;  %2439 = vmatpush1.bf16.msra.mxu1 %v13097_v63  ;;  %v13107_v62 = vld [vmem:[#allocation80_spill] sm:$0xff]  ;;  %v13108_v63 = vld [vmem:[#allocation81_spill] sm:$0xff] }
 0x529   :  { %2399 = vmatprep.subr.bf16.mxu0 %v13098_v58  ;;  %2440 = vmatprep.subr.bf16.mxu1 %v13099_v51  ;;  %v13109_v58 = vld [vmem:[#allocation82_spill] sm:$0xff]  ;;  %v13110_v51 = vld [vmem:[#allocation83_spill] sm:$0xff] }
 0x52c   :  { %2400 = vmatpush1.bf16.msra.mxu0 %v13100_v53  ;;  %2441 = vmatpush1.bf16.msra.mxu1 %v13101_v35  ;;  %v13111_v53 = vld [vmem:[#allocation84_spill] sm:$0xff] }
 0x52d   :  { %2401 = vmatprep.subr.bf16.mxu0 %v13102_v14  ;;  %2442 = vmatprep.subr.bf16.mxu1 %v13103_v54 }
 0x530   :  { %2402 = vmatpush1.bf16.msra.mxu0 %v13104_v55  ;;  %2443 = vmatpush1.bf16.msra.mxu1 %v13105_v59 }
 0x531   :  { %2403 = vmatprep.subr.bf16.mxu0 %v13106_v61  ;;  %2444 = vmatprep.subr.bf16.mxu1 %v13107_v62 }
 0x534   :  { %2404 = vmatpush1.bf16.msra.mxu0 %v13108_v63  ;;  %2445 = vmatpush1.bf16.msra.mxu1 %v13109_v58 }
 0x535   :  { %2455 = vmatprep.subr.bf16.mxu0 %v13110_v51  ;;  %2496 = vmatprep.subr.bf16.mxu1 %v13111_v53 }
 0x58a   :  { %v2159_v35 = vpop.f32.mrb[40].mxu0  ;;  %v2200_v14 = vpop.f32.mrb[56].mxu1 }
 0x58b   :  { %v2289_v54 = vadd.f32 %v2159_v35, %v13112_v36  ;;  %v2291_v55 = vadd.f32 %v2200_v14, %v13113_v56  ;;  %v2161_v34 = vpop.f32.mrb[41].mxu0  ;;  %v2202_v59 = vpop.f32.mrb[57].mxu1 }
 0x58c   :  { %v2290_v61 = vadd.f32 %v2161_v34, %v13114_v21  ;;  %v2292_v62 = vadd.f32 %v2202_v59, %v13115_v38  ;;  %v2163_v27 = vpop.f32.mrb[42].mxu0  ;;  %v2204_v63 = vpop.f32.mrb[58].mxu1  ;;  %v13119_v38 = vld [vmem:[#allocation138_spill] sm:$0xff] }
 0x58d   :  { %v2164_v19 = vpop.f32.mrb[43].mxu0  ;;  %v2205_v58 = vpop.f32.mrb[59].mxu1  ;;  %v7512_v28 = vmul.f32 -1.442695, %v2289_v54  ;;  %v7514_v51 = vmul.f32 -1.442695, %v2291_v55 }
 0x58e   :  { %v7513_v9 = vmul.f32 -1.442695, %v2290_v61  ;;  %v7515_v53 = vmul.f32 -1.442695, %v2292_v62  ;;  %v13116_v54 = vld [vmem:[#allocation114_spill] sm:$0xff]  ;;  %v13117_v61 = vld [vmem:[#allocation135_spill] sm:$0xff] }
 0x58f   :  { %8102 = vpow2.f32 %v7512_v28 }
 0x590   :  { %8104 = vpow2.f32 %v7514_v51 }
 0x591   :  { %8106 = vpow2.f32 %v7513_v9 }
 0x592   :  { %8108 = vpow2.f32 %v7515_v53  ;;  %v13118_v53 = vld [vmem:[#allocation121_spill] sm:$0xff] }
 0x599   :  { %v8103_v35 = vpop.eup %8102 }
 0x59a   :  { %v8105_v56 = vpop.eup %8104  ;;  %v2303_v8 = vadd.f32 1.0, %v8103_v35 }
 0x59b   :  { %v8107_v36 = vpop.eup %8106  ;;  %v2315_v21 = vadd.f32 1.0, %v8105_v56 }
 0x59c   :  { %v8109_v14 = vpop.eup %8108  ;;  %v2304_v34 = vadd.f32 1.0, %v8107_v36  ;;  %8110 = vrcp.f32 %v2303_v8 }
 0x59d   :  { %v2316_v59 = vadd.f32 1.0, %v8109_v14  ;;  %8112 = vrcp.f32 %v2315_v21 }
 0x59e   :  { %8114 = vrcp.f32 %v2304_v34 }
 0x59f   :  { %8116 = vrcp.f32 %v2316_v59 }
 0x5a6   :  { %v8111_v21 = vpop.eup %8110 }
 0x5a7   :  { %v8113_v34 = vpop.eup %8112 }
 0x5ca   :  { %v2241_v63 = vpop.f32.mrb[44].mxu0  ;;  %v2282_v58 = vpop.f32.mrb[60].mxu1 }
 0x5cb   :  { %v2293_v55 = vadd.f32 %v2241_v63, %v13116_v54  ;;  %v2295_v62 = vadd.f32 %v2282_v58, %v13117_v61  ;;  %v2243_v51 = vpop.f32.mrb[45].mxu0  ;;  %v2284_v19 = vpop.f32.mrb[61].mxu1  ;;  %v2335_v61 = vmul.f32 %v8113_v34, %v9744_v40  ;;  %v13122_v34 = vld [vmem:[#allocation162_spill] sm:$0xff] }
 0x5cc   :  { %v2294_v27 = vadd.f32 %v2243_v51, %v13118_v53  ;;  %v2296_v28 = vadd.f32 %v2284_v19, %v13119_v38  ;;  %v2245_v9 = vpop.f32.mrb[46].mxu0  ;;  %v2286_v35 = vpop.f32.mrb[62].mxu1 }
 0x5cd   :  { %8118 = vtanh.f32 %v2293_v55  ;;  %v7516_v56 = vmul.f32 -1.442695, %v2295_v62  ;;  %v2246_v8 = vpop.f32.mrb[47].mxu0  ;;  %v2287_v36 = vpop.f32.mrb[63].mxu1 }
 0x5ce   :  { %8120 = vtanh.f32 %v2294_v27  ;;  %v7517_v14 = vmul.f32 -1.442695, %v2296_v28  ;;  %v8115_v63 = vpop.eup %8114 }
 0x5cf   :  { %8122 = vpow2.f32 %v7516_v56  ;;  %v8117_v58 = vpop.eup %8116 }
 0x5d0   :  { %8124 = vpow2.f32 %v7517_v14  ;;  %v2336_v53 = vmul.f32 %v8117_v58, %v9746_v41  ;;  %v13124_v58 = vld [vmem:[#allocation164_spill] sm:$0xff] }
 0x5d7   :  { %v8119_v54 = vpop.eup %8118 }
 0x5d8   :  { %v8121_v59 = vpop.eup %8120  ;;  %v2337_v51 = vmul.f32 %v8119_v54, %v8111_v21  ;;  %v13125_v54 = vld [vmem:[#allocation165_spill] sm:$0xff] }
 0x5d9   :  { %v8123_v19 = vpop.eup %8122  ;;  %v2338_v55 = vmul.f32 %v8121_v59, %v8115_v63  ;;  %v13123_v63 = vld [vmem:[#allocation163_spill] sm:$0xff]  ;;  %v13126_v59 = vld [vmem:[#allocation166_spill] sm:$0xff] }
 0x5da   :  { %v8125_v62 = vpop.eup %8124  ;;  %v9902_v38 = vadd.f32 %v2337_v51, %v2335_v61  ;;  %v2329_v27 = vadd.f32 1.0, %v8123_v19  ;;  %v13127_v61 = vld [vmem:[#allocation167_spill] sm:$0xff]  ;;  %v13128_v51 = vld [vmem:[#allocation168_spill] sm:$0xff] }
 0x5db   :  { %v9904_v28 = vadd.f32 %v2338_v55, %v2336_v53  ;;  %v2330_v9 = vadd.f32 1.0, %v8125_v62  ;;  %v13129_v19 = vld [vmem:[#allocation172_spill] sm:$0xff]  ;;  %v13130_v53 = vld [vmem:[#allocation173_spill] sm:$0xff]  ;;  %v13132_v62 = vld [vmem:[#allocation194_spill] sm:$0xff] }
 0x5dc   :  { %8126 = vtanh.f32 %v9902_v38  ;;  %v13131_v55 = vld [vmem:[#allocation193_spill] sm:$0xff] }
 0x5dd   :  { %8128 = vrcp.f32 %v2329_v27  ;;  %v13133_v27 = vld [vmem:[#allocation195_spill] sm:$0xff] }
 0x5de   :  { %8130 = vtanh.f32 %v9904_v28 }
 0x5df   :  { %8132 = vrcp.f32 %v2330_v9  ;;  %v13134_v9 = vld [vmem:[#allocation196_spill] sm:$0xff] }
 0x5e6   :  { %v8127_v35 = vpop.eup %8126 }
 0x5e7   :  { %v8129_v40 = vpop.eup %8128 }
 0x5e8   :  { %v8131_v56 = vpop.eup %8130  ;;  %v9908_v36 = vmul.f32 %v8129_v40, %v8127_v35  ;;  %v13135_v35 = vld [vmem:[#allocation197_spill] sm:$0xff]  ;;  %v13136_v40 = vld [vmem:[#allocation198_spill] sm:$0xff] }
 0x5e9   :  { %v8133_v8 = vpop.eup %8132 }
 0x5ea   :  { %13120 = vst [vmem:[#allocation106_spill] sm:$0xff] %v9908_v36  ;;  %v9910_v41 = vmul.f32 %v8133_v8, %v8131_v56  ;;  %v9916_v21 = vpack.c.bf16 %v9908_v36, %v9908_v36  ;;  %v13137_v56 = vld [vmem:[#allocation199_spill] sm:$0xff]  ;;  %v13138_v8 = vld [vmem:[#allocation200_spill] sm:$0xff] }
 0x5eb   :  { %v13141_v36 = vld [vmem:[#allocation203_spill] sm:$0xff] }
 0x5ec   :  { %13121 = vst [vmem:[#allocation131_spill] sm:$0xff] %v9910_v41  ;;  %v2372_v14 = vpack.c.bf16 %v9910_v41, %v9910_v41  ;;  %v13140_v41 = vld [vmem:[#allocation202_spill] sm:$0xff] }
 0x5ee   :  { %2405 = vmatprep.mubr.bf16.mxu0 %v2372_v14  ;;  %2446 = vmatprep.mubr.bf16.mxu1 %v2372_v14 }
 0x5ef   :  { %2406 = vmatmul.mubr.bf16.vlgmr.msra.gmra.mrb[48].mxu0 %v9916_v21  ;;  %2447 = vmatmul.mubr.bf16.vlgmr.msra.gmra.mrb[64].mxu1 %v9916_v21 }
 0x5f0   :  { %2456 = vmatpush1.bf16.msra.mxu0 %v12927_v2  ;;  %2497 = vmatpush1.bf16.msra.mxu1 %v12928_v0 }
 0x5f1   :  { %2487 = vmatprep.mubr.bf16.mxu0 %v2372_v14  ;;  %2528 = vmatprep.mubr.bf16.mxu1 %v2372_v14  ;;  %v13139_v14 = vld [vmem:[#allocation201_spill] sm:$0xff] }
 0x5f2   :  { %2457 = vmatprep.subr.bf16.mxu0 %v12929_v1  ;;  %2498 = vmatprep.subr.bf16.mxu1 %v12930_v49 }
 0x5f4   :  { %2458 = vmatpush1.bf16.msra.mxu0 %v12931_v57  ;;  %2499 = vmatpush1.bf16.msra.mxu1 %v12932_v60 }
 0x5f5   :  { %2459 = vmatprep.subr.bf16.mxu0 %v12933_v10  ;;  %2500 = vmatprep.subr.bf16.mxu1 %v12934_v18 }
 0x5f8   :  { %2460 = vmatpush1.bf16.msra.mxu0 %v12935_v52  ;;  %2501 = vmatpush1.bf16.msra.mxu1 %v12936_v25 }
 0x5f9   :  { %2461 = vmatprep.subr.bf16.mxu0 %v13025_v15  ;;  %2502 = vmatprep.subr.bf16.mxu1 %v13026_v7 }
 0x5fc   :  { %2462 = vmatpush1.bf16.msra.mxu0 %v13027_v11  ;;  %2503 = vmatpush1.bf16.msra.mxu1 %v13028_v23 }
 0x5fd   :  { %2463 = vmatprep.subr.bf16.mxu0 %v13029_v13  ;;  %2504 = vmatprep.subr.bf16.mxu1 %v13030_v37 }
 0x600   :  { %2464 = vmatpush1.bf16.msra.mxu0 %v13031_v29  ;;  %2505 = vmatpush1.bf16.msra.mxu1 %v13032_v5 }
 0x601   :  { %2465 = vmatprep.subr.bf16.mxu0 %v13033_v31  ;;  %2506 = vmatprep.subr.bf16.mxu1 %v13122_v34 }
 0x604   :  { %2466 = vmatpush1.bf16.msra.mxu0 %v13123_v63  ;;  %2507 = vmatpush1.bf16.msra.mxu1 %v13124_v58 }
 0x605   :  { %2467 = vmatprep.subr.bf16.mxu0 %v13125_v54  ;;  %2508 = vmatprep.subr.bf16.mxu1 %v13126_v59 }
 0x608   :  { %2468 = vmatpush1.bf16.msra.mxu0 %v13127_v61  ;;  %2509 = vmatpush1.bf16.msra.mxu1 %v13128_v51 }
 0x609   :  { %2469 = vmatprep.subr.bf16.mxu0 %v13041_v3  ;;  %2510 = vmatprep.subr.bf16.mxu1 %v13042_v33 }
 0x60c   :  { %2470 = vmatpush1.bf16.msra.mxu0 %v13043_v50  ;;  %2511 = vmatpush1.bf16.msra.mxu1 %v13129_v19 }
 0x60d   :  { %2471 = vmatprep.subr.bf16.mxu0 %v13130_v53  ;;  %2512 = vmatprep.subr.bf16.mxu1 %v13046_v6 }
 0x610   :  { %2472 = vmatpush1.bf16.msra.mxu0 %v13047_v39  ;;  %2513 = vmatpush1.bf16.msra.mxu1 %v13048_v17 }
 0x611   :  { %2473 = vmatprep.subr.bf16.mxu0 %v13049_v22  ;;  %2514 = vmatprep.subr.bf16.mxu1 %v13050_v47 }
 0x614   :  { %2474 = vmatpush1.bf16.msra.mxu0 %v13051_v20  ;;  %2515 = vmatpush1.bf16.msra.mxu1 %v12964_v26 }
 0x615   :  { %2475 = vmatprep.subr.bf16.mxu0 %v12965_v42  ;;  %2516 = vmatprep.subr.bf16.mxu1 %v12966_v12 }
 0x618   :  { %2476 = vmatpush1.bf16.msra.mxu0 %v13052_v32  ;;  %2517 = vmatpush1.bf16.msra.mxu1 %v13053_v24 }
 0x619   :  { %2477 = vmatprep.subr.bf16.mxu0 %v12969_v45  ;;  %2518 = vmatprep.subr.bf16.mxu1 %v12970_v16 }
 0x61c   :  { %2478 = vmatpush1.bf16.msra.mxu0 %v12971_v48  ;;  %2519 = vmatpush1.bf16.msra.mxu1 %v12972_v44 }
 0x61d   :  { %2479 = vmatprep.subr.bf16.mxu0 %v12973_v4  ;;  %2520 = vmatprep.subr.bf16.mxu1 %v12974_v30  ;;  %v13211_v30 = vld [vmem:[#allocation101_spill] sm:$0xff]  ;;  %v13212_v4 = vld [vmem:[#allocation111_spill] sm:$0xff] }
 0x620   :  { %2480 = vmatpush1.bf16.msra.mxu0 %v9464_v46  ;;  %2521 = vmatpush1.bf16.msra.mxu1 %v9466_v43  ;;  %v13210_v43 = vld [vmem:[#allocation116_spill] sm:$0xff] }
 0x621   :  { %2481 = vmatprep.subr.bf16.mxu0 %v13131_v55  ;;  %2522 = vmatprep.subr.bf16.mxu1 %v13132_v62  ;;  %v13142_v55 = vld [vmem:[#allocation204_spill] sm:$0xff]  ;;  %v13143_v62 = vld [vmem:[#allocation19_spill] sm:$0xff] }
 0x624   :  { %2482 = vmatpush1.bf16.msra.mxu0 %v13133_v27  ;;  %2523 = vmatpush1.bf16.msra.mxu1 %v13134_v9  ;;  %v13144_v27 = vld [vmem:[#allocation20_spill] sm:$0xff] }
 0x625   :  { %2483 = vmatprep.subr.bf16.mxu0 %v13135_v35  ;;  %2524 = vmatprep.subr.bf16.mxu1 %v13136_v40  ;;  %v13145_v40 = vld [vmem:[#allocation21_spill] sm:$0xff]  ;;  %v13154_v35 = vld [vmem:[#allocation30_spill] sm:$0xff]  ;;  %v13209_v9 = vld [vmem:[#allocation88_spill] sm:$0xff] }
 0x628   :  { %2484 = vmatpush1.bf16.msra.mxu0 %v13137_v56  ;;  %2525 = vmatpush1.bf16.msra.mxu1 %v13138_v8  ;;  %v13146_v56 = vld [vmem:[#allocation22_spill] sm:$0xff]  ;;  %v13147_v8 = vld [vmem:[#allocation23_spill] sm:$0xff] }
 0x629   :  { %2485 = vmatprep.subr.bf16.mxu0 %v13139_v14  ;;  %2526 = vmatprep.subr.bf16.mxu1 %v13140_v41  ;;  %v13148_v14 = vld [vmem:[#allocation24_spill] sm:$0xff]  ;;  %v13149_v41 = vld [vmem:[#allocation25_spill] sm:$0xff] }
 0x62c   :  { %2486 = vmatpush1.bf16.msra.mxu0 %v13141_v36  ;;  %2527 = vmatpush1.bf16.msra.mxu1 %v13142_v55  ;;  %v13150_v36 = vld [vmem:[#allocation26_spill] sm:$0xff]  ;;  %v13151_v55 = vld [vmem:[#allocation27_spill] sm:$0xff] }
 0x62d   :  { %2621 = vmatprep.subr.bf16.mxu0 %v13143_v62  ;;  %2662 = vmatprep.subr.bf16.mxu1 %v13144_v27  ;;  %v13152_v62 = vld [vmem:[#allocation28_spill] sm:$0xff]  ;;  %v13153_v27 = vld [vmem:[#allocation29_spill] sm:$0xff] }
 0x62f   :  { %2488 = vmatmul.mubr.bf16.vlgmr.msra.gmra.mrb[52].mxu0 %v9916_v21  ;;  %2529 = vmatmul.mubr.bf16.vlgmr.msra.gmra.mrb[68].mxu1 %v9916_v21  ;;  %v13155_v21 = vld [vmem:[#allocation31_spill] sm:$0xff] }
 0x630   :  { %2622 = vmatpush1.bf16.msra.mxu0 %v13145_v40  ;;  %2663 = vmatpush1.bf16.msra.mxu1 %v13146_v56  ;;  %v13156_v40 = vld [vmem:[#allocation32_spill] sm:$0xff]  ;;  %v13157_v56 = vld [vmem:[#allocation33_spill] sm:$0xff] }
 0x631   :  { %2623 = vmatprep.subr.bf16.mxu0 %v13147_v8  ;;  %2664 = vmatprep.subr.bf16.mxu1 %v13148_v14  ;;  %v13158_v8 = vld [vmem:[#allocation34_spill] sm:$0xff]  ;;  %v13159_v14 = vld [vmem:[#allocation35_spill] sm:$0xff] }
 0x634   :  { %2624 = vmatpush1.bf16.msra.mxu0 %v13149_v41  ;;  %2665 = vmatpush1.bf16.msra.mxu1 %v13150_v36  ;;  %v13160_v41 = vld [vmem:[#allocation36_spill] sm:$0xff]  ;;  %v13161_v36 = vld [vmem:[#allocation37_spill] sm:$0xff] }
 0x635   :  { %2625 = vmatprep.subr.bf16.mxu0 %v13151_v55  ;;  %2666 = vmatprep.subr.bf16.mxu1 %v13152_v62  ;;  %v13162_v55 = vld [vmem:[#allocation38_spill] sm:$0xff]  ;;  %v13163_v62 = vld [vmem:[#allocation39_spill] sm:$0xff] }
 0x638   :  { %2626 = vmatpush1.bf16.msra.mxu0 %v13153_v27  ;;  %2667 = vmatpush1.bf16.msra.mxu1 %v13154_v35  ;;  %v13164_v27 = vld [vmem:[#allocation40_spill] sm:$0xff]  ;;  %v13165_v35 = vld [vmem:[#allocation41_spill] sm:$0xff] }
 0x639   :  { %2627 = vmatprep.subr.bf16.mxu0 %v13155_v21  ;;  %2668 = vmatprep.subr.bf16.mxu1 %v13156_v40  ;;  %v13166_v21 = vld [vmem:[#allocation42_spill] sm:$0xff]  ;;  %v13167_v40 = vld [vmem:[#allocation43_spill] sm:$0xff] }
 0x63c   :  { %2628 = vmatpush1.bf16.msra.mxu0 %v13157_v56  ;;  %2669 = vmatpush1.bf16.msra.mxu1 %v13158_v8  ;;  %v13168_v56 = vld [vmem:[#allocation44_spill] sm:$0xff]  ;;  %v13169_v8 = vld [vmem:[#allocation45_spill] sm:$0xff] }
 0x63d   :  { %2629 = vmatprep.subr.bf16.mxu0 %v13159_v14  ;;  %2670 = vmatprep.subr.bf16.mxu1 %v13160_v41  ;;  %v13170_v14 = vld [vmem:[#allocation46_spill] sm:$0xff]  ;;  %v13171_v41 = vld [vmem:[#allocation47_spill] sm:$0xff] }
 0x640   :  { %2630 = vmatpush1.bf16.msra.mxu0 %v13161_v36  ;;  %2671 = vmatpush1.bf16.msra.mxu1 %v13162_v55  ;;  %v13172_v36 = vld [vmem:[#allocation48_spill] sm:$0xff]  ;;  %v13173_v55 = vld [vmem:[#allocation49_spill] sm:$0xff] }
 0x641   :  { %2631 = vmatprep.subr.bf16.mxu0 %v13163_v62  ;;  %2672 = vmatprep.subr.bf16.mxu1 %v13164_v27  ;;  %v13174_v62 = vld [vmem:[#allocation50_spill] sm:$0xff]  ;;  %v13175_v27 = vld [vmem:[#allocation51_spill] sm:$0xff] }
 0x644   :  { %2632 = vmatpush1.bf16.msra.mxu0 %v13165_v35  ;;  %2673 = vmatpush1.bf16.msra.mxu1 %v13166_v21  ;;  %v13176_v35 = vld [vmem:[#allocation52_spill] sm:$0xff]  ;;  %v13177_v21 = vld [vmem:[#allocation53_spill] sm:$0xff] }
 0x645   :  { %2633 = vmatprep.subr.bf16.mxu0 %v13167_v40  ;;  %2674 = vmatprep.subr.bf16.mxu1 %v13168_v56  ;;  %v13178_v40 = vld [vmem:[#allocation54_spill] sm:$0xff]  ;;  %v13179_v56 = vld [vmem:[#allocation55_spill] sm:$0xff] }
 0x648   :  { %2634 = vmatpush1.bf16.msra.mxu0 %v13169_v8  ;;  %2675 = vmatpush1.bf16.msra.mxu1 %v13170_v14  ;;  %v13180_v8 = vld [vmem:[#allocation56_spill] sm:$0xff]  ;;  %v13181_v14 = vld [vmem:[#allocation57_spill] sm:$0xff] }
 0x649   :  { %2635 = vmatprep.subr.bf16.mxu0 %v13171_v41  ;;  %2676 = vmatprep.subr.bf16.mxu1 %v13172_v36  ;;  %v13182_v41 = vld [vmem:[#allocation58_spill] sm:$0xff]  ;;  %v13183_v36 = vld [vmem:[#allocation59_spill] sm:$0xff] }
 0x64c   :  { %2636 = vmatpush1.bf16.msra.mxu0 %v13173_v55  ;;  %2677 = vmatpush1.bf16.msra.mxu1 %v13174_v62  ;;  %v13184_v55 = vld [vmem:[#allocation60_spill] sm:$0xff]  ;;  %v13185_v62 = vld [vmem:[#allocation61_spill] sm:$0xff] }
 0x64d   :  { %2637 = vmatprep.subr.bf16.mxu0 %v13175_v27  ;;  %2678 = vmatprep.subr.bf16.mxu1 %v13176_v35  ;;  %v13186_v27 = vld [vmem:[#allocation62_spill] sm:$0xff]  ;;  %v13187_v35 = vld [vmem:[#allocation63_spill] sm:$0xff] }
 0x650   :  { %2638 = vmatpush1.bf16.msra.mxu0 %v13177_v21  ;;  %2679 = vmatpush1.bf16.msra.mxu1 %v13178_v40  ;;  %v13188_v21 = vld [vmem:[#allocation64_spill] sm:$0xff]  ;;  %v13189_v40 = vld [vmem:[#allocation65_spill] sm:$0xff] }
 0x651   :  { %2639 = vmatprep.subr.bf16.mxu0 %v13179_v56  ;;  %2680 = vmatprep.subr.bf16.mxu1 %v13180_v8  ;;  %v13190_v56 = vld [vmem:[#allocation66_spill] sm:$0xff]  ;;  %v13191_v8 = vld [vmem:[#allocation67_spill] sm:$0xff] }
 0x654   :  { %2640 = vmatpush1.bf16.msra.mxu0 %v13181_v14  ;;  %2681 = vmatpush1.bf16.msra.mxu1 %v13182_v41  ;;  %v13192_v14 = vld [vmem:[#allocation68_spill] sm:$0xff]  ;;  %v13193_v41 = vld [vmem:[#allocation69_spill] sm:$0xff] }
 0x655   :  { %2641 = vmatprep.subr.bf16.mxu0 %v13183_v36  ;;  %2682 = vmatprep.subr.bf16.mxu1 %v13184_v55  ;;  %v13194_v36 = vld [vmem:[#allocation70_spill] sm:$0xff]  ;;  %v13195_v55 = vld [vmem:[#allocation71_spill] sm:$0xff] }
 0x658   :  { %2642 = vmatpush1.bf16.msra.mxu0 %v13185_v62  ;;  %2683 = vmatpush1.bf16.msra.mxu1 %v13186_v27  ;;  %v13196_v62 = vld [vmem:[#allocation73_spill] sm:$0xff]  ;;  %v13197_v27 = vld [vmem:[#allocation72_spill] sm:$0xff] }
 0x659   :  { %2643 = vmatprep.subr.bf16.mxu0 %v13187_v35  ;;  %2684 = vmatprep.subr.bf16.mxu1 %v13188_v21  ;;  %v13198_v35 = vld [vmem:[#allocation74_spill] sm:$0xff]  ;;  %v13199_v21 = vld [vmem:[#allocation75_spill] sm:$0xff] }
 0x65c   :  { %2644 = vmatpush1.bf16.msra.mxu0 %v13189_v40  ;;  %2685 = vmatpush1.bf16.msra.mxu1 %v13190_v56  ;;  %v13200_v40 = vld [vmem:[#allocation76_spill] sm:$0xff]  ;;  %v13201_v56 = vld [vmem:[#allocation77_spill] sm:$0xff] }
 0x65d   :  { %2645 = vmatprep.subr.bf16.mxu0 %v13191_v8  ;;  %2686 = vmatprep.subr.bf16.mxu1 %v13192_v14  ;;  %v13202_v8 = vld [vmem:[#allocation78_spill] sm:$0xff]  ;;  %v13203_v14 = vld [vmem:[#allocation79_spill] sm:$0xff] }
 0x660   :  { %2646 = vmatpush1.bf16.msra.mxu0 %v13193_v41  ;;  %2687 = vmatpush1.bf16.msra.mxu1 %v13194_v36  ;;  %v13204_v41 = vld [vmem:[#allocation80_spill] sm:$0xff]  ;;  %v13205_v36 = vld [vmem:[#allocation81_spill] sm:$0xff] }
 0x661   :  { %2647 = vmatprep.subr.bf16.mxu0 %v13195_v55  ;;  %2688 = vmatprep.subr.bf16.mxu1 %v13196_v62  ;;  %v13206_v55 = vld [vmem:[#allocation82_spill] sm:$0xff]  ;;  %v13207_v62 = vld [vmem:[#allocation83_spill] sm:$0xff] }
 0x664   :  { %2648 = vmatpush1.bf16.msra.mxu0 %v13197_v27  ;;  %2689 = vmatpush1.bf16.msra.mxu1 %v13198_v35  ;;  %v13208_v27 = vld [vmem:[#allocation84_spill] sm:$0xff] }
 0x665   :  { %2649 = vmatprep.subr.bf16.mxu0 %v13199_v21  ;;  %2690 = vmatprep.subr.bf16.mxu1 %v13200_v40 }
 0x668   :  { %2650 = vmatpush1.bf16.msra.mxu0 %v13201_v56  ;;  %2691 = vmatpush1.bf16.msra.mxu1 %v13202_v8 }
 0x669   :  { %2651 = vmatprep.subr.bf16.mxu0 %v13203_v14  ;;  %2692 = vmatprep.subr.bf16.mxu1 %v13204_v41 }
 0x66c   :  { %2652 = vmatpush1.bf16.msra.mxu0 %v13205_v36  ;;  %2693 = vmatpush1.bf16.msra.mxu1 %v13206_v55 }
 0x66d   :  { %2703 = vmatprep.subr.bf16.mxu0 %v13207_v62  ;;  %2744 = vmatprep.subr.bf16.mxu1 %v13208_v27 }
 0x6c2   :  { %v2407_v35 = vpop.f32.mrb[48].mxu0  ;;  %v2448_v21 = vpop.f32.mrb[64].mxu1 }
 0x6c3   :  { %v2537_v40 = vadd.f32 %v2407_v35, %v13209_v9  ;;  %v2539_v56 = vadd.f32 %v2448_v21, %v13210_v43  ;;  %v2409_v46 = vpop.f32.mrb[49].mxu0  ;;  %v2450_v8 = vpop.f32.mrb[65].mxu1 }
 0x6c4   :  { %v2538_v14 = vadd.f32 %v2409_v46, %v13211_v30  ;;  %v2540_v41 = vadd.f32 %v2450_v8, %v13212_v4  ;;  %v2411_v44 = vpop.f32.mrb[50].mxu0  ;;  %v2452_v36 = vpop.f32.mrb[66].mxu1 }
 0x6c5   :  { %v2412_v48 = vpop.f32.mrb[51].mxu0  ;;  %v2453_v55 = vpop.f32.mrb[67].mxu1  ;;  %v7518_v16 = vmul.f32 -1.442695, %v2537_v40  ;;  %v7520_v62 = vmul.f32 -1.442695, %v2539_v56 }
 0x6c6   :  { %v7519_v45 = vmul.f32 -1.442695, %v2538_v14  ;;  %v7521_v27 = vmul.f32 -1.442695, %v2540_v41  ;;  %v13213_v36 = vld [vmem:[#allocation120_spill] sm:$0xff]  ;;  %v13214_v41 = vld [vmem:[#allocation137_spill] sm:$0xff] }
 0x6c7   :  { %8134 = vpow2.f32 %v7518_v16  ;;  %v13216_v56 = vld [vmem:[#allocation136_spill] sm:$0xff] }
 0x6c8   :  { %8136 = vpow2.f32 %v7520_v62 }
 0x6c9   :  { %8138 = vpow2.f32 %v7519_v45 }
 0x6ca   :  { %8140 = vpow2.f32 %v7521_v27  ;;  %v13215_v27 = vld [vmem:[#allocation115_spill] sm:$0xff] }
 0x6d1   :  { %v8135_v9 = vpop.eup %8134 }
 0x6d2   :  { %v8137_v43 = vpop.eup %8136  ;;  %v2551_v24 = vadd.f32 1.0, %v8135_v9 }
 0x6d3   :  { %v8139_v35 = vpop.eup %8138  ;;  %v2563_v46 = vadd.f32 1.0, %v8137_v43 }
 0x6d4   :  { %v8141_v21 = vpop.eup %8140  ;;  %v2552_v30 = vadd.f32 1.0, %v8139_v35  ;;  %8142 = vrcp.f32 %v2551_v24 }
 0x6d5   :  { %v2564_v4 = vadd.f32 1.0, %v8141_v21  ;;  %8144 = vrcp.f32 %v2563_v46 }
 0x6d6   :  { %8146 = vrcp.f32 %v2552_v30 }
 0x6d7   :  { %8148 = vrcp.f32 %v2564_v4 }
 0x6de   :  { %v8143_v46 = vpop.eup %8142 }
 0x6df   :  { %v8145_v30 = vpop.eup %8144 }
 0x702   :  { %v2489_v48 = vpop.f32.mrb[52].mxu0  ;;  %v2530_v44 = vpop.f32.mrb[68].mxu1 }
 0x703   :  { %v2541_v55 = vadd.f32 %v2489_v48, %v13213_v36  ;;  %v2543_v16 = vadd.f32 %v2530_v44, %v13214_v41  ;;  %v2491_v62 = vpop.f32.mrb[53].mxu0  ;;  %v2532_v45 = vpop.f32.mrb[69].mxu1  ;;  %v2583_v41 = vmul.f32 %v8145_v30, %v9902_v38  ;;  %v13219_v30 = vld [vmem:[#allocation184_spill] sm:$0xff] }
 0x704   :  { %v2542_v40 = vadd.f32 %v2491_v62, %v13215_v27  ;;  %v2544_v8 = vadd.f32 %v2532_v45, %v13216_v56  ;;  %v2493_v14 = vpop.f32.mrb[54].mxu0  ;;  %v2534_v9 = vpop.f32.mrb[70].mxu1 }
 0x705   :  { %8150 = vtanh.f32 %v2541_v55  ;;  %v7522_v43 = vmul.f32 -1.442695, %v2543_v16  ;;  %v2494_v24 = vpop.f32.mrb[55].mxu0  ;;  %v2535_v35 = vpop.f32.mrb[71].mxu1 }
 0x706   :  { %8152 = vtanh.f32 %v2542_v40  ;;  %v7523_v21 = vmul.f32 -1.442695, %v2544_v8  ;;  %v8147_v48 = vpop.eup %8146 }
 0x707   :  { %8154 = vpow2.f32 %v7522_v43  ;;  %v8149_v44 = vpop.eup %8148 }
 0x708   :  { %8156 = vpow2.f32 %v7523_v21  ;;  %v2584_v27 = vmul.f32 %v8149_v44, %v9904_v28  ;;  %v13221_v44 = vld [vmem:[#allocation186_spill] sm:$0xff] }
 0x70f   :  { %v8151_v36 = vpop.eup %8150 }
 0x710   :  { %v8153_v4 = vpop.eup %8152  ;;  %v2585_v62 = vmul.f32 %v8151_v36, %v8143_v46  ;;  %v13222_v36 = vld [vmem:[#allocation187_spill] sm:$0xff] }
 0x711   :  { %v8155_v45 = vpop.eup %8154  ;;  %v2586_v55 = vmul.f32 %v8153_v4, %v8147_v48  ;;  %v13220_v48 = vld [vmem:[#allocation185_spill] sm:$0xff]  ;;  %v13223_v4 = vld [vmem:[#allocation188_spill] sm:$0xff] }
 0x712   :  { %v8157_v16 = vpop.eup %8156  ;;  %v10060_v56 = vadd.f32 %v2585_v62, %v2583_v41  ;;  %v2577_v40 = vadd.f32 1.0, %v8155_v45  ;;  %v13224_v41 = vld [vmem:[#allocation189_spill] sm:$0xff]  ;;  %v13225_v62 = vld [vmem:[#allocation190_spill] sm:$0xff]  ;;  %v13226_v45 = vld [vmem:[#allocation191_spill] sm:$0xff] }
 0x713   :  { %v10062_v8 = vadd.f32 %v2586_v55, %v2584_v27  ;;  %v2578_v14 = vadd.f32 1.0, %v8157_v16  ;;  %v13227_v27 = vld [vmem:[#allocation192_spill] sm:$0xff]  ;;  %v13228_v55 = vld [vmem:[#allocation193_spill] sm:$0xff]  ;;  %v13229_v16 = vld [vmem:[#allocation194_spill] sm:$0xff] }
 0x714   :  { %8158 = vtanh.f32 %v10060_v56 }
 0x715   :  { %8160 = vrcp.f32 %v2577_v40  ;;  %v13230_v40 = vld [vmem:[#allocation195_spill] sm:$0xff] }
 0x716   :  { %8162 = vtanh.f32 %v10062_v8 }
 0x717   :  { %8164 = vrcp.f32 %v2578_v14  ;;  %v13231_v14 = vld [vmem:[#allocation196_spill] sm:$0xff] }
 0x71e   :  { %v8159_v9 = vpop.eup %8158 }
 0x71f   :  { %v8161_v38 = vpop.eup %8160 }
 0x720   :  { %v8163_v43 = vpop.eup %8162  ;;  %v10066_v35 = vmul.f32 %v8161_v38, %v8159_v9  ;;  %v13232_v9 = vld [vmem:[#allocation197_spill] sm:$0xff]  ;;  %v13233_v38 = vld [vmem:[#allocation198_spill] sm:$0xff] }
 0x721   :  { %v8165_v24 = vpop.eup %8164 }
 0x722   :  { %13217 = vst [vmem:[#allocation128_spill] sm:$0xff] %v10066_v35  ;;  %v10068_v28 = vmul.f32 %v8165_v24, %v8163_v43  ;;  %v10074_v46 = vpack.c.bf16 %v10066_v35, %v10066_v35  ;;  %v13234_v43 = vld [vmem:[#allocation199_spill] sm:$0xff]  ;;  %v13235_v24 = vld [vmem:[#allocation200_spill] sm:$0xff]  ;;  %v13237_v35 = vld [vmem:[#allocation202_spill] sm:$0xff] }
 0x724   :  { %13218 = vst [vmem:[#allocation85_spill] sm:$0xff] %v10068_v28  ;;  %v2620_v21 = vpack.c.bf16 %v10068_v28, %v10068_v28  ;;  %v13238_v28 = vld [vmem:[#allocation203_spill] sm:$0xff] }
 0x726   :  { %2653 = vmatprep.mubr.bf16.mxu0 %v2620_v21  ;;  %2694 = vmatprep.mubr.bf16.mxu1 %v2620_v21 }
 0x727   :  { %2654 = vmatmul.mubr.bf16.vlgmr.msra.gmra.mrb[56].mxu0 %v10074_v46  ;;  %2695 = vmatmul.mubr.bf16.vlgmr.msra.gmra.mrb[72].mxu1 %v10074_v46 }
 0x728   :  { %2704 = vmatpush1.bf16.msra.mxu0 %v12927_v2  ;;  %2745 = vmatpush1.bf16.msra.mxu1 %v12928_v0 }
 0x729   :  { %2735 = vmatprep.mubr.bf16.mxu0 %v2620_v21  ;;  %2776 = vmatprep.mubr.bf16.mxu1 %v2620_v21  ;;  %v13236_v21 = vld [vmem:[#allocation201_spill] sm:$0xff] }
 0x72a   :  { %2705 = vmatprep.subr.bf16.mxu0 %v12929_v1  ;;  %2746 = vmatprep.subr.bf16.mxu1 %v12930_v49 }
 0x72c   :  { %2706 = vmatpush1.bf16.msra.mxu0 %v12931_v57  ;;  %2747 = vmatpush1.bf16.msra.mxu1 %v12932_v60 }
 0x72d   :  { %2707 = vmatprep.subr.bf16.mxu0 %v12933_v10  ;;  %2748 = vmatprep.subr.bf16.mxu1 %v12934_v18 }
 0x730   :  { %2708 = vmatpush1.bf16.msra.mxu0 %v12935_v52  ;;  %2749 = vmatpush1.bf16.msra.mxu1 %v12936_v25 }
 0x731   :  { %2709 = vmatprep.subr.bf16.mxu0 %v13025_v15  ;;  %2750 = vmatprep.subr.bf16.mxu1 %v13026_v7 }
 0x734   :  { %2710 = vmatpush1.bf16.msra.mxu0 %v13027_v11  ;;  %2751 = vmatpush1.bf16.msra.mxu1 %v13028_v23 }
 0x735   :  { %2711 = vmatprep.subr.bf16.mxu0 %v13029_v13  ;;  %2752 = vmatprep.subr.bf16.mxu1 %v13030_v37 }
 0x738   :  { %2712 = vmatpush1.bf16.msra.mxu0 %v13031_v29  ;;  %2753 = vmatpush1.bf16.msra.mxu1 %v13032_v5 }
 0x739   :  { %2713 = vmatprep.subr.bf16.mxu0 %v13033_v31  ;;  %2754 = vmatprep.subr.bf16.mxu1 %v13122_v34 }
 0x73c   :  { %2714 = vmatpush1.bf16.msra.mxu0 %v13123_v63  ;;  %2755 = vmatpush1.bf16.msra.mxu1 %v13124_v58 }
 0x73d   :  { %2715 = vmatprep.subr.bf16.mxu0 %v13125_v54  ;;  %2756 = vmatprep.subr.bf16.mxu1 %v13126_v59 }
 0x740   :  { %2716 = vmatpush1.bf16.msra.mxu0 %v13127_v61  ;;  %2757 = vmatpush1.bf16.msra.mxu1 %v13128_v51 }
 0x741   :  { %2717 = vmatprep.subr.bf16.mxu0 %v13041_v3  ;;  %2758 = vmatprep.subr.bf16.mxu1 %v13042_v33 }
 0x744   :  { %2718 = vmatpush1.bf16.msra.mxu0 %v13043_v50  ;;  %2759 = vmatpush1.bf16.msra.mxu1 %v13129_v19 }
 0x745   :  { %2719 = vmatprep.subr.bf16.mxu0 %v13130_v53  ;;  %2760 = vmatprep.subr.bf16.mxu1 %v13046_v6 }
 0x748   :  { %2720 = vmatpush1.bf16.msra.mxu0 %v13047_v39  ;;  %2761 = vmatpush1.bf16.msra.mxu1 %v13048_v17 }
 0x749   :  { %2721 = vmatprep.subr.bf16.mxu0 %v13049_v22  ;;  %2762 = vmatprep.subr.bf16.mxu1 %v13050_v47 }
 0x74c   :  { %2722 = vmatpush1.bf16.msra.mxu0 %v13051_v20  ;;  %2763 = vmatpush1.bf16.msra.mxu1 %v12964_v26 }
 0x74d   :  { %2723 = vmatprep.subr.bf16.mxu0 %v12965_v42  ;;  %2764 = vmatprep.subr.bf16.mxu1 %v12966_v12 }
 0x750   :  { %2724 = vmatpush1.bf16.msra.mxu0 %v13052_v32  ;;  %2765 = vmatpush1.bf16.msra.mxu1 %v13219_v30 }
 0x751   :  { %2725 = vmatprep.subr.bf16.mxu0 %v13220_v48  ;;  %2766 = vmatprep.subr.bf16.mxu1 %v13221_v44 }
 0x754   :  { %2726 = vmatpush1.bf16.msra.mxu0 %v13222_v36  ;;  %2767 = vmatpush1.bf16.msra.mxu1 %v13223_v4 }
 0x755   :  { %2727 = vmatprep.subr.bf16.mxu0 %v13224_v41  ;;  %2768 = vmatprep.subr.bf16.mxu1 %v13225_v62  ;;  %v13308_v62 = vld [vmem:[#allocation99_spill] sm:$0xff]  ;;  %v13309_v41 = vld [vmem:[#allocation109_spill] sm:$0xff] }
 0x758   :  { %2728 = vmatpush1.bf16.msra.mxu0 %v13226_v45  ;;  %2769 = vmatpush1.bf16.msra.mxu1 %v13227_v27  ;;  %v13307_v27 = vld [vmem:[#allocation118_spill] sm:$0xff] }
 0x759   :  { %2729 = vmatprep.subr.bf16.mxu0 %v13228_v55  ;;  %2770 = vmatprep.subr.bf16.mxu1 %v13229_v16  ;;  %v13239_v55 = vld [vmem:[#allocation204_spill] sm:$0xff]  ;;  %v13240_v16 = vld [vmem:[#allocation19_spill] sm:$0xff] }
 0x75c   :  { %2730 = vmatpush1.bf16.msra.mxu0 %v13230_v40  ;;  %2771 = vmatpush1.bf16.msra.mxu1 %v13231_v14  ;;  %v13241_v40 = vld [vmem:[#allocation20_spill] sm:$0xff]  ;;  %v13306_v14 = vld [vmem:[#allocation90_spill] sm:$0xff] }
 0x75d   :  { %2731 = vmatprep.subr.bf16.mxu0 %v13232_v9  ;;  %2772 = vmatprep.subr.bf16.mxu1 %v13233_v38  ;;  %v13242_v38 = vld [vmem:[#allocation21_spill] sm:$0xff]  ;;  %v13251_v9 = vld [vmem:[#allocation30_spill] sm:$0xff] }
 0x760   :  { %2732 = vmatpush1.bf16.msra.mxu0 %v13234_v43  ;;  %2773 = vmatpush1.bf16.msra.mxu1 %v13235_v24  ;;  %v13243_v43 = vld [vmem:[#allocation22_spill] sm:$0xff]  ;;  %v13244_v24 = vld [vmem:[#allocation23_spill] sm:$0xff] }
 0x761   :  { %2733 = vmatprep.subr.bf16.mxu0 %v13236_v21  ;;  %2774 = vmatprep.subr.bf16.mxu1 %v13237_v35  ;;  %v13245_v21 = vld [vmem:[#allocation24_spill] sm:$0xff]  ;;  %v13246_v35 = vld [vmem:[#allocation25_spill] sm:$0xff] }
 0x764   :  { %2734 = vmatpush1.bf16.msra.mxu0 %v13238_v28  ;;  %2775 = vmatpush1.bf16.msra.mxu1 %v13239_v55  ;;  %v13247_v28 = vld [vmem:[#allocation26_spill] sm:$0xff]  ;;  %v13248_v55 = vld [vmem:[#allocation27_spill] sm:$0xff] }
 0x765   :  { %2869 = vmatprep.subr.bf16.mxu0 %v13240_v16  ;;  %2910 = vmatprep.subr.bf16.mxu1 %v13241_v40  ;;  %v13249_v16 = vld [vmem:[#allocation28_spill] sm:$0xff]  ;;  %v13250_v40 = vld [vmem:[#allocation29_spill] sm:$0xff] }
 0x767   :  { %2736 = vmatmul.mubr.bf16.vlgmr.msra.gmra.mrb[60].mxu0 %v10074_v46  ;;  %2777 = vmatmul.mubr.bf16.vlgmr.msra.gmra.mrb[76].mxu1 %v10074_v46  ;;  %v13252_v46 = vld [vmem:[#allocation31_spill] sm:$0xff] }
 0x768   :  { %2870 = vmatpush1.bf16.msra.mxu0 %v13242_v38  ;;  %2911 = vmatpush1.bf16.msra.mxu1 %v13243_v43  ;;  %v13253_v38 = vld [vmem:[#allocation32_spill] sm:$0xff]  ;;  %v13254_v43 = vld [vmem:[#allocation33_spill] sm:$0xff] }
 0x769   :  { %2871 = vmatprep.subr.bf16.mxu0 %v13244_v24  ;;  %2912 = vmatprep.subr.bf16.mxu1 %v13245_v21  ;;  %v13255_v24 = vld [vmem:[#allocation34_spill] sm:$0xff]  ;;  %v13256_v21 = vld [vmem:[#allocation35_spill] sm:$0xff] }
 0x76c   :  { %2872 = vmatpush1.bf16.msra.mxu0 %v13246_v35  ;;  %2913 = vmatpush1.bf16.msra.mxu1 %v13247_v28  ;;  %v13257_v35 = vld [vmem:[#allocation36_spill] sm:$0xff]  ;;  %v13258_v28 = vld [vmem:[#allocation37_spill] sm:$0xff] }
 0x76d   :  { %2873 = vmatprep.subr.bf16.mxu0 %v13248_v55  ;;  %2914 = vmatprep.subr.bf16.mxu1 %v13249_v16  ;;  %v13259_v55 = vld [vmem:[#allocation38_spill] sm:$0xff]  ;;  %v13260_v16 = vld [vmem:[#allocation39_spill] sm:$0xff] }
 0x770   :  { %2874 = vmatpush1.bf16.msra.mxu0 %v13250_v40  ;;  %2915 = vmatpush1.bf16.msra.mxu1 %v13251_v9  ;;  %v13261_v40 = vld [vmem:[#allocation40_spill] sm:$0xff]  ;;  %v13262_v9 = vld [vmem:[#allocation41_spill] sm:$0xff] }
 0x771   :  { %2875 = vmatprep.subr.bf16.mxu0 %v13252_v46  ;;  %2916 = vmatprep.subr.bf16.mxu1 %v13253_v38  ;;  %v13263_v46 = vld [vmem:[#allocation42_spill] sm:$0xff]  ;;  %v13264_v38 = vld [vmem:[#allocation43_spill] sm:$0xff] }
 0x774   :  { %2876 = vmatpush1.bf16.msra.mxu0 %v13254_v43  ;;  %2917 = vmatpush1.bf16.msra.mxu1 %v13255_v24  ;;  %v13265_v43 = vld [vmem:[#allocation44_spill] sm:$0xff]  ;;  %v13266_v24 = vld [vmem:[#allocation45_spill] sm:$0xff] }
 0x775   :  { %2877 = vmatprep.subr.bf16.mxu0 %v13256_v21  ;;  %2918 = vmatprep.subr.bf16.mxu1 %v13257_v35  ;;  %v13267_v21 = vld [vmem:[#allocation46_spill] sm:$0xff]  ;;  %v13268_v35 = vld [vmem:[#allocation47_spill] sm:$0xff] }
 0x778   :  { %2878 = vmatpush1.bf16.msra.mxu0 %v13258_v28  ;;  %2919 = vmatpush1.bf16.msra.mxu1 %v13259_v55  ;;  %v13269_v28 = vld [vmem:[#allocation48_spill] sm:$0xff]  ;;  %v13270_v55 = vld [vmem:[#allocation49_spill] sm:$0xff] }
 0x779   :  { %2879 = vmatprep.subr.bf16.mxu0 %v13260_v16  ;;  %2920 = vmatprep.subr.bf16.mxu1 %v13261_v40  ;;  %v13271_v16 = vld [vmem:[#allocation50_spill] sm:$0xff]  ;;  %v13272_v40 = vld [vmem:[#allocation51_spill] sm:$0xff] }
 0x77c   :  { %2880 = vmatpush1.bf16.msra.mxu0 %v13262_v9  ;;  %2921 = vmatpush1.bf16.msra.mxu1 %v13263_v46  ;;  %v13273_v9 = vld [vmem:[#allocation52_spill] sm:$0xff]  ;;  %v13274_v46 = vld [vmem:[#allocation53_spill] sm:$0xff] }
 0x77d   :  { %2881 = vmatprep.subr.bf16.mxu0 %v13264_v38  ;;  %2922 = vmatprep.subr.bf16.mxu1 %v13265_v43  ;;  %v13275_v38 = vld [vmem:[#allocation54_spill] sm:$0xff]  ;;  %v13276_v43 = vld [vmem:[#allocation55_spill] sm:$0xff] }
 0x780   :  { %2882 = vmatpush1.bf16.msra.mxu0 %v13266_v24  ;;  %2923 = vmatpush1.bf16.msra.mxu1 %v13267_v21  ;;  %v13277_v24 = vld [vmem:[#allocation56_spill] sm:$0xff]  ;;  %v13278_v21 = vld [vmem:[#allocation57_spill] sm:$0xff] }
 0x781   :  { %2883 = vmatprep.subr.bf16.mxu0 %v13268_v35  ;;  %2924 = vmatprep.subr.bf16.mxu1 %v13269_v28  ;;  %v13279_v35 = vld [vmem:[#allocation58_spill] sm:$0xff]  ;;  %v13280_v28 = vld [vmem:[#allocation59_spill] sm:$0xff] }
 0x784   :  { %2884 = vmatpush1.bf16.msra.mxu0 %v13270_v55  ;;  %2925 = vmatpush1.bf16.msra.mxu1 %v13271_v16  ;;  %v13281_v55 = vld [vmem:[#allocation60_spill] sm:$0xff]  ;;  %v13282_v16 = vld [vmem:[#allocation61_spill] sm:$0xff] }
 0x785   :  { %2885 = vmatprep.subr.bf16.mxu0 %v13272_v40  ;;  %2926 = vmatprep.subr.bf16.mxu1 %v13273_v9  ;;  %v13283_v40 = vld [vmem:[#allocation62_spill] sm:$0xff]  ;;  %v13284_v9 = vld [vmem:[#allocation63_spill] sm:$0xff] }
 0x788   :  { %2886 = vmatpush1.bf16.msra.mxu0 %v13274_v46  ;;  %2927 = vmatpush1.bf16.msra.mxu1 %v13275_v38  ;;  %v13285_v46 = vld [vmem:[#allocation64_spill] sm:$0xff]  ;;  %v13286_v38 = vld [vmem:[#allocation65_spill] sm:$0xff] }
 0x789   :  { %2887 = vmatprep.subr.bf16.mxu0 %v13276_v43  ;;  %2928 = vmatprep.subr.bf16.mxu1 %v13277_v24  ;;  %v13287_v43 = vld [vmem:[#allocation66_spill] sm:$0xff]  ;;  %v13288_v24 = vld [vmem:[#allocation67_spill] sm:$0xff] }
 0x78c   :  { %2888 = vmatpush1.bf16.msra.mxu0 %v13278_v21  ;;  %2929 = vmatpush1.bf16.msra.mxu1 %v13279_v35  ;;  %v13289_v21 = vld [vmem:[#allocation68_spill] sm:$0xff]  ;;  %v13290_v35 = vld [vmem:[#allocation69_spill] sm:$0xff] }
 0x78d   :  { %2889 = vmatprep.subr.bf16.mxu0 %v13280_v28  ;;  %2930 = vmatprep.subr.bf16.mxu1 %v13281_v55  ;;  %v13291_v28 = vld [vmem:[#allocation70_spill] sm:$0xff]  ;;  %v13292_v55 = vld [vmem:[#allocation71_spill] sm:$0xff] }
 0x790   :  { %2890 = vmatpush1.bf16.msra.mxu0 %v13282_v16  ;;  %2931 = vmatpush1.bf16.msra.mxu1 %v13283_v40  ;;  %v13293_v16 = vld [vmem:[#allocation73_spill] sm:$0xff]  ;;  %v13294_v40 = vld [vmem:[#allocation72_spill] sm:$0xff] }
 0x791   :  { %2891 = vmatprep.subr.bf16.mxu0 %v13284_v9  ;;  %2932 = vmatprep.subr.bf16.mxu1 %v13285_v46  ;;  %v13295_v9 = vld [vmem:[#allocation74_spill] sm:$0xff]  ;;  %v13296_v46 = vld [vmem:[#allocation75_spill] sm:$0xff] }
 0x794   :  { %2892 = vmatpush1.bf16.msra.mxu0 %v13286_v38  ;;  %2933 = vmatpush1.bf16.msra.mxu1 %v13287_v43  ;;  %v13297_v38 = vld [vmem:[#allocation76_spill] sm:$0xff]  ;;  %v13298_v43 = vld [vmem:[#allocation77_spill] sm:$0xff] }
 0x795   :  { %2893 = vmatprep.subr.bf16.mxu0 %v13288_v24  ;;  %2934 = vmatprep.subr.bf16.mxu1 %v13289_v21  ;;  %v13299_v24 = vld [vmem:[#allocation78_spill] sm:$0xff]  ;;  %v13300_v21 = vld [vmem:[#allocation79_spill] sm:$0xff] }
 0x798   :  { %2894 = vmatpush1.bf16.msra.mxu0 %v13290_v35  ;;  %2935 = vmatpush1.bf16.msra.mxu1 %v13291_v28  ;;  %v13301_v35 = vld [vmem:[#allocation80_spill] sm:$0xff]  ;;  %v13302_v28 = vld [vmem:[#allocation81_spill] sm:$0xff] }
 0x799   :  { %2895 = vmatprep.subr.bf16.mxu0 %v13292_v55  ;;  %2936 = vmatprep.subr.bf16.mxu1 %v13293_v16  ;;  %v13303_v55 = vld [vmem:[#allocation82_spill] sm:$0xff]  ;;  %v13304_v16 = vld [vmem:[#allocation83_spill] sm:$0xff] }
 0x79c   :  { %2896 = vmatpush1.bf16.msra.mxu0 %v13294_v40  ;;  %2937 = vmatpush1.bf16.msra.mxu1 %v13295_v9  ;;  %v13305_v40 = vld [vmem:[#allocation84_spill] sm:$0xff] }
 0x79d   :  { %2897 = vmatprep.subr.bf16.mxu0 %v13296_v46  ;;  %2938 = vmatprep.subr.bf16.mxu1 %v13297_v38 }
 0x7a0   :  { %2898 = vmatpush1.bf16.msra.mxu0 %v13298_v43  ;;  %2939 = vmatpush1.bf16.msra.mxu1 %v13299_v24 }
 0x7a1   :  { %2899 = vmatprep.subr.bf16.mxu0 %v13300_v21  ;;  %2940 = vmatprep.subr.bf16.mxu1 %v13301_v35 }
 0x7a4   :  { %2900 = vmatpush1.bf16.msra.mxu0 %v13302_v28  ;;  %2941 = vmatpush1.bf16.msra.mxu1 %v13303_v55 }
 0x7a5   :  { %2951 = vmatprep.subr.bf16.mxu0 %v13304_v16  ;;  %2992 = vmatprep.subr.bf16.mxu1 %v13305_v40 }
 0x7fa   :  { %v2655_v9 = vpop.f32.mrb[56].mxu0  ;;  %v2696_v46 = vpop.f32.mrb[72].mxu1 }
 0x7fb   :  { %v2785_v38 = vadd.f32 %v2655_v9, %v13306_v14  ;;  %v2787_v43 = vadd.f32 %v2696_v46, %v13307_v27  ;;  %v2657_v45 = vpop.f32.mrb[57].mxu0  ;;  %v2698_v24 = vpop.f32.mrb[73].mxu1 }
 0x7fc   :  { %v2786_v21 = vadd.f32 %v2657_v45, %v13308_v62  ;;  %v2788_v35 = vadd.f32 %v2698_v24, %v13309_v41  ;;  %v2659_v4 = vpop.f32.mrb[58].mxu0  ;;  %v2700_v28 = vpop.f32.mrb[74].mxu1 }
 0x7fd   :  { %v2660_v36 = vpop.f32.mrb[59].mxu0  ;;  %v2701_v55 = vpop.f32.mrb[75].mxu1  ;;  %v7524_v44 = vmul.f32 -1.442695, %v2785_v38  ;;  %v7526_v16 = vmul.f32 -1.442695, %v2787_v43 }
 0x7fe   :  { %v7525_v48 = vmul.f32 -1.442695, %v2786_v21  ;;  %v7527_v40 = vmul.f32 -1.442695, %v2788_v35  ;;  %v13310_v4 = vld [vmem:[#allocation122_spill] sm:$0xff]  ;;  %v13311_v35 = vld [vmem:[#allocation139_spill] sm:$0xff] }
 0x7ff   :  { %8166 = vpow2.f32 %v7524_v44  ;;  %v13313_v43 = vld [vmem:[#allocation134_spill] sm:$0xff] }
 0x800   :  { %8168 = vpow2.f32 %v7526_v16 }
 0x801   :  { %8170 = vpow2.f32 %v7525_v48 }
 0x802   :  { %8172 = vpow2.f32 %v7527_v40  ;;  %v13312_v40 = vld [vmem:[#allocation113_spill] sm:$0xff] }
 0x809   :  { %v8167_v14 = vpop.eup %8166 }
 0x80a   :  { %v8169_v27 = vpop.eup %8168  ;;  %v2799_v30 = vadd.f32 1.0, %v8167_v14 }
 0x80b   :  { %v8171_v9 = vpop.eup %8170  ;;  %v2811_v62 = vadd.f32 1.0, %v8169_v27 }
 0x80c   :  { %v8173_v46 = vpop.eup %8172  ;;  %v2800_v45 = vadd.f32 1.0, %v8171_v9  ;;  %8174 = vrcp.f32 %v2799_v30 }
 0x80d   :  { %v2812_v41 = vadd.f32 1.0, %v8173_v46  ;;  %8176 = vrcp.f32 %v2811_v62 }
 0x80e   :  { %8178 = vrcp.f32 %v2800_v45 }
 0x80f   :  { %8180 = vrcp.f32 %v2812_v41 }
 0x816   :  { %v8175_v62 = vpop.eup %8174 }
 0x817   :  { %v8177_v45 = vpop.eup %8176 }
 0x83a   :  { %v2737_v28 = vpop.f32.mrb[60].mxu0  ;;  %v2778_v36 = vpop.f32.mrb[76].mxu1 }
 0x83b   :  { %v2789_v55 = vadd.f32 %v2737_v28, %v13310_v4  ;;  %v2791_v44 = vadd.f32 %v2778_v36, %v13311_v35  ;;  %v2739_v16 = vpop.f32.mrb[61].mxu0  ;;  %v2780_v48 = vpop.f32.mrb[77].mxu1  ;;  %v2831_v35 = vmul.f32 %v8177_v45, %v10060_v56  ;;  %v13316_v45 = vld [vmem:[#allocation184_spill] sm:$0xff] }
 0x83c   :  { %v2790_v38 = vadd.f32 %v2739_v16, %v13312_v40  ;;  %v2792_v24 = vadd.f32 %v2780_v48, %v13313_v43  ;;  %v2741_v21 = vpop.f32.mrb[62].mxu0  ;;  %v2782_v14 = vpop.f32.mrb[78].mxu1 }
 0x83d   :  { %8182 = vtanh.f32 %v2789_v55  ;;  %v7528_v27 = vmul.f32 -1.442695, %v2791_v44  ;;  %v2742_v30 = vpop.f32.mrb[63].mxu0  ;;  %v2783_v9 = vpop.f32.mrb[79].mxu1 }
 0x83e   :  { %8184 = vtanh.f32 %v2790_v38  ;;  %v7529_v46 = vmul.f32 -1.442695, %v2792_v24  ;;  %v8179_v28 = vpop.eup %8178 }
 0x83f   :  { %8186 = vpow2.f32 %v7528_v27  ;;  %v8181_v36 = vpop.eup %8180 }
 0x840   :  { %8188 = vpow2.f32 %v7529_v46  ;;  %v2832_v40 = vmul.f32 %v8181_v36, %v10062_v8  ;;  %v13318_v36 = vld [vmem:[#allocation186_spill] sm:$0xff] }
 0x847   :  { %v8183_v4 = vpop.eup %8182 }
 0x848   :  { %v8185_v41 = vpop.eup %8184  ;;  %v2833_v16 = vmul.f32 %v8183_v4, %v8175_v62  ;;  %v13319_v4 = vld [vmem:[#allocation187_spill] sm:$0xff] }
 0x849   :  { %v8187_v48 = vpop.eup %8186  ;;  %v2834_v55 = vmul.f32 %v8185_v41, %v8179_v28  ;;  %v13317_v28 = vld [vmem:[#allocation185_spill] sm:$0xff]  ;;  %v13320_v41 = vld [vmem:[#allocation188_spill] sm:$0xff] }
 0x84a   :  { %v8189_v44 = vpop.eup %8188  ;;  %v10218_v43 = vadd.f32 %v2833_v16, %v2831_v35  ;;  %v2825_v38 = vadd.f32 1.0, %v8187_v48  ;;  %v13321_v35 = vld [vmem:[#allocation189_spill] sm:$0xff]  ;;  %v13322_v16 = vld [vmem:[#allocation190_spill] sm:$0xff]  ;;  %v13323_v48 = vld [vmem:[#allocation191_spill] sm:$0xff] }
 0x84b   :  { %v10220_v24 = vadd.f32 %v2834_v55, %v2832_v40  ;;  %v2826_v21 = vadd.f32 1.0, %v8189_v44  ;;  %v13324_v40 = vld [vmem:[#allocation192_spill] sm:$0xff]  ;;  %v13325_v55 = vld [vmem:[#allocation193_spill] sm:$0xff]  ;;  %v13326_v44 = vld [vmem:[#allocation194_spill] sm:$0xff] }
 0x84c   :  { %8190 = vtanh.f32 %v10218_v43 }
 0x84d   :  { %8192 = vrcp.f32 %v2825_v38  ;;  %v13327_v38 = vld [vmem:[#allocation195_spill] sm:$0xff] }
 0x84e   :  { %8194 = vtanh.f32 %v10220_v24 }
 0x84f   :  { %8196 = vrcp.f32 %v2826_v21  ;;  %v13328_v21 = vld [vmem:[#allocation196_spill] sm:$0xff] }
 0x856   :  { %v8191_v14 = vpop.eup %8190 }
 0x857   :  { %v8193_v56 = vpop.eup %8192 }
 0x858   :  { %v8195_v27 = vpop.eup %8194  ;;  %v10224_v9 = vmul.f32 %v8193_v56, %v8191_v14  ;;  %v13329_v14 = vld [vmem:[#allocation197_spill] sm:$0xff]  ;;  %v13330_v56 = vld [vmem:[#allocation198_spill] sm:$0xff] }
 0x859   :  { %v8197_v30 = vpop.eup %8196 }
 0x85a   :  { %13314 = vst [vmem:[#allocation86_spill] sm:$0xff] %v10224_v9  ;;  %v10226_v8 = vmul.f32 %v8197_v30, %v8195_v27  ;;  %v10232_v62 = vpack.c.bf16 %v10224_v9, %v10224_v9  ;;  %v13331_v27 = vld [vmem:[#allocation199_spill] sm:$0xff]  ;;  %v13332_v30 = vld [vmem:[#allocation200_spill] sm:$0xff]  ;;  %v13334_v9 = vld [vmem:[#allocation202_spill] sm:$0xff] }
 0x85c   :  { %13315 = vst [vmem:[#allocation145_spill] sm:$0xff] %v10226_v8  ;;  %v2868_v46 = vpack.c.bf16 %v10226_v8, %v10226_v8  ;;  %v13335_v8 = vld [vmem:[#allocation203_spill] sm:$0xff] }
 0x85e   :  { %2901 = vmatprep.mubr.bf16.mxu0 %v2868_v46  ;;  %2942 = vmatprep.mubr.bf16.mxu1 %v2868_v46 }
 0x85f   :  { %2902 = vmatmul.mubr.bf16.vlgmr.msra.gmra.mrb[64].mxu0 %v10232_v62  ;;  %2943 = vmatmul.mubr.bf16.vlgmr.msra.gmra.mrb[80].mxu1 %v10232_v62 }
 0x860   :  { %2952 = vmatpush1.bf16.msra.mxu0 %v12927_v2  ;;  %2993 = vmatpush1.bf16.msra.mxu1 %v12928_v0 }
 0x861   :  { %2983 = vmatprep.mubr.bf16.mxu0 %v2868_v46  ;;  %3024 = vmatprep.mubr.bf16.mxu1 %v2868_v46  ;;  %v13333_v46 = vld [vmem:[#allocation201_spill] sm:$0xff] }
 0x862   :  { %2953 = vmatprep.subr.bf16.mxu0 %v12929_v1  ;;  %2994 = vmatprep.subr.bf16.mxu1 %v12930_v49 }
 0x864   :  { %2954 = vmatpush1.bf16.msra.mxu0 %v12931_v57  ;;  %2995 = vmatpush1.bf16.msra.mxu1 %v12932_v60 }
 0x865   :  { %2955 = vmatprep.subr.bf16.mxu0 %v12933_v10  ;;  %2996 = vmatprep.subr.bf16.mxu1 %v12934_v18 }
 0x868   :  { %2956 = vmatpush1.bf16.msra.mxu0 %v12935_v52  ;;  %2997 = vmatpush1.bf16.msra.mxu1 %v12936_v25 }
 0x869   :  { %2957 = vmatprep.subr.bf16.mxu0 %v13025_v15  ;;  %2998 = vmatprep.subr.bf16.mxu1 %v13026_v7 }
 0x86c   :  { %2958 = vmatpush1.bf16.msra.mxu0 %v13027_v11  ;;  %2999 = vmatpush1.bf16.msra.mxu1 %v13028_v23 }
 0x86d   :  { %2959 = vmatprep.subr.bf16.mxu0 %v13029_v13  ;;  %3000 = vmatprep.subr.bf16.mxu1 %v13030_v37 }
 0x870   :  { %2960 = vmatpush1.bf16.msra.mxu0 %v13031_v29  ;;  %3001 = vmatpush1.bf16.msra.mxu1 %v13032_v5 }
 0x871   :  { %2961 = vmatprep.subr.bf16.mxu0 %v13033_v31  ;;  %3002 = vmatprep.subr.bf16.mxu1 %v13122_v34 }
 0x874   :  { %2962 = vmatpush1.bf16.msra.mxu0 %v13123_v63  ;;  %3003 = vmatpush1.bf16.msra.mxu1 %v13124_v58 }
 0x875   :  { %2963 = vmatprep.subr.bf16.mxu0 %v13125_v54  ;;  %3004 = vmatprep.subr.bf16.mxu1 %v13126_v59 }
 0x878   :  { %2964 = vmatpush1.bf16.msra.mxu0 %v13127_v61  ;;  %3005 = vmatpush1.bf16.msra.mxu1 %v13128_v51 }
 0x879   :  { %2965 = vmatprep.subr.bf16.mxu0 %v13041_v3  ;;  %3006 = vmatprep.subr.bf16.mxu1 %v13042_v33 }
 0x87c   :  { %2966 = vmatpush1.bf16.msra.mxu0 %v13043_v50  ;;  %3007 = vmatpush1.bf16.msra.mxu1 %v13129_v19 }
 0x87d   :  { %2967 = vmatprep.subr.bf16.mxu0 %v13130_v53  ;;  %3008 = vmatprep.subr.bf16.mxu1 %v13046_v6 }
 0x880   :  { %2968 = vmatpush1.bf16.msra.mxu0 %v13047_v39  ;;  %3009 = vmatpush1.bf16.msra.mxu1 %v13048_v17 }
 0x881   :  { %2969 = vmatprep.subr.bf16.mxu0 %v13049_v22  ;;  %3010 = vmatprep.subr.bf16.mxu1 %v13050_v47 }
 0x884   :  { %2970 = vmatpush1.bf16.msra.mxu0 %v13051_v20  ;;  %3011 = vmatpush1.bf16.msra.mxu1 %v12964_v26 }
 0x885   :  { %2971 = vmatprep.subr.bf16.mxu0 %v12965_v42  ;;  %3012 = vmatprep.subr.bf16.mxu1 %v12966_v12 }
 0x888   :  { %2972 = vmatpush1.bf16.msra.mxu0 %v13052_v32  ;;  %3013 = vmatpush1.bf16.msra.mxu1 %v13316_v45 }
 0x889   :  { %2973 = vmatprep.subr.bf16.mxu0 %v13317_v28  ;;  %3014 = vmatprep.subr.bf16.mxu1 %v13318_v36 }
 0x88c   :  { %2974 = vmatpush1.bf16.msra.mxu0 %v13319_v4  ;;  %3015 = vmatpush1.bf16.msra.mxu1 %v13320_v41 }
 0x88d   :  { %2975 = vmatprep.subr.bf16.mxu0 %v13321_v35  ;;  %3016 = vmatprep.subr.bf16.mxu1 %v13322_v16  ;;  %v13405_v16 = vld [vmem:[#allocation94_spill] sm:$0xff]  ;;  %v13406_v35 = vld [vmem:[#allocation104_spill] sm:$0xff] }
 0x890   :  { %2976 = vmatpush1.bf16.msra.mxu0 %v13323_v48  ;;  %3017 = vmatpush1.bf16.msra.mxu1 %v13324_v40  ;;  %v13404_v40 = vld [vmem:[#allocation124_spill] sm:$0xff] }
 0x891   :  { %2977 = vmatprep.subr.bf16.mxu0 %v13325_v55  ;;  %3018 = vmatprep.subr.bf16.mxu1 %v13326_v44  ;;  %v13336_v55 = vld [vmem:[#allocation204_spill] sm:$0xff]  ;;  %v13337_v44 = vld [vmem:[#allocation19_spill] sm:$0xff] }
 0x894   :  { %2978 = vmatpush1.bf16.msra.mxu0 %v13327_v38  ;;  %3019 = vmatpush1.bf16.msra.mxu1 %v13328_v21  ;;  %v13338_v38 = vld [vmem:[#allocation20_spill] sm:$0xff]  ;;  %v13403_v21 = vld [vmem:[#allocation95_spill] sm:$0xff] }
 0x895   :  { %2979 = vmatprep.subr.bf16.mxu0 %v13329_v14  ;;  %3020 = vmatprep.subr.bf16.mxu1 %v13330_v56  ;;  %v13339_v56 = vld [vmem:[#allocation21_spill] sm:$0xff]  ;;  %v13348_v14 = vld [vmem:[#allocation30_spill] sm:$0xff] }
 0x898   :  { %2980 = vmatpush1.bf16.msra.mxu0 %v13331_v27  ;;  %3021 = vmatpush1.bf16.msra.mxu1 %v13332_v30  ;;  %v13340_v27 = vld [vmem:[#allocation22_spill] sm:$0xff]  ;;  %v13341_v30 = vld [vmem:[#allocation23_spill] sm:$0xff] }
 0x899   :  { %2981 = vmatprep.subr.bf16.mxu0 %v13333_v46  ;;  %3022 = vmatprep.subr.bf16.mxu1 %v13334_v9  ;;  %v13342_v46 = vld [vmem:[#allocation24_spill] sm:$0xff]  ;;  %v13343_v9 = vld [vmem:[#allocation25_spill] sm:$0xff] }
 0x89c   :  { %2982 = vmatpush1.bf16.msra.mxu0 %v13335_v8  ;;  %3023 = vmatpush1.bf16.msra.mxu1 %v13336_v55  ;;  %v13344_v8 = vld [vmem:[#allocation26_spill] sm:$0xff]  ;;  %v13345_v55 = vld [vmem:[#allocation27_spill] sm:$0xff] }
 0x89d   :  { %3117 = vmatprep.subr.bf16.mxu0 %v13337_v44  ;;  %3158 = vmatprep.subr.bf16.mxu1 %v13338_v38  ;;  %v13346_v44 = vld [vmem:[#allocation28_spill] sm:$0xff]  ;;  %v13347_v38 = vld [vmem:[#allocation29_spill] sm:$0xff] }
 0x89f   :  { %2984 = vmatmul.mubr.bf16.vlgmr.msra.gmra.mrb[68].mxu0 %v10232_v62  ;;  %3025 = vmatmul.mubr.bf16.vlgmr.msra.gmra.mrb[84].mxu1 %v10232_v62  ;;  %v13349_v62 = vld [vmem:[#allocation31_spill] sm:$0xff] }
 0x8a0   :  { %3118 = vmatpush1.bf16.msra.mxu0 %v13339_v56  ;;  %3159 = vmatpush1.bf16.msra.mxu1 %v13340_v27  ;;  %v13350_v56 = vld [vmem:[#allocation32_spill] sm:$0xff]  ;;  %v13351_v27 = vld [vmem:[#allocation33_spill] sm:$0xff] }
 0x8a1   :  { %3119 = vmatprep.subr.bf16.mxu0 %v13341_v30  ;;  %3160 = vmatprep.subr.bf16.mxu1 %v13342_v46  ;;  %v13352_v30 = vld [vmem:[#allocation34_spill] sm:$0xff]  ;;  %v13353_v46 = vld [vmem:[#allocation35_spill] sm:$0xff] }
 0x8a4   :  { %3120 = vmatpush1.bf16.msra.mxu0 %v13343_v9  ;;  %3161 = vmatpush1.bf16.msra.mxu1 %v13344_v8  ;;  %v13354_v9 = vld [vmem:[#allocation36_spill] sm:$0xff]  ;;  %v13355_v8 = vld [vmem:[#allocation37_spill] sm:$0xff] }
 0x8a5   :  { %3121 = vmatprep.subr.bf16.mxu0 %v13345_v55  ;;  %3162 = vmatprep.subr.bf16.mxu1 %v13346_v44  ;;  %v13356_v55 = vld [vmem:[#allocation38_spill] sm:$0xff]  ;;  %v13357_v44 = vld [vmem:[#allocation39_spill] sm:$0xff] }
 0x8a8   :  { %3122 = vmatpush1.bf16.msra.mxu0 %v13347_v38  ;;  %3163 = vmatpush1.bf16.msra.mxu1 %v13348_v14  ;;  %v13358_v38 = vld [vmem:[#allocation40_spill] sm:$0xff]  ;;  %v13359_v14 = vld [vmem:[#allocation41_spill] sm:$0xff] }
 0x8a9   :  { %3123 = vmatprep.subr.bf16.mxu0 %v13349_v62  ;;  %3164 = vmatprep.subr.bf16.mxu1 %v13350_v56  ;;  %v13360_v62 = vld [vmem:[#allocation42_spill] sm:$0xff]  ;;  %v13361_v56 = vld [vmem:[#allocation43_spill] sm:$0xff] }
 0x8ac   :  { %3124 = vmatpush1.bf16.msra.mxu0 %v13351_v27  ;;  %3165 = vmatpush1.bf16.msra.mxu1 %v13352_v30  ;;  %v13362_v27 = vld [vmem:[#allocation44_spill] sm:$0xff]  ;;  %v13363_v30 = vld [vmem:[#allocation45_spill] sm:$0xff] }
 0x8ad   :  { %3125 = vmatprep.subr.bf16.mxu0 %v13353_v46  ;;  %3166 = vmatprep.subr.bf16.mxu1 %v13354_v9  ;;  %v13364_v46 = vld [vmem:[#allocation46_spill] sm:$0xff]  ;;  %v13365_v9 = vld [vmem:[#allocation47_spill] sm:$0xff] }
 0x8b0   :  { %3126 = vmatpush1.bf16.msra.mxu0 %v13355_v8  ;;  %3167 = vmatpush1.bf16.msra.mxu1 %v13356_v55  ;;  %v13366_v8 = vld [vmem:[#allocation48_spill] sm:$0xff]  ;;  %v13367_v55 = vld [vmem:[#allocation49_spill] sm:$0xff] }
 0x8b1   :  { %3127 = vmatprep.subr.bf16.mxu0 %v13357_v44  ;;  %3168 = vmatprep.subr.bf16.mxu1 %v13358_v38  ;;  %v13368_v44 = vld [vmem:[#allocation50_spill] sm:$0xff]  ;;  %v13369_v38 = vld [vmem:[#allocation51_spill] sm:$0xff] }
 0x8b4   :  { %3128 = vmatpush1.bf16.msra.mxu0 %v13359_v14  ;;  %3169 = vmatpush1.bf16.msra.mxu1 %v13360_v62  ;;  %v13370_v14 = vld [vmem:[#allocation52_spill] sm:$0xff]  ;;  %v13371_v62 = vld [vmem:[#allocation53_spill] sm:$0xff] }
 0x8b5   :  { %3129 = vmatprep.subr.bf16.mxu0 %v13361_v56  ;;  %3170 = vmatprep.subr.bf16.mxu1 %v13362_v27  ;;  %v13372_v56 = vld [vmem:[#allocation54_spill] sm:$0xff]  ;;  %v13373_v27 = vld [vmem:[#allocation55_spill] sm:$0xff] }
 0x8b8   :  { %3130 = vmatpush1.bf16.msra.mxu0 %v13363_v30  ;;  %3171 = vmatpush1.bf16.msra.mxu1 %v13364_v46  ;;  %v13374_v30 = vld [vmem:[#allocation56_spill] sm:$0xff]  ;;  %v13375_v46 = vld [vmem:[#allocation57_spill] sm:$0xff] }
 0x8b9   :  { %3131 = vmatprep.subr.bf16.mxu0 %v13365_v9  ;;  %3172 = vmatprep.subr.bf16.mxu1 %v13366_v8  ;;  %v13376_v9 = vld [vmem:[#allocation58_spill] sm:$0xff]  ;;  %v13377_v8 = vld [vmem:[#allocation59_spill] sm:$0xff] }
 0x8bc   :  { %3132 = vmatpush1.bf16.msra.mxu0 %v13367_v55  ;;  %3173 = vmatpush1.bf16.msra.mxu1 %v13368_v44  ;;  %v13378_v55 = vld [vmem:[#allocation60_spill] sm:$0xff]  ;;  %v13379_v44 = vld [vmem:[#allocation61_spill] sm:$0xff] }
 0x8bd   :  { %3133 = vmatprep.subr.bf16.mxu0 %v13369_v38  ;;  %3174 = vmatprep.subr.bf16.mxu1 %v13370_v14  ;;  %v13380_v38 = vld [vmem:[#allocation62_spill] sm:$0xff]  ;;  %v13381_v14 = vld [vmem:[#allocation63_spill] sm:$0xff] }
 0x8c0   :  { %3134 = vmatpush1.bf16.msra.mxu0 %v13371_v62  ;;  %3175 = vmatpush1.bf16.msra.mxu1 %v13372_v56  ;;  %v13382_v62 = vld [vmem:[#allocation64_spill] sm:$0xff]  ;;  %v13383_v56 = vld [vmem:[#allocation65_spill] sm:$0xff] }
 0x8c1   :  { %3135 = vmatprep.subr.bf16.mxu0 %v13373_v27  ;;  %3176 = vmatprep.subr.bf16.mxu1 %v13374_v30  ;;  %v13384_v27 = vld [vmem:[#allocation66_spill] sm:$0xff]  ;;  %v13385_v30 = vld [vmem:[#allocation67_spill] sm:$0xff] }
 0x8c4   :  { %3136 = vmatpush1.bf16.msra.mxu0 %v13375_v46  ;;  %3177 = vmatpush1.bf16.msra.mxu1 %v13376_v9  ;;  %v13386_v46 = vld [vmem:[#allocation68_spill] sm:$0xff]  ;;  %v13387_v9 = vld [vmem:[#allocation69_spill] sm:$0xff] }
 0x8c5   :  { %3137 = vmatprep.subr.bf16.mxu0 %v13377_v8  ;;  %3178 = vmatprep.subr.bf16.mxu1 %v13378_v55  ;;  %v13388_v8 = vld [vmem:[#allocation70_spill] sm:$0xff]  ;;  %v13389_v55 = vld [vmem:[#allocation71_spill] sm:$0xff] }
 0x8c8   :  { %3138 = vmatpush1.bf16.msra.mxu0 %v13379_v44  ;;  %3179 = vmatpush1.bf16.msra.mxu1 %v13380_v38  ;;  %v13390_v44 = vld [vmem:[#allocation73_spill] sm:$0xff]  ;;  %v13391_v38 = vld [vmem:[#allocation72_spill] sm:$0xff] }
 0x8c9   :  { %3139 = vmatprep.subr.bf16.mxu0 %v13381_v14  ;;  %3180 = vmatprep.subr.bf16.mxu1 %v13382_v62  ;;  %v13392_v14 = vld [vmem:[#allocation74_spill] sm:$0xff]  ;;  %v13393_v62 = vld [vmem:[#allocation75_spill] sm:$0xff] }
 0x8cc   :  { %3140 = vmatpush1.bf16.msra.mxu0 %v13383_v56  ;;  %3181 = vmatpush1.bf16.msra.mxu1 %v13384_v27  ;;  %v13394_v56 = vld [vmem:[#allocation76_spill] sm:$0xff]  ;;  %v13395_v27 = vld [vmem:[#allocation77_spill] sm:$0xff] }
 0x8cd   :  { %3141 = vmatprep.subr.bf16.mxu0 %v13385_v30  ;;  %3182 = vmatprep.subr.bf16.mxu1 %v13386_v46  ;;  %v13396_v30 = vld [vmem:[#allocation78_spill] sm:$0xff]  ;;  %v13397_v46 = vld [vmem:[#allocation79_spill] sm:$0xff] }
 0x8d0   :  { %3142 = vmatpush1.bf16.msra.mxu0 %v13387_v9  ;;  %3183 = vmatpush1.bf16.msra.mxu1 %v13388_v8  ;;  %v13398_v9 = vld [vmem:[#allocation80_spill] sm:$0xff]  ;;  %v13399_v8 = vld [vmem:[#allocation81_spill] sm:$0xff] }
 0x8d1   :  { %3143 = vmatprep.subr.bf16.mxu0 %v13389_v55  ;;  %3184 = vmatprep.subr.bf16.mxu1 %v13390_v44  ;;  %v13400_v55 = vld [vmem:[#allocation82_spill] sm:$0xff]  ;;  %v13401_v44 = vld [vmem:[#allocation83_spill] sm:$0xff] }
 0x8d4   :  { %3144 = vmatpush1.bf16.msra.mxu0 %v13391_v38  ;;  %3185 = vmatpush1.bf16.msra.mxu1 %v13392_v14  ;;  %v13402_v38 = vld [vmem:[#allocation84_spill] sm:$0xff] }
 0x8d5   :  { %3145 = vmatprep.subr.bf16.mxu0 %v13393_v62  ;;  %3186 = vmatprep.subr.bf16.mxu1 %v13394_v56 }
 0x8d8   :  { %3146 = vmatpush1.bf16.msra.mxu0 %v13395_v27  ;;  %3187 = vmatpush1.bf16.msra.mxu1 %v13396_v30 }
 0x8d9   :  { %3147 = vmatprep.subr.bf16.mxu0 %v13397_v46  ;;  %3188 = vmatprep.subr.bf16.mxu1 %v13398_v9 }
 0x8dc   :  { %3148 = vmatpush1.bf16.msra.mxu0 %v13399_v8  ;;  %3189 = vmatpush1.bf16.msra.mxu1 %v13400_v55 }
 0x8dd   :  { %3199 = vmatprep.subr.bf16.mxu0 %v13401_v44  ;;  %3240 = vmatprep.subr.bf16.mxu1 %v13402_v38 }
 0x932   :  { %v2903_v14 = vpop.f32.mrb[64].mxu0  ;;  %v2944_v62 = vpop.f32.mrb[80].mxu1 }
 0x933   :  { %v3033_v56 = vadd.f32 %v2903_v14, %v13403_v21  ;;  %v3035_v27 = vadd.f32 %v2944_v62, %v13404_v40  ;;  %v2905_v48 = vpop.f32.mrb[65].mxu0  ;;  %v2946_v30 = vpop.f32.mrb[81].mxu1 }
 0x934   :  { %v3034_v46 = vadd.f32 %v2905_v48, %v13405_v16  ;;  %v3036_v9 = vadd.f32 %v2946_v30, %v13406_v35  ;;  %v2907_v41 = vpop.f32.mrb[66].mxu0  ;;  %v2948_v8 = vpop.f32.mrb[82].mxu1  ;;  %v13408_v30 = vld [vmem:[#allocation141_spill] sm:$0xff] }
 0x935   :  { %v2908_v4 = vpop.f32.mrb[67].mxu0  ;;  %v2949_v55 = vpop.f32.mrb[83].mxu1  ;;  %v7530_v36 = vmul.f32 -1.442695, %v3033_v56  ;;  %v7532_v44 = vmul.f32 -1.442695, %v3035_v27 }
 0x936   :  { %v7531_v28 = vmul.f32 -1.442695, %v3034_v46  ;;  %v7533_v38 = vmul.f32 -1.442695, %v3036_v9  ;;  %v13407_v56 = vld [vmem:[#allocation127_spill] sm:$0xff]  ;;  %v13410_v55 = vld [vmem:[#allocation132_spill] sm:$0xff] }
 0x937   :  { %8198 = vpow2.f32 %v7530_v36  ;;  %v13409_v9 = vld [vmem:[#allocation107_spill] sm:$0xff] }
 0x938   :  { %8200 = vpow2.f32 %v7532_v44 }
 0x939   :  { %8202 = vpow2.f32 %v7531_v28 }
 0x93a   :  { %8204 = vpow2.f32 %v7533_v38 }
 0x941   :  { %v8199_v21 = vpop.eup %8198 }
 0x942   :  { %v8201_v40 = vpop.eup %8200  ;;  %v3047_v45 = vadd.f32 1.0, %v8199_v21 }
 0x943   :  { %v8203_v14 = vpop.eup %8202  ;;  %v3059_v16 = vadd.f32 1.0, %v8201_v40 }
 0x944   :  { %v8205_v62 = vpop.eup %8204  ;;  %v3048_v48 = vadd.f32 1.0, %v8203_v14  ;;  %8206 = vrcp.f32 %v3047_v45 }
 0x945   :  { %v3060_v35 = vadd.f32 1.0, %v8205_v62  ;;  %8208 = vrcp.f32 %v3059_v16 }
 0x946   :  { %8210 = vrcp.f32 %v3048_v48 }
 0x947   :  { %8212 = vrcp.f32 %v3060_v35 }
 0x94e   :  { %v8207_v16 = vpop.eup %8206 }
 0x94f   :  { %v8209_v48 = vpop.eup %8208 }
 0x972   :  { %v2985_v4 = vpop.f32.mrb[68].mxu0  ;;  %v3026_v41 = vpop.f32.mrb[84].mxu1 }
 0x973   :  { %v3037_v27 = vadd.f32 %v2985_v4, %v13407_v56  ;;  %v3039_v36 = vadd.f32 %v3026_v41, %v13408_v30  ;;  %v2987_v46 = vpop.f32.mrb[69].mxu0  ;;  %v3028_v28 = vpop.f32.mrb[85].mxu1  ;;  %v3079_v30 = vmul.f32 %v8209_v48, %v10218_v43 }
 0x974   :  { %v3038_v8 = vadd.f32 %v2987_v46, %v13409_v9  ;;  %v3040_v44 = vadd.f32 %v3028_v28, %v13410_v55  ;;  %v2989_v38 = vpop.f32.mrb[70].mxu0  ;;  %v3030_v21 = vpop.f32.mrb[86].mxu1 }
 0x975   :  { %8214 = vtanh.f32 %v3037_v27  ;;  %v7534_v40 = vmul.f32 -1.442695, %v3039_v36  ;;  %v2990_v45 = vpop.f32.mrb[71].mxu0  ;;  %v3031_v14 = vpop.f32.mrb[87].mxu1 }
 0x976   :  { %8216 = vtanh.f32 %v3038_v8  ;;  %v7535_v62 = vmul.f32 -1.442695, %v3040_v44  ;;  %v8211_v4 = vpop.eup %8210 }
 0x977   :  { %8218 = vpow2.f32 %v7534_v40  ;;  %v8213_v41 = vpop.eup %8212 }
 0x978   :  { %8220 = vpow2.f32 %v7535_v62  ;;  %v3080_v9 = vmul.f32 %v8213_v41, %v10220_v24  ;;  %v3387_v41 = vld [vmem:[#allocation9 + $0xc0] sm:$0xff] }
 0x97f   :  { %v8215_v56 = vpop.eup %8214 }
 0x980   :  { %v8217_v35 = vpop.eup %8216  ;;  %v3081_v46 = vmul.f32 %v8215_v56, %v8207_v16  ;;  %v3391_v56 = vld [vmem:[#allocation9 + $0xe0] sm:$0xff] }
 0x981   :  { %v8219_v28 = vpop.eup %8218  ;;  %v3082_v27 = vmul.f32 %v8217_v35, %v8211_v4  ;;  %v3388_v35 = vld [vmem:[#allocation9 + $0xc8] sm:$0xff] }
 0x982   :  { %v8221_v36 = vpop.eup %8220  ;;  %v10376_v55 = vadd.f32 %v3081_v46, %v3079_v30  ;;  %v3073_v8 = vadd.f32 1.0, %v8219_v28  ;;  %v3392_v30 = vld [vmem:[#allocation9 + $0xe8] sm:$0xff] }
 0x983   :  { %v10378_v44 = vadd.f32 %v3082_v27, %v3080_v9  ;;  %v3074_v38 = vadd.f32 1.0, %v8221_v36  ;;  %v7567_v9 = vcombine.high %v3387_v41, %v3391_v56  ;;  %v7569_v27 = vcombine.high %v3388_v35, %v3392_v30  ;;  %v3395_v36 = vld [vmem:[#allocation9 + $0x100] sm:$0xff] }
 0x984   :  { %8222 = vtanh.f32 %v10376_v55 }
 0x985   :  { %8224 = vrcp.f32 %v3073_v8  ;;  %v3399_v8 = vld [vmem:[#allocation9 + $0x120] sm:$0xff] }
 0x986   :  { %8226 = vtanh.f32 %v10378_v44 }
 0x987   :  { %8228 = vrcp.f32 %v3074_v38  ;;  %v3396_v38 = vld [vmem:[#allocation9 + $0x108] sm:$0xff] }
 0x98e   :  { %v8223_v21 = vpop.eup %8222 }
 0x98f   :  { %v8225_v43 = vpop.eup %8224 }
 0x990   :  { %v8227_v40 = vpop.eup %8226  ;;  %v10382_v14 = vmul.f32 %v8225_v43, %v8223_v21  ;;  %v3400_v21 = vld [vmem:[#allocation9 + $0x128] sm:$0xff]  ;;  %v7566_v43 = vcombine.low %v3387_v41, %v3391_v56 }
 0x991   :  { %v8229_v45 = vpop.eup %8228  ;;  %v3444_v41 = vld [vmem:[#allocation9 + $0x288] sm:$0xff] }
 0x992   :  { %v10384_v24 = vmul.f32 %v8229_v45, %v8227_v40  ;;  %v10390_v16 = vpack.c.bf16 %v10382_v14, %v10382_v14  ;;  %v7568_v40 = vcombine.low %v3388_v35, %v3392_v30  ;;  %v7575_v45 = vcombine.high %v3395_v36, %v3399_v8  ;;  %v3448_v35 = vld [vmem:[#allocation9 + $0x2a8] sm:$0xff] }
 0x994   :  { %v3116_v62 = vpack.c.bf16 %v10384_v24, %v10384_v24 }
 0x996   :  { %3149 = vmatprep.mubr.bf16.mxu0 %v3116_v62  ;;  %3190 = vmatprep.mubr.bf16.mxu1 %v3116_v62 }
 0x997   :  { %3150 = vmatmul.mubr.bf16.vlgmr.msra.gmra.mrb[72].mxu0 %v10390_v16  ;;  %3191 = vmatmul.mubr.bf16.vlgmr.msra.gmra.mrb[88].mxu1 %v10390_v16 }
 0x998   :  { %3200 = vmatpush1.bf16.msra.mxu0 %v12927_v2  ;;  %3241 = vmatpush1.bf16.msra.mxu1 %v12928_v0  ;;  %v13411_v2 = vld [vmem:[#allocation184_spill] sm:$0xff]  ;;  %v13412_v0 = vld [vmem:[#allocation185_spill] sm:$0xff] }
 0x999   :  { %3231 = vmatprep.mubr.bf16.mxu0 %v3116_v62  ;;  %3272 = vmatprep.mubr.bf16.mxu1 %v3116_v62  ;;  %v7577_v62 = vcombine.high %v3396_v38, %v3400_v21 }
 0x99a   :  { %3201 = vmatprep.subr.bf16.mxu0 %v12929_v1  ;;  %3242 = vmatprep.subr.bf16.mxu1 %v12930_v49  ;;  %v13413_v1 = vld [vmem:[#allocation186_spill] sm:$0xff]  ;;  %v13414_v49 = vld [vmem:[#allocation187_spill] sm:$0xff] }
 0x99c   :  { %3202 = vmatpush1.bf16.msra.mxu0 %v12931_v57  ;;  %3243 = vmatpush1.bf16.msra.mxu1 %v12932_v60  ;;  %v13415_v57 = vld [vmem:[#allocation188_spill] sm:$0xff]  ;;  %v13416_v60 = vld [vmem:[#allocation189_spill] sm:$0xff] }
 0x99d   :  { %3203 = vmatprep.subr.bf16.mxu0 %v12933_v10  ;;  %3244 = vmatprep.subr.bf16.mxu1 %v12934_v18  ;;  %v13417_v10 = vld [vmem:[#allocation190_spill] sm:$0xff]  ;;  %v13418_v18 = vld [vmem:[#allocation191_spill] sm:$0xff] }
 0x9a0   :  { %3204 = vmatpush1.bf16.msra.mxu0 %v12935_v52  ;;  %3245 = vmatpush1.bf16.msra.mxu1 %v12936_v25  ;;  %v13419_v52 = vld [vmem:[#allocation192_spill] sm:$0xff]  ;;  %v13420_v25 = vld [vmem:[#allocation193_spill] sm:$0xff] }
 0x9a1   :  { %3205 = vmatprep.subr.bf16.mxu0 %v13025_v15  ;;  %3246 = vmatprep.subr.bf16.mxu1 %v13026_v7  ;;  %v13426_v15 = vld [vmem:[#allocation199_spill] sm:$0xff]  ;;  %v13427_v7 = vld [vmem:[#allocation200_spill] sm:$0xff] }
 0x9a4   :  { %3206 = vmatpush1.bf16.msra.mxu0 %v13027_v11  ;;  %3247 = vmatpush1.bf16.msra.mxu1 %v13028_v23  ;;  %v13428_v11 = vld [vmem:[#allocation201_spill] sm:$0xff]  ;;  %v13429_v23 = vld [vmem:[#allocation202_spill] sm:$0xff] }
 0x9a5   :  { %3207 = vmatprep.subr.bf16.mxu0 %v13029_v13  ;;  %3248 = vmatprep.subr.bf16.mxu1 %v13030_v37  ;;  %v13430_v13 = vld [vmem:[#allocation203_spill] sm:$0xff]  ;;  %v13431_v37 = vld [vmem:[#allocation204_spill] sm:$0xff] }
 0x9a8   :  { %3208 = vmatpush1.bf16.msra.mxu0 %v13031_v29  ;;  %3249 = vmatpush1.bf16.msra.mxu1 %v13032_v5  ;;  %v3363_v29 = vld [vmem:[#allocation9] sm:$0xff] }
 0x9a9   :  { %3209 = vmatprep.subr.bf16.mxu0 %v13033_v31  ;;  %3250 = vmatprep.subr.bf16.mxu1 %v13122_v34  ;;  %v3367_v5 = vld [vmem:[#allocation9 + $0x20] sm:$0xff]  ;;  %v3364_v31 = vld [vmem:[#allocation9 + $0x8] sm:$0xff] }
 0x9aa   :  { %v3372_v34 = vld [vmem:[#allocation9 + $0x48] sm:$0xff] }
 0x9ac   :  { %3210 = vmatpush1.bf16.msra.mxu0 %v13123_v63  ;;  %3251 = vmatpush1.bf16.msra.mxu1 %v13124_v58  ;;  %v3376_v63 = vld [vmem:[#allocation9 + $0x68] sm:$0xff]  ;;  %v3379_v58 = vld [vmem:[#allocation9 + $0x80] sm:$0xff] }
 0x9ad   :  { %3211 = vmatprep.subr.bf16.mxu0 %v13125_v54  ;;  %3252 = vmatprep.subr.bf16.mxu1 %v13126_v59  ;;  %v7553_v54 = vcombine.high %v3372_v34, %v3376_v63  ;;  %v3383_v59 = vld [vmem:[#allocation9 + $0xa0] sm:$0xff] }
 0x9ae   :  { %v7559_v48 = vcombine.high %v3379_v58, %v3383_v59  ;;  %v7558_v46 = vcombine.low %v3379_v58, %v3383_v59  ;;  %v3439_v58 = vld [vmem:[#allocation9 + $0x260] sm:$0xff] }
 0x9b0   :  { %3212 = vmatpush1.bf16.msra.mxu0 %v13127_v61  ;;  %3253 = vmatpush1.bf16.msra.mxu1 %v13128_v51  ;;  %v3380_v61 = vld [vmem:[#allocation9 + $0x88] sm:$0xff] }
 0x9b1   :  { %3213 = vmatprep.subr.bf16.mxu0 %v13041_v3  ;;  %3254 = vmatprep.subr.bf16.mxu1 %v13042_v33  ;;  %v3384_v51 = vld [vmem:[#allocation9 + $0xa8] sm:$0xff] }
 0x9b2   :  { %v7561_v4 = vcombine.high %v3380_v61, %v3384_v51  ;;  %v7560_v28 = vcombine.low %v3380_v61, %v3384_v51  ;;  %v3440_v61 = vld [vmem:[#allocation9 + $0x268] sm:$0xff] }
 0x9b4   :  { %3214 = vmatpush1.bf16.msra.mxu0 %v13043_v50  ;;  %3255 = vmatpush1.bf16.msra.mxu1 %v13129_v19  ;;  %v13425_v50 = vld [vmem:[#allocation198_spill] sm:$0xff] }
 0x9b5   :  { %3215 = vmatprep.subr.bf16.mxu0 %v13130_v53  ;;  %3256 = vmatprep.subr.bf16.mxu1 %v13046_v6  ;;  %v7542_v6 = vcombine.low %v3363_v29, %v3367_v5  ;;  %v7552_v53 = vcombine.low %v3372_v34, %v3376_v63  ;;  %v3435_v63 = vld [vmem:[#allocation9 + $0x240] sm:$0xff] }
 0x9b6   :  { %v7615_v59 = vcombine.high %v3435_v63, %v3439_v58  ;;  %v7614_v51 = vcombine.low %v3435_v63, %v3439_v58  ;;  %v10466_v63 = vld [vmem:[#allocation9 + $0x38] sm:$0xff] }
 0x9b8   :  { %3216 = vmatpush1.bf16.msra.mxu0 %v13047_v39  ;;  %3257 = vmatpush1.bf16.msra.mxu1 %v13048_v17  ;;  %v7543_v39 = vcombine.high %v3363_v29, %v3367_v5  ;;  %v3368_v17 = vld [vmem:[#allocation9 + $0x28] sm:$0xff] }
 0x9b9   :  { %3217 = vmatprep.subr.bf16.mxu0 %v13049_v22  ;;  %3258 = vmatprep.subr.bf16.mxu1 %v13050_v47  ;;  %v3371_v22 = vld [vmem:[#allocation9 + $0x40] sm:$0xff]  ;;  %v7545_v3 = vcombine.high %v3364_v31, %v3368_v17 }
 0x9ba   :  { %v3375_v47 = vld [vmem:[#allocation9 + $0x60] sm:$0xff] }
 0x9bb   :  { %v7551_v33 = vcombine.high %v3371_v22, %v3375_v47  ;;  %v7550_v19 = vcombine.low %v3371_v22, %v3375_v47  ;;  %v3428_v22 = vld [vmem:[#allocation9 + $0x208] sm:$0xff] }
 0x9bc   :  { %3218 = vmatpush1.bf16.msra.mxu0 %v13051_v20  ;;  %3259 = vmatpush1.bf16.msra.mxu1 %v12964_v26  ;;  %v13421_v26 = vld [vmem:[#allocation194_spill] sm:$0xff]  ;;  %v7544_v20 = vcombine.low %v3364_v31, %v3368_v17 }
 0x9bd   :  { %3219 = vmatprep.subr.bf16.mxu0 %v12965_v42  ;;  %3260 = vmatprep.subr.bf16.mxu1 %v12966_v12  ;;  %v13422_v42 = vld [vmem:[#allocation195_spill] sm:$0xff]  ;;  %v13423_v12 = vld [vmem:[#allocation196_spill] sm:$0xff]  ;;  %v3431_v17 = vld [vmem:[#allocation9 + $0x220] sm:$0xff] }
 0x9c0   :  { %3220 = vmatpush1.bf16.msra.mxu0 %v13052_v32  ;;  %3261 = vmatpush1.bf16.msra.mxu1 %v13411_v2  ;;  %v13424_v32 = vld [vmem:[#allocation197_spill] sm:$0xff]  ;;  %v3407_v2 = vld [vmem:[#allocation9 + $0x160] sm:$0xff] }
 0x9c1   :  { %3221 = vmatprep.subr.bf16.mxu0 %v13412_v0  ;;  %3262 = vmatprep.subr.bf16.mxu1 %v13413_v1  ;;  %v3404_v0 = vld [vmem:[#allocation9 + $0x148] sm:$0xff] }
 0x9c2   :  { %v3408_v1 = vld [vmem:[#allocation9 + $0x168] sm:$0xff] }
 0x9c4   :  { %3222 = vmatpush1.bf16.msra.mxu0 %v13414_v49  ;;  %3263 = vmatpush1.bf16.msra.mxu1 %v13415_v57  ;;  %v7574_v49 = vcombine.low %v3395_v36, %v3399_v8  ;;  %v7576_v57 = vcombine.low %v3396_v38, %v3400_v21  ;;  %v3452_v36 = vld [vmem:[#allocation9 + $0x2c8] sm:$0xff] }
 0x9c5   :  { %3223 = vmatprep.subr.bf16.mxu0 %v13416_v60  ;;  %3264 = vmatprep.subr.bf16.mxu1 %v13417_v10  ;;  %v7585_v10 = vcombine.high %v3404_v0, %v3408_v1  ;;  %v3456_v38 = vld [vmem:[#allocation9 + $0x2e8] sm:$0xff] }
 0x9c8   :  { %3224 = vmatpush1.bf16.msra.mxu0 %v13418_v18  ;;  %3265 = vmatpush1.bf16.msra.mxu1 %v13419_v52  ;;  %v3411_v18 = vld [vmem:[#allocation9 + $0x180] sm:$0xff] }
 0x9c9   :  { %3225 = vmatprep.subr.bf16.mxu0 %v13420_v25  ;;  %3266 = vmatprep.subr.bf16.mxu1 %v13421_v26  ;;  %v3415_v52 = vld [vmem:[#allocation9 + $0x1a0] sm:$0xff]  ;;  %v3412_v25 = vld [vmem:[#allocation9 + $0x188] sm:$0xff] }
 0x9ca   :  { %v3416_v26 = vld [vmem:[#allocation9 + $0x1a8] sm:$0xff] }
 0x9cc   :  { %3226 = vmatpush1.bf16.msra.mxu0 %v13422_v42  ;;  %3267 = vmatpush1.bf16.msra.mxu1 %v13423_v12  ;;  %v7584_v12 = vcombine.low %v3404_v0, %v3408_v1  ;;  %v3464_v0 = vld [vmem:[#allocation9 + $0x328] sm:$0xff] }
 0x9cd   :  { %3227 = vmatprep.subr.bf16.mxu0 %v13424_v32  ;;  %3268 = vmatprep.subr.bf16.mxu1 %v13425_v50  ;;  %v7591_v32 = vcombine.high %v3411_v18, %v3415_v52  ;;  %v7593_v50 = vcombine.high %v3412_v25, %v3416_v26 }
 0x9d0   :  { %3228 = vmatpush1.bf16.msra.mxu0 %v13426_v15  ;;  %3269 = vmatpush1.bf16.msra.mxu1 %v13427_v7  ;;  %v3419_v15 = vld [vmem:[#allocation9 + $0x1c0] sm:$0xff] }
 0x9d1   :  { %3229 = vmatprep.subr.bf16.mxu0 %v13428_v11  ;;  %3270 = vmatprep.subr.bf16.mxu1 %v13429_v23  ;;  %v3423_v7 = vld [vmem:[#allocation9 + $0x1e0] sm:$0xff]  ;;  %v3420_v11 = vld [vmem:[#allocation9 + $0x1c8] sm:$0xff] }
 0x9d2   :  { %v3424_v23 = vld [vmem:[#allocation9 + $0x1e8] sm:$0xff]  ;;  %v7599_v29 = vcombine.high %v3419_v15, %v3423_v7  ;;  %v7598_v31 = vcombine.low %v3419_v15, %v3423_v7 }
 0x9d3   :  { %v7601_v5 = vcombine.high %v3420_v11, %v3424_v23  ;;  %v3476_v7 = vld [vmem:[#allocation9 + $0x388] sm:$0xff] }
 0x9d4   :  { %3230 = vmatpush1.bf16.msra.mxu0 %v13430_v13  ;;  %3271 = vmatpush1.bf16.msra.mxu1 %v13431_v37  ;;  %v7590_v13 = vcombine.low %v3411_v18, %v3415_v52  ;;  %v7592_v37 = vcombine.low %v3412_v25, %v3416_v26  ;;  %v3468_v18 = vld [vmem:[#allocation9 + $0x348] sm:$0xff] }
 0x9d5   :  { %4301 = vmatprep.subr.bf16.mxu0 %v7543_v39  ;;  %4374 = vmatprep.subr.bf16.mxu1 %v7545_v3  ;;  %v3427_v39 = vld [vmem:[#allocation9 + $0x200] sm:$0xff]  ;;  %v3472_v26 = vld [vmem:[#allocation9 + $0x368] sm:$0xff] }
 0x9d6   :  { %v7607_v47 = vcombine.high %v3427_v39, %v3431_v17  ;;  %v7606_v3 = vcombine.low %v3427_v39, %v3431_v17 }
 0x9d7   :  { %3232 = vmatmul.mubr.bf16.vlgmr.msra.gmra.mrb[76].mxu0 %v10390_v16  ;;  %3273 = vmatmul.mubr.bf16.vlgmr.msra.gmra.mrb[92].mxu1 %v10390_v16  ;;  %v3403_v16 = vld [vmem:[#allocation9 + $0x140] sm:$0xff] }
 0x9d8   :  { %4302 = vmatpush1.bf16.msra.mxu0 %v7542_v6  ;;  %4375 = vmatpush1.bf16.msra.mxu1 %v7544_v20  ;;  %v7583_v60 = vcombine.high %v3403_v16, %v3407_v2  ;;  %v7582_v42 = vcombine.low %v3403_v16, %v3407_v2  ;;  %v7600_v6 = vcombine.low %v3420_v11, %v3424_v23  ;;  %v3432_v20 = vld [vmem:[#allocation9 + $0x228] sm:$0xff]  ;;  %v3483_v23 = vld [vmem:[#allocation9 + $0x3c0] sm:$0xff] }
 0x9d9   :  { %4303 = vmatprep.subr.bf16.mxu0 %v7551_v33  ;;  %4376 = vmatprep.subr.bf16.mxu1 %v7553_v54  ;;  %v7608_v33 = vcombine.low %v3428_v22, %v3432_v20  ;;  %v7609_v34 = vcombine.high %v3428_v22, %v3432_v20  ;;  %v3436_v54 = vld [vmem:[#allocation9 + $0x248] sm:$0xff]  ;;  %v10458_v20 = vld [vmem:[#allocation9 + $0x10] sm:$0xff] }
 0x9da   :  { %v3460_v16 = vld [vmem:[#allocation9 + $0x308] sm:$0xff] }
 0x9db   :  { %v3480_v11 = vld [vmem:[#allocation9 + $0x3a8] sm:$0xff] }
 0x9dc   :  { %4304 = vmatpush1.bf16.msra.mxu0 %v7550_v19  ;;  %4377 = vmatpush1.bf16.msra.mxu1 %v7552_v53  ;;  %v7616_v19 = vcombine.low %v3436_v54, %v3440_v61  ;;  %v7617_v53 = vcombine.high %v3436_v54, %v3440_v61 }
 0x9dd   :  { %4305 = vmatprep.subr.bf16.mxu0 %v7559_v48  ;;  %4378 = vmatprep.subr.bf16.mxu1 %v7561_v4  ;;  %v3443_v48 = vld [vmem:[#allocation9 + $0x280] sm:$0xff] }
 0x9de   :  { %v3447_v4 = vld [vmem:[#allocation9 + $0x2a0] sm:$0xff] }
 0x9df   :  { %v7623_v56 = vcombine.high %v3443_v48, %v3447_v4  ;;  %v7622_v30 = vcombine.low %v3443_v48, %v3447_v4  ;;  %v13433_v48 = vld [vmem:[#allocation126_spill] sm:$0xff] }
 0x9e0   :  { %4306 = vmatpush1.bf16.msra.mxu0 %v7558_v46  ;;  %4379 = vmatpush1.bf16.msra.mxu1 %v7560_v28  ;;  %v7624_v46 = vcombine.low %v3444_v41, %v3448_v35  ;;  %v7625_v28 = vcombine.high %v3444_v41, %v3448_v35  ;;  %v13434_v35 = vld [vmem:[#allocation92_spill] sm:$0xff] }
 0x9e1   :  { %4307 = vmatprep.subr.bf16.mxu0 %v7567_v9  ;;  %4380 = vmatprep.subr.bf16.mxu1 %v7569_v27  ;;  %v3451_v9 = vld [vmem:[#allocation9 + $0x2c0] sm:$0xff] }
 0x9e2   :  { %v3455_v27 = vld [vmem:[#allocation9 + $0x2e0] sm:$0xff] }
 0x9e3   :  { %v7631_v8 = vcombine.high %v3451_v9, %v3455_v27  ;;  %v7630_v21 = vcombine.low %v3451_v9, %v3455_v27 }
 0x9e4   :  { %4308 = vmatpush1.bf16.msra.mxu0 %v7566_v43  ;;  %4381 = vmatpush1.bf16.msra.mxu1 %v7568_v40  ;;  %v7632_v43 = vcombine.low %v3452_v36, %v3456_v38  ;;  %v7633_v40 = vcombine.high %v3452_v36, %v3456_v38 }
 0x9e5   :  { %4309 = vmatprep.subr.bf16.mxu0 %v7575_v45  ;;  %4382 = vmatprep.subr.bf16.mxu1 %v7577_v62  ;;  %v3459_v45 = vld [vmem:[#allocation9 + $0x300] sm:$0xff] }
 0x9e6   :  { %v3463_v62 = vld [vmem:[#allocation9 + $0x320] sm:$0xff] }
 0x9e7   :  { %v7639_v2 = vcombine.high %v3459_v45, %v3463_v62  ;;  %v7638_v1 = vcombine.low %v3459_v45, %v3463_v62 }
 0x9e8   :  { %4310 = vmatpush1.bf16.msra.mxu0 %v7574_v49  ;;  %4383 = vmatpush1.bf16.msra.mxu1 %v7576_v57  ;;  %v7640_v49 = vcombine.low %v3460_v16, %v3464_v0  ;;  %v7641_v57 = vcombine.high %v3460_v16, %v3464_v0 }
 0x9e9   :  { %4311 = vmatprep.subr.bf16.mxu0 %v7583_v60  ;;  %4384 = vmatprep.subr.bf16.mxu1 %v7585_v10  ;;  %v3467_v60 = vld [vmem:[#allocation9 + $0x340] sm:$0xff] }
 0x9ea   :  { %v3471_v10 = vld [vmem:[#allocation9 + $0x360] sm:$0xff] }
 0x9eb   :  { %v7646_v52 = vcombine.low %v3467_v60, %v3471_v10  ;;  %v7647_v25 = vcombine.high %v3467_v60, %v3471_v10 }
 0x9ec   :  { %4312 = vmatpush1.bf16.msra.mxu0 %v7582_v42  ;;  %4385 = vmatpush1.bf16.msra.mxu1 %v7584_v12  ;;  %v3475_v42 = vld [vmem:[#allocation9 + $0x380] sm:$0xff] }
 0x9ed   :  { %4313 = vmatprep.subr.bf16.mxu0 %v7591_v32  ;;  %4386 = vmatprep.subr.bf16.mxu1 %v7593_v50  ;;  %v3479_v12 = vld [vmem:[#allocation9 + $0x3a0] sm:$0xff]  ;;  %v7648_v32 = vcombine.low %v3468_v18, %v3472_v26  ;;  %v7649_v50 = vcombine.high %v3468_v18, %v3472_v26  ;;  %v13436_v18 = vld [vmem:[#allocation129_spill] sm:$0xff] }
 0x9ee   :  { %v7655_v15 = vcombine.high %v3475_v42, %v3479_v12 }
 0x9f0   :  { %4314 = vmatpush1.bf16.msra.mxu0 %v7590_v13  ;;  %4387 = vmatpush1.bf16.msra.mxu1 %v7592_v37  ;;  %v7657_v13 = vcombine.high %v3476_v7, %v3480_v11  ;;  %v3487_v37 = vld [vmem:[#allocation9 + $0x3e0] sm:$0xff] }
 0x9f1   :  { %4315 = vmatprep.subr.bf16.mxu0 %v7599_v29  ;;  %4388 = vmatprep.subr.bf16.mxu1 %v7601_v5  ;;  %v3484_v29 = vld [vmem:[#allocation9 + $0x3c8] sm:$0xff]  ;;  %v7663_v39 = vcombine.high %v3483_v23, %v3487_v37  ;;  %v7662_v22 = vcombine.low %v3483_v23, %v3487_v37 }
 0x9f2   :  { %v3488_v5 = vld [vmem:[#allocation9 + $0x3e8] sm:$0xff] }
 0x9f3   :  { %v7665_v17 = vcombine.high %v3484_v29, %v3488_v5 }
 0x9f4   :  { %4316 = vmatpush1.bf16.msra.mxu0 %v7598_v31  ;;  %4389 = vmatpush1.bf16.msra.mxu1 %v7600_v6  ;;  %v7654_v31 = vcombine.low %v3475_v42, %v3479_v12  ;;  %v7656_v6 = vcombine.low %v3476_v7, %v3480_v11 }
 0x9f5   :  { %4317 = vmatprep.subr.bf16.mxu0 %v7607_v47  ;;  %4390 = vmatprep.subr.bf16.mxu1 %v7609_v34  ;;  %v7664_v47 = vcombine.low %v3484_v29, %v3488_v5 }
 0x9f8   :  { %4318 = vmatpush1.bf16.msra.mxu0 %v7606_v3  ;;  %4391 = vmatpush1.bf16.msra.mxu1 %v7608_v33  ;;  %v10460_v3 = vld [vmem:[#allocation9 + $0x30] sm:$0xff]  ;;  %v10462_v33 = vld [vmem:[#allocation9 + $0x18] sm:$0xff] }
 0x9f9   :  { %4319 = vmatprep.subr.bf16.mxu0 %v7615_v59  ;;  %4392 = vmatprep.subr.bf16.mxu1 %v7617_v53  ;;  %v7547_v34 = vcombine.high %v10458_v20, %v10460_v3  ;;  %v7546_v58 = vcombine.low %v10458_v20, %v10460_v3  ;;  %v7548_v54 = vcombine.low %v10462_v33, %v10466_v63 }
 0x9fa   :  { %v7549_v59 = vcombine.high %v10462_v33, %v10466_v63  ;;  %v13444_v33 = vld [vmem:[#allocation96_spill] sm:$0xff]  ;;  %v13445_v63 = vld [vmem:[#allocation106_spill] sm:$0xff] }
 0x9fc   :  { %4320 = vmatpush1.bf16.msra.mxu0 %v7614_v51  ;;  %4393 = vmatpush1.bf16.msra.mxu1 %v7616_v19  ;;  %v13432_v19 = vld [vmem:[#allocation97_spill] sm:$0xff] }
 0x9fd   :  { %4321 = vmatprep.subr.bf16.mxu0 %v7623_v56  ;;  %4394 = vmatprep.subr.bf16.mxu1 %v7625_v28 }
 0xa00   :  { %4322 = vmatpush1.bf16.msra.mxu0 %v7622_v30  ;;  %4395 = vmatpush1.bf16.msra.mxu1 %v7624_v46  ;;  %v13435_v46 = vld [vmem:[#allocation102_spill] sm:$0xff] }
 0xa01   :  { %4323 = vmatprep.subr.bf16.mxu0 %v7631_v8  ;;  %4396 = vmatprep.subr.bf16.mxu1 %v7633_v40 }
 0xa04   :  { %4324 = vmatpush1.bf16.msra.mxu0 %v7630_v21  ;;  %4397 = vmatpush1.bf16.msra.mxu1 %v7632_v43 }
 0xa05   :  { %4325 = vmatprep.subr.bf16.mxu0 %v7639_v2  ;;  %4398 = vmatprep.subr.bf16.mxu1 %v7641_v57 }
 0xa08   :  { %4326 = vmatpush1.bf16.msra.mxu0 %v7638_v1  ;;  %4399 = vmatpush1.bf16.msra.mxu1 %v7640_v49 }
 0xa09   :  { %4327 = vmatprep.subr.bf16.mxu0 %v7647_v25  ;;  %4400 = vmatprep.subr.bf16.mxu1 %v7649_v50  ;;  %v13437_v25 = vld [vmem:[#allocation142_spill] sm:$0xff] }
 0xa0c   :  { %4328 = vmatpush1.bf16.msra.mxu0 %v7646_v52  ;;  %4401 = vmatpush1.bf16.msra.mxu1 %v7648_v32  ;;  %v13438_v32 = vld [vmem:[#allocation105_spill] sm:$0xff] }
 0xa0d   :  { %4329 = vmatprep.subr.bf16.mxu0 %v7655_v15  ;;  %4402 = vmatprep.subr.bf16.mxu1 %v7657_v13  ;;  %v13439_v15 = vld [vmem:[#allocation130_spill] sm:$0xff] }
 0xa10   :  { %4330 = vmatpush1.bf16.msra.mxu0 %v7654_v31  ;;  %4403 = vmatpush1.bf16.msra.mxu1 %v7656_v6 }
 0xa11   :  { %4331 = vmatprep.subr.bf16.mxu0 %v7663_v39  ;;  %4404 = vmatprep.subr.bf16.mxu1 %v7665_v17 }
 0xa14   :  { %4332 = vmatpush1.bf16.msra.mxu0 %v7662_v22  ;;  %4405 = vmatpush1.bf16.msra.mxu1 %v7664_v47 }
 0xa15   :  { %4447 = vmatprep.subr.bf16.mxu0 %v7547_v34  ;;  %4520 = vmatprep.subr.bf16.mxu1 %v7549_v59 }
 0xa6a   :  { %v3151_v61 = vpop.f32.mrb[72].mxu0  ;;  %v3192_v51 = vpop.f32.mrb[88].mxu1 }
 0xa6b   :  { %v3281_v53 = vadd.f32 %v3151_v61, %v13432_v19  ;;  %v3283_v4 = vadd.f32 %v3192_v51, %v13433_v48  ;;  %v3153_v41 = vpop.f32.mrb[73].mxu0  ;;  %v3194_v56 = vpop.f32.mrb[89].mxu1 }
 0xa6c   :  { %v3282_v30 = vadd.f32 %v3153_v41, %v13434_v35  ;;  %v3284_v28 = vadd.f32 %v3194_v56, %v13435_v46  ;;  %v3155_v9 = vpop.f32.mrb[74].mxu0  ;;  %v3196_v27 = vpop.f32.mrb[90].mxu1 }
 0xa6d   :  { %v3156_v36 = vpop.f32.mrb[75].mxu0  ;;  %v3197_v8 = vpop.f32.mrb[91].mxu1  ;;  %v7536_v38 = vmul.f32 -1.442695, %v3281_v53  ;;  %v7538_v21 = vmul.f32 -1.442695, %v3283_v4 }
 0xa6e   :  { %v7537_v43 = vmul.f32 -1.442695, %v3282_v30  ;;  %v7539_v40 = vmul.f32 -1.442695, %v3284_v28  ;;  %v3373_v27 = vld [vmem:[#allocation9 + $0x50] sm:$0xff]  ;;  %v3378_v8 = vld [vmem:[#allocation9 + $0x78] sm:$0xff] }
 0xa6f   :  { %8230 = vpow2.f32 %v7536_v38  ;;  %v3377_v36 = vld [vmem:[#allocation9 + $0x70] sm:$0xff] }
 0xa70   :  { %8232 = vpow2.f32 %v7538_v21  ;;  %v13440_v21 = vld [vmem:[#allocation143_spill] sm:$0xff] }
 0xa71   :  { %8234 = vpow2.f32 %v7537_v43  ;;  %v13441_v43 = vld [vmem:[#allocation93_spill] sm:$0xff] }
 0xa72   :  { %8236 = vpow2.f32 %v7539_v40  ;;  %v10491_v40 = vpack.c.bf16 %v13441_v43, %v13440_v21  ;;  %v3425_v21 = vld [vmem:[#allocation9 + $0x1f0] sm:$0xff]  ;;  %v3422_v43 = vld [vmem:[#allocation9 + $0x1d8] sm:$0xff] }
 0xa79   :  { %v8231_v45 = vpop.eup %8230 }
 0xa7a   :  { %v8233_v62 = vpop.eup %8232  ;;  %v3295_v0 = vadd.f32 1.0, %v8231_v45  ;;  %v3381_v45 = vld [vmem:[#allocation9 + $0x90] sm:$0xff] }
 0xa7b   :  { %v8235_v16 = vpop.eup %8234  ;;  %v3307_v1 = vadd.f32 1.0, %v8233_v62  ;;  %v7555_v62 = vcombine.high %v3373_v27, %v3377_v36 }
 0xa7c   :  { %v8237_v2 = vpop.eup %8236  ;;  %v3296_v49 = vadd.f32 1.0, %v8235_v16  ;;  %8238 = vrcp.f32 %v3295_v0  ;;  %v3382_v0 = vld [vmem:[#allocation9 + $0x98] sm:$0xff] }
 0xa7d   :  { %v3308_v57 = vadd.f32 1.0, %v8237_v2  ;;  %8240 = vrcp.f32 %v3307_v1  ;;  %v3385_v2 = vld [vmem:[#allocation9 + $0xb0] sm:$0xff]  ;;  %v3386_v1 = vld [vmem:[#allocation9 + $0xb8] sm:$0xff] }
 0xa7e   :  { %8242 = vrcp.f32 %v3296_v49  ;;  %v13443_v49 = vld [vmem:[#allocation85_spill] sm:$0xff]  ;;  %v7562_v20 = vcombine.low %v3381_v45, %v3385_v2  ;;  %v7564_v3 = vcombine.low %v3382_v0, %v3386_v1 }
 0xa7f   :  { %8244 = vrcp.f32 %v3308_v57 }
 0xa86   :  { %v8239_v31 = vpop.eup %8238 }
 0xa87   :  { %v8241_v6 = vpop.eup %8240 }
 0xa88   :  { %v8243_v39 = vpop.eup %8242  ;;  %v3327_v34 = vmul.f32 %v8241_v6, %v10376_v55 }
 0xa89   :  { %v8245_v17 = vpop.eup %8244 }
 0xa8a   :  { %v3328_v51 = vmul.f32 %v8245_v17, %v10378_v44  ;;  %v3374_v44 = vld [vmem:[#allocation9 + $0x58] sm:$0xff]  ;;  %v3409_v17 = vld [vmem:[#allocation9 + $0x170] sm:$0xff] }
 0xa8b   :  { %v7557_v16 = vcombine.high %v3374_v44, %v3378_v8 }
 0xaaa   :  { %v3233_v60 = vpop.f32.mrb[76].mxu0  ;;  %v3274_v10 = vpop.f32.mrb[92].mxu1 }
 0xaab   :  { %v3285_v52 = vadd.f32 %v3233_v60, %v13436_v18  ;;  %v3287_v26 = vadd.f32 %v3274_v10, %v13437_v25  ;;  %v3235_v42 = vpop.f32.mrb[77].mxu0  ;;  %v3276_v12 = vpop.f32.mrb[93].mxu1  ;;  %v7554_v60 = vcombine.low %v3373_v27, %v3377_v36  ;;  %v7556_v10 = vcombine.low %v3374_v44, %v3378_v8  ;;  %v3389_v25 = vld [vmem:[#allocation9 + $0xd0] sm:$0xff] }
 0xaac   :  { %v3286_v50 = vadd.f32 %v3235_v42, %v13438_v32  ;;  %v3288_v7 = vadd.f32 %v3276_v12, %v13439_v15  ;;  %v3237_v11 = vpop.f32.mrb[78].mxu0  ;;  %v3278_v23 = vpop.f32.mrb[94].mxu1  ;;  %v7563_v18 = vcombine.high %v3381_v45, %v3385_v2  ;;  %v3390_v42 = vld [vmem:[#allocation9 + $0xd8] sm:$0xff]  ;;  %v3401_v15 = vld [vmem:[#allocation9 + $0x130] sm:$0xff] }
 0xaad   :  { %8246 = vtanh.f32 %v3285_v52  ;;  %v7540_v13 = vmul.f32 -1.442695, %v3287_v26  ;;  %v3238_v37 = vpop.f32.mrb[79].mxu0  ;;  %v3279_v29 = vpop.f32.mrb[95].mxu1  ;;  %v7565_v52 = vcombine.high %v3382_v0, %v3386_v1  ;;  %v3393_v26 = vld [vmem:[#allocation9 + $0xf0] sm:$0xff]  ;;  %v3394_v12 = vld [vmem:[#allocation9 + $0xf8] sm:$0xff] }
 0xaae   :  { %8248 = vtanh.f32 %v3286_v50  ;;  %v7541_v5 = vmul.f32 -1.442695, %v3288_v7  ;;  %v7571_v32 = vcombine.high %v3389_v25, %v3393_v26  ;;  %v7573_v50 = vcombine.high %v3390_v42, %v3394_v12  ;;  %v3398_v7 = vld [vmem:[#allocation9 + $0x118] sm:$0xff]  ;;  %v13446_v23 = vld [vmem:[#allocation131_spill] sm:$0xff]  ;;  %v3421_v8 = vld [vmem:[#allocation9 + $0x1d0] sm:$0xff] }
 0xaaf   :  { %8250 = vpow2.f32 %v7540_v13  ;;  %v3402_v11 = vld [vmem:[#allocation9 + $0x138] sm:$0xff]  ;;  %v7570_v29 = vcombine.low %v3389_v25, %v3393_v26  ;;  %v3429_v0 = vld [vmem:[#allocation9 + $0x210] sm:$0xff]  ;;  %v7603_v1 = vcombine.high %v3421_v8, %v3425_v21 }
 0xab0   :  { %8252 = vpow2.f32 %v7541_v5  ;;  %v13447_v13 = vld [vmem:[#allocation125_spill] sm:$0xff]  ;;  %v7572_v5 = vcombine.low %v3390_v42, %v3394_v12  ;;  %v7581_v6 = vcombine.high %v3398_v7, %v3402_v11  ;;  %v3437_v25 = vld [vmem:[#allocation9 + $0x250] sm:$0xff] }
 0xab1   :  { %v10517_v37 = vpack.c.bf16 %v13447_v13, %v13446_v23  ;;  %v3426_v45 = vld [vmem:[#allocation9 + $0x1f8] sm:$0xff]  ;;  %v3441_v26 = vld [vmem:[#allocation9 + $0x270] sm:$0xff] }
 0xab2   :  { %v3438_v42 = vld [vmem:[#allocation9 + $0x258] sm:$0xff]  ;;  %v3453_v13 = vld [vmem:[#allocation9 + $0x2d0] sm:$0xff] }
 0xab3   :  { %v3442_v12 = vld [vmem:[#allocation9 + $0x278] sm:$0xff] }
 0xab7   :  { %v8247_v22 = vpop.eup %8246 }
 0xab8   :  { %v8249_v47 = vpop.eup %8248  ;;  %v3329_v59 = vmul.f32 %v8247_v22, %v8239_v31  ;;  %v3406_v22 = vld [vmem:[#allocation9 + $0x158] sm:$0xff] }
 0xab9   :  { %v8251_v61 = vpop.eup %8250  ;;  %v3330_v19 = vmul.f32 %v8249_v47, %v8243_v39  ;;  %v3405_v39 = vld [vmem:[#allocation9 + $0x150] sm:$0xff]  ;;  %v3410_v47 = vld [vmem:[#allocation9 + $0x178] sm:$0xff] }
 0xaba   :  { %v8253_v53 = vpop.eup %8252  ;;  %v3331_v48 = vadd.f32 %v3329_v59, %v3327_v34  ;;  %v3321_v4 = vadd.f32 1.0, %v8251_v61  ;;  %v7580_v59 = vcombine.low %v3398_v7, %v3402_v11  ;;  %v13448_v61 = vld [vmem:[#allocation128_spill] sm:$0xff]  ;;  %v7588_v27 = vcombine.low %v3406_v22, %v3410_v47 }
 0xabb   :  { %v3332_v41 = vadd.f32 %v3330_v19, %v3328_v51  ;;  %v3322_v56 = vadd.f32 1.0, %v8253_v53  ;;  %v13449_v51 = vld [vmem:[#allocation86_spill] sm:$0xff]  ;;  %v3413_v53 = vld [vmem:[#allocation9 + $0x190] sm:$0xff]  ;;  %v7620_v7 = vcombine.low %v3438_v42, %v3442_v12 }
 0xabc   :  { %8254 = vtanh.f32 %v3331_v48  ;;  %v10523_v19 = vpack.c.bf16 %v13449_v51, %v13448_v61  ;;  %v7587_v48 = vcombine.high %v3405_v39, %v3409_v17  ;;  %v3466_v61 = vld [vmem:[#allocation9 + $0x338] sm:$0xff] }
 0xabd   :  { %8256 = vrcp.f32 %v3321_v4  ;;  %v7589_v4 = vcombine.high %v3406_v22, %v3410_v47  ;;  %v3461_v47 = vld [vmem:[#allocation9 + $0x310] sm:$0xff] }
 0xabe   :  { %8258 = vtanh.f32 %v3332_v41  ;;  %v3417_v41 = vld [vmem:[#allocation9 + $0x1b0] sm:$0xff] }
 0xabf   :  { %8260 = vrcp.f32 %v3322_v56  ;;  %v3414_v56 = vld [vmem:[#allocation9 + $0x198] sm:$0xff]  ;;  %v7595_v36 = vcombine.high %v3413_v53, %v3417_v41 }
 0xac6   :  { %v8255_v35 = vpop.eup %8254 }
 0xac7   :  { %v8257_v30 = vpop.eup %8256 }
 0xac8   :  { %v8259_v46 = vpop.eup %8258  ;;  %v10484_v28 = vmul.f32 %v8257_v30, %v8255_v35  ;;  %v3418_v35 = vld [vmem:[#allocation9 + $0x1b8] sm:$0xff]  ;;  %v13450_v30 = vld [vmem:[#allocation103_spill] sm:$0xff] }
 0xac9   :  { %v8261_v55 = vpop.eup %8260  ;;  %v7597_v44 = vcombine.high %v3414_v56, %v3418_v35 }
 0xaca   :  { %v3336_v9 = vmul.f32 %v8261_v55, %v8259_v46  ;;  %v13451_v46 = vld [vmem:[#allocation144_spill] sm:$0xff]  ;;  %v10535_v2 = vpack.c.bf16 %v10484_v28, %v10382_v14 }
 0xacb   :  { %v10529_v55 = vpack.c.bf16 %v13451_v46, %v13450_v30  ;;  %v3474_v30 = vld [vmem:[#allocation9 + $0x378] sm:$0xff] }
 0xacc   :  { %v10487_v38 = vpack.c.bf16 %v10384_v24, %v3336_v9  ;;  %v13442_v24 = vld [vmem:[#allocation145_spill] sm:$0xff]  ;;  %v7586_v9 = vcombine.low %v3405_v39, %v3409_v17 }
 0xacd   :  { %v10499_v57 = vpack.c.bf16 %v13443_v49, %v13442_v24  ;;  %v7605_v24 = vcombine.high %v3422_v43, %v3426_v45  ;;  %v3433_v49 = vld [vmem:[#allocation9 + $0x230] sm:$0xff] }
 0xace   :  { %4333 = vmatprep.mubr.bf16.mxu0 %v10487_v38  ;;  %4406 = vmatprep.mubr.bf16.mxu1 %v10487_v38  ;;  %v7611_v14 = vcombine.high %v3429_v0, %v3433_v49 }
 0xacf   :  { %4334 = vmatmul.mubr.bf16.vlgmr.msra.gmra.mrb[80].mxu0 %v10491_v40  ;;  %4407 = vmatmul.mubr.bf16.vlgmr.msra.gmra.mrb[96].mxu1 %v10491_v40 }
 0xad0   :  { %4448 = vmatpush1.bf16.msra.mxu0 %v7546_v58  ;;  %4521 = vmatpush1.bf16.msra.mxu1 %v7548_v54  ;;  %v10511_v58 = vpack.c.bf16 %v13445_v63, %v13444_v33  ;;  %v3397_v54 = vld [vmem:[#allocation9 + $0x110] sm:$0xff]  ;;  %v7619_v33 = vcombine.high %v3437_v25, %v3441_v26  ;;  %v7621_v63 = vcombine.high %v3438_v42, %v3442_v12 }
 0xad1   :  { %4343 = vmatprep.mubr.bf16.mxu0 %v10499_v57  ;;  %4416 = vmatprep.mubr.bf16.mxu1 %v10499_v57  ;;  %v7579_v31 = vcombine.high %v3397_v54, %v3401_v15  ;;  %v7578_v34 = vcombine.low %v3397_v54, %v3401_v15  ;;  %v3445_v54 = vld [vmem:[#allocation9 + $0x290] sm:$0xff]  ;;  %v7618_v15 = vcombine.low %v3437_v25, %v3441_v26 }
 0xad2   :  { %4449 = vmatprep.subr.bf16.mxu0 %v7555_v62  ;;  %4522 = vmatprep.subr.bf16.mxu1 %v7557_v16  ;;  %v7594_v62 = vcombine.low %v3413_v53, %v3417_v41  ;;  %v7596_v16 = vcombine.low %v3414_v56, %v3418_v35  ;;  %v3469_v41 = vld [vmem:[#allocation9 + $0x350] sm:$0xff]  ;;  %v3470_v35 = vld [vmem:[#allocation9 + $0x358] sm:$0xff] }
 0xad3   :  { %v3473_v56 = vld [vmem:[#allocation9 + $0x370] sm:$0xff] }
 0xad4   :  { %4450 = vmatpush1.bf16.msra.mxu0 %v7554_v60  ;;  %4523 = vmatpush1.bf16.msra.mxu1 %v7556_v10  ;;  %v3430_v60 = vld [vmem:[#allocation9 + $0x218] sm:$0xff]  ;;  %v3493_v26 = vld [vmem:[#allocation12 + $0x8] sm:$0xff] }
 0xad5   :  { %4451 = vmatprep.subr.bf16.mxu0 %v7563_v18  ;;  %4524 = vmatprep.subr.bf16.mxu1 %v7565_v52  ;;  %v3434_v10 = vld [vmem:[#allocation9 + $0x238] sm:$0xff]  ;;  %v7602_v18 = vcombine.low %v3421_v8, %v3425_v21  ;;  %v7604_v52 = vcombine.low %v3422_v43, %v3426_v45  ;;  %v3481_v8 = vld [vmem:[#allocation9 + $0x3b0] sm:$0xff]  ;;  %v7650_v45 = vcombine.low %v3469_v41, %v3473_v56 }
 0xad6   :  { %v7613_v28 = vcombine.high %v3430_v60, %v3434_v10  ;;  %v3478_v21 = vld [vmem:[#allocation9 + $0x398] sm:$0xff]  ;;  %v3497_v42 = vld [vmem:[#allocation12 + $0x28] sm:$0xff] }
 0xad7   :  { %4344 = vmatmul.mubr.bf16.gmra.mrb[84].mxu0 %v10511_v58  ;;  %4417 = vmatmul.mubr.bf16.gmra.mrb[100].mxu1 %v10511_v58  ;;  %v3482_v43 = vld [vmem:[#allocation9 + $0x3b8] sm:$0xff] }
 0xad8   :  { %4452 = vmatpush1.bf16.msra.mxu0 %v7562_v20  ;;  %4525 = vmatpush1.bf16.msra.mxu1 %v7564_v3  ;;  %v7610_v20 = vcombine.low %v3429_v0, %v3433_v49  ;;  %v7612_v3 = vcombine.low %v3430_v60, %v3434_v10  ;;  %v7661_v0 = vcombine.high %v3478_v21, %v3482_v43  ;;  %v3486_v49 = vld [vmem:[#allocation9 + $0x3d8] sm:$0xff] }
 0xad9   :  { %4353 = vmatprep.mubr.bf16.mxu0 %v10517_v37  ;;  %4426 = vmatprep.mubr.bf16.mxu1 %v10517_v37  ;;  %v3490_v60 = vld [vmem:[#allocation9 + $0x3f8] sm:$0xff] }
 0xada   :  { %4453 = vmatprep.subr.bf16.mxu0 %v7571_v32  ;;  %4526 = vmatprep.subr.bf16.mxu1 %v7573_v50  ;;  %v3449_v32 = vld [vmem:[#allocation9 + $0x2b0] sm:$0xff]  ;;  %v3446_v50 = vld [vmem:[#allocation9 + $0x298] sm:$0xff]  ;;  %v7668_v25 = vcombine.low %v3486_v49, %v3490_v60 }
 0xadb   :  { %v7627_v11 = vcombine.high %v3445_v54, %v3449_v32 }
 0xadc   :  { %4454 = vmatpush1.bf16.msra.mxu0 %v7570_v29  ;;  %4527 = vmatpush1.bf16.msra.mxu1 %v7572_v5  ;;  %v3457_v29 = vld [vmem:[#allocation9 + $0x2f0] sm:$0xff]  ;;  %v3454_v5 = vld [vmem:[#allocation9 + $0x2d8] sm:$0xff] }
 0xadd   :  { %4455 = vmatprep.subr.bf16.mxu0 %v7579_v31  ;;  %4528 = vmatprep.subr.bf16.mxu1 %v7581_v6  ;;  %v3458_v31 = vld [vmem:[#allocation9 + $0x2f8] sm:$0xff]  ;;  %v7626_v6 = vcombine.low %v3445_v54, %v3449_v32  ;;  %v7635_v17 = vcombine.high %v3453_v13, %v3457_v29  ;;  %v7634_v51 = vcombine.low %v3453_v13, %v3457_v29 }
 0xade   :  { %v7637_v22 = vcombine.high %v3454_v5, %v3458_v31  ;;  %v7636_v53 = vcombine.low %v3454_v5, %v3458_v31  ;;  %v3516_v5 = vld [vmem:[#allocation12 + $0xc0] sm:$0xff] }
 0xadf   :  { %4354 = vmatmul.mubr.bf16.gmra.mrb[88].mxu0 %v10523_v19  ;;  %4427 = vmatmul.mubr.bf16.gmra.mrb[104].mxu1 %v10523_v19  ;;  %v3520_v31 = vld [vmem:[#allocation12 + $0xe0] sm:$0xff] }
 0xae0   :  { %4456 = vmatpush1.bf16.msra.mxu0 %v7578_v34  ;;  %4529 = vmatpush1.bf16.msra.mxu1 %v7580_v59  ;;  %v3465_v34 = vld [vmem:[#allocation9 + $0x330] sm:$0xff]  ;;  %v3462_v59 = vld [vmem:[#allocation9 + $0x318] sm:$0xff] }
 0xae1   :  { %4363 = vmatprep.mubr.bf16.mxu0 %v10529_v55  ;;  %4436 = vmatprep.mubr.bf16.mxu1 %v10529_v55  ;;  %v7642_v46 = vcombine.low %v3461_v47, %v3465_v34 }
 0xae2   :  { %4457 = vmatprep.subr.bf16.mxu0 %v7587_v48  ;;  %4530 = vmatprep.subr.bf16.mxu1 %v7589_v4  ;;  %v7643_v48 = vcombine.high %v3461_v47, %v3465_v34  ;;  %v7645_v4 = vcombine.high %v3462_v59, %v3466_v61  ;;  %v10595_v47 = vcombine.low %v3516_v5, %v3520_v31 }
 0xae4   :  { %4458 = vmatpush1.bf16.msra.mxu0 %v7586_v9  ;;  %4531 = vmatpush1.bf16.msra.mxu1 %v7588_v27  ;;  %v7644_v9 = vcombine.low %v3462_v59, %v3466_v61  ;;  %v7651_v27 = vcombine.high %v3469_v41, %v3473_v56  ;;  %13466 = vst [vmem:[#allocation112_spill] sm:$0xff] %v10595_v47  ;;  %v3524_v59 = vld [vmem:[#allocation12 + $0x100] sm:$0xff] }
 0xae5   :  { %4459 = vmatprep.subr.bf16.mxu0 %v7595_v36  ;;  %4532 = vmatprep.subr.bf16.mxu1 %v7597_v44  ;;  %v7653_v36 = vcombine.high %v3470_v35, %v3474_v30  ;;  %v3477_v44 = vld [vmem:[#allocation9 + $0x390] sm:$0xff]  ;;  %v3528_v61 = vld [vmem:[#allocation12 + $0x120] sm:$0xff] }
 0xae6   :  { %v7658_v10 = vcombine.low %v3477_v44, %v3481_v8  ;;  %v10607_v41 = vcombine.low %v3524_v59, %v3528_v61 }
 0xae7   :  { %4364 = vmatmul.mubr.bf16.gmra.mrb[92].mxu0 %v10535_v2  ;;  %4437 = vmatmul.mubr.bf16.gmra.mrb[108].mxu1 %v10535_v2 }
 0xae8   :  { %4460 = vmatpush1.bf16.msra.mxu0 %v7594_v62  ;;  %4533 = vmatpush1.bf16.msra.mxu1 %v7596_v16  ;;  %v7652_v62 = vcombine.low %v3470_v35, %v3474_v30  ;;  %v7659_v16 = vcombine.high %v3477_v44, %v3481_v8  ;;  %13470 = vst [vmem:[#allocation153_spill] sm:$0xff] %v10607_v41  ;;  %v3532_v35 = vld [vmem:[#allocation12 + $0x140] sm:$0xff] }
 0xae9   :  { %4479 = vmatprep.mubr.bf16.mxu0 %v10487_v38  ;;  %4552 = vmatprep.mubr.bf16.mxu1 %v10487_v38  ;;  %v3450_v38 = vld [vmem:[#allocation9 + $0x2b8] sm:$0xff]  ;;  %v3536_v30 = vld [vmem:[#allocation12 + $0x160] sm:$0xff] }
 0xaea   :  { %4461 = vmatprep.subr.bf16.mxu0 %v7603_v1  ;;  %4534 = vmatprep.subr.bf16.mxu1 %v7605_v24  ;;  %v7629_v23 = vcombine.high %v3446_v50, %v3450_v38  ;;  %v7628_v39 = vcombine.low %v3446_v50, %v3450_v38  ;;  %v3485_v1 = vld [vmem:[#allocation9 + $0x3d0] sm:$0xff]  ;;  %v3508_v50 = vld [vmem:[#allocation12 + $0x80] sm:$0xff]  ;;  %v10619_v44 = vcombine.low %v3532_v35, %v3536_v30 }
 0xaeb   :  { %v3489_v24 = vld [vmem:[#allocation9 + $0x3f0] sm:$0xff]  ;;  %v3512_v38 = vld [vmem:[#allocation12 + $0xa0] sm:$0xff] }
 0xaec   :  { %4462 = vmatpush1.bf16.msra.mxu0 %v7602_v18  ;;  %4535 = vmatpush1.bf16.msra.mxu1 %v7604_v52  ;;  %v7660_v18 = vcombine.low %v3478_v21, %v3482_v43  ;;  %v7667_v52 = vcombine.high %v3485_v1, %v3489_v24  ;;  %v10583_v13 = vcombine.low %v3508_v50, %v3512_v38  ;;  %v3540_v21 = vld [vmem:[#allocation12 + $0x180] sm:$0xff] }
 0xaed   :  { %4463 = vmatprep.subr.bf16.mxu0 %v7611_v14  ;;  %4536 = vmatprep.subr.bf16.mxu1 %v7613_v28  ;;  %v7669_v14 = vcombine.high %v3486_v49, %v3490_v60  ;;  %v7666_v28 = vcombine.low %v3485_v1, %v3489_v24  ;;  %13474 = vst [vmem:[#allocation157_spill] sm:$0xff] %v10619_v44  ;;  %v3544_v43 = vld [vmem:[#allocation12 + $0x1a0] sm:$0xff] }
 0xaee   :  { %13462 = vst [vmem:[#allocation98_spill] sm:$0xff] %v10583_v13  ;;  %v10631_v1 = vcombine.low %v3540_v21, %v3544_v43  ;;  %v3548_v49 = vld [vmem:[#allocation12 + $0x1c0] sm:$0xff] }
 0xaef   :  { %v3552_v60 = vld [vmem:[#allocation12 + $0x1e0] sm:$0xff] }
 0xaf0   :  { %4464 = vmatpush1.bf16.msra.mxu0 %v7610_v20  ;;  %4537 = vmatpush1.bf16.msra.mxu1 %v7612_v3  ;;  %v10561_v20 = vcombine.low %v3493_v26, %v3497_v42  ;;  %13478 = vst [vmem:[#allocation161_spill] sm:$0xff] %v10631_v1 }
 0xaf1   :  { %4465 = vmatprep.subr.bf16.mxu0 %v7619_v33  ;;  %4538 = vmatprep.subr.bf16.mxu1 %v7621_v63  ;;  %v3505_v33 = vld [vmem:[#allocation12 + $0x68] sm:$0xff] }
 0xaf2   :  { %13455 = vst [vmem:[#allocation149_spill] sm:$0xff] %v10561_v20 }
 0xaf4   :  { %4466 = vmatpush1.bf16.msra.mxu0 %v7618_v15  ;;  %4539 = vmatpush1.bf16.msra.mxu1 %v7620_v7  ;;  %v3509_v15 = vld [vmem:[#allocation12 + $0x88] sm:$0xff]  ;;  %v10579_v7 = vcombine.high %v3508_v50, %v3512_v38  ;;  %v3564_v50 = vld [vmem:[#allocation12 + $0x240] sm:$0xff] }
 0xaf5   :  { %4467 = vmatprep.subr.bf16.mxu0 %v7627_v11  ;;  %4540 = vmatprep.subr.bf16.mxu1 %v7629_v23  ;;  %v3513_v11 = vld [vmem:[#allocation12 + $0xa8] sm:$0xff]  ;;  %v3568_v38 = vld [vmem:[#allocation12 + $0x260] sm:$0xff] }
 0xaf6   :  { %13460 = vst [vmem:[#allocation181_spill] sm:$0xff] %v10579_v7  ;;  %v10581_v23 = vcombine.high %v3509_v15, %v3513_v11  ;;  %v10585_v29 = vcombine.low %v3509_v15, %v3513_v11  ;;  %v3565_v15 = vld [vmem:[#allocation12 + $0x248] sm:$0xff]  ;;  %v10663_v11 = vcombine.high %v3564_v50, %v3568_v38 }
 0xaf8   :  { %4468 = vmatpush1.bf16.msra.mxu0 %v7626_v6  ;;  %4541 = vmatpush1.bf16.msra.mxu1 %v7628_v39  ;;  %13461 = vst [vmem:[#allocation182_spill] sm:$0xff] %v10581_v23  ;;  %13463 = vst [vmem:[#allocation108_spill] sm:$0xff] %v10585_v29  ;;  %v3517_v6 = vld [vmem:[#allocation12 + $0xc8] sm:$0xff]  ;;  %v10591_v39 = vcombine.high %v3516_v5, %v3520_v31 }
 0xaf9   :  { %4469 = vmatprep.subr.bf16.mxu0 %v7635_v17  ;;  %4542 = vmatprep.subr.bf16.mxu1 %v7637_v22  ;;  %v3521_v17 = vld [vmem:[#allocation12 + $0xe8] sm:$0xff]  ;;  %13488 = vst [vmem:[#allocation183_spill] sm:$0xff] %v10663_v11 }
 0xafa   :  { %13464 = vst [vmem:[#allocation91_spill] sm:$0xff] %v10591_v39  ;;  %v10593_v22 = vcombine.high %v3517_v6, %v3521_v17  ;;  %v10597_v34 = vcombine.low %v3517_v6, %v3521_v17  ;;  %v3569_v5 = vld [vmem:[#allocation12 + $0x268] sm:$0xff]  ;;  %v10667_v6 = vcombine.low %v3564_v50, %v3568_v38 }
 0xafb   :  { %v10665_v31 = vcombine.high %v3565_v15, %v3569_v5  ;;  %v10669_v17 = vcombine.low %v3565_v15, %v3569_v5  ;;  %v3593_v50 = vld [vmem:[#allocation12 + $0x328] sm:$0xff] }
 0xafc   :  { %4470 = vmatpush1.bf16.msra.mxu0 %v7634_v51  ;;  %4543 = vmatpush1.bf16.msra.mxu1 %v7636_v53  ;;  %13465 = vst [vmem:[#allocation119_spill] sm:$0xff] %v10593_v22  ;;  %13467 = vst [vmem:[#allocation133_spill] sm:$0xff] %v10597_v34  ;;  %v3525_v51 = vld [vmem:[#allocation12 + $0x108] sm:$0xff]  ;;  %v10603_v53 = vcombine.high %v3524_v59, %v3528_v61  ;;  %v3572_v59 = vld [vmem:[#allocation12 + $0x280] sm:$0xff] }
 0xafd   :  { %4471 = vmatprep.subr.bf16.mxu0 %v7643_v48  ;;  %4544 = vmatprep.subr.bf16.mxu1 %v7645_v4  ;;  %v3529_v48 = vld [vmem:[#allocation12 + $0x128] sm:$0xff]  ;;  %13489 = vst [vmem:[#allocation100_spill] sm:$0xff] %v10665_v31  ;;  %13490 = vst [vmem:[#allocation110_spill] sm:$0xff] %v10667_v6  ;;  %v3576_v61 = vld [vmem:[#allocation12 + $0x2a0] sm:$0xff] }
 0xafe   :  { %13468 = vst [vmem:[#allocation123_spill] sm:$0xff] %v10603_v53  ;;  %v10605_v4 = vcombine.high %v3525_v51, %v3529_v48  ;;  %v10609_v56 = vcombine.low %v3525_v51, %v3529_v48  ;;  %13491 = vst [vmem:[#allocation89_spill] sm:$0xff] %v10669_v17  ;;  %v3573_v51 = vld [vmem:[#allocation12 + $0x288] sm:$0xff]  ;;  %v10675_v48 = vcombine.high %v3572_v59, %v3576_v61 }
 0xb00   :  { %4472 = vmatpush1.bf16.msra.mxu0 %v7642_v46  ;;  %4545 = vmatpush1.bf16.msra.mxu1 %v7644_v9  ;;  %13469 = vst [vmem:[#allocation140_spill] sm:$0xff] %v10605_v4  ;;  %13471 = vst [vmem:[#allocation154_spill] sm:$0xff] %v10609_v56  ;;  %v3533_v46 = vld [vmem:[#allocation12 + $0x148] sm:$0xff]  ;;  %v10615_v9 = vcombine.high %v3532_v35, %v3536_v30 }
 0xb01   :  { %4473 = vmatprep.subr.bf16.mxu0 %v7651_v27  ;;  %4546 = vmatprep.subr.bf16.mxu1 %v7653_v36  ;;  %v3537_v27 = vld [vmem:[#allocation12 + $0x168] sm:$0xff]  ;;  %13492 = vst [vmem:[#allocation117_spill] sm:$0xff] %v10675_v48 }
 0xb02   :  { %13472 = vst [vmem:[#allocation155_spill] sm:$0xff] %v10615_v9  ;;  %v10617_v36 = vcombine.high %v3533_v46, %v3537_v27  ;;  %v10621_v8 = vcombine.low %v3533_v46, %v3537_v27  ;;  %v3577_v35 = vld [vmem:[#allocation12 + $0x2a8] sm:$0xff]  ;;  %v10679_v46 = vcombine.low %v3572_v59, %v3576_v61  ;;  %v3596_v59 = vld [vmem:[#allocation12 + $0x340] sm:$0xff] }
 0xb03   :  { %v10677_v30 = vcombine.high %v3573_v51, %v3577_v35  ;;  %v10681_v27 = vcombine.low %v3573_v51, %v3577_v35  ;;  %v3600_v61 = vld [vmem:[#allocation12 + $0x360] sm:$0xff]  ;;  %v3597_v51 = vld [vmem:[#allocation12 + $0x348] sm:$0xff] }
 0xb04   :  { %4474 = vmatpush1.bf16.msra.mxu0 %v7650_v45  ;;  %4547 = vmatpush1.bf16.msra.mxu1 %v7652_v62  ;;  %13473 = vst [vmem:[#allocation156_spill] sm:$0xff] %v10617_v36  ;;  %13475 = vst [vmem:[#allocation158_spill] sm:$0xff] %v10621_v8  ;;  %v3541_v45 = vld [vmem:[#allocation12 + $0x188] sm:$0xff]  ;;  %v10627_v62 = vcombine.high %v3540_v21, %v3544_v43  ;;  %v3580_v21 = vld [vmem:[#allocation12 + $0x2c0] sm:$0xff]  ;;  %v10711_v35 = vcombine.high %v3596_v59, %v3600_v61 }
 0xb05   :  { %4475 = vmatprep.subr.bf16.mxu0 %v7659_v16  ;;  %4548 = vmatprep.subr.bf16.mxu1 %v7661_v0  ;;  %v3545_v16 = vld [vmem:[#allocation12 + $0x1a8] sm:$0xff]  ;;  %13493 = vst [vmem:[#allocation114_spill] sm:$0xff] %v10677_v30  ;;  %13494 = vst [vmem:[#allocation135_spill] sm:$0xff] %v10679_v46  ;;  %v3584_v43 = vld [vmem:[#allocation12 + $0x2e0] sm:$0xff] }
 0xb06   :  { %13476 = vst [vmem:[#allocation159_spill] sm:$0xff] %v10627_v62  ;;  %v10629_v0 = vcombine.high %v3541_v45, %v3545_v16  ;;  %v10633_v24 = vcombine.low %v3541_v45, %v3545_v16  ;;  %13495 = vst [vmem:[#allocation121_spill] sm:$0xff] %v10681_v27  ;;  %v3581_v45 = vld [vmem:[#allocation12 + $0x2c8] sm:$0xff]  ;;  %v10687_v16 = vcombine.high %v3580_v21, %v3584_v43 }
 0xb07   :  { %13504 = vst [vmem:[#allocation172_spill] sm:$0xff] %v10711_v35 }
 0xb08   :  { %4476 = vmatpush1.bf16.msra.mxu0 %v7658_v10  ;;  %4549 = vmatpush1.bf16.msra.mxu1 %v7660_v18  ;;  %13477 = vst [vmem:[#allocation160_spill] sm:$0xff] %v10629_v0  ;;  %13479 = vst [vmem:[#allocation169_spill] sm:$0xff] %v10633_v24  ;;  %v3549_v10 = vld [vmem:[#allocation12 + $0x1c8] sm:$0xff]  ;;  %v10639_v18 = vcombine.high %v3548_v49, %v3552_v60 }
 0xb09   :  { %4477 = vmatprep.subr.bf16.mxu0 %v7667_v52  ;;  %4550 = vmatprep.subr.bf16.mxu1 %v7669_v14  ;;  %v3553_v52 = vld [vmem:[#allocation12 + $0x1e8] sm:$0xff]  ;;  %13496 = vst [vmem:[#allocation138_spill] sm:$0xff] %v10687_v16 }
 0xb0a   :  { %13480 = vst [vmem:[#allocation170_spill] sm:$0xff] %v10639_v18  ;;  %v10641_v14 = vcombine.high %v3549_v10, %v3553_v52 }
 0xb0c   :  { %4478 = vmatpush1.bf16.msra.mxu0 %v7666_v28  ;;  %4551 = vmatpush1.bf16.msra.mxu1 %v7668_v25  ;;  %13481 = vst [vmem:[#allocation171_spill] sm:$0xff] %v10641_v14  ;;  %v10643_v28 = vcombine.low %v3548_v49, %v3552_v60  ;;  %v10645_v25 = vcombine.low %v3549_v10, %v3553_v52  ;;  %v3585_v49 = vld [vmem:[#allocation12 + $0x2e8] sm:$0xff] }
 0xb0d   :  { %v10689_v60 = vcombine.high %v3581_v45, %v3585_v49  ;;  %v10691_v10 = vcombine.low %v3580_v21, %v3584_v43  ;;  %v10693_v52 = vcombine.low %v3581_v45, %v3585_v49  ;;  %v3601_v21 = vld [vmem:[#allocation12 + $0x368] sm:$0xff]  ;;  %v10713_v43 = vcombine.low %v3596_v59, %v3600_v61  ;;  %v3604_v45 = vld [vmem:[#allocation12 + $0x380] sm:$0xff] }
 0xb0e   :  { %13482 = vst [vmem:[#allocation174_spill] sm:$0xff] %v10643_v28  ;;  %13483 = vst [vmem:[#allocation175_spill] sm:$0xff] %v10645_v25  ;;  %v3608_v49 = vld [vmem:[#allocation12 + $0x3a0] sm:$0xff] }
 0xb0f   :  { %4480 = vmatmul.mubr.bf16.vlgmr.msra.gmra.mrb[96].mxu0 %v10491_v40  ;;  %4553 = vmatmul.mubr.bf16.vlgmr.msra.gmra.mrb[112].mxu1 %v10491_v40  ;;  %v3492_v40 = vld [vmem:[#allocation12] sm:$0xff]  ;;  %13497 = vst [vmem:[#allocation162_spill] sm:$0xff] %v10689_v60  ;;  %13498 = vst [vmem:[#allocation163_spill] sm:$0xff] %v10691_v10  ;;  %v10726_v59 = vcombine.low %v3604_v45, %v3608_v49 }
 0xb10   :  { %4489 = vmatprep.mubr.bf16.mxu0 %v10499_v57  ;;  %4562 = vmatprep.mubr.bf16.mxu1 %v10499_v57  ;;  %v3496_v57 = vld [vmem:[#allocation12 + $0x20] sm:$0xff]  ;;  %13499 = vst [vmem:[#allocation164_spill] sm:$0xff] %v10693_v52  ;;  %13505 = vst [vmem:[#allocation173_spill] sm:$0xff] %v10713_v43 }
 0xb11   :  { %v10557_v12 = vcombine.low %v3492_v40, %v3496_v57  ;;  %13510 = vst [vmem:[#allocation120_spill] sm:$0xff] %v10726_v59 }
 0xb13   :  { %13453 = vst [vmem:[#allocation147_spill] sm:$0xff] %v10557_v12 }
 0xb17   :  { %4490 = vmatmul.mubr.bf16.gmra.mrb[100].mxu0 %v10511_v58  ;;  %4563 = vmatmul.mubr.bf16.gmra.mrb[116].mxu1 %v10511_v58  ;;  %v10555_v58 = vcombine.high %v3492_v40, %v3496_v57  ;;  %v3556_v40 = vld [vmem:[#allocation12 + $0x200] sm:$0xff] }
 0xb18   :  { %4499 = vmatprep.mubr.bf16.mxu0 %v10517_v37  ;;  %4572 = vmatprep.mubr.bf16.mxu1 %v10517_v37  ;;  %v10559_v37 = vcombine.high %v3493_v26, %v3497_v42  ;;  %v3560_v57 = vld [vmem:[#allocation12 + $0x220] sm:$0xff]  ;;  %v3557_v26 = vld [vmem:[#allocation12 + $0x208] sm:$0xff] }
 0xb19   :  { %13452 = vst [vmem:[#allocation146_spill] sm:$0xff] %v10555_v58  ;;  %5395 = vmatprep.subr.bf16.mxu0 %v10555_v58  ;;  %v10651_v42 = vcombine.high %v3556_v40, %v3560_v57 }
 0xb1a   :  { %13454 = vst [vmem:[#allocation148_spill] sm:$0xff] %v10559_v37  ;;  %5436 = vmatprep.subr.bf16.mxu1 %v10559_v37  ;;  %5396 = vmatpush1.bf16.msra.mxu0 %v10557_v12 }
 0xb1b   :  { %5437 = vmatpush1.bf16.msra.mxu1 %v10561_v20  ;;  %13484 = vst [vmem:[#allocation176_spill] sm:$0xff] %v10651_v42 }
 0xb1f   :  { %4500 = vmatmul.mubr.bf16.gmra.mrb[104].mxu0 %v10523_v19  ;;  %4573 = vmatmul.mubr.bf16.gmra.mrb[120].mxu1 %v10523_v19  ;;  %v3500_v19 = vld [vmem:[#allocation12 + $0x40] sm:$0xff] }
 0xb20   :  { %4509 = vmatprep.mubr.bf16.mxu0 %v10529_v55  ;;  %4582 = vmatprep.mubr.bf16.mxu1 %v10529_v55  ;;  %v3504_v55 = vld [vmem:[#allocation12 + $0x60] sm:$0xff] }
 0xb21   :  { %v10567_v3 = vcombine.high %v3500_v19, %v3504_v55  ;;  %v10571_v54 = vcombine.low %v3500_v19, %v3504_v55  ;;  %v3561_v19 = vld [vmem:[#allocation12 + $0x228] sm:$0xff] }
 0xb22   :  { %v10653_v55 = vcombine.high %v3557_v26, %v3561_v19 }
 0xb23   :  { %13456 = vst [vmem:[#allocation150_spill] sm:$0xff] %v10567_v3  ;;  %13458 = vst [vmem:[#allocation152_spill] sm:$0xff] %v10571_v54  ;;  %5397 = vmatprep.subr.bf16.mxu0 %v10567_v3 }
 0xb24   :  { %5398 = vmatpush1.bf16.msra.mxu0 %v10571_v54  ;;  %13485 = vst [vmem:[#allocation177_spill] sm:$0xff] %v10653_v55 }
 0xb25   :  { %5399 = vmatprep.subr.bf16.mxu0 %v10579_v7 }
 0xb27   :  { %4510 = vmatmul.mubr.bf16.gmra.mrb[108].mxu0 %v10535_v2  ;;  %4583 = vmatmul.mubr.bf16.gmra.mrb[124].mxu1 %v10535_v2  ;;  %v3501_v2 = vld [vmem:[#allocation12 + $0x48] sm:$0xff] }
 0xb28   :  { %v10569_v63 = vcombine.high %v3501_v2, %v3505_v33  ;;  %v10573_v32 = vcombine.low %v3501_v2, %v3505_v33  ;;  %5400 = vmatpush1.bf16.msra.mxu0 %v10583_v13  ;;  %v10655_v2 = vcombine.low %v3556_v40, %v3560_v57  ;;  %v10657_v33 = vcombine.low %v3557_v26, %v3561_v19  ;;  %v3588_v40 = vld [vmem:[#allocation12 + $0x300] sm:$0xff]  ;;  %v3589_v26 = vld [vmem:[#allocation12 + $0x308] sm:$0xff] }
 0xb29   :  { %5401 = vmatprep.subr.bf16.mxu0 %v10591_v39  ;;  %v3592_v57 = vld [vmem:[#allocation12 + $0x320] sm:$0xff]  ;;  %v10701_v38 = vcombine.high %v3589_v26, %v3593_v50  ;;  %v10705_v5 = vcombine.low %v3589_v26, %v3593_v50  ;;  %v10719_v26 = vcombine.high %v3604_v45, %v3608_v49  ;;  %v3605_v50 = vld [vmem:[#allocation12 + $0x388] sm:$0xff]  ;;  %v3498_v49 = vld [vmem:[#allocation12 + $0x30] sm:$0xff] }
 0xb2a   :  { %13457 = vst [vmem:[#allocation151_spill] sm:$0xff] %v10569_v63  ;;  %13459 = vst [vmem:[#allocation180_spill] sm:$0xff] %v10573_v32  ;;  %5438 = vmatprep.subr.bf16.mxu1 %v10569_v63  ;;  %v10699_v19 = vcombine.high %v3588_v40, %v3592_v57  ;;  %v10703_v15 = vcombine.low %v3588_v40, %v3592_v57  ;;  %v10715_v40 = vcombine.high %v3597_v51, %v3601_v21 }
 0xb2b   :  { %5439 = vmatpush1.bf16.msra.mxu1 %v10573_v32  ;;  %13486 = vst [vmem:[#allocation178_spill] sm:$0xff] %v10655_v2  ;;  %13487 = vst [vmem:[#allocation179_spill] sm:$0xff] %v10657_v33  ;;  %v10717_v57 = vcombine.low %v3597_v51, %v3601_v21 }
 0xb2c   :  { %5440 = vmatprep.subr.bf16.mxu1 %v10581_v23  ;;  %5402 = vmatpush1.bf16.msra.mxu0 %v10595_v47  ;;  %13500 = vst [vmem:[#allocation165_spill] sm:$0xff] %v10699_v19  ;;  %13501 = vst [vmem:[#allocation166_spill] sm:$0xff] %v10701_v38 }
 0xb2d   :  { %5403 = vmatprep.subr.bf16.mxu0 %v10603_v53  ;;  %13502 = vst [vmem:[#allocation167_spill] sm:$0xff] %v10703_v15  ;;  %13503 = vst [vmem:[#allocation168_spill] sm:$0xff] %v10705_v5 }
 0xb2e   :  { %13506 = vst [vmem:[#allocation88_spill] sm:$0xff] %v10715_v40  ;;  %13507 = vst [vmem:[#allocation116_spill] sm:$0xff] %v10717_v57 }
 0xb2f   :  { %5441 = vmatpush1.bf16.msra.mxu1 %v10585_v29  ;;  %13508 = vst [vmem:[#allocation101_spill] sm:$0xff] %v10719_v26 }
 0xb30   :  { %5442 = vmatprep.subr.bf16.mxu1 %v10593_v22  ;;  %5404 = vmatpush1.bf16.msra.mxu0 %v10607_v41 }
 0xb31   :  { %5405 = vmatprep.subr.bf16.mxu0 %v10615_v9 }
 0xb33   :  { %5443 = vmatpush1.bf16.msra.mxu1 %v10597_v34 }
 0xb34   :  { %5444 = vmatprep.subr.bf16.mxu1 %v10605_v4  ;;  %5406 = vmatpush1.bf16.msra.mxu0 %v10619_v44 }
 0xb35   :  { %5407 = vmatprep.subr.bf16.mxu0 %v10627_v62 }
 0xb37   :  { %5445 = vmatpush1.bf16.msra.mxu1 %v10609_v56 }
 0xb38   :  { %5446 = vmatprep.subr.bf16.mxu1 %v10617_v36  ;;  %5408 = vmatpush1.bf16.msra.mxu0 %v10631_v1 }
 0xb39   :  { %5409 = vmatprep.subr.bf16.mxu0 %v10639_v18 }
 0xb3b   :  { %5447 = vmatpush1.bf16.msra.mxu1 %v10621_v8 }
 0xb3c   :  { %5448 = vmatprep.subr.bf16.mxu1 %v10629_v0  ;;  %5410 = vmatpush1.bf16.msra.mxu0 %v10643_v28 }
 0xb3d   :  { %5411 = vmatprep.subr.bf16.mxu0 %v10651_v42 }
 0xb3f   :  { %5449 = vmatpush1.bf16.msra.mxu1 %v10633_v24 }
 0xb40   :  { %5450 = vmatprep.subr.bf16.mxu1 %v10641_v14  ;;  %5412 = vmatpush1.bf16.msra.mxu0 %v10655_v2 }
 0xb41   :  { %5413 = vmatprep.subr.bf16.mxu0 %v10663_v11 }
 0xb43   :  { %5451 = vmatpush1.bf16.msra.mxu1 %v10645_v25 }
 0xb44   :  { %5452 = vmatprep.subr.bf16.mxu1 %v10653_v55  ;;  %5414 = vmatpush1.bf16.msra.mxu0 %v10667_v6 }
 0xb45   :  { %5415 = vmatprep.subr.bf16.mxu0 %v10675_v48 }
 0xb47   :  { %5453 = vmatpush1.bf16.msra.mxu1 %v10657_v33 }
 0xb48   :  { %5454 = vmatprep.subr.bf16.mxu1 %v10665_v31  ;;  %5416 = vmatpush1.bf16.msra.mxu0 %v10679_v46 }
 0xb49   :  { %5417 = vmatprep.subr.bf16.mxu0 %v10687_v16 }
 0xb4b   :  { %5455 = vmatpush1.bf16.msra.mxu1 %v10669_v17 }
 0xb4c   :  { %5456 = vmatprep.subr.bf16.mxu1 %v10677_v30  ;;  %5418 = vmatpush1.bf16.msra.mxu0 %v10691_v10  ;;  %v3617_v10 = vld [vmem:[#allocation12 + $0x3e8] sm:$0xff] }
 0xb4d   :  { %5419 = vmatprep.subr.bf16.mxu0 %v10699_v19 }
 0xb4f   :  { %5457 = vmatpush1.bf16.msra.mxu1 %v10681_v27 }
 0xb50   :  { %5458 = vmatprep.subr.bf16.mxu1 %v10689_v60  ;;  %5420 = vmatpush1.bf16.msra.mxu0 %v10703_v15  ;;  %v3609_v15 = vld [vmem:[#allocation12 + $0x3a8] sm:$0xff] }
 0xb51   :  { %5421 = vmatprep.subr.bf16.mxu0 %v10711_v35  ;;  %v10722_v19 = vcombine.high %v3605_v50, %v3609_v15  ;;  %v10730_v61 = vcombine.low %v3605_v50, %v3609_v15  ;;  %v3494_v15 = vld [vmem:[#allocation12 + $0x10] sm:$0xff]  ;;  %v3495_v50 = vld [vmem:[#allocation12 + $0x18] sm:$0xff] }
 0xb53   :  { %5459 = vmatpush1.bf16.msra.mxu1 %v10693_v52  ;;  %13509 = vst [vmem:[#allocation111_spill] sm:$0xff] %v10722_v19  ;;  %v3613_v52 = vld [vmem:[#allocation12 + $0x3c8] sm:$0xff]  ;;  %13511 = vst [vmem:[#allocation137_spill] sm:$0xff] %v10730_v61 }
 0xb54   :  { %5460 = vmatprep.subr.bf16.mxu1 %v10701_v38  ;;  %v3612_v38 = vld [vmem:[#allocation12 + $0x3c0] sm:$0xff]  ;;  %5422 = vmatpush1.bf16.msra.mxu0 %v10713_v43  ;;  %v10735_v21 = vcombine.high %v3613_v52, %v3617_v10  ;;  %v10742_v45 = vcombine.low %v3613_v52, %v3617_v10  ;;  %v10756_v52 = vld [vmem:[#allocation11] sm:$0xff] }
 0xb55   :  { %5423 = vmatprep.subr.bf16.mxu0 %v10719_v26 }
 0xb56   :  { %13513 = vst [vmem:[#allocation136_spill] sm:$0xff] %v10735_v21  ;;  %13515 = vst [vmem:[#allocation118_spill] sm:$0xff] %v10742_v45 }
 0xb57   :  { %5461 = vmatpush1.bf16.msra.mxu1 %v10705_v5  ;;  %v3616_v5 = vld [vmem:[#allocation12 + $0x3e0] sm:$0xff] }
 0xb58   :  { %5462 = vmatprep.subr.bf16.mxu1 %v10715_v40  ;;  %v10732_v51 = vcombine.high %v3612_v38, %v3616_v5  ;;  %5424 = vmatpush1.bf16.msra.mxu0 %v10726_v59  ;;  %v10738_v35 = vcombine.low %v3612_v38, %v3616_v5  ;;  %v3499_v59 = vld [vmem:[#allocation12 + $0x38] sm:$0xff]  ;;  %v10751_v5 = vcombine.low %v3494_v15, %v3498_v49 }
 0xb59   :  { %v10749_v38 = vcombine.high %v3495_v50, %v3499_v59  ;;  %v10754_v10 = vcombine.low %v3495_v50, %v3499_v59 }
 0xb5a   :  { %13512 = vst [vmem:[#allocation115_spill] sm:$0xff] %v10732_v51  ;;  %13514 = vst [vmem:[#allocation90_spill] sm:$0xff] %v10738_v35  ;;  %5425 = vmatprep.subr.bf16.mxu0 %v10732_v51  ;;  %v13520_v51 = vld [vmem:[#allocation87_spill] sm:$0xff] }
 0xb5b   :  { %5463 = vmatpush1.bf16.msra.mxu1 %v10717_v57  ;;  %13517 = vst [vmem:[#allocation109_spill] sm:$0xff] %v10749_v38  ;;  %13518 = vst [vmem:[#allocation122_spill] sm:$0xff] %v10751_v5  ;;  %v13522_v26 = vsub.s32 3, %v13520_v51  ;;  %v13523_v59 = vsub.s32 0, %v13520_v51  ;;  %v13524_v50 = vsub.s32 2, %v13520_v51 }
 0xb5c   :  { %5464 = vmatprep.subr.bf16.mxu1 %v10722_v19  ;;  %5426 = vmatpush1.bf16.msra.mxu0 %v10738_v35  ;;  %v10747_v19 = vcombine.high %v3494_v15, %v3498_v49  ;;  %13519 = vst [vmem:[#allocation139_spill] sm:$0xff] %v10754_v10 }
 0xb5d   :  { %v10769_v15 = vrot.slane %v10756_v52, %v13522_v26  ;;  %v3624_v49 = vrot.slane %v10756_v52, %v13523_v59 }
 0xb5e   :  { %13516 = vst [vmem:[#allocation99_spill] sm:$0xff] %v10747_v19  ;;  %5477 = vmatprep.subr.bf16.mxu0 %v10747_v19 }
 0xb5f   :  { %5465 = vmatpush1.bf16.msra.mxu1 %v10730_v61 }
 0xb60   :  { %5466 = vmatprep.subr.bf16.mxu1 %v10735_v21 }
 0xb63   :  { %5467 = vmatpush1.bf16.msra.mxu1 %v10742_v45  ;;  %v13521_v45 = vsub.s32 1, %v13520_v51 }
 0xb64   :  { %5518 = vmatprep.subr.bf16.mxu1 %v10749_v38  ;;  %v3632_v38 = vrot.slane %v10756_v52, %v13524_v50 }
 0xb65   :  { %v10764_v61 = vrot.slane %v10756_v52, %v13521_v45 }
 0xba2   :  { %v10759_v35 = vpop.f32.mrb[80].mxu0  ;;  %v4408_v21 = vpop.f32.mrb[96].mxu1 }
 0xba3   :  { %v4337_v19 = vpop.f32.mrb[81].mxu0  ;;  %v4410_v57 = vpop.f32.mrb[97].mxu1 }
 0xba4   :  { %v4339_v43 = vpop.f32.mrb[82].mxu0  ;;  %v4412_v40 = vpop.f32.mrb[98].mxu1 }
 0xba5   :  { %v10777_v60 = vadd.f32 %v4339_v43, %v3624_v49  ;;  %v10779_v45 = vadd.f32 %v4412_v40, %v3632_v38  ;;  %v4341_v16 = vpop.f32.mrb[83].mxu0  ;;  %v4414_v27 = vpop.f32.mrb[99].mxu1 }
 0xba6   :  { %v10782_v26 = vadd.f32 %v4341_v16, %v10764_v61  ;;  %v10785_v46 = vadd.f32 %v4414_v27, %v10769_v15 }
 0xba7   :  { %13525 = vst [vmem:[#allocation113_spill] sm:$0xff] %v10777_v60  ;;  %13526 = vst [vmem:[#allocation134_spill] sm:$0xff] %v10779_v45 }
 0xba8   :  { %13527 = vst [vmem:[#allocation19_spill] sm:$0xff] %v10782_v26  ;;  %13528 = vst [vmem:[#allocation20_spill] sm:$0xff] %v10785_v46 }
 0xbaa   :  { %v4345_v59 = vpop.f32.mrb[84].mxu0  ;;  %v4418_v30 = vpop.f32.mrb[100].mxu1 }
 0xbab   :  { %v10787_v48 = vadd.f32 %v4345_v59, %v3624_v49  ;;  %v10789_v19 = vadd.f32 %v4418_v30, %v3632_v38  ;;  %v4347_v57 = vpop.f32.mrb[85].mxu0  ;;  %v4420_v50 = vpop.f32.mrb[101].mxu1 }
 0xbac   :  { %v10792_v43 = vadd.f32 %v4347_v57, %v10764_v61  ;;  %v10795_v40 = vadd.f32 %v4420_v50, %v10769_v15  ;;  %v4349_v45 = vpop.f32.mrb[86].mxu0  ;;  %v4422_v16 = vpop.f32.mrb[102].mxu1 }
 0xbad   :  { %13529 = vst [vmem:[#allocation21_spill] sm:$0xff] %v10787_v48  ;;  %13530 = vst [vmem:[#allocation22_spill] sm:$0xff] %v10789_v19  ;;  %v10797_v26 = vadd.f32 %v4349_v45, %v3624_v49  ;;  %v10799_v27 = vadd.f32 %v4422_v16, %v3632_v38  ;;  %v4351_v46 = vpop.f32.mrb[87].mxu0  ;;  %v4424_v60 = vpop.f32.mrb[103].mxu1 }
 0xbae   :  { %13531 = vst [vmem:[#allocation23_spill] sm:$0xff] %v10792_v43  ;;  %13532 = vst [vmem:[#allocation24_spill] sm:$0xff] %v10795_v40  ;;  %v10802_v59 = vadd.f32 %v4351_v46, %v10764_v61  ;;  %v10805_v30 = vadd.f32 %v4424_v60, %v10769_v15 }
 0xbaf   :  { %13533 = vst [vmem:[#allocation25_spill] sm:$0xff] %v10797_v26  ;;  %13534 = vst [vmem:[#allocation26_spill] sm:$0xff] %v10799_v27 }
 0xbb0   :  { %13535 = vst [vmem:[#allocation27_spill] sm:$0xff] %v10802_v59  ;;  %13536 = vst [vmem:[#allocation28_spill] sm:$0xff] %v10805_v30 }
 0xbb2   :  { %v4355_v19 = vpop.f32.mrb[88].mxu0  ;;  %v4428_v57 = vpop.f32.mrb[104].mxu1 }
 0xbb3   :  { %v10807_v43 = vadd.f32 %v4355_v19, %v3624_v49  ;;  %v10809_v50 = vadd.f32 %v4428_v57, %v3632_v38  ;;  %v4357_v40 = vpop.f32.mrb[89].mxu0  ;;  %v4430_v48 = vpop.f32.mrb[105].mxu1 }
 0xbb4   :  { %v10812_v45 = vadd.f32 %v4357_v40, %v10764_v61  ;;  %v10815_v16 = vadd.f32 %v4430_v48, %v10769_v15  ;;  %v4359_v27 = vpop.f32.mrb[90].mxu0  ;;  %v4432_v46 = vpop.f32.mrb[106].mxu1 }
 0xbb5   :  { %13537 = vst [vmem:[#allocation29_spill] sm:$0xff] %v10807_v43  ;;  %13538 = vst [vmem:[#allocation30_spill] sm:$0xff] %v10809_v50  ;;  %v10817_v59 = vadd.f32 %v4359_v27, %v3624_v49  ;;  %v10819_v60 = vadd.f32 %v4432_v46, %v3632_v38  ;;  %v4361_v30 = vpop.f32.mrb[91].mxu0  ;;  %v4434_v26 = vpop.f32.mrb[107].mxu1 }
 0xbb6   :  { %13539 = vst [vmem:[#allocation31_spill] sm:$0xff] %v10812_v45  ;;  %13540 = vst [vmem:[#allocation32_spill] sm:$0xff] %v10815_v16  ;;  %v10822_v19 = vadd.f32 %v4361_v30, %v10764_v61  ;;  %v10825_v57 = vadd.f32 %v4434_v26, %v10769_v15 }
 0xbb7   :  { %13541 = vst [vmem:[#allocation33_spill] sm:$0xff] %v10817_v59  ;;  %13542 = vst [vmem:[#allocation34_spill] sm:$0xff] %v10819_v60 }
 0xbb8   :  { %13543 = vst [vmem:[#allocation35_spill] sm:$0xff] %v10822_v19  ;;  %13544 = vst [vmem:[#allocation36_spill] sm:$0xff] %v10825_v57 }
 0xbba   :  { %v4365_v50 = vpop.f32.mrb[92].mxu0  ;;  %v4438_v40 = vpop.f32.mrb[108].mxu1 }
 0xbbb   :  { %v10827_v43 = vadd.f32 %v4365_v50, %v3624_v49  ;;  %v10829_v48 = vadd.f32 %v4438_v40, %v3632_v38  ;;  %v4367_v16 = vpop.f32.mrb[93].mxu0  ;;  %v4440_v45 = vpop.f32.mrb[109].mxu1  ;;  %v4409_v50 = vadd.f32 %v4408_v21, %v3632_v38  ;;  %v4336_v40 = vadd.f32 %v10759_v35, %v3624_v49 }
 0xbbc   :  { %v10832_v27 = vadd.f32 %v4367_v16, %v10764_v61  ;;  %v10835_v46 = vadd.f32 %v4440_v45, %v10769_v15  ;;  %v4369_v60 = vpop.f32.mrb[94].mxu0  ;;  %v4442_v30 = vpop.f32.mrb[110].mxu1  ;;  %v13551_v45 = vsub.s32 4, %v13520_v51  ;;  %v13553_v35 = vsub.s32 7, %v13520_v51 }
 0xbbd   :  { %13545 = vst [vmem:[#allocation37_spill] sm:$0xff] %v10827_v43  ;;  %13546 = vst [vmem:[#allocation38_spill] sm:$0xff] %v10829_v48  ;;  %v10837_v59 = vadd.f32 %v4369_v60, %v3624_v49  ;;  %v10839_v26 = vadd.f32 %v4442_v30, %v3632_v38  ;;  %v4371_v57 = vpop.f32.mrb[95].mxu0  ;;  %v4444_v19 = vpop.f32.mrb[111].mxu1  ;;  %v7672_v48 = vmul.f32 -1.442695, %v4409_v50 }
 0xbbe   :  { %13547 = vst [vmem:[#allocation39_spill] sm:$0xff] %v10832_v27  ;;  %13548 = vst [vmem:[#allocation40_spill] sm:$0xff] %v10835_v46  ;;  %v7670_v43 = vmul.f32 -1.442695, %v4336_v40  ;;  %v10845_v46 = vrot.slane %v10756_v52, %v13551_v45  ;;  %v10855_v38 = vrot.slane %v10756_v52, %v13553_v35 }
 0xbbf   :  { %13549 = vst [vmem:[#allocation41_spill] sm:$0xff] %v10837_v59  ;;  %13550 = vst [vmem:[#allocation42_spill] sm:$0xff] %v10839_v26  ;;  %8262 = vpow2.f32 %v7672_v48  ;;  %v13552_v59 = vsub.s32 5, %v13520_v51 }
 0xbc0   :  { %8264 = vpow2.f32 %v7670_v43  ;;  %v13554_v43 = vsub.s32 6, %v13520_v51  ;;  %v4372_v51 = vadd.f32 %v4371_v57, %v10764_v61 }
 0xbc1   :  { %v10850_v21 = vrot.slane %v10756_v52, %v13552_v59  ;;  %v4445_v59 = vadd.f32 %v4444_v19, %v10769_v15 }
 0xbc2   :  { %v10861_v48 = vrot.slane %v10756_v52, %v13554_v43 }
 0xbc3   :  { %v7673_v43 = vmul.f32 -1.442695, %v4445_v59 }
 0xbc9   :  { %v8263_v16 = vpop.eup %8262 }
 0xbca   :  { %v8265_v27 = vpop.eup %8264  ;;  %v4699_v17 = vadd.f32 1.0, %v8263_v16 }
 0xbcb   :  { %v4687_v60 = vadd.f32 1.0, %v8265_v27 }
 0xbcc   :  { %8266 = vrcp.f32 %v4699_v17 }
 0xbcd   :  { %8268 = vrcp.f32 %v4687_v60 }
 0xbd6   :  { %v8267_v59 = vpop.eup %8266 }
 0xbe2   :  { %v4481_v30 = vpop.f32.mrb[96].mxu0  ;;  %v4554_v26 = vpop.f32.mrb[112].mxu1 }
 0xbe3   :  { %v4482_v49 = vadd.f32 %v4481_v30, %v10845_v46  ;;  %v4483_v27 = vpop.f32.mrb[97].mxu0  ;;  %v4556_v50 = vpop.f32.mrb[113].mxu1 }
 0xbe4   :  { %v4485_v40 = vpop.f32.mrb[98].mxu0  ;;  %v4558_v16 = vpop.f32.mrb[114].mxu1  ;;  %v7671_v27 = vmul.f32 -1.442695, %v4372_v51 }
 0xbe5   :  { %8270 = vtanh.f32 %v4482_v49  ;;  %v10865_v45 = vadd.f32 %v4485_v40, %v10845_v46  ;;  %v10868_v17 = vadd.f32 %v4558_v16, %v10861_v48  ;;  %v4487_v30 = vpop.f32.mrb[99].mxu0  ;;  %v4560_v35 = vpop.f32.mrb[115].mxu1 }
 0xbe6   :  { %v10872_v52 = vadd.f32 %v4487_v30, %v10850_v21  ;;  %v10875_v60 = vadd.f32 %v4560_v35, %v10855_v38  ;;  %8272 = vpow2.f32 %v7673_v43 }
 0xbe7   :  { %8274 = vpow2.f32 %v7671_v27 }
 0xbe8   :  { %13555 = vst [vmem:[#allocation43_spill] sm:$0xff] %v10872_v52  ;;  %13556 = vst [vmem:[#allocation44_spill] sm:$0xff] %v10875_v60  ;;  %v8269_v52 = vpop.eup %8268 }
 0xbea   :  { %v4491_v15 = vpop.f32.mrb[100].mxu0  ;;  %v4564_v19 = vpop.f32.mrb[116].mxu1 }
 0xbeb   :  { %v10878_v49 = vadd.f32 %v4491_v15, %v10845_v46  ;;  %v10881_v50 = vadd.f32 %v4564_v19, %v10861_v48  ;;  %v4493_v40 = vpop.f32.mrb[101].mxu0  ;;  %v4566_v16 = vpop.f32.mrb[117].mxu1 }
 0xbec   :  { %v10884_v61 = vadd.f32 %v4493_v40, %v10850_v21  ;;  %v10887_v57 = vadd.f32 %v4566_v16, %v10855_v38  ;;  %v4495_v30 = vpop.f32.mrb[102].mxu0  ;;  %v4568_v35 = vpop.f32.mrb[118].mxu1 }
 0xbed   :  { %13557 = vst [vmem:[#allocation45_spill] sm:$0xff] %v10878_v49  ;;  %13558 = vst [vmem:[#allocation46_spill] sm:$0xff] %v10881_v50  ;;  %v10890_v51 = vadd.f32 %v4495_v30, %v10845_v46  ;;  %v10893_v15 = vadd.f32 %v4568_v35, %v10861_v48  ;;  %v4497_v19 = vpop.f32.mrb[103].mxu0  ;;  %v4570_v60 = vpop.f32.mrb[119].mxu1 }
 0xbee   :  { %13559 = vst [vmem:[#allocation47_spill] sm:$0xff] %v10884_v61  ;;  %13560 = vst [vmem:[#allocation48_spill] sm:$0xff] %v10887_v57  ;;  %v10896_v40 = vadd.f32 %v4497_v19, %v10850_v21  ;;  %v10899_v16 = vadd.f32 %v4570_v60, %v10855_v38  ;;  %v4719_v61 = vmul.f32 0.0, %v8267_v59  ;;  %v4555_v19 = vadd.f32 %v4554_v26, %v10861_v48 }
 0xbef   :  { %13561 = vst [vmem:[#allocation49_spill] sm:$0xff] %v10890_v51  ;;  %13562 = vst [vmem:[#allocation50_spill] sm:$0xff] %v10893_v15  ;;  %v8271_v57 = vpop.eup %8270 }
 0xbf0   :  { %13563 = vst [vmem:[#allocation51_spill] sm:$0xff] %v10896_v40  ;;  %13564 = vst [vmem:[#allocation52_spill] sm:$0xff] %v10899_v16  ;;  %v4721_v50 = vmul.f32 %v8271_v57, %v8269_v52 }
 0xbf2   :  { %v10901_v43 = vadd.f32 %v4721_v50, %v4719_v61  ;;  %v4501_v30 = vpop.f32.mrb[104].mxu0  ;;  %v4574_v51 = vpop.f32.mrb[120].mxu1 }
 0xbf3   :  { %v10904_v35 = vadd.f32 %v4501_v30, %v10845_v46  ;;  %v10907_v15 = vadd.f32 %v4574_v51, %v10861_v48  ;;  %v4503_v27 = vpop.f32.mrb[105].mxu0  ;;  %v4576_v49 = vpop.f32.mrb[121].mxu1 }
 0xbf4   :  { %v10911_v60 = vadd.f32 %v4503_v27, %v10850_v21  ;;  %v10914_v59 = vadd.f32 %v4576_v49, %v10855_v38  ;;  %v4505_v52 = vpop.f32.mrb[106].mxu0  ;;  %v4578_v50 = vpop.f32.mrb[122].mxu1  ;;  %v7674_v49 = vmul.f32 -1.442695, %v4555_v19 }
 0xbf5   :  { %13565 = vst [vmem:[#allocation53_spill] sm:$0xff] %v10904_v35  ;;  %13566 = vst [vmem:[#allocation54_spill] sm:$0xff] %v10907_v15  ;;  %v10917_v61 = vadd.f32 %v4505_v52, %v10845_v46  ;;  %v10920_v57 = vadd.f32 %v4578_v50, %v10861_v48  ;;  %v4507_v51 = vpop.f32.mrb[107].mxu0  ;;  %v4580_v30 = vpop.f32.mrb[123].mxu1 }
 0xbf6   :  { %13567 = vst [vmem:[#allocation55_spill] sm:$0xff] %v10911_v60  ;;  %13568 = vst [vmem:[#allocation56_spill] sm:$0xff] %v10914_v59  ;;  %v10923_v16 = vadd.f32 %v4507_v51, %v10850_v21  ;;  %v10926_v26 = vadd.f32 %v4580_v30, %v10855_v38  ;;  %v8273_v27 = vpop.eup %8272  ;;  %8276 = vpow2.f32 %v7674_v49 }
 0xbf7   :  { %13569 = vst [vmem:[#allocation57_spill] sm:$0xff] %v10917_v61  ;;  %13570 = vst [vmem:[#allocation58_spill] sm:$0xff] %v10920_v57  ;;  %v8275_v40 = vpop.eup %8274  ;;  %v4700_v15 = vadd.f32 1.0, %v8273_v27 }
 0xbf8   :  { %13571 = vst [vmem:[#allocation59_spill] sm:$0xff] %v10923_v16  ;;  %13572 = vst [vmem:[#allocation60_spill] sm:$0xff] %v10926_v26  ;;  %v4688_v60 = vadd.f32 1.0, %v8275_v40 }
 0xbf9   :  { %8278 = vrcp.f32 %v4700_v15 }
 0xbfa   :  { %v4511_v35 = vpop.f32.mrb[108].mxu0  ;;  %v4584_v59 = vpop.f32.mrb[124].mxu1  ;;  %8280 = vrcp.f32 %v4688_v60 }
 0xbfb   :  { %v10929_v52 = vadd.f32 %v4511_v35, %v10845_v46  ;;  %v10932_v50 = vadd.f32 %v4584_v59, %v10861_v48  ;;  %v4513_v57 = vpop.f32.mrb[109].mxu0  ;;  %v4586_v61 = vpop.f32.mrb[125].mxu1 }
 0xbfc   :  { %v10935_v51 = vadd.f32 %v4513_v57, %v10850_v21  ;;  %v10938_v30 = vadd.f32 %v4586_v61, %v10855_v38  ;;  %v4515_v19 = vpop.f32.mrb[110].mxu0  ;;  %v4588_v27 = vpop.f32.mrb[126].mxu1 }
 0xbfd   :  { %13573 = vst [vmem:[#allocation61_spill] sm:$0xff] %v10929_v52  ;;  %13574 = vst [vmem:[#allocation62_spill] sm:$0xff] %v10932_v50  ;;  %v10941_v26 = vadd.f32 %v4515_v19, %v10845_v46  ;;  %v10944_v40 = vadd.f32 %v4588_v27, %v10861_v48  ;;  %v4517_v35 = vpop.f32.mrb[111].mxu0  ;;  %v4590_v59 = vpop.f32.mrb[127].mxu1 }
 0xbfe   :  { %13575 = vst [vmem:[#allocation63_spill] sm:$0xff] %v10938_v30  ;;  %v4518_v50 = vadd.f32 %v4517_v35, %v10850_v21  ;;  %v4591_v49 = vadd.f32 %v4590_v59, %v10855_v38 }
 0xbff   :  { %13576 = vst [vmem:[#allocation64_spill] sm:$0xff] %v10941_v26  ;;  %13577 = vst [vmem:[#allocation65_spill] sm:$0xff] %v10944_v40  ;;  %v3522_v40 = vld [vmem:[#allocation12 + $0xf0] sm:$0xff] }
 0xc00   :  { %8282 = vtanh.f32 %v4518_v50  ;;  %v7675_v57 = vmul.f32 -1.442695, %v4591_v49  ;;  %v8277_v61 = vpop.eup %8276  ;;  %v3502_v49 = vld [vmem:[#allocation12 + $0x50] sm:$0xff] }
 0xc01   :  { %v4713_v30 = vadd.f32 1.0, %v8277_v61 }
 0xc02   :  { %8284 = vpow2.f32 %v7675_v57  ;;  %v3506_v57 = vld [vmem:[#allocation12 + $0x70] sm:$0xff] }
 0xc03   :  { %v8279_v52 = vpop.eup %8278  ;;  %8286 = vtanh.f32 %v10901_v43 }
 0xc04   :  { %v8281_v16 = vpop.eup %8280  ;;  %v4720_v19 = vmul.f32 0.0, %v8279_v52  ;;  %8288 = vrcp.f32 %v4713_v30  ;;  %v3503_v52 = vld [vmem:[#allocation12 + $0x58] sm:$0xff]  ;;  %v10958_v30 = vcombine.high %v3502_v49, %v3506_v57 }
 0xc06   :  { %13580 = vst [vmem:[#allocation68_spill] sm:$0xff] %v10958_v30 }
 0xc0a   :  { %v8283_v46 = vpop.eup %8282 }
 0xc0b   :  { %v4722_v26 = vmul.f32 %v8283_v46, %v8281_v16  ;;  %v3507_v16 = vld [vmem:[#allocation12 + $0x78] sm:$0xff] }
 0xc0c   :  { %v8285_v48 = vpop.eup %8284 }
 0xc0d   :  { %v10949_v15 = vadd.f32 %v4722_v26, %v4720_v19  ;;  %v4714_v21 = vadd.f32 1.0, %v8285_v48  ;;  %v8287_v38 = vpop.eup %8286  ;;  %v3510_v26 = vld [vmem:[#allocation12 + $0x90] sm:$0xff]  ;;  %v10960_v19 = vcombine.high %v3503_v52, %v3507_v16 }
 0xc0e   :  { %v8289_v60 = vpop.eup %8288  ;;  %v3514_v48 = vld [vmem:[#allocation12 + $0xb0] sm:$0xff] }
 0xc0f   :  { %13578 = vst [vmem:[#allocation66_spill] sm:$0xff] %v10949_v15  ;;  %8290 = vtanh.f32 %v10949_v15  ;;  %v4727_v35 = vmul.f32 %v8289_v60, %v8287_v38  ;;  %13581 = vst [vmem:[#allocation69_spill] sm:$0xff] %v10960_v19  ;;  %v3515_v38 = vld [vmem:[#allocation12 + $0xb8] sm:$0xff]  ;;  %v10966_v60 = vcombine.low %v3502_v49, %v3506_v57  ;;  %v10980_v49 = vcombine.low %v3510_v26, %v3514_v48 }
 0xc10   :  { %8292 = vrcp.f32 %v4714_v21  ;;  %v3511_v21 = vld [vmem:[#allocation12 + $0x98] sm:$0xff] }
 0xc11   :  { %v10954_v46 = vpack.c.bf16 %v4727_v35, %v4727_v35  ;;  %13582 = vst [vmem:[#allocation70_spill] sm:$0xff] %v10966_v60  ;;  %v10974_v35 = vcombine.high %v3511_v21, %v3515_v38  ;;  %13586 = vst [vmem:[#allocation74_spill] sm:$0xff] %v10980_v49  ;;  %v10982_v57 = vcombine.low %v3511_v21, %v3515_v38  ;;  %v3531_v15 = vld [vmem:[#allocation12 + $0x138] sm:$0xff] }
 0xc13   :  { %13585 = vst [vmem:[#allocation72_spill] sm:$0xff] %v10974_v35  ;;  %13587 = vst [vmem:[#allocation75_spill] sm:$0xff] %v10982_v57 }
 0xc19   :  { %v8291_v50 = vpop.eup %8290 }
 0xc1a   :  { %v8293_v27 = vpop.eup %8292 }
 0xc1b   :  { %v4728_v59 = vmul.f32 %v8293_v27, %v8291_v50  ;;  %v10968_v50 = vcombine.low %v3503_v52, %v3507_v16  ;;  %v10972_v27 = vcombine.high %v3510_v26, %v3514_v48 }
 0xc1d   :  { %v10952_v61 = vpack.c.bf16 %v4728_v59, %v4728_v59  ;;  %13583 = vst [vmem:[#allocation71_spill] sm:$0xff] %v10968_v50  ;;  %13584 = vst [vmem:[#allocation73_spill] sm:$0xff] %v10972_v27  ;;  %v3518_v59 = vld [vmem:[#allocation12 + $0xd0] sm:$0xff] }
 0xc1e   :  { %v10986_v52 = vcombine.high %v3518_v59, %v3522_v40  ;;  %v10992_v26 = vcombine.low %v3518_v59, %v3522_v40 }
 0xc1f   :  { %13579 = vst [vmem:[#allocation67_spill] sm:$0xff] %v10952_v61  ;;  %5427 = vmatprep.mubr.bf16.mxu0 %v10952_v61  ;;  %5468 = vmatprep.mubr.bf16.mxu1 %v10952_v61 }
 0xc20   :  { %5428 = vmatmul.mubr.bf16.vlgmr.msra.gmra.mrb[112].mxu0 %v10954_v46  ;;  %5469 = vmatmul.mubr.bf16.vlgmr.msra.gmra.mrb[128].mxu1 %v10954_v46  ;;  %13588 = vst [vmem:[#allocation76_spill] sm:$0xff] %v10986_v52  ;;  %13590 = vst [vmem:[#allocation78_spill] sm:$0xff] %v10992_v26 }
 0xc21   :  { %5478 = vmatpush1.bf16.msra.mxu0 %v10751_v5  ;;  %5519 = vmatpush1.bf16.msra.mxu1 %v10754_v10  ;;  %v3519_v5 = vld [vmem:[#allocation12 + $0xd8] sm:$0xff] }
 0xc22   :  { %5509 = vmatprep.mubr.bf16.mxu0 %v10952_v61  ;;  %5550 = vmatprep.mubr.bf16.mxu1 %v10952_v61  ;;  %v3523_v10 = vld [vmem:[#allocation12 + $0xf8] sm:$0xff]  ;;  %v3526_v61 = vld [vmem:[#allocation12 + $0x110] sm:$0xff] }
 0xc23   :  { %5479 = vmatprep.subr.bf16.mxu0 %v10958_v30  ;;  %5520 = vmatprep.subr.bf16.mxu1 %v10960_v19  ;;  %v10988_v16 = vcombine.high %v3519_v5, %v3523_v10  ;;  %v3530_v19 = vld [vmem:[#allocation12 + $0x130] sm:$0xff]  ;;  %v3527_v30 = vld [vmem:[#allocation12 + $0x118] sm:$0xff]  ;;  %v10994_v48 = vcombine.low %v3519_v5, %v3523_v10 }
 0xc24   :  { %v10998_v21 = vcombine.high %v3526_v61, %v3530_v19  ;;  %v11000_v38 = vcombine.high %v3527_v30, %v3531_v15  ;;  %v11004_v40 = vcombine.low %v3526_v61, %v3530_v19  ;;  %v11006_v5 = vcombine.low %v3527_v30, %v3531_v15 }
 0xc25   :  { %5480 = vmatpush1.bf16.msra.mxu0 %v10966_v60  ;;  %5521 = vmatpush1.bf16.msra.mxu1 %v10968_v50  ;;  %13589 = vst [vmem:[#allocation77_spill] sm:$0xff] %v10988_v16  ;;  %13591 = vst [vmem:[#allocation79_spill] sm:$0xff] %v10994_v48  ;;  %v3535_v50 = vld [vmem:[#allocation12 + $0x158] sm:$0xff] }
 0xc26   :  { %5481 = vmatprep.subr.bf16.mxu0 %v10972_v27  ;;  %5522 = vmatprep.subr.bf16.mxu1 %v10974_v35  ;;  %13592 = vst [vmem:[#allocation80_spill] sm:$0xff] %v10998_v21  ;;  %13593 = vst [vmem:[#allocation81_spill] sm:$0xff] %v11000_v38  ;;  %v3534_v35 = vld [vmem:[#allocation12 + $0x150] sm:$0xff]  ;;  %v3539_v60 = vld [vmem:[#allocation12 + $0x178] sm:$0xff] }
 0xc27   :  { %v3538_v27 = vld [vmem:[#allocation12 + $0x170] sm:$0xff]  ;;  %13594 = vst [vmem:[#allocation82_spill] sm:$0xff] %v11004_v40  ;;  %13595 = vst [vmem:[#allocation83_spill] sm:$0xff] %v11006_v5  ;;  %v11012_v59 = vcombine.high %v3535_v50, %v3539_v60  ;;  %v11018_v15 = vcombine.low %v3535_v50, %v3539_v60 }
 0xc28   :  { %v11010_v10 = vcombine.high %v3534_v35, %v3538_v27  ;;  %v11016_v61 = vcombine.low %v3534_v35, %v3538_v27 }
 0xc29   :  { %5482 = vmatpush1.bf16.msra.mxu0 %v10980_v49  ;;  %5523 = vmatpush1.bf16.msra.mxu1 %v10982_v57  ;;  %13597 = vst [vmem:[#allocation95_spill] sm:$0xff] %v11012_v59  ;;  %v3543_v57 = vld [vmem:[#allocation12 + $0x198] sm:$0xff]  ;;  %13599 = vst [vmem:[#allocation94_spill] sm:$0xff] %v11018_v15 }
 0xc2a   :  { %5483 = vmatprep.subr.bf16.mxu0 %v10986_v52  ;;  %5524 = vmatprep.subr.bf16.mxu1 %v10988_v16  ;;  %13596 = vst [vmem:[#allocation84_spill] sm:$0xff] %v11010_v10  ;;  %v3542_v16 = vld [vmem:[#allocation12 + $0x190] sm:$0xff]  ;;  %v3547_v49 = vld [vmem:[#allocation12 + $0x1b8] sm:$0xff]  ;;  %13598 = vst [vmem:[#allocation124_spill] sm:$0xff] %v11016_v61 }
 0xc2b   :  { %v3546_v52 = vld [vmem:[#allocation12 + $0x1b0] sm:$0xff]  ;;  %v11024_v19 = vcombine.high %v3543_v57, %v3547_v49  ;;  %v11030_v60 = vcombine.low %v3543_v57, %v3547_v49 }
 0xc2c   :  { %v11022_v30 = vcombine.high %v3542_v16, %v3546_v52  ;;  %v11028_v27 = vcombine.low %v3542_v16, %v3546_v52 }
 0xc2d   :  { %5484 = vmatpush1.bf16.msra.mxu0 %v10992_v26  ;;  %5525 = vmatpush1.bf16.msra.mxu1 %v10994_v48  ;;  %13601 = vst [vmem:[#allocation127_spill] sm:$0xff] %v11024_v19  ;;  %v3551_v48 = vld [vmem:[#allocation12 + $0x1d8] sm:$0xff]  ;;  %13603 = vst [vmem:[#allocation107_spill] sm:$0xff] %v11030_v60 }
 0xc2e   :  { %5485 = vmatprep.subr.bf16.mxu0 %v10998_v21  ;;  %5526 = vmatprep.subr.bf16.mxu1 %v11000_v38  ;;  %13600 = vst [vmem:[#allocation104_spill] sm:$0xff] %v11022_v30  ;;  %v3550_v38 = vld [vmem:[#allocation12 + $0x1d0] sm:$0xff]  ;;  %v3555_v26 = vld [vmem:[#allocation12 + $0x1f8] sm:$0xff]  ;;  %13602 = vst [vmem:[#allocation141_spill] sm:$0xff] %v11028_v27 }
 0xc2f   :  { %v3554_v21 = vld [vmem:[#allocation12 + $0x1f0] sm:$0xff]  ;;  %v11036_v35 = vcombine.high %v3551_v48, %v3555_v26  ;;  %v11042_v49 = vcombine.low %v3551_v48, %v3555_v26 }
 0xc30   :  { %v11034_v50 = vcombine.high %v3550_v38, %v3554_v21  ;;  %v11040_v52 = vcombine.low %v3550_v38, %v3554_v21 }
 0xc31   :  { %5486 = vmatpush1.bf16.msra.mxu0 %v11004_v40  ;;  %5527 = vmatpush1.bf16.msra.mxu1 %v11006_v5  ;;  %13605 = vst [vmem:[#allocation184_spill] sm:$0xff] %v11036_v35  ;;  %v3559_v5 = vld [vmem:[#allocation12 + $0x218] sm:$0xff]  ;;  %13607 = vst [vmem:[#allocation186_spill] sm:$0xff] %v11042_v49 }
 0xc32   :  { %5487 = vmatprep.subr.bf16.mxu0 %v11010_v10  ;;  %5528 = vmatprep.subr.bf16.mxu1 %v11012_v59  ;;  %13604 = vst [vmem:[#allocation132_spill] sm:$0xff] %v11034_v50  ;;  %v3558_v59 = vld [vmem:[#allocation12 + $0x210] sm:$0xff]  ;;  %v3563_v40 = vld [vmem:[#allocation12 + $0x238] sm:$0xff]  ;;  %13606 = vst [vmem:[#allocation185_spill] sm:$0xff] %v11040_v52 }
 0xc33   :  { %v3562_v10 = vld [vmem:[#allocation12 + $0x230] sm:$0xff]  ;;  %v11048_v16 = vcombine.high %v3559_v5, %v3563_v40  ;;  %v11054_v26 = vcombine.low %v3559_v5, %v3563_v40 }
 0xc34   :  { %v11046_v57 = vcombine.high %v3558_v59, %v3562_v10  ;;  %v11052_v21 = vcombine.low %v3558_v59, %v3562_v10 }
 0xc35   :  { %5488 = vmatpush1.bf16.msra.mxu0 %v11016_v61  ;;  %5529 = vmatpush1.bf16.msra.mxu1 %v11018_v15  ;;  %13609 = vst [vmem:[#allocation188_spill] sm:$0xff] %v11048_v16  ;;  %v3567_v15 = vld [vmem:[#allocation12 + $0x258] sm:$0xff]  ;;  %13611 = vst [vmem:[#allocation190_spill] sm:$0xff] %v11054_v26 }
 0xc36   :  { %5489 = vmatprep.subr.bf16.mxu0 %v11022_v30  ;;  %5530 = vmatprep.subr.bf16.mxu1 %v11024_v19  ;;  %13608 = vst [vmem:[#allocation187_spill] sm:$0xff] %v11046_v57  ;;  %v3566_v19 = vld [vmem:[#allocation12 + $0x250] sm:$0xff]  ;;  %v3571_v61 = vld [vmem:[#allocation12 + $0x278] sm:$0xff]  ;;  %13610 = vst [vmem:[#allocation189_spill] sm:$0xff] %v11052_v21 }
 0xc37   :  { %v3570_v30 = vld [vmem:[#allocation12 + $0x270] sm:$0xff]  ;;  %v11060_v38 = vcombine.high %v3567_v15, %v3571_v61  ;;  %v11066_v40 = vcombine.low %v3567_v15, %v3571_v61 }
 0xc38   :  { %v11058_v48 = vcombine.high %v3566_v19, %v3570_v30  ;;  %v11064_v10 = vcombine.low %v3566_v19, %v3570_v30 }
 0xc39   :  { %5490 = vmatpush1.bf16.msra.mxu0 %v11028_v27  ;;  %5531 = vmatpush1.bf16.msra.mxu1 %v11030_v60  ;;  %13613 = vst [vmem:[#allocation192_spill] sm:$0xff] %v11060_v38  ;;  %v3575_v60 = vld [vmem:[#allocation12 + $0x298] sm:$0xff]  ;;  %13615 = vst [vmem:[#allocation194_spill] sm:$0xff] %v11066_v40 }
 0xc3a   :  { %5491 = vmatprep.subr.bf16.mxu0 %v11034_v50  ;;  %5532 = vmatprep.subr.bf16.mxu1 %v11036_v35  ;;  %13612 = vst [vmem:[#allocation191_spill] sm:$0xff] %v11058_v48  ;;  %v3574_v35 = vld [vmem:[#allocation12 + $0x290] sm:$0xff]  ;;  %v3579_v27 = vld [vmem:[#allocation12 + $0x2b8] sm:$0xff]  ;;  %13614 = vst [vmem:[#allocation193_spill] sm:$0xff] %v11064_v10 }
 0xc3b   :  { %v3578_v50 = vld [vmem:[#allocation12 + $0x2b0] sm:$0xff]  ;;  %v11072_v59 = vcombine.high %v3575_v60, %v3579_v27  ;;  %v11078_v61 = vcombine.low %v3575_v60, %v3579_v27 }
 0xc3c   :  { %v11070_v5 = vcombine.high %v3574_v35, %v3578_v50  ;;  %v11076_v30 = vcombine.low %v3574_v35, %v3578_v50 }
 0xc3d   :  { %5492 = vmatpush1.bf16.msra.mxu0 %v11040_v52  ;;  %5533 = vmatpush1.bf16.msra.mxu1 %v11042_v49  ;;  %13617 = vst [vmem:[#allocation196_spill] sm:$0xff] %v11072_v59  ;;  %v3583_v49 = vld [vmem:[#allocation12 + $0x2d8] sm:$0xff]  ;;  %13619 = vst [vmem:[#allocation198_spill] sm:$0xff] %v11078_v61 }
 0xc3e   :  { %5493 = vmatprep.subr.bf16.mxu0 %v11046_v57  ;;  %5534 = vmatprep.subr.bf16.mxu1 %v11048_v16  ;;  %13616 = vst [vmem:[#allocation195_spill] sm:$0xff] %v11070_v5  ;;  %v3582_v16 = vld [vmem:[#allocation12 + $0x2d0] sm:$0xff]  ;;  %v3587_v52 = vld [vmem:[#allocation12 + $0x2f8] sm:$0xff]  ;;  %13618 = vst [vmem:[#allocation197_spill] sm:$0xff] %v11076_v30 }
 0xc3f   :  { %v3586_v57 = vld [vmem:[#allocation12 + $0x2f0] sm:$0xff]  ;;  %v11084_v19 = vcombine.high %v3583_v49, %v3587_v52  ;;  %v11090_v27 = vcombine.low %v3583_v49, %v3587_v52 }
 0xc40   :  { %v11082_v15 = vcombine.high %v3582_v16, %v3586_v57  ;;  %v11088_v50 = vcombine.low %v3582_v16, %v3586_v57 }
 0xc41   :  { %5494 = vmatpush1.bf16.msra.mxu0 %v11052_v21  ;;  %5535 = vmatpush1.bf16.msra.mxu1 %v11054_v26  ;;  %13621 = vst [vmem:[#allocation200_spill] sm:$0xff] %v11084_v19  ;;  %v3591_v26 = vld [vmem:[#allocation12 + $0x318] sm:$0xff]  ;;  %13623 = vst [vmem:[#allocation202_spill] sm:$0xff] %v11090_v27 }
 0xc42   :  { %5495 = vmatprep.subr.bf16.mxu0 %v11058_v48  ;;  %5536 = vmatprep.subr.bf16.mxu1 %v11060_v38  ;;  %13620 = vst [vmem:[#allocation199_spill] sm:$0xff] %v11082_v15  ;;  %v3590_v38 = vld [vmem:[#allocation12 + $0x310] sm:$0xff]  ;;  %v3595_v21 = vld [vmem:[#allocation12 + $0x338] sm:$0xff]  ;;  %13622 = vst [vmem:[#allocation201_spill] sm:$0xff] %v11088_v50 }
 0xc43   :  { %v3594_v48 = vld [vmem:[#allocation12 + $0x330] sm:$0xff]  ;;  %v11096_v35 = vcombine.high %v3591_v26, %v3595_v21  ;;  %v11102_v52 = vcombine.low %v3591_v26, %v3595_v21 }
 0xc44   :  { %v11094_v60 = vcombine.high %v3590_v38, %v3594_v48  ;;  %v11100_v57 = vcombine.low %v3590_v38, %v3594_v48 }
 0xc45   :  { %5496 = vmatpush1.bf16.msra.mxu0 %v11064_v10  ;;  %5537 = vmatpush1.bf16.msra.mxu1 %v11066_v40  ;;  %13625 = vst [vmem:[#allocation204_spill] sm:$0xff] %v11096_v35  ;;  %v3599_v40 = vld [vmem:[#allocation12 + $0x358] sm:$0xff]  ;;  %13627 = vst [vmem:[#allocation126_spill] sm:$0xff] %v11102_v52 }
 0xc46   :  { %5497 = vmatprep.subr.bf16.mxu0 %v11070_v5  ;;  %5538 = vmatprep.subr.bf16.mxu1 %v11072_v59  ;;  %13624 = vst [vmem:[#allocation203_spill] sm:$0xff] %v11094_v60  ;;  %v3598_v59 = vld [vmem:[#allocation12 + $0x350] sm:$0xff]  ;;  %v3603_v10 = vld [vmem:[#allocation12 + $0x378] sm:$0xff]  ;;  %13626 = vst [vmem:[#allocation97_spill] sm:$0xff] %v11100_v57 }
 0xc47   :  { %v3602_v5 = vld [vmem:[#allocation12 + $0x370] sm:$0xff]  ;;  %v11108_v16 = vcombine.high %v3599_v40, %v3603_v10  ;;  %v11114_v21 = vcombine.low %v3599_v40, %v3603_v10 }
 0xc48   :  { %v11106_v49 = vcombine.high %v3598_v59, %v3602_v5  ;;  %v11112_v48 = vcombine.low %v3598_v59, %v3602_v5 }
 0xc49   :  { %5498 = vmatpush1.bf16.msra.mxu0 %v11076_v30  ;;  %5539 = vmatpush1.bf16.msra.mxu1 %v11078_v61  ;;  %13629 = vst [vmem:[#allocation102_spill] sm:$0xff] %v11108_v16  ;;  %v3607_v61 = vld [vmem:[#allocation12 + $0x398] sm:$0xff]  ;;  %13631 = vst [vmem:[#allocation142_spill] sm:$0xff] %v11114_v21 }
 0xc4a   :  { %5499 = vmatprep.subr.bf16.mxu0 %v11082_v15  ;;  %5540 = vmatprep.subr.bf16.mxu1 %v11084_v19  ;;  %13628 = vst [vmem:[#allocation92_spill] sm:$0xff] %v11106_v49  ;;  %v3606_v19 = vld [vmem:[#allocation12 + $0x390] sm:$0xff]  ;;  %v3611_v30 = vld [vmem:[#allocation12 + $0x3b8] sm:$0xff]  ;;  %13630 = vst [vmem:[#allocation129_spill] sm:$0xff] %v11112_v48 }
 0xc4b   :  { %v3610_v15 = vld [vmem:[#allocation12 + $0x3b0] sm:$0xff]  ;;  %v11120_v38 = vcombine.high %v3607_v61, %v3611_v30  ;;  %v11126_v10 = vcombine.low %v3607_v61, %v3611_v30  ;;  %v13642_v61 = vld [vmem:[#allocation114_spill] sm:$0xff] }
 0xc4c   :  { %v11118_v26 = vcombine.high %v3606_v19, %v3610_v15  ;;  %v11124_v5 = vcombine.low %v3606_v19, %v3610_v15  ;;  %v13641_v30 = vld [vmem:[#allocation117_spill] sm:$0xff]  ;;  %v13643_v15 = vld [vmem:[#allocation135_spill] sm:$0xff] }
 0xc4d   :  { %5500 = vmatpush1.bf16.msra.mxu0 %v11088_v50  ;;  %5541 = vmatpush1.bf16.msra.mxu1 %v11090_v27  ;;  %13633 = vst [vmem:[#allocation130_spill] sm:$0xff] %v11120_v38  ;;  %v3615_v27 = vld [vmem:[#allocation12 + $0x3d8] sm:$0xff]  ;;  %13635 = vst [vmem:[#allocation93_spill] sm:$0xff] %v11126_v10  ;;  %v13644_v19 = vld [vmem:[#allocation121_spill] sm:$0xff] }
 0xc4e   :  { %5501 = vmatprep.subr.bf16.mxu0 %v11094_v60  ;;  %5542 = vmatprep.subr.bf16.mxu1 %v11096_v35  ;;  %13632 = vst [vmem:[#allocation105_spill] sm:$0xff] %v11118_v26  ;;  %v3614_v35 = vld [vmem:[#allocation12 + $0x3d0] sm:$0xff]  ;;  %v3619_v50 = vld [vmem:[#allocation12 + $0x3f8] sm:$0xff]  ;;  %13634 = vst [vmem:[#allocation143_spill] sm:$0xff] %v11124_v5 }
 0xc4f   :  { %v3618_v60 = vld [vmem:[#allocation12 + $0x3f0] sm:$0xff]  ;;  %v11132_v59 = vcombine.high %v3615_v27, %v3619_v50 }
 0xc50   :  { %v11130_v40 = vcombine.high %v3614_v35, %v3618_v60 }
 0xc51   :  { %5502 = vmatpush1.bf16.msra.mxu0 %v11100_v57  ;;  %5543 = vmatpush1.bf16.msra.mxu1 %v11102_v52  ;;  %13637 = vst [vmem:[#allocation85_spill] sm:$0xff] %v11132_v59 }
 0xc52   :  { %5503 = vmatprep.subr.bf16.mxu0 %v11106_v49  ;;  %5544 = vmatprep.subr.bf16.mxu1 %v11108_v16  ;;  %13636 = vst [vmem:[#allocation145_spill] sm:$0xff] %v11130_v40  ;;  %v11136_v16 = vcombine.low %v3614_v35, %v3618_v60  ;;  %v13647_v60 = vld [vmem:[#allocation163_spill] sm:$0xff]  ;;  %v13648_v35 = vld [vmem:[#allocation164_spill] sm:$0xff] }
 0xc54   :  { %13638 = vst [vmem:[#allocation96_spill] sm:$0xff] %v11136_v16 }
 0xc55   :  { %5504 = vmatpush1.bf16.msra.mxu0 %v11112_v48  ;;  %5545 = vmatpush1.bf16.msra.mxu1 %v11114_v21  ;;  %v11138_v48 = vcombine.low %v3615_v27, %v3619_v50  ;;  %v13645_v50 = vld [vmem:[#allocation138_spill] sm:$0xff] }
 0xc56   :  { %5505 = vmatprep.subr.bf16.mxu0 %v11118_v26  ;;  %5546 = vmatprep.subr.bf16.mxu1 %v11120_v38  ;;  %v13646_v27 = vld [vmem:[#allocation162_spill] sm:$0xff] }
 0xc57   :  { %13639 = vst [vmem:[#allocation106_spill] sm:$0xff] %v11138_v48 }
 0xc59   :  { %5506 = vmatpush1.bf16.msra.mxu0 %v11124_v5  ;;  %5547 = vmatpush1.bf16.msra.mxu1 %v11126_v10 }
 0xc5a   :  { %5507 = vmatprep.subr.bf16.mxu0 %v11130_v40  ;;  %5548 = vmatprep.subr.bf16.mxu1 %v11132_v59 }
 0xc5d   :  { %5508 = vmatpush1.bf16.msra.mxu0 %v11136_v16  ;;  %5549 = vmatpush1.bf16.msra.mxu1 %v11138_v48 }
 0xc5e   :  { %5641 = vmatprep.subr.bf16.mxu0 %v10555_v58  ;;  %5682 = vmatprep.subr.bf16.mxu1 %v10559_v37 }
 0xc60   :  { %5510 = vmatmul.mubr.bf16.vlgmr.msra.gmra.mrb[116].mxu0 %v10954_v46  ;;  %5551 = vmatmul.mubr.bf16.vlgmr.msra.gmra.mrb[132].mxu1 %v10954_v46  ;;  %v13640_v46 = vld [vmem:[#allocation89_spill] sm:$0xff] }
 0xc61   :  { %5642 = vmatpush1.bf16.msra.mxu0 %v10557_v12  ;;  %5683 = vmatpush1.bf16.msra.mxu1 %v10561_v20 }
 0xc62   :  { %5643 = vmatprep.subr.bf16.mxu0 %v10567_v3  ;;  %5684 = vmatprep.subr.bf16.mxu1 %v10569_v63 }
 0xc65   :  { %5644 = vmatpush1.bf16.msra.mxu0 %v10571_v54  ;;  %5685 = vmatpush1.bf16.msra.mxu1 %v10573_v32 }
 0xc66   :  { %5645 = vmatprep.subr.bf16.mxu0 %v10579_v7  ;;  %5686 = vmatprep.subr.bf16.mxu1 %v10581_v23 }
 0xc69   :  { %5646 = vmatpush1.bf16.msra.mxu0 %v10583_v13  ;;  %5687 = vmatpush1.bf16.msra.mxu1 %v10585_v29 }
 0xc6a   :  { %5647 = vmatprep.subr.bf16.mxu0 %v10591_v39  ;;  %5688 = vmatprep.subr.bf16.mxu1 %v10593_v22 }
 0xc6d   :  { %5648 = vmatpush1.bf16.msra.mxu0 %v10595_v47  ;;  %5689 = vmatpush1.bf16.msra.mxu1 %v10597_v34 }
 0xc6e   :  { %5649 = vmatprep.subr.bf16.mxu0 %v10603_v53  ;;  %5690 = vmatprep.subr.bf16.mxu1 %v10605_v4 }
 0xc71   :  { %5650 = vmatpush1.bf16.msra.mxu0 %v10607_v41  ;;  %5691 = vmatpush1.bf16.msra.mxu1 %v10609_v56 }
 0xc72   :  { %5651 = vmatprep.subr.bf16.mxu0 %v10615_v9  ;;  %5692 = vmatprep.subr.bf16.mxu1 %v10617_v36 }
 0xc75   :  { %5652 = vmatpush1.bf16.msra.mxu0 %v10619_v44  ;;  %5693 = vmatpush1.bf16.msra.mxu1 %v10621_v8 }
 0xc76   :  { %5653 = vmatprep.subr.bf16.mxu0 %v10627_v62  ;;  %5694 = vmatprep.subr.bf16.mxu1 %v10629_v0 }
 0xc79   :  { %5654 = vmatpush1.bf16.msra.mxu0 %v10631_v1  ;;  %5695 = vmatpush1.bf16.msra.mxu1 %v10633_v24 }
 0xc7a   :  { %5655 = vmatprep.subr.bf16.mxu0 %v10639_v18  ;;  %5696 = vmatprep.subr.bf16.mxu1 %v10641_v14 }
 0xc7d   :  { %5656 = vmatpush1.bf16.msra.mxu0 %v10643_v28  ;;  %5697 = vmatpush1.bf16.msra.mxu1 %v10645_v25 }
 0xc7e   :  { %5657 = vmatprep.subr.bf16.mxu0 %v10651_v42  ;;  %5698 = vmatprep.subr.bf16.mxu1 %v10653_v55  ;;  %v13669_v55 = vld [vmem:[#allocation39_spill] sm:$0xff]  ;;  %v13670_v42 = vld [vmem:[#allocation40_spill] sm:$0xff] }
 0xc81   :  { %5658 = vmatpush1.bf16.msra.mxu0 %v10655_v2  ;;  %5699 = vmatpush1.bf16.msra.mxu1 %v10657_v33  ;;  %v13668_v33 = vld [vmem:[#allocation134_spill] sm:$0xff] }
 0xc82   :  { %5659 = vmatprep.subr.bf16.mxu0 %v10663_v11  ;;  %5700 = vmatprep.subr.bf16.mxu1 %v10665_v31  ;;  %v13649_v31 = vld [vmem:[#allocation165_spill] sm:$0xff] }
 0xc83   :  { %v13667_v11 = vld [vmem:[#allocation113_spill] sm:$0xff] }
 0xc85   :  { %5660 = vmatpush1.bf16.msra.mxu0 %v10667_v6  ;;  %5701 = vmatpush1.bf16.msra.mxu1 %v13640_v46  ;;  %v13650_v6 = vld [vmem:[#allocation166_spill] sm:$0xff]  ;;  %v13651_v46 = vld [vmem:[#allocation167_spill] sm:$0xff] }
 0xc86   :  { %5661 = vmatprep.subr.bf16.mxu0 %v13641_v30  ;;  %5702 = vmatprep.subr.bf16.mxu1 %v13642_v61  ;;  %v13652_v30 = vld [vmem:[#allocation168_spill] sm:$0xff] }
 0xc87   :  { %v13653_v61 = vld [vmem:[#allocation172_spill] sm:$0xff] }
 0xc89   :  { %5662 = vmatpush1.bf16.msra.mxu0 %v13643_v15  ;;  %5703 = vmatpush1.bf16.msra.mxu1 %v13644_v19  ;;  %v13654_v15 = vld [vmem:[#allocation88_spill] sm:$0xff]  ;;  %v13655_v19 = vld [vmem:[#allocation173_spill] sm:$0xff] }
 0xc8a   :  { %5663 = vmatprep.subr.bf16.mxu0 %v13645_v50  ;;  %5704 = vmatprep.subr.bf16.mxu1 %v13646_v27  ;;  %v13656_v50 = vld [vmem:[#allocation116_spill] sm:$0xff]  ;;  %v13657_v27 = vld [vmem:[#allocation101_spill] sm:$0xff] }
 0xc8d   :  { %5664 = vmatpush1.bf16.msra.mxu0 %v13647_v60  ;;  %5705 = vmatpush1.bf16.msra.mxu1 %v13648_v35  ;;  %v13658_v60 = vld [vmem:[#allocation111_spill] sm:$0xff]  ;;  %v13659_v35 = vld [vmem:[#allocation120_spill] sm:$0xff] }
 0xc8e   :  { %5665 = vmatprep.subr.bf16.mxu0 %v13649_v31  ;;  %5706 = vmatprep.subr.bf16.mxu1 %v13650_v6  ;;  %v13660_v31 = vld [vmem:[#allocation137_spill] sm:$0xff]  ;;  %v13661_v6 = vld [vmem:[#allocation115_spill] sm:$0xff] }
 0xc91   :  { %5666 = vmatpush1.bf16.msra.mxu0 %v13651_v46  ;;  %5707 = vmatpush1.bf16.msra.mxu1 %v13652_v30  ;;  %v13662_v46 = vld [vmem:[#allocation136_spill] sm:$0xff]  ;;  %v13663_v30 = vld [vmem:[#allocation90_spill] sm:$0xff] }
 0xc92   :  { %5667 = vmatprep.subr.bf16.mxu0 %v13653_v61  ;;  %5708 = vmatprep.subr.bf16.mxu1 %v13654_v15  ;;  %v13664_v61 = vld [vmem:[#allocation118_spill] sm:$0xff]  ;;  %v13665_v15 = vld [vmem:[#allocation99_spill] sm:$0xff] }
 0xc95   :  { %5668 = vmatpush1.bf16.msra.mxu0 %v13655_v19  ;;  %5709 = vmatpush1.bf16.msra.mxu1 %v13656_v50  ;;  %v13666_v19 = vld [vmem:[#allocation109_spill] sm:$0xff] }
 0xc96   :  { %5669 = vmatprep.subr.bf16.mxu0 %v13657_v27  ;;  %5710 = vmatprep.subr.bf16.mxu1 %v13658_v60 }
 0xc99   :  { %5670 = vmatpush1.bf16.msra.mxu0 %v13659_v35  ;;  %5711 = vmatpush1.bf16.msra.mxu1 %v13660_v31 }
 0xc9a   :  { %5671 = vmatprep.subr.bf16.mxu0 %v13661_v6  ;;  %5712 = vmatprep.subr.bf16.mxu1 %v13662_v46 }
 0xc9d   :  { %5672 = vmatpush1.bf16.msra.mxu0 %v13663_v30  ;;  %5713 = vmatpush1.bf16.msra.mxu1 %v13664_v61 }
 0xc9e   :  { %5723 = vmatprep.subr.bf16.mxu0 %v13665_v15  ;;  %5764 = vmatprep.subr.bf16.mxu1 %v13666_v19 }
 0xcf3   :  { %v5429_v50 = vpop.f32.mrb[112].mxu0  ;;  %v5470_v27 = vpop.f32.mrb[128].mxu1 }
 0xcf4   :  { %v5559_v60 = vadd.f32 %v5429_v50, %v13667_v11  ;;  %v5561_v35 = vadd.f32 %v5470_v27, %v13668_v33  ;;  %v5431_v2 = vpop.f32.mrb[113].mxu0  ;;  %v5472_v31 = vpop.f32.mrb[129].mxu1 }
 0xcf5   :  { %v5560_v6 = vadd.f32 %v5431_v2, %v13669_v55  ;;  %v5562_v46 = vadd.f32 %v5472_v31, %v13670_v42  ;;  %v5433_v25 = vpop.f32.mrb[114].mxu0  ;;  %v5474_v30 = vpop.f32.mrb[130].mxu1 }
 0xcf6   :  { %v5434_v28 = vpop.f32.mrb[115].mxu0  ;;  %v5475_v61 = vpop.f32.mrb[131].mxu1  ;;  %v7804_v14 = vmul.f32 -1.442695, %v5559_v60  ;;  %v7806_v15 = vmul.f32 -1.442695, %v5561_v35 }
 0xcf7   :  { %v7805_v18 = vmul.f32 -1.442695, %v5560_v6  ;;  %v7807_v19 = vmul.f32 -1.442695, %v5562_v46  ;;  %v13671_v30 = vld [vmem:[#allocation63_spill] sm:$0xff] }
 0xcf8   :  { %8294 = vpow2.f32 %v7804_v14 }
 0xcf9   :  { %8296 = vpow2.f32 %v7806_v15 }
 0xcfa   :  { %8298 = vpow2.f32 %v7805_v18 }
 0xcfb   :  { %8300 = vpow2.f32 %v7807_v19 }
 0xd02   :  { %v8295_v11 = vpop.eup %8294 }
 0xd03   :  { %v8297_v33 = vpop.eup %8296  ;;  %v5573_v24 = vadd.f32 1.0, %v8295_v11 }
 0xd04   :  { %v8299_v50 = vpop.eup %8298  ;;  %v5585_v55 = vadd.f32 1.0, %v8297_v33 }
 0xd05   :  { %v8301_v27 = vpop.eup %8300  ;;  %v5574_v2 = vadd.f32 1.0, %v8299_v50  ;;  %8302 = vrcp.f32 %v5573_v24 }
 0xd06   :  { %v5586_v42 = vadd.f32 1.0, %v8301_v27  ;;  %8304 = vrcp.f32 %v5585_v55 }
 0xd07   :  { %8306 = vrcp.f32 %v5574_v2 }
 0xd08   :  { %8308 = vrcp.f32 %v5586_v42 }
 0xd33   :  { %v5511_v28 = vpop.f32.mrb[116].mxu0  ;;  %v5552_v25 = vpop.f32.mrb[132].mxu1 }
 0xd34   :  { %v5563_v31 = vadd.f32 %v5511_v28, %v10865_v45  ;;  %v5565_v14 = vadd.f32 %v5552_v25, %v10868_v17  ;;  %v5513_v6 = vpop.f32.mrb[117].mxu0  ;;  %v5554_v18 = vpop.f32.mrb[133].mxu1  ;;  %v13672_v28 = vld [vmem:[#allocation66_spill] sm:$0xff] }
 0xd35   :  { %v5564_v46 = vadd.f32 %v5513_v6, %v10935_v51  ;;  %v5566_v61 = vadd.f32 %v5554_v18, %v13671_v30  ;;  %v5515_v15 = vpop.f32.mrb[118].mxu0  ;;  %v5556_v19 = vpop.f32.mrb[134].mxu1 }
 0xd36   :  { %8310 = vtanh.f32 %v5563_v31  ;;  %v7808_v60 = vmul.f32 -1.442695, %v5565_v14  ;;  %v5516_v24 = vpop.f32.mrb[119].mxu0  ;;  %v5557_v35 = vpop.f32.mrb[135].mxu1 }
 0xd37   :  { %8312 = vtanh.f32 %v5564_v46  ;;  %v7809_v11 = vmul.f32 -1.442695, %v5566_v61  ;;  %v8303_v45 = vpop.eup %8302 }
 0xd38   :  { %8314 = vpow2.f32 %v7808_v60  ;;  %v8305_v33 = vpop.eup %8304 }
 0xd39   :  { %8316 = vpow2.f32 %v7809_v11  ;;  %v8307_v17 = vpop.eup %8306  ;;  %v5605_v51 = vmul.f32 %v8305_v33, %v10901_v43  ;;  %v13674_v33 = vld [vmem:[#allocation139_spill] sm:$0xff] }
 0xd3a   :  { %v8309_v50 = vpop.eup %8308 }
 0xd3b   :  { %v5606_v25 = vmul.f32 %v8309_v50, %v13672_v28  ;;  %v13676_v50 = vld [vmem:[#allocation69_spill] sm:$0xff]  ;;  %v13682_v28 = vld [vmem:[#allocation75_spill] sm:$0xff] }
 0xd40   :  { %v8311_v27 = vpop.eup %8310 }
 0xd41   :  { %v8313_v55 = vpop.eup %8312  ;;  %v5607_v2 = vmul.f32 %v8311_v27, %v8303_v45  ;;  %v13673_v45 = vld [vmem:[#allocation122_spill] sm:$0xff] }
 0xd42   :  { %v8315_v42 = vpop.eup %8314  ;;  %v5608_v31 = vmul.f32 %v8313_v55, %v8307_v17  ;;  %v13675_v17 = vld [vmem:[#allocation68_spill] sm:$0xff]  ;;  %v13677_v27 = vld [vmem:[#allocation70_spill] sm:$0xff]  ;;  %v13678_v55 = vld [vmem:[#allocation71_spill] sm:$0xff] }
 0xd43   :  { %v8317_v14 = vpop.eup %8316  ;;  %v11222_v6 = vadd.f32 %v5607_v2, %v5605_v51  ;;  %v5599_v18 = vadd.f32 1.0, %v8315_v42  ;;  %v13679_v51 = vld [vmem:[#allocation73_spill] sm:$0xff]  ;;  %v13680_v2 = vld [vmem:[#allocation72_spill] sm:$0xff]  ;;  %v13681_v42 = vld [vmem:[#allocation74_spill] sm:$0xff] }
 0xd44   :  { %v11224_v46 = vadd.f32 %v5608_v31, %v5606_v25  ;;  %v5600_v30 = vadd.f32 1.0, %v8317_v14  ;;  %v13683_v25 = vld [vmem:[#allocation76_spill] sm:$0xff]  ;;  %v13684_v31 = vld [vmem:[#allocation77_spill] sm:$0xff]  ;;  %v13685_v14 = vld [vmem:[#allocation78_spill] sm:$0xff] }
 0xd45   :  { %8318 = vtanh.f32 %v11222_v6 }
 0xd46   :  { %8320 = vrcp.f32 %v5599_v18  ;;  %v13686_v18 = vld [vmem:[#allocation79_spill] sm:$0xff] }
 0xd47   :  { %8322 = vtanh.f32 %v11224_v46 }
 0xd48   :  { %8324 = vrcp.f32 %v5600_v30  ;;  %v13687_v30 = vld [vmem:[#allocation80_spill] sm:$0xff] }
 0xd4f   :  { %v8319_v61 = vpop.eup %8318 }
 0xd50   :  { %v8321_v43 = vpop.eup %8320 }
 0xd51   :  { %v8323_v15 = vpop.eup %8322  ;;  %v5613_v60 = vmul.f32 %v8321_v43, %v8319_v61  ;;  %v13688_v61 = vld [vmem:[#allocation81_spill] sm:$0xff]  ;;  %v13689_v43 = vld [vmem:[#allocation82_spill] sm:$0xff] }
 0xd52   :  { %v8325_v19 = vpop.eup %8324 }
 0xd53   :  { %v5614_v24 = vmul.f32 %v8325_v19, %v8323_v15  ;;  %v11228_v11 = vpack.c.bf16 %v5613_v60, %v5613_v60  ;;  %v13690_v15 = vld [vmem:[#allocation83_spill] sm:$0xff]  ;;  %v13691_v19 = vld [vmem:[#allocation84_spill] sm:$0xff] }
 0xd54   :  { %v13692_v60 = vld [vmem:[#allocation95_spill] sm:$0xff] }
 0xd55   :  { %v5640_v35 = vpack.c.bf16 %v5614_v24, %v5614_v24  ;;  %v13693_v24 = vld [vmem:[#allocation124_spill] sm:$0xff] }
 0xd57   :  { %5673 = vmatprep.mubr.bf16.mxu0 %v5640_v35  ;;  %5714 = vmatprep.mubr.bf16.mxu1 %v5640_v35 }
 0xd58   :  { %5674 = vmatmul.mubr.bf16.vlgmr.msra.gmra.mrb[120].mxu0 %v11228_v11  ;;  %5715 = vmatmul.mubr.bf16.vlgmr.msra.gmra.mrb[136].mxu1 %v11228_v11 }
 0xd59   :  { %5724 = vmatpush1.bf16.msra.mxu0 %v13673_v45  ;;  %5765 = vmatpush1.bf16.msra.mxu1 %v13674_v33 }
 0xd5a   :  { %5755 = vmatprep.mubr.bf16.mxu0 %v5640_v35  ;;  %5796 = vmatprep.mubr.bf16.mxu1 %v5640_v35  ;;  %v13694_v35 = vld [vmem:[#allocation94_spill] sm:$0xff] }
 0xd5b   :  { %5725 = vmatprep.subr.bf16.mxu0 %v13675_v17  ;;  %5766 = vmatprep.subr.bf16.mxu1 %v13676_v50 }
 0xd5d   :  { %5726 = vmatpush1.bf16.msra.mxu0 %v13677_v27  ;;  %5767 = vmatpush1.bf16.msra.mxu1 %v13678_v55 }
 0xd5e   :  { %5727 = vmatprep.subr.bf16.mxu0 %v13679_v51  ;;  %5768 = vmatprep.subr.bf16.mxu1 %v13680_v2 }
 0xd61   :  { %5728 = vmatpush1.bf16.msra.mxu0 %v13681_v42  ;;  %5769 = vmatpush1.bf16.msra.mxu1 %v13682_v28 }
 0xd62   :  { %5729 = vmatprep.subr.bf16.mxu0 %v13683_v25  ;;  %5770 = vmatprep.subr.bf16.mxu1 %v13684_v31  ;;  %v13695_v31 = vld [vmem:[#allocation104_spill] sm:$0xff] }
 0xd65   :  { %5730 = vmatpush1.bf16.msra.mxu0 %v13685_v14  ;;  %5771 = vmatpush1.bf16.msra.mxu1 %v13686_v18  ;;  %v13696_v14 = vld [vmem:[#allocation127_spill] sm:$0xff]  ;;  %v13697_v18 = vld [vmem:[#allocation141_spill] sm:$0xff] }
 0xd66   :  { %5731 = vmatprep.subr.bf16.mxu0 %v13687_v30  ;;  %5772 = vmatprep.subr.bf16.mxu1 %v13688_v61  ;;  %v13698_v30 = vld [vmem:[#allocation107_spill] sm:$0xff]  ;;  %v13699_v61 = vld [vmem:[#allocation132_spill] sm:$0xff] }
 0xd69   :  { %5732 = vmatpush1.bf16.msra.mxu0 %v13689_v43  ;;  %5773 = vmatpush1.bf16.msra.mxu1 %v13690_v15  ;;  %v13700_v43 = vld [vmem:[#allocation184_spill] sm:$0xff]  ;;  %v13701_v15 = vld [vmem:[#allocation185_spill] sm:$0xff] }
 0xd6a   :  { %5733 = vmatprep.subr.bf16.mxu0 %v13691_v19  ;;  %5774 = vmatprep.subr.bf16.mxu1 %v13692_v60  ;;  %v13702_v19 = vld [vmem:[#allocation186_spill] sm:$0xff]  ;;  %v13703_v60 = vld [vmem:[#allocation187_spill] sm:$0xff] }
 0xd6d   :  { %5734 = vmatpush1.bf16.msra.mxu0 %v13693_v24  ;;  %5775 = vmatpush1.bf16.msra.mxu1 %v13694_v35  ;;  %v13704_v24 = vld [vmem:[#allocation188_spill] sm:$0xff]  ;;  %v13705_v35 = vld [vmem:[#allocation189_spill] sm:$0xff] }
 0xd6e   :  { %5735 = vmatprep.subr.bf16.mxu0 %v13695_v31  ;;  %5776 = vmatprep.subr.bf16.mxu1 %v13696_v14  ;;  %v13706_v31 = vld [vmem:[#allocation190_spill] sm:$0xff]  ;;  %v13707_v14 = vld [vmem:[#allocation191_spill] sm:$0xff] }
 0xd71   :  { %5736 = vmatpush1.bf16.msra.mxu0 %v13697_v18  ;;  %5777 = vmatpush1.bf16.msra.mxu1 %v13698_v30  ;;  %v13708_v18 = vld [vmem:[#allocation192_spill] sm:$0xff]  ;;  %v13709_v30 = vld [vmem:[#allocation193_spill] sm:$0xff] }
 0xd72   :  { %5737 = vmatprep.subr.bf16.mxu0 %v13699_v61  ;;  %5778 = vmatprep.subr.bf16.mxu1 %v13700_v43  ;;  %v13710_v61 = vld [vmem:[#allocation194_spill] sm:$0xff]  ;;  %v13711_v43 = vld [vmem:[#allocation195_spill] sm:$0xff] }
 0xd75   :  { %5738 = vmatpush1.bf16.msra.mxu0 %v13701_v15  ;;  %5779 = vmatpush1.bf16.msra.mxu1 %v13702_v19  ;;  %v13712_v15 = vld [vmem:[#allocation196_spill] sm:$0xff]  ;;  %v13713_v19 = vld [vmem:[#allocation197_spill] sm:$0xff] }
 0xd76   :  { %5739 = vmatprep.subr.bf16.mxu0 %v13703_v60  ;;  %5780 = vmatprep.subr.bf16.mxu1 %v13704_v24  ;;  %v13714_v60 = vld [vmem:[#allocation198_spill] sm:$0xff]  ;;  %v13715_v24 = vld [vmem:[#allocation199_spill] sm:$0xff] }
 0xd79   :  { %5740 = vmatpush1.bf16.msra.mxu0 %v13705_v35  ;;  %5781 = vmatpush1.bf16.msra.mxu1 %v13706_v31  ;;  %v13716_v35 = vld [vmem:[#allocation200_spill] sm:$0xff]  ;;  %v13717_v31 = vld [vmem:[#allocation201_spill] sm:$0xff] }
 0xd7a   :  { %5741 = vmatprep.subr.bf16.mxu0 %v13707_v14  ;;  %5782 = vmatprep.subr.bf16.mxu1 %v13708_v18  ;;  %v13718_v14 = vld [vmem:[#allocation202_spill] sm:$0xff]  ;;  %v13719_v18 = vld [vmem:[#allocation203_spill] sm:$0xff] }
 0xd7d   :  { %5742 = vmatpush1.bf16.msra.mxu0 %v13709_v30  ;;  %5783 = vmatpush1.bf16.msra.mxu1 %v13710_v61  ;;  %v13720_v30 = vld [vmem:[#allocation204_spill] sm:$0xff] }
 0xd7e   :  { %5743 = vmatprep.subr.bf16.mxu0 %v13711_v43  ;;  %5784 = vmatprep.subr.bf16.mxu1 %v13712_v15 }
 0xd81   :  { %5744 = vmatpush1.bf16.msra.mxu0 %v13713_v19  ;;  %5785 = vmatpush1.bf16.msra.mxu1 %v13714_v60  ;;  %v13721_v19 = vld [vmem:[#allocation102_spill] sm:$0xff]  ;;  %v13722_v60 = vld [vmem:[#allocation129_spill] sm:$0xff] }
 0xd82   :  { %5745 = vmatprep.subr.bf16.mxu0 %v13715_v24  ;;  %5786 = vmatprep.subr.bf16.mxu1 %v13716_v35 }
 0xd85   :  { %5746 = vmatpush1.bf16.msra.mxu0 %v13717_v31  ;;  %5787 = vmatpush1.bf16.msra.mxu1 %v13718_v14 }
 0xd86   :  { %5747 = vmatprep.subr.bf16.mxu0 %v13719_v18  ;;  %5788 = vmatprep.subr.bf16.mxu1 %v13720_v30 }
 0xd89   :  { %5748 = vmatpush1.bf16.msra.mxu0 %v11100_v57  ;;  %5789 = vmatpush1.bf16.msra.mxu1 %v11102_v52 }
 0xd8a   :  { %5749 = vmatprep.subr.bf16.mxu0 %v11106_v49  ;;  %5790 = vmatprep.subr.bf16.mxu1 %v13721_v19 }
 0xd8d   :  { %5750 = vmatpush1.bf16.msra.mxu0 %v13722_v60  ;;  %5791 = vmatpush1.bf16.msra.mxu1 %v11114_v21 }
 0xd8e   :  { %5751 = vmatprep.subr.bf16.mxu0 %v11118_v26  ;;  %5792 = vmatprep.subr.bf16.mxu1 %v11120_v38 }
 0xd91   :  { %5752 = vmatpush1.bf16.msra.mxu0 %v11124_v5  ;;  %5793 = vmatpush1.bf16.msra.mxu1 %v11126_v10 }
 0xd92   :  { %5753 = vmatprep.subr.bf16.mxu0 %v11130_v40  ;;  %5794 = vmatprep.subr.bf16.mxu1 %v11132_v59 }
 0xd95   :  { %5754 = vmatpush1.bf16.msra.mxu0 %v11136_v16  ;;  %5795 = vmatpush1.bf16.msra.mxu1 %v11138_v48 }
 0xd96   :  { %5887 = vmatprep.subr.bf16.mxu0 %v10555_v58  ;;  %5928 = vmatprep.subr.bf16.mxu1 %v10559_v37 }
 0xd98   :  { %5756 = vmatmul.mubr.bf16.vlgmr.msra.gmra.mrb[124].mxu0 %v11228_v11  ;;  %5797 = vmatmul.mubr.bf16.vlgmr.msra.gmra.mrb[140].mxu1 %v11228_v11  ;;  %v13723_v11 = vld [vmem:[#allocation169_spill] sm:$0xff] }
 0xd99   :  { %5888 = vmatpush1.bf16.msra.mxu0 %v10557_v12  ;;  %5929 = vmatpush1.bf16.msra.mxu1 %v10561_v20 }
 0xd9a   :  { %5889 = vmatprep.subr.bf16.mxu0 %v10567_v3  ;;  %5930 = vmatprep.subr.bf16.mxu1 %v10569_v63 }
 0xd9d   :  { %5890 = vmatpush1.bf16.msra.mxu0 %v10571_v54  ;;  %5931 = vmatpush1.bf16.msra.mxu1 %v10573_v32 }
 0xd9e   :  { %5891 = vmatprep.subr.bf16.mxu0 %v10579_v7  ;;  %5932 = vmatprep.subr.bf16.mxu1 %v10581_v23 }
 0xda1   :  { %5892 = vmatpush1.bf16.msra.mxu0 %v10583_v13  ;;  %5933 = vmatpush1.bf16.msra.mxu1 %v10585_v29 }
 0xda2   :  { %5893 = vmatprep.subr.bf16.mxu0 %v10591_v39  ;;  %5934 = vmatprep.subr.bf16.mxu1 %v10593_v22  ;;  %v13764_v22 = vld [vmem:[#allocation35_spill] sm:$0xff]  ;;  %v13765_v39 = vld [vmem:[#allocation36_spill] sm:$0xff] }
 0xda5   :  { %5894 = vmatpush1.bf16.msra.mxu0 %v10595_v47  ;;  %5935 = vmatpush1.bf16.msra.mxu1 %v10597_v34  ;;  %v13763_v34 = vld [vmem:[#allocation22_spill] sm:$0xff] }
 0xda6   :  { %5895 = vmatprep.subr.bf16.mxu0 %v10603_v53  ;;  %5936 = vmatprep.subr.bf16.mxu1 %v10605_v4  ;;  %v13724_v4 = vld [vmem:[#allocation170_spill] sm:$0xff]  ;;  %v13762_v53 = vld [vmem:[#allocation21_spill] sm:$0xff] }
 0xda9   :  { %5896 = vmatpush1.bf16.msra.mxu0 %v10607_v41  ;;  %5937 = vmatpush1.bf16.msra.mxu1 %v10609_v56  ;;  %v13725_v41 = vld [vmem:[#allocation171_spill] sm:$0xff]  ;;  %v13726_v56 = vld [vmem:[#allocation174_spill] sm:$0xff] }
 0xdaa   :  { %5897 = vmatprep.subr.bf16.mxu0 %v10615_v9  ;;  %5938 = vmatprep.subr.bf16.mxu1 %v10617_v36  ;;  %v13727_v9 = vld [vmem:[#allocation175_spill] sm:$0xff]  ;;  %v13728_v36 = vld [vmem:[#allocation176_spill] sm:$0xff] }
 0xdad   :  { %5898 = vmatpush1.bf16.msra.mxu0 %v10619_v44  ;;  %5939 = vmatpush1.bf16.msra.mxu1 %v10621_v8  ;;  %v13729_v44 = vld [vmem:[#allocation177_spill] sm:$0xff]  ;;  %v13730_v8 = vld [vmem:[#allocation178_spill] sm:$0xff] }
 0xdae   :  { %5899 = vmatprep.subr.bf16.mxu0 %v10627_v62  ;;  %5940 = vmatprep.subr.bf16.mxu1 %v10629_v0  ;;  %v13731_v62 = vld [vmem:[#allocation179_spill] sm:$0xff] }
 0xdaf   :  { %v13732_v0 = vld [vmem:[#allocation183_spill] sm:$0xff] }
 0xdb1   :  { %5900 = vmatpush1.bf16.msra.mxu0 %v10631_v1  ;;  %5941 = vmatpush1.bf16.msra.mxu1 %v13723_v11  ;;  %v13733_v1 = vld [vmem:[#allocation100_spill] sm:$0xff]  ;;  %v13734_v11 = vld [vmem:[#allocation110_spill] sm:$0xff] }
 0xdb2   :  { %5901 = vmatprep.subr.bf16.mxu0 %v13724_v4  ;;  %5942 = vmatprep.subr.bf16.mxu1 %v13725_v41  ;;  %v13735_v4 = vld [vmem:[#allocation89_spill] sm:$0xff] }
 0xdb3   :  { %v13736_v41 = vld [vmem:[#allocation117_spill] sm:$0xff] }
 0xdb5   :  { %5902 = vmatpush1.bf16.msra.mxu0 %v13726_v56  ;;  %5943 = vmatpush1.bf16.msra.mxu1 %v13727_v9  ;;  %v13737_v56 = vld [vmem:[#allocation114_spill] sm:$0xff]  ;;  %v13738_v9 = vld [vmem:[#allocation135_spill] sm:$0xff] }
 0xdb6   :  { %5903 = vmatprep.subr.bf16.mxu0 %v13728_v36  ;;  %5944 = vmatprep.subr.bf16.mxu1 %v13729_v44  ;;  %v13739_v36 = vld [vmem:[#allocation121_spill] sm:$0xff]  ;;  %v13740_v44 = vld [vmem:[#allocation138_spill] sm:$0xff] }
 0xdb9   :  { %5904 = vmatpush1.bf16.msra.mxu0 %v13730_v8  ;;  %5945 = vmatpush1.bf16.msra.mxu1 %v13731_v62  ;;  %v13741_v8 = vld [vmem:[#allocation162_spill] sm:$0xff]  ;;  %v13742_v62 = vld [vmem:[#allocation163_spill] sm:$0xff] }
 0xdba   :  { %5905 = vmatprep.subr.bf16.mxu0 %v13732_v0  ;;  %5946 = vmatprep.subr.bf16.mxu1 %v13733_v1  ;;  %v13743_v0 = vld [vmem:[#allocation164_spill] sm:$0xff]  ;;  %v13744_v1 = vld [vmem:[#allocation165_spill] sm:$0xff] }
 0xdbd   :  { %5906 = vmatpush1.bf16.msra.mxu0 %v13734_v11  ;;  %5947 = vmatpush1.bf16.msra.mxu1 %v13735_v4  ;;  %v13745_v11 = vld [vmem:[#allocation166_spill] sm:$0xff]  ;;  %v13746_v4 = vld [vmem:[#allocation167_spill] sm:$0xff] }
 0xdbe   :  { %5907 = vmatprep.subr.bf16.mxu0 %v13736_v41  ;;  %5948 = vmatprep.subr.bf16.mxu1 %v13737_v56  ;;  %v13747_v41 = vld [vmem:[#allocation168_spill] sm:$0xff] }
 0xdbf   :  { %v13748_v56 = vld [vmem:[#allocation172_spill] sm:$0xff] }
 0xdc1   :  { %5908 = vmatpush1.bf16.msra.mxu0 %v13738_v9  ;;  %5949 = vmatpush1.bf16.msra.mxu1 %v13739_v36  ;;  %v13749_v9 = vld [vmem:[#allocation88_spill] sm:$0xff]  ;;  %v13750_v36 = vld [vmem:[#allocation173_spill] sm:$0xff] }
 0xdc2   :  { %5909 = vmatprep.subr.bf16.mxu0 %v13740_v44  ;;  %5950 = vmatprep.subr.bf16.mxu1 %v13741_v8  ;;  %v13751_v44 = vld [vmem:[#allocation116_spill] sm:$0xff]  ;;  %v13752_v8 = vld [vmem:[#allocation101_spill] sm:$0xff] }
 0xdc5   :  { %5910 = vmatpush1.bf16.msra.mxu0 %v13742_v62  ;;  %5951 = vmatpush1.bf16.msra.mxu1 %v13743_v0  ;;  %v13753_v62 = vld [vmem:[#allocation111_spill] sm:$0xff]  ;;  %v13754_v0 = vld [vmem:[#allocation120_spill] sm:$0xff] }
 0xdc6   :  { %5911 = vmatprep.subr.bf16.mxu0 %v13744_v1  ;;  %5952 = vmatprep.subr.bf16.mxu1 %v13745_v11  ;;  %v13755_v1 = vld [vmem:[#allocation137_spill] sm:$0xff]  ;;  %v13756_v11 = vld [vmem:[#allocation115_spill] sm:$0xff] }
 0xdc9   :  { %5912 = vmatpush1.bf16.msra.mxu0 %v13746_v4  ;;  %5953 = vmatpush1.bf16.msra.mxu1 %v13747_v41  ;;  %v13757_v4 = vld [vmem:[#allocation136_spill] sm:$0xff]  ;;  %v13758_v41 = vld [vmem:[#allocation90_spill] sm:$0xff] }
 0xdca   :  { %5913 = vmatprep.subr.bf16.mxu0 %v13748_v56  ;;  %5954 = vmatprep.subr.bf16.mxu1 %v13749_v9  ;;  %v13759_v56 = vld [vmem:[#allocation118_spill] sm:$0xff]  ;;  %v13760_v9 = vld [vmem:[#allocation99_spill] sm:$0xff] }
 0xdcd   :  { %5914 = vmatpush1.bf16.msra.mxu0 %v13750_v36  ;;  %5955 = vmatpush1.bf16.msra.mxu1 %v13751_v44  ;;  %v13761_v36 = vld [vmem:[#allocation109_spill] sm:$0xff] }
 0xdce   :  { %5915 = vmatprep.subr.bf16.mxu0 %v13752_v8  ;;  %5956 = vmatprep.subr.bf16.mxu1 %v13753_v62 }
 0xdd1   :  { %5916 = vmatpush1.bf16.msra.mxu0 %v13754_v0  ;;  %5957 = vmatpush1.bf16.msra.mxu1 %v13755_v1 }
 0xdd2   :  { %5917 = vmatprep.subr.bf16.mxu0 %v13756_v11  ;;  %5958 = vmatprep.subr.bf16.mxu1 %v13757_v4 }
 0xdd5   :  { %5918 = vmatpush1.bf16.msra.mxu0 %v13758_v41  ;;  %5959 = vmatpush1.bf16.msra.mxu1 %v13759_v56 }
 0xdd6   :  { %5969 = vmatprep.subr.bf16.mxu0 %v13760_v9  ;;  %6010 = vmatprep.subr.bf16.mxu1 %v13761_v36 }
 0xe2b   :  { %v5675_v44 = vpop.f32.mrb[120].mxu0  ;;  %v5716_v8 = vpop.f32.mrb[136].mxu1 }
 0xe2c   :  { %v5805_v62 = vadd.f32 %v5675_v44, %v13762_v53  ;;  %v5807_v0 = vadd.f32 %v5716_v8, %v13763_v34  ;;  %v5677_v47 = vpop.f32.mrb[121].mxu0  ;;  %v5718_v1 = vpop.f32.mrb[137].mxu1 }
 0xe2d   :  { %v5806_v11 = vadd.f32 %v5677_v47, %v13764_v22  ;;  %v5808_v4 = vadd.f32 %v5718_v1, %v13765_v39  ;;  %v5679_v29 = vpop.f32.mrb[122].mxu0  ;;  %v5720_v41 = vpop.f32.mrb[138].mxu1 }
 0xe2e   :  { %v5680_v13 = vpop.f32.mrb[123].mxu0  ;;  %v5721_v56 = vpop.f32.mrb[139].mxu1  ;;  %v7810_v23 = vmul.f32 -1.442695, %v5805_v62  ;;  %v7812_v9 = vmul.f32 -1.442695, %v5807_v0 }
 0xe2f   :  { %v7811_v7 = vmul.f32 -1.442695, %v5806_v11  ;;  %v7813_v36 = vmul.f32 -1.442695, %v5808_v4  ;;  %v13766_v41 = vld [vmem:[#allocation45_spill] sm:$0xff]  ;;  %v13767_v4 = vld [vmem:[#allocation46_spill] sm:$0xff] }
 0xe30   :  { %8326 = vpow2.f32 %v7810_v23  ;;  %v13769_v0 = vld [vmem:[#allocation60_spill] sm:$0xff] }
 0xe31   :  { %8328 = vpow2.f32 %v7812_v9 }
 0xe32   :  { %8330 = vpow2.f32 %v7811_v7 }
 0xe33   :  { %8332 = vpow2.f32 %v7813_v36  ;;  %v13768_v36 = vld [vmem:[#allocation59_spill] sm:$0xff] }
 0xe3a   :  { %v8327_v53 = vpop.eup %8326 }
 0xe3b   :  { %v8329_v34 = vpop.eup %8328  ;;  %v5819_v32 = vadd.f32 1.0, %v8327_v53 }
 0xe3c   :  { %v8331_v44 = vpop.eup %8330  ;;  %v5831_v22 = vadd.f32 1.0, %v8329_v34 }
 0xe3d   :  { %v8333_v8 = vpop.eup %8332  ;;  %v5820_v47 = vadd.f32 1.0, %v8331_v44  ;;  %8334 = vrcp.f32 %v5819_v32 }
 0xe3e   :  { %v5832_v39 = vadd.f32 1.0, %v8333_v8  ;;  %8336 = vrcp.f32 %v5831_v22 }
 0xe3f   :  { %8338 = vrcp.f32 %v5820_v47 }
 0xe40   :  { %8340 = vrcp.f32 %v5832_v39 }
 0xe47   :  { %v8335_v22 = vpop.eup %8334 }
 0xe48   :  { %v8337_v47 = vpop.eup %8336 }
 0xe6b   :  { %v5757_v13 = vpop.f32.mrb[124].mxu0  ;;  %v5798_v29 = vpop.f32.mrb[140].mxu1 }
 0xe6c   :  { %v5809_v56 = vadd.f32 %v5757_v13, %v13766_v41  ;;  %v5811_v23 = vadd.f32 %v5798_v29, %v13767_v4  ;;  %v5759_v9 = vpop.f32.mrb[125].mxu0  ;;  %v5800_v7 = vpop.f32.mrb[141].mxu1  ;;  %v5851_v4 = vmul.f32 %v8337_v47, %v11222_v6  ;;  %v13770_v47 = vld [vmem:[#allocation77_spill] sm:$0xff] }
 0xe6d   :  { %v5810_v62 = vadd.f32 %v5759_v9, %v13768_v36  ;;  %v5812_v1 = vadd.f32 %v5800_v7, %v13769_v0  ;;  %v5761_v11 = vpop.f32.mrb[126].mxu0  ;;  %v5802_v53 = vpop.f32.mrb[142].mxu1 }
 0xe6e   :  { %8342 = vtanh.f32 %v5809_v56  ;;  %v7814_v34 = vmul.f32 -1.442695, %v5811_v23  ;;  %v5762_v32 = vpop.f32.mrb[127].mxu0  ;;  %v5803_v44 = vpop.f32.mrb[143].mxu1 }
 0xe6f   :  { %8344 = vtanh.f32 %v5810_v62  ;;  %v7815_v8 = vmul.f32 -1.442695, %v5812_v1  ;;  %v8339_v13 = vpop.eup %8338 }
 0xe70   :  { %8346 = vpow2.f32 %v7814_v34  ;;  %v8341_v29 = vpop.eup %8340 }
 0xe71   :  { %8348 = vpow2.f32 %v7815_v8  ;;  %v5852_v36 = vmul.f32 %v8341_v29, %v11224_v46  ;;  %v13772_v29 = vld [vmem:[#allocation79_spill] sm:$0xff] }
 0xe78   :  { %v8343_v41 = vpop.eup %8342 }
 0xe79   :  { %v8345_v39 = vpop.eup %8344  ;;  %v5853_v9 = vmul.f32 %v8343_v41, %v8335_v22  ;;  %v13773_v41 = vld [vmem:[#allocation80_spill] sm:$0xff] }
 0xe7a   :  { %v8347_v7 = vpop.eup %8346  ;;  %v5854_v56 = vmul.f32 %v8345_v39, %v8339_v13  ;;  %v13771_v13 = vld [vmem:[#allocation78_spill] sm:$0xff]  ;;  %v13774_v39 = vld [vmem:[#allocation81_spill] sm:$0xff] }
 0xe7b   :  { %v8349_v23 = vpop.eup %8348  ;;  %v11372_v0 = vadd.f32 %v5853_v9, %v5851_v4  ;;  %v5845_v62 = vadd.f32 1.0, %v8347_v7  ;;  %v13775_v4 = vld [vmem:[#allocation82_spill] sm:$0xff]  ;;  %v13776_v9 = vld [vmem:[#allocation83_spill] sm:$0xff]  ;;  %v13777_v7 = vld [vmem:[#allocation84_spill] sm:$0xff] }
 0xe7c   :  { %v11374_v1 = vadd.f32 %v5854_v56, %v5852_v36  ;;  %v5846_v11 = vadd.f32 1.0, %v8349_v23  ;;  %v13778_v36 = vld [vmem:[#allocation95_spill] sm:$0xff]  ;;  %v13779_v56 = vld [vmem:[#allocation124_spill] sm:$0xff]  ;;  %v13780_v23 = vld [vmem:[#allocation94_spill] sm:$0xff] }
 0xe7d   :  { %8350 = vtanh.f32 %v11372_v0 }
 0xe7e   :  { %8352 = vrcp.f32 %v5845_v62  ;;  %v13781_v62 = vld [vmem:[#allocation104_spill] sm:$0xff] }
 0xe7f   :  { %8354 = vtanh.f32 %v11374_v1 }
 0xe80   :  { %8356 = vrcp.f32 %v5846_v11  ;;  %v13782_v11 = vld [vmem:[#allocation127_spill] sm:$0xff] }
 0xe87   :  { %v8351_v53 = vpop.eup %8350 }
 0xe88   :  { %v8353_v6 = vpop.eup %8352 }
 0xe89   :  { %v8355_v34 = vpop.eup %8354  ;;  %v5859_v44 = vmul.f32 %v8353_v6, %v8351_v53  ;;  %v13783_v53 = vld [vmem:[#allocation141_spill] sm:$0xff]  ;;  %v13784_v6 = vld [vmem:[#allocation107_spill] sm:$0xff] }
 0xe8a   :  { %v8357_v32 = vpop.eup %8356 }
 0xe8b   :  { %v5860_v46 = vmul.f32 %v8357_v32, %v8355_v34  ;;  %v11378_v22 = vpack.c.bf16 %v5859_v44, %v5859_v44  ;;  %v13785_v34 = vld [vmem:[#allocation132_spill] sm:$0xff]  ;;  %v13787_v44 = vld [vmem:[#allocation185_spill] sm:$0xff] }
 0xe8c   :  { %v13786_v32 = vld [vmem:[#allocation184_spill] sm:$0xff] }
 0xe8d   :  { %v5886_v8 = vpack.c.bf16 %v5860_v46, %v5860_v46  ;;  %v13788_v46 = vld [vmem:[#allocation186_spill] sm:$0xff] }
 0xe8f   :  { %5919 = vmatprep.mubr.bf16.mxu0 %v5886_v8  ;;  %5960 = vmatprep.mubr.bf16.mxu1 %v5886_v8 }
 0xe90   :  { %5920 = vmatmul.mubr.bf16.vlgmr.msra.gmra.mrb[128].mxu0 %v11378_v22  ;;  %5961 = vmatmul.mubr.bf16.vlgmr.msra.gmra.mrb[144].mxu1 %v11378_v22 }
 0xe91   :  { %5970 = vmatpush1.bf16.msra.mxu0 %v13673_v45  ;;  %6011 = vmatpush1.bf16.msra.mxu1 %v13674_v33 }
 0xe92   :  { %6001 = vmatprep.mubr.bf16.mxu0 %v5886_v8  ;;  %6042 = vmatprep.mubr.bf16.mxu1 %v5886_v8  ;;  %v13789_v8 = vld [vmem:[#allocation187_spill] sm:$0xff] }
 0xe93   :  { %5971 = vmatprep.subr.bf16.mxu0 %v13675_v17  ;;  %6012 = vmatprep.subr.bf16.mxu1 %v13676_v50 }
 0xe95   :  { %5972 = vmatpush1.bf16.msra.mxu0 %v13677_v27  ;;  %6013 = vmatpush1.bf16.msra.mxu1 %v13678_v55 }
 0xe96   :  { %5973 = vmatprep.subr.bf16.mxu0 %v13679_v51  ;;  %6014 = vmatprep.subr.bf16.mxu1 %v13680_v2 }
 0xe99   :  { %5974 = vmatpush1.bf16.msra.mxu0 %v13681_v42  ;;  %6015 = vmatpush1.bf16.msra.mxu1 %v13682_v28 }
 0xe9a   :  { %5975 = vmatprep.subr.bf16.mxu0 %v13683_v25  ;;  %6016 = vmatprep.subr.bf16.mxu1 %v13770_v47 }
 0xe9d   :  { %5976 = vmatpush1.bf16.msra.mxu0 %v13771_v13  ;;  %6017 = vmatpush1.bf16.msra.mxu1 %v13772_v29 }
 0xe9e   :  { %5977 = vmatprep.subr.bf16.mxu0 %v13773_v41  ;;  %6018 = vmatprep.subr.bf16.mxu1 %v13774_v39 }
 0xea1   :  { %5978 = vmatpush1.bf16.msra.mxu0 %v13775_v4  ;;  %6019 = vmatpush1.bf16.msra.mxu1 %v13776_v9 }
 0xea2   :  { %5979 = vmatprep.subr.bf16.mxu0 %v13777_v7  ;;  %6020 = vmatprep.subr.bf16.mxu1 %v13778_v36 }
 0xea5   :  { %5980 = vmatpush1.bf16.msra.mxu0 %v13779_v56  ;;  %6021 = vmatpush1.bf16.msra.mxu1 %v13780_v23  ;;  %v13790_v56 = vld [vmem:[#allocation188_spill] sm:$0xff]  ;;  %v13791_v23 = vld [vmem:[#allocation189_spill] sm:$0xff] }
 0xea6   :  { %5981 = vmatprep.subr.bf16.mxu0 %v13781_v62  ;;  %6022 = vmatprep.subr.bf16.mxu1 %v13782_v11  ;;  %v13792_v62 = vld [vmem:[#allocation190_spill] sm:$0xff]  ;;  %v13793_v11 = vld [vmem:[#allocation191_spill] sm:$0xff] }
 0xea9   :  { %5982 = vmatpush1.bf16.msra.mxu0 %v13783_v53  ;;  %6023 = vmatpush1.bf16.msra.mxu1 %v13784_v6  ;;  %v13794_v53 = vld [vmem:[#allocation192_spill] sm:$0xff]  ;;  %v13795_v6 = vld [vmem:[#allocation193_spill] sm:$0xff] }
 0xeaa   :  { %5983 = vmatprep.subr.bf16.mxu0 %v13785_v34  ;;  %6024 = vmatprep.subr.bf16.mxu1 %v13786_v32 }
 0xead   :  { %5984 = vmatpush1.bf16.msra.mxu0 %v13787_v44  ;;  %6025 = vmatpush1.bf16.msra.mxu1 %v13788_v46  ;;  %v13796_v46 = vld [vmem:[#allocation197_spill] sm:$0xff] }
 0xeae   :  { %5985 = vmatprep.subr.bf16.mxu0 %v13789_v8  ;;  %6026 = vmatprep.subr.bf16.mxu1 %v13790_v56  ;;  %v13797_v8 = vld [vmem:[#allocation198_spill] sm:$0xff] }
 0xeb1   :  { %5986 = vmatpush1.bf16.msra.mxu0 %v13791_v23  ;;  %6027 = vmatpush1.bf16.msra.mxu1 %v13792_v62 }
 0xeb2   :  { %5987 = vmatprep.subr.bf16.mxu0 %v13793_v11  ;;  %6028 = vmatprep.subr.bf16.mxu1 %v13794_v53 }
 0xeb5   :  { %5988 = vmatpush1.bf16.msra.mxu0 %v13795_v6  ;;  %6029 = vmatpush1.bf16.msra.mxu1 %v13710_v61 }
 0xeb6   :  { %5989 = vmatprep.subr.bf16.mxu0 %v13711_v43  ;;  %6030 = vmatprep.subr.bf16.mxu1 %v13712_v15 }
 0xeb9   :  { %5990 = vmatpush1.bf16.msra.mxu0 %v13796_v46  ;;  %6031 = vmatpush1.bf16.msra.mxu1 %v13797_v8 }
 0xeba   :  { %5991 = vmatprep.subr.bf16.mxu0 %v13715_v24  ;;  %6032 = vmatprep.subr.bf16.mxu1 %v13716_v35 }
 0xebd   :  { %5992 = vmatpush1.bf16.msra.mxu0 %v13717_v31  ;;  %6033 = vmatpush1.bf16.msra.mxu1 %v13718_v14 }
 0xebe   :  { %5993 = vmatprep.subr.bf16.mxu0 %v13719_v18  ;;  %6034 = vmatprep.subr.bf16.mxu1 %v13720_v30 }
 0xec1   :  { %5994 = vmatpush1.bf16.msra.mxu0 %v11100_v57  ;;  %6035 = vmatpush1.bf16.msra.mxu1 %v11102_v52 }
 0xec2   :  { %5995 = vmatprep.subr.bf16.mxu0 %v11106_v49  ;;  %6036 = vmatprep.subr.bf16.mxu1 %v13721_v19 }
 0xec5   :  { %5996 = vmatpush1.bf16.msra.mxu0 %v13722_v60  ;;  %6037 = vmatpush1.bf16.msra.mxu1 %v11114_v21 }
 0xec6   :  { %5997 = vmatprep.subr.bf16.mxu0 %v11118_v26  ;;  %6038 = vmatprep.subr.bf16.mxu1 %v11120_v38  ;;  %v13859_v38 = vld [vmem:[#allocation31_spill] sm:$0xff]  ;;  %v13860_v26 = vld [vmem:[#allocation32_spill] sm:$0xff] }
 0xec9   :  { %5998 = vmatpush1.bf16.msra.mxu0 %v11124_v5  ;;  %6039 = vmatpush1.bf16.msra.mxu1 %v11126_v10  ;;  %v13858_v10 = vld [vmem:[#allocation26_spill] sm:$0xff] }
 0xeca   :  { %5999 = vmatprep.subr.bf16.mxu0 %v11130_v40  ;;  %6040 = vmatprep.subr.bf16.mxu1 %v11132_v59  ;;  %v13802_v59 = vld [vmem:[#allocation108_spill] sm:$0xff]  ;;  %v13857_v40 = vld [vmem:[#allocation25_spill] sm:$0xff] }
 0xecd   :  { %6000 = vmatpush1.bf16.msra.mxu0 %v11136_v16  ;;  %6041 = vmatpush1.bf16.msra.mxu1 %v11138_v48  ;;  %v13798_v16 = vld [vmem:[#allocation180_spill] sm:$0xff]  ;;  %v13799_v48 = vld [vmem:[#allocation181_spill] sm:$0xff] }
 0xece   :  { %6117 = vmatprep.subr.bf16.mxu0 %v10555_v58  ;;  %6158 = vmatprep.subr.bf16.mxu1 %v10559_v37  ;;  %v13800_v58 = vld [vmem:[#allocation182_spill] sm:$0xff] }
 0xecf   :  { %v13801_v37 = vld [vmem:[#allocation98_spill] sm:$0xff] }
 0xed0   :  { %6002 = vmatmul.mubr.bf16.vlgmr.msra.gmra.mrb[132].mxu0 %v11378_v22  ;;  %6043 = vmatmul.mubr.bf16.vlgmr.msra.gmra.mrb[148].mxu1 %v11378_v22  ;;  %v13803_v22 = vld [vmem:[#allocation91_spill] sm:$0xff] }
 0xed1   :  { %6118 = vmatpush1.bf16.msra.mxu0 %v10557_v12  ;;  %6159 = vmatpush1.bf16.msra.mxu1 %v10561_v20  ;;  %v13804_v12 = vld [vmem:[#allocation119_spill] sm:$0xff]  ;;  %v13805_v20 = vld [vmem:[#allocation112_spill] sm:$0xff] }
 0xed2   :  { %6119 = vmatprep.subr.bf16.mxu0 %v10567_v3  ;;  %6160 = vmatprep.subr.bf16.mxu1 %v10569_v63  ;;  %v13806_v3 = vld [vmem:[#allocation133_spill] sm:$0xff]  ;;  %v13807_v63 = vld [vmem:[#allocation123_spill] sm:$0xff] }
 0xed5   :  { %6120 = vmatpush1.bf16.msra.mxu0 %v10571_v54  ;;  %6161 = vmatpush1.bf16.msra.mxu1 %v13798_v16  ;;  %v13808_v54 = vld [vmem:[#allocation140_spill] sm:$0xff]  ;;  %v13809_v16 = vld [vmem:[#allocation153_spill] sm:$0xff] }
 0xed6   :  { %6121 = vmatprep.subr.bf16.mxu0 %v13799_v48  ;;  %6162 = vmatprep.subr.bf16.mxu1 %v13800_v58  ;;  %v13810_v48 = vld [vmem:[#allocation154_spill] sm:$0xff]  ;;  %v13811_v58 = vld [vmem:[#allocation155_spill] sm:$0xff] }
 0xed9   :  { %6122 = vmatpush1.bf16.msra.mxu0 %v13801_v37  ;;  %6163 = vmatpush1.bf16.msra.mxu1 %v13802_v59  ;;  %v13812_v37 = vld [vmem:[#allocation156_spill] sm:$0xff]  ;;  %v13813_v59 = vld [vmem:[#allocation157_spill] sm:$0xff] }
 0xeda   :  { %6123 = vmatprep.subr.bf16.mxu0 %v13803_v22  ;;  %6164 = vmatprep.subr.bf16.mxu1 %v13804_v12  ;;  %v13814_v22 = vld [vmem:[#allocation158_spill] sm:$0xff]  ;;  %v13815_v12 = vld [vmem:[#allocation159_spill] sm:$0xff] }
 0xedd   :  { %6124 = vmatpush1.bf16.msra.mxu0 %v13805_v20  ;;  %6165 = vmatpush1.bf16.msra.mxu1 %v13806_v3  ;;  %v13816_v20 = vld [vmem:[#allocation160_spill] sm:$0xff]  ;;  %v13817_v3 = vld [vmem:[#allocation161_spill] sm:$0xff] }
 0xede   :  { %6125 = vmatprep.subr.bf16.mxu0 %v13807_v63  ;;  %6166 = vmatprep.subr.bf16.mxu1 %v13808_v54  ;;  %v13818_v63 = vld [vmem:[#allocation169_spill] sm:$0xff]  ;;  %v13819_v54 = vld [vmem:[#allocation170_spill] sm:$0xff] }
 0xee1   :  { %6126 = vmatpush1.bf16.msra.mxu0 %v13809_v16  ;;  %6167 = vmatpush1.bf16.msra.mxu1 %v13810_v48  ;;  %v13820_v16 = vld [vmem:[#allocation171_spill] sm:$0xff]  ;;  %v13821_v48 = vld [vmem:[#allocation174_spill] sm:$0xff] }
 0xee2   :  { %6127 = vmatprep.subr.bf16.mxu0 %v13811_v58  ;;  %6168 = vmatprep.subr.bf16.mxu1 %v13812_v37  ;;  %v13822_v58 = vld [vmem:[#allocation175_spill] sm:$0xff]  ;;  %v13823_v37 = vld [vmem:[#allocation176_spill] sm:$0xff] }
 0xee5   :  { %6128 = vmatpush1.bf16.msra.mxu0 %v13813_v59  ;;  %6169 = vmatpush1.bf16.msra.mxu1 %v13814_v22  ;;  %v13824_v59 = vld [vmem:[#allocation177_spill] sm:$0xff]  ;;  %v13825_v22 = vld [vmem:[#allocation178_spill] sm:$0xff] }
 0xee6   :  { %6129 = vmatprep.subr.bf16.mxu0 %v13815_v12  ;;  %6170 = vmatprep.subr.bf16.mxu1 %v13816_v20  ;;  %v13826_v12 = vld [vmem:[#allocation179_spill] sm:$0xff] }
 0xee7   :  { %v13827_v20 = vld [vmem:[#allocation183_spill] sm:$0xff] }
 0xee9   :  { %6130 = vmatpush1.bf16.msra.mxu0 %v13817_v3  ;;  %6171 = vmatpush1.bf16.msra.mxu1 %v13818_v63  ;;  %v13828_v3 = vld [vmem:[#allocation100_spill] sm:$0xff]  ;;  %v13829_v63 = vld [vmem:[#allocation110_spill] sm:$0xff] }
 0xeea   :  { %6131 = vmatprep.subr.bf16.mxu0 %v13819_v54  ;;  %6172 = vmatprep.subr.bf16.mxu1 %v13820_v16  ;;  %v13830_v54 = vld [vmem:[#allocation89_spill] sm:$0xff] }
 0xeeb   :  { %v13831_v16 = vld [vmem:[#allocation117_spill] sm:$0xff] }
 0xeed   :  { %6132 = vmatpush1.bf16.msra.mxu0 %v13821_v48  ;;  %6173 = vmatpush1.bf16.msra.mxu1 %v13822_v58  ;;  %v13832_v48 = vld [vmem:[#allocation114_spill] sm:$0xff]  ;;  %v13833_v58 = vld [vmem:[#allocation135_spill] sm:$0xff] }
 0xeee   :  { %6133 = vmatprep.subr.bf16.mxu0 %v13823_v37  ;;  %6174 = vmatprep.subr.bf16.mxu1 %v13824_v59  ;;  %v13834_v37 = vld [vmem:[#allocation121_spill] sm:$0xff]  ;;  %v13835_v59 = vld [vmem:[#allocation138_spill] sm:$0xff] }
 0xef1   :  { %6134 = vmatpush1.bf16.msra.mxu0 %v13825_v22  ;;  %6175 = vmatpush1.bf16.msra.mxu1 %v13826_v12  ;;  %v13836_v22 = vld [vmem:[#allocation162_spill] sm:$0xff]  ;;  %v13837_v12 = vld [vmem:[#allocation163_spill] sm:$0xff] }
 0xef2   :  { %6135 = vmatprep.subr.bf16.mxu0 %v13827_v20  ;;  %6176 = vmatprep.subr.bf16.mxu1 %v13828_v3  ;;  %v13838_v20 = vld [vmem:[#allocation164_spill] sm:$0xff]  ;;  %v13839_v3 = vld [vmem:[#allocation165_spill] sm:$0xff] }
 0xef5   :  { %6136 = vmatpush1.bf16.msra.mxu0 %v13829_v63  ;;  %6177 = vmatpush1.bf16.msra.mxu1 %v13830_v54  ;;  %v13840_v63 = vld [vmem:[#allocation166_spill] sm:$0xff]  ;;  %v13841_v54 = vld [vmem:[#allocation167_spill] sm:$0xff] }
 0xef6   :  { %6137 = vmatprep.subr.bf16.mxu0 %v13831_v16  ;;  %6178 = vmatprep.subr.bf16.mxu1 %v13832_v48  ;;  %v13842_v16 = vld [vmem:[#allocation168_spill] sm:$0xff] }
 0xef7   :  { %v13843_v48 = vld [vmem:[#allocation172_spill] sm:$0xff] }
 0xef9   :  { %6138 = vmatpush1.bf16.msra.mxu0 %v13833_v58  ;;  %6179 = vmatpush1.bf16.msra.mxu1 %v13834_v37  ;;  %v13844_v58 = vld [vmem:[#allocation88_spill] sm:$0xff]  ;;  %v13845_v37 = vld [vmem:[#allocation173_spill] sm:$0xff] }
 0xefa   :  { %6139 = vmatprep.subr.bf16.mxu0 %v13835_v59  ;;  %6180 = vmatprep.subr.bf16.mxu1 %v13836_v22  ;;  %v13846_v59 = vld [vmem:[#allocation116_spill] sm:$0xff]  ;;  %v13847_v22 = vld [vmem:[#allocation101_spill] sm:$0xff] }
 0xefd   :  { %6140 = vmatpush1.bf16.msra.mxu0 %v13837_v12  ;;  %6181 = vmatpush1.bf16.msra.mxu1 %v13838_v20  ;;  %v13848_v12 = vld [vmem:[#allocation111_spill] sm:$0xff]  ;;  %v13849_v20 = vld [vmem:[#allocation120_spill] sm:$0xff] }
 0xefe   :  { %6141 = vmatprep.subr.bf16.mxu0 %v13839_v3  ;;  %6182 = vmatprep.subr.bf16.mxu1 %v13840_v63  ;;  %v13850_v3 = vld [vmem:[#allocation137_spill] sm:$0xff]  ;;  %v13851_v63 = vld [vmem:[#allocation115_spill] sm:$0xff] }
 0xf01   :  { %6142 = vmatpush1.bf16.msra.mxu0 %v13841_v54  ;;  %6183 = vmatpush1.bf16.msra.mxu1 %v13842_v16  ;;  %v13852_v54 = vld [vmem:[#allocation136_spill] sm:$0xff]  ;;  %v13853_v16 = vld [vmem:[#allocation90_spill] sm:$0xff] }
 0xf02   :  { %6143 = vmatprep.subr.bf16.mxu0 %v13843_v48  ;;  %6184 = vmatprep.subr.bf16.mxu1 %v13844_v58  ;;  %v13854_v48 = vld [vmem:[#allocation118_spill] sm:$0xff]  ;;  %v13855_v58 = vld [vmem:[#allocation99_spill] sm:$0xff] }
 0xf05   :  { %6144 = vmatpush1.bf16.msra.mxu0 %v13845_v37  ;;  %6185 = vmatpush1.bf16.msra.mxu1 %v13846_v59  ;;  %v13856_v37 = vld [vmem:[#allocation109_spill] sm:$0xff] }
 0xf06   :  { %6145 = vmatprep.subr.bf16.mxu0 %v13847_v22  ;;  %6186 = vmatprep.subr.bf16.mxu1 %v13848_v12 }
 0xf09   :  { %6146 = vmatpush1.bf16.msra.mxu0 %v13849_v20  ;;  %6187 = vmatpush1.bf16.msra.mxu1 %v13850_v3 }
 0xf0a   :  { %6147 = vmatprep.subr.bf16.mxu0 %v13851_v63  ;;  %6188 = vmatprep.subr.bf16.mxu1 %v13852_v54 }
 0xf0d   :  { %6148 = vmatpush1.bf16.msra.mxu0 %v13853_v16  ;;  %6189 = vmatpush1.bf16.msra.mxu1 %v13854_v48 }
 0xf0e   :  { %6199 = vmatprep.subr.bf16.mxu0 %v13855_v58  ;;  %6240 = vmatprep.subr.bf16.mxu1 %v13856_v37 }
 0xf63   :  { %v5921_v59 = vpop.f32.mrb[128].mxu0  ;;  %v5962_v22 = vpop.f32.mrb[144].mxu1 }
 0xf64   :  { %v6051_v12 = vadd.f32 %v5921_v59, %v13857_v40  ;;  %v6053_v20 = vadd.f32 %v5962_v22, %v13858_v10  ;;  %v5923_v5 = vpop.f32.mrb[129].mxu0  ;;  %v5964_v3 = vpop.f32.mrb[145].mxu1 }
 0xf65   :  { %v6052_v63 = vadd.f32 %v5923_v5, %v13859_v38  ;;  %v6054_v54 = vadd.f32 %v5964_v3, %v13860_v26  ;;  %v5925_v21 = vpop.f32.mrb[130].mxu0  ;;  %v5966_v16 = vpop.f32.mrb[146].mxu1  ;;  %v13864_v26 = vld [vmem:[#allocation56_spill] sm:$0xff] }
 0xf66   :  { %v5926_v60 = vpop.f32.mrb[131].mxu0  ;;  %v5967_v48 = vpop.f32.mrb[147].mxu1  ;;  %v7816_v19 = vmul.f32 -1.442695, %v6051_v12  ;;  %v7818_v58 = vmul.f32 -1.442695, %v6053_v20 }
 0xf67   :  { %v7817_v49 = vmul.f32 -1.442695, %v6052_v63  ;;  %v7819_v37 = vmul.f32 -1.442695, %v6054_v54  ;;  %v13861_v12 = vld [vmem:[#allocation49_spill] sm:$0xff]  ;;  %v13862_v63 = vld [vmem:[#allocation50_spill] sm:$0xff] }
 0xf68   :  { %8358 = vpow2.f32 %v7816_v19 }
 0xf69   :  { %8360 = vpow2.f32 %v7818_v58 }
 0xf6a   :  { %8362 = vpow2.f32 %v7817_v49 }
 0xf6b   :  { %8364 = vpow2.f32 %v7819_v37  ;;  %v13863_v37 = vld [vmem:[#allocation55_spill] sm:$0xff] }
 0xf72   :  { %v8359_v40 = vpop.eup %8358 }
 0xf73   :  { %v8361_v10 = vpop.eup %8360  ;;  %v6065_v52 = vadd.f32 1.0, %v8359_v40 }
 0xf74   :  { %v8363_v59 = vpop.eup %8362  ;;  %v6077_v38 = vadd.f32 1.0, %v8361_v10 }
 0xf75   :  { %v8365_v22 = vpop.eup %8364  ;;  %v6066_v5 = vadd.f32 1.0, %v8363_v59  ;;  %8366 = vrcp.f32 %v6065_v52 }
 0xf76   :  { %v6078_v3 = vadd.f32 1.0, %v8365_v22  ;;  %8368 = vrcp.f32 %v6077_v38 }
 0xf77   :  { %8370 = vrcp.f32 %v6066_v5 }
 0xf78   :  { %8372 = vrcp.f32 %v6078_v3 }
 0xf7f   :  { %v8367_v38 = vpop.eup %8366 }
 0xf80   :  { %v8369_v5 = vpop.eup %8368 }
 0xfa3   :  { %v6003_v16 = vpop.f32.mrb[132].mxu0  ;;  %v6044_v48 = vpop.f32.mrb[148].mxu1 }
 0xfa4   :  { %v6055_v20 = vadd.f32 %v6003_v16, %v13861_v12  ;;  %v6057_v54 = vadd.f32 %v6044_v48, %v13862_v63  ;;  %v6005_v58 = vpop.f32.mrb[133].mxu0  ;;  %v6046_v49 = vpop.f32.mrb[149].mxu1  ;;  %v6097_v63 = vmul.f32 %v8369_v5, %v11372_v0  ;;  %v13865_v5 = vld [vmem:[#allocation124_spill] sm:$0xff] }
 0xfa5   :  { %v6056_v21 = vadd.f32 %v6005_v58, %v13863_v37  ;;  %v6058_v19 = vadd.f32 %v6046_v49, %v13864_v26  ;;  %v6007_v60 = vpop.f32.mrb[134].mxu0  ;;  %v6048_v40 = vpop.f32.mrb[150].mxu1 }
 0xfa6   :  { %8374 = vtanh.f32 %v6055_v20  ;;  %v7820_v10 = vmul.f32 -1.442695, %v6057_v54  ;;  %v6008_v52 = vpop.f32.mrb[135].mxu0  ;;  %v6049_v59 = vpop.f32.mrb[151].mxu1 }
 0xfa7   :  { %8376 = vtanh.f32 %v6056_v21  ;;  %v7821_v22 = vmul.f32 -1.442695, %v6058_v19  ;;  %v8371_v16 = vpop.eup %8370 }
 0xfa8   :  { %8378 = vpow2.f32 %v7820_v10  ;;  %v8373_v48 = vpop.eup %8372 }
 0xfa9   :  { %8380 = vpow2.f32 %v7821_v22  ;;  %v6098_v37 = vmul.f32 %v8373_v48, %v11374_v1  ;;  %v13867_v48 = vld [vmem:[#allocation104_spill] sm:$0xff] }
 0xfb0   :  { %v8375_v12 = vpop.eup %8374 }
 0xfb1   :  { %v8377_v3 = vpop.eup %8376  ;;  %v6099_v58 = vmul.f32 %v8375_v12, %v8367_v38  ;;  %v13868_v12 = vld [vmem:[#allocation127_spill] sm:$0xff] }
 0xfb2   :  { %v8379_v49 = vpop.eup %8378  ;;  %v6100_v20 = vmul.f32 %v8377_v3, %v8371_v16  ;;  %v13866_v16 = vld [vmem:[#allocation94_spill] sm:$0xff]  ;;  %v13869_v3 = vld [vmem:[#allocation141_spill] sm:$0xff] }
 0xfb3   :  { %v8381_v54 = vpop.eup %8380  ;;  %v11522_v26 = vadd.f32 %v6099_v58, %v6097_v63  ;;  %v6091_v21 = vadd.f32 1.0, %v8379_v49  ;;  %v13870_v63 = vld [vmem:[#allocation107_spill] sm:$0xff]  ;;  %v13871_v58 = vld [vmem:[#allocation186_spill] sm:$0xff] }
 0xfb4   :  { %v11524_v19 = vadd.f32 %v6100_v20, %v6098_v37  ;;  %v6092_v60 = vadd.f32 1.0, %v8381_v54  ;;  %v13872_v49 = vld [vmem:[#allocation187_spill] sm:$0xff]  ;;  %v13873_v37 = vld [vmem:[#allocation126_spill] sm:$0xff]  ;;  %v13874_v20 = vld [vmem:[#allocation92_spill] sm:$0xff] }
 0xfb5   :  { %8382 = vtanh.f32 %v11522_v26  ;;  %v13875_v54 = vld [vmem:[#allocation102_spill] sm:$0xff] }
 0xfb6   :  { %8384 = vrcp.f32 %v6091_v21  ;;  %v13876_v21 = vld [vmem:[#allocation129_spill] sm:$0xff] }
 0xfb7   :  { %8386 = vtanh.f32 %v11524_v19 }
 0xfb8   :  { %8388 = vrcp.f32 %v6092_v60  ;;  %v13877_v60 = vld [vmem:[#allocation142_spill] sm:$0xff] }
 0xfbf   :  { %v8383_v40 = vpop.eup %8382 }
 0xfc0   :  { %v8385_v0 = vpop.eup %8384 }
 0xfc1   :  { %v8387_v10 = vpop.eup %8386  ;;  %v6105_v59 = vmul.f32 %v8385_v0, %v8383_v40  ;;  %v13878_v40 = vld [vmem:[#allocation105_spill] sm:$0xff]  ;;  %v13879_v0 = vld [vmem:[#allocation130_spill] sm:$0xff] }
 0xfc2   :  { %v8389_v52 = vpop.eup %8388 }
 0xfc3   :  { %v6106_v1 = vmul.f32 %v8389_v52, %v8387_v10  ;;  %v11528_v38 = vpack.c.bf16 %v6105_v59, %v6105_v59  ;;  %v13880_v10 = vld [vmem:[#allocation143_spill] sm:$0xff]  ;;  %v13881_v52 = vld [vmem:[#allocation93_spill] sm:$0xff] }
 0xfc4   :  { %v13882_v59 = vld [vmem:[#allocation145_spill] sm:$0xff] }
 0xfc5   :  { %v6116_v22 = vpack.c.bf16 %v6106_v1, %v6106_v1  ;;  %v13883_v1 = vld [vmem:[#allocation85_spill] sm:$0xff] }
 0xfc7   :  { %6149 = vmatprep.mubr.bf16.mxu0 %v6116_v22  ;;  %6190 = vmatprep.mubr.bf16.mxu1 %v6116_v22 }
 0xfc8   :  { %6150 = vmatmul.mubr.bf16.vlgmr.msra.gmra.mrb[136].mxu0 %v11528_v38  ;;  %6191 = vmatmul.mubr.bf16.vlgmr.msra.gmra.mrb[152].mxu1 %v11528_v38 }
 0xfc9   :  { %6200 = vmatpush1.bf16.msra.mxu0 %v13673_v45  ;;  %6241 = vmatpush1.bf16.msra.mxu1 %v13674_v33 }
 0xfca   :  { %6231 = vmatprep.mubr.bf16.mxu0 %v6116_v22  ;;  %6272 = vmatprep.mubr.bf16.mxu1 %v6116_v22  ;;  %v13884_v22 = vld [vmem:[#allocation96_spill] sm:$0xff] }
 0xfcb   :  { %6201 = vmatprep.subr.bf16.mxu0 %v13675_v17  ;;  %6242 = vmatprep.subr.bf16.mxu1 %v13676_v50 }
 0xfcd   :  { %6202 = vmatpush1.bf16.msra.mxu0 %v13677_v27  ;;  %6243 = vmatpush1.bf16.msra.mxu1 %v13678_v55 }
 0xfce   :  { %6203 = vmatprep.subr.bf16.mxu0 %v13679_v51  ;;  %6244 = vmatprep.subr.bf16.mxu1 %v13680_v2 }
 0xfd1   :  { %6204 = vmatpush1.bf16.msra.mxu0 %v13681_v42  ;;  %6245 = vmatpush1.bf16.msra.mxu1 %v13682_v28 }
 0xfd2   :  { %6205 = vmatprep.subr.bf16.mxu0 %v13683_v25  ;;  %6246 = vmatprep.subr.bf16.mxu1 %v13770_v47 }
 0xfd5   :  { %6206 = vmatpush1.bf16.msra.mxu0 %v13771_v13  ;;  %6247 = vmatpush1.bf16.msra.mxu1 %v13772_v29 }
 0xfd6   :  { %6207 = vmatprep.subr.bf16.mxu0 %v13773_v41  ;;  %6248 = vmatprep.subr.bf16.mxu1 %v13774_v39 }
 0xfd9   :  { %6208 = vmatpush1.bf16.msra.mxu0 %v13775_v4  ;;  %6249 = vmatpush1.bf16.msra.mxu1 %v13776_v9 }
 0xfda   :  { %6209 = vmatprep.subr.bf16.mxu0 %v13777_v7  ;;  %6250 = vmatprep.subr.bf16.mxu1 %v13778_v36 }
 0xfdd   :  { %6210 = vmatpush1.bf16.msra.mxu0 %v13865_v5  ;;  %6251 = vmatpush1.bf16.msra.mxu1 %v13866_v16 }
 0xfde   :  { %6211 = vmatprep.subr.bf16.mxu0 %v13867_v48  ;;  %6252 = vmatprep.subr.bf16.mxu1 %v13868_v12 }
 0xfe1   :  { %6212 = vmatpush1.bf16.msra.mxu0 %v13869_v3  ;;  %6253 = vmatpush1.bf16.msra.mxu1 %v13870_v63 }
 0xfe2   :  { %6213 = vmatprep.subr.bf16.mxu0 %v13785_v34  ;;  %6254 = vmatprep.subr.bf16.mxu1 %v13786_v32 }
 0xfe5   :  { %6214 = vmatpush1.bf16.msra.mxu0 %v13787_v44  ;;  %6255 = vmatpush1.bf16.msra.mxu1 %v13871_v58 }
 0xfe6   :  { %6215 = vmatprep.subr.bf16.mxu0 %v13872_v49  ;;  %6256 = vmatprep.subr.bf16.mxu1 %v13790_v56 }
 0xfe9   :  { %6216 = vmatpush1.bf16.msra.mxu0 %v13791_v23  ;;  %6257 = vmatpush1.bf16.msra.mxu1 %v13792_v62 }
 0xfea   :  { %6217 = vmatprep.subr.bf16.mxu0 %v13793_v11  ;;  %6258 = vmatprep.subr.bf16.mxu1 %v13794_v53 }
 0xfed   :  { %6218 = vmatpush1.bf16.msra.mxu0 %v13795_v6  ;;  %6259 = vmatpush1.bf16.msra.mxu1 %v13710_v61 }
 0xfee   :  { %6219 = vmatprep.subr.bf16.mxu0 %v13711_v43  ;;  %6260 = vmatprep.subr.bf16.mxu1 %v13712_v15 }
 0xff1   :  { %6220 = vmatpush1.bf16.msra.mxu0 %v13796_v46  ;;  %6261 = vmatpush1.bf16.msra.mxu1 %v13797_v8 }
 0xff2   :  { %6221 = vmatprep.subr.bf16.mxu0 %v13715_v24  ;;  %6262 = vmatprep.subr.bf16.mxu1 %v13716_v35 }
 0xff5   :  { %6222 = vmatpush1.bf16.msra.mxu0 %v13717_v31  ;;  %6263 = vmatpush1.bf16.msra.mxu1 %v13718_v14 }
 0xff6   :  { %6223 = vmatprep.subr.bf16.mxu0 %v13719_v18  ;;  %6264 = vmatprep.subr.bf16.mxu1 %v13720_v30  ;;  %v13954_v30 = vld [vmem:[#allocation27_spill] sm:$0xff]  ;;  %v13955_v18 = vld [vmem:[#allocation28_spill] sm:$0xff] }
 0xff9   :  { %6224 = vmatpush1.bf16.msra.mxu0 %v11100_v57  ;;  %6265 = vmatpush1.bf16.msra.mxu1 %v13873_v37  ;;  %v13953_v37 = vld [vmem:[#allocation30_spill] sm:$0xff] }
 0xffa   :  { %6225 = vmatprep.subr.bf16.mxu0 %v13874_v20  ;;  %6266 = vmatprep.subr.bf16.mxu1 %v13875_v54  ;;  %v13885_v20 = vld [vmem:[#allocation106_spill] sm:$0xff] }
 0xffb   :  { %v13886_v54 = vld [vmem:[#allocation146_spill] sm:$0xff] }
 0xffd   :  { %6226 = vmatpush1.bf16.msra.mxu0 %v13876_v21  ;;  %6267 = vmatpush1.bf16.msra.mxu1 %v13877_v60  ;;  %v13887_v21 = vld [vmem:[#allocation148_spill] sm:$0xff]  ;;  %v13952_v60 = vld [vmem:[#allocation29_spill] sm:$0xff] }
 0xffe   :  { %6227 = vmatprep.subr.bf16.mxu0 %v13878_v40  ;;  %6268 = vmatprep.subr.bf16.mxu1 %v13879_v0  ;;  %v13888_v0 = vld [vmem:[#allocation147_spill] sm:$0xff]  ;;  %v13897_v40 = vld [vmem:[#allocation108_spill] sm:$0xff] }
0x1001   :  { %6228 = vmatpush1.bf16.msra.mxu0 %v13880_v10  ;;  %6269 = vmatpush1.bf16.msra.mxu1 %v13881_v52  ;;  %v13889_v10 = vld [vmem:[#allocation149_spill] sm:$0xff]  ;;  %v13890_v52 = vld [vmem:[#allocation150_spill] sm:$0xff] }
0x1002   :  { %6229 = vmatprep.subr.bf16.mxu0 %v13882_v59  ;;  %6270 = vmatprep.subr.bf16.mxu1 %v13883_v1  ;;  %v13891_v59 = vld [vmem:[#allocation151_spill] sm:$0xff]  ;;  %v13892_v1 = vld [vmem:[#allocation152_spill] sm:$0xff] }
0x1005   :  { %6230 = vmatpush1.bf16.msra.mxu0 %v13884_v22  ;;  %6271 = vmatpush1.bf16.msra.mxu1 %v13885_v20  ;;  %v13893_v22 = vld [vmem:[#allocation180_spill] sm:$0xff]  ;;  %v13894_v20 = vld [vmem:[#allocation181_spill] sm:$0xff] }
0x1006   :  { %6347 = vmatprep.subr.bf16.mxu0 %v13886_v54  ;;  %6388 = vmatprep.subr.bf16.mxu1 %v13887_v21  ;;  %v13895_v54 = vld [vmem:[#allocation182_spill] sm:$0xff] }
0x1007   :  { %v13896_v21 = vld [vmem:[#allocation98_spill] sm:$0xff] }
0x1008   :  { %6232 = vmatmul.mubr.bf16.vlgmr.msra.gmra.mrb[140].mxu0 %v11528_v38  ;;  %6273 = vmatmul.mubr.bf16.vlgmr.msra.gmra.mrb[156].mxu1 %v11528_v38  ;;  %v13898_v38 = vld [vmem:[#allocation91_spill] sm:$0xff] }
0x1009   :  { %6348 = vmatpush1.bf16.msra.mxu0 %v13888_v0  ;;  %6389 = vmatpush1.bf16.msra.mxu1 %v13889_v10  ;;  %v13899_v0 = vld [vmem:[#allocation119_spill] sm:$0xff]  ;;  %v13900_v10 = vld [vmem:[#allocation112_spill] sm:$0xff] }
0x100a   :  { %6349 = vmatprep.subr.bf16.mxu0 %v13890_v52  ;;  %6390 = vmatprep.subr.bf16.mxu1 %v13891_v59  ;;  %v13901_v52 = vld [vmem:[#allocation133_spill] sm:$0xff]  ;;  %v13902_v59 = vld [vmem:[#allocation123_spill] sm:$0xff] }
0x100d   :  { %6350 = vmatpush1.bf16.msra.mxu0 %v13892_v1  ;;  %6391 = vmatpush1.bf16.msra.mxu1 %v13893_v22  ;;  %v13903_v1 = vld [vmem:[#allocation140_spill] sm:$0xff]  ;;  %v13904_v22 = vld [vmem:[#allocation153_spill] sm:$0xff] }
0x100e   :  { %6351 = vmatprep.subr.bf16.mxu0 %v13894_v20  ;;  %6392 = vmatprep.subr.bf16.mxu1 %v13895_v54  ;;  %v13905_v20 = vld [vmem:[#allocation154_spill] sm:$0xff]  ;;  %v13906_v54 = vld [vmem:[#allocation155_spill] sm:$0xff] }
0x1011   :  { %6352 = vmatpush1.bf16.msra.mxu0 %v13896_v21  ;;  %6393 = vmatpush1.bf16.msra.mxu1 %v13897_v40  ;;  %v13907_v21 = vld [vmem:[#allocation156_spill] sm:$0xff]  ;;  %v13908_v40 = vld [vmem:[#allocation157_spill] sm:$0xff] }
0x1012   :  { %6353 = vmatprep.subr.bf16.mxu0 %v13898_v38  ;;  %6394 = vmatprep.subr.bf16.mxu1 %v13899_v0  ;;  %v13909_v38 = vld [vmem:[#allocation158_spill] sm:$0xff]  ;;  %v13910_v0 = vld [vmem:[#allocation159_spill] sm:$0xff] }
0x1015   :  { %6354 = vmatpush1.bf16.msra.mxu0 %v13900_v10  ;;  %6395 = vmatpush1.bf16.msra.mxu1 %v13901_v52  ;;  %v13911_v10 = vld [vmem:[#allocation160_spill] sm:$0xff]  ;;  %v13912_v52 = vld [vmem:[#allocation161_spill] sm:$0xff] }
0x1016   :  { %6355 = vmatprep.subr.bf16.mxu0 %v13902_v59  ;;  %6396 = vmatprep.subr.bf16.mxu1 %v13903_v1  ;;  %v13913_v59 = vld [vmem:[#allocation169_spill] sm:$0xff]  ;;  %v13914_v1 = vld [vmem:[#allocation170_spill] sm:$0xff] }
0x1019   :  { %6356 = vmatpush1.bf16.msra.mxu0 %v13904_v22  ;;  %6397 = vmatpush1.bf16.msra.mxu1 %v13905_v20  ;;  %v13915_v22 = vld [vmem:[#allocation171_spill] sm:$0xff]  ;;  %v13916_v20 = vld [vmem:[#allocation174_spill] sm:$0xff] }
0x101a   :  { %6357 = vmatprep.subr.bf16.mxu0 %v13906_v54  ;;  %6398 = vmatprep.subr.bf16.mxu1 %v13907_v21  ;;  %v13917_v54 = vld [vmem:[#allocation175_spill] sm:$0xff]  ;;  %v13918_v21 = vld [vmem:[#allocation176_spill] sm:$0xff] }
0x101d   :  { %6358 = vmatpush1.bf16.msra.mxu0 %v13908_v40  ;;  %6399 = vmatpush1.bf16.msra.mxu1 %v13909_v38  ;;  %v13919_v40 = vld [vmem:[#allocation177_spill] sm:$0xff]  ;;  %v13920_v38 = vld [vmem:[#allocation178_spill] sm:$0xff] }
0x101e   :  { %6359 = vmatprep.subr.bf16.mxu0 %v13910_v0  ;;  %6400 = vmatprep.subr.bf16.mxu1 %v13911_v10  ;;  %v13921_v0 = vld [vmem:[#allocation179_spill] sm:$0xff] }
0x101f   :  { %v13922_v10 = vld [vmem:[#allocation183_spill] sm:$0xff] }
0x1021   :  { %6360 = vmatpush1.bf16.msra.mxu0 %v13912_v52  ;;  %6401 = vmatpush1.bf16.msra.mxu1 %v13913_v59  ;;  %v13923_v52 = vld [vmem:[#allocation100_spill] sm:$0xff]  ;;  %v13924_v59 = vld [vmem:[#allocation110_spill] sm:$0xff] }
0x1022   :  { %6361 = vmatprep.subr.bf16.mxu0 %v13914_v1  ;;  %6402 = vmatprep.subr.bf16.mxu1 %v13915_v22  ;;  %v13925_v1 = vld [vmem:[#allocation89_spill] sm:$0xff] }
0x1023   :  { %v13926_v22 = vld [vmem:[#allocation117_spill] sm:$0xff] }
0x1025   :  { %6362 = vmatpush1.bf16.msra.mxu0 %v13916_v20  ;;  %6403 = vmatpush1.bf16.msra.mxu1 %v13917_v54  ;;  %v13927_v20 = vld [vmem:[#allocation114_spill] sm:$0xff]  ;;  %v13928_v54 = vld [vmem:[#allocation135_spill] sm:$0xff] }
0x1026   :  { %6363 = vmatprep.subr.bf16.mxu0 %v13918_v21  ;;  %6404 = vmatprep.subr.bf16.mxu1 %v13919_v40  ;;  %v13929_v21 = vld [vmem:[#allocation121_spill] sm:$0xff]  ;;  %v13930_v40 = vld [vmem:[#allocation138_spill] sm:$0xff] }
0x1029   :  { %6364 = vmatpush1.bf16.msra.mxu0 %v13920_v38  ;;  %6405 = vmatpush1.bf16.msra.mxu1 %v13921_v0  ;;  %v13931_v38 = vld [vmem:[#allocation162_spill] sm:$0xff]  ;;  %v13932_v0 = vld [vmem:[#allocation163_spill] sm:$0xff] }
0x102a   :  { %6365 = vmatprep.subr.bf16.mxu0 %v13922_v10  ;;  %6406 = vmatprep.subr.bf16.mxu1 %v13923_v52  ;;  %v13933_v10 = vld [vmem:[#allocation164_spill] sm:$0xff]  ;;  %v13934_v52 = vld [vmem:[#allocation165_spill] sm:$0xff] }
0x102d   :  { %6366 = vmatpush1.bf16.msra.mxu0 %v13924_v59  ;;  %6407 = vmatpush1.bf16.msra.mxu1 %v13925_v1  ;;  %v13935_v59 = vld [vmem:[#allocation166_spill] sm:$0xff]  ;;  %v13936_v1 = vld [vmem:[#allocation167_spill] sm:$0xff] }
0x102e   :  { %6367 = vmatprep.subr.bf16.mxu0 %v13926_v22  ;;  %6408 = vmatprep.subr.bf16.mxu1 %v13927_v20  ;;  %v13937_v22 = vld [vmem:[#allocation168_spill] sm:$0xff] }
0x102f   :  { %v13938_v20 = vld [vmem:[#allocation172_spill] sm:$0xff] }
0x1031   :  { %6368 = vmatpush1.bf16.msra.mxu0 %v13928_v54  ;;  %6409 = vmatpush1.bf16.msra.mxu1 %v13929_v21  ;;  %v13939_v54 = vld [vmem:[#allocation88_spill] sm:$0xff]  ;;  %v13940_v21 = vld [vmem:[#allocation173_spill] sm:$0xff] }
0x1032   :  { %6369 = vmatprep.subr.bf16.mxu0 %v13930_v40  ;;  %6410 = vmatprep.subr.bf16.mxu1 %v13931_v38  ;;  %v13941_v40 = vld [vmem:[#allocation116_spill] sm:$0xff]  ;;  %v13942_v38 = vld [vmem:[#allocation101_spill] sm:$0xff] }
0x1035   :  { %6370 = vmatpush1.bf16.msra.mxu0 %v13932_v0  ;;  %6411 = vmatpush1.bf16.msra.mxu1 %v13933_v10  ;;  %v13943_v0 = vld [vmem:[#allocation111_spill] sm:$0xff]  ;;  %v13944_v10 = vld [vmem:[#allocation120_spill] sm:$0xff] }
0x1036   :  { %6371 = vmatprep.subr.bf16.mxu0 %v13934_v52  ;;  %6412 = vmatprep.subr.bf16.mxu1 %v13935_v59  ;;  %v13945_v52 = vld [vmem:[#allocation137_spill] sm:$0xff]  ;;  %v13946_v59 = vld [vmem:[#allocation115_spill] sm:$0xff] }
0x1039   :  { %6372 = vmatpush1.bf16.msra.mxu0 %v13936_v1  ;;  %6413 = vmatpush1.bf16.msra.mxu1 %v13937_v22  ;;  %v13947_v1 = vld [vmem:[#allocation136_spill] sm:$0xff]  ;;  %v13948_v22 = vld [vmem:[#allocation90_spill] sm:$0xff] }
0x103a   :  { %6373 = vmatprep.subr.bf16.mxu0 %v13938_v20  ;;  %6414 = vmatprep.subr.bf16.mxu1 %v13939_v54  ;;  %v13949_v20 = vld [vmem:[#allocation118_spill] sm:$0xff]  ;;  %v13950_v54 = vld [vmem:[#allocation99_spill] sm:$0xff] }
0x103d   :  { %6374 = vmatpush1.bf16.msra.mxu0 %v13940_v21  ;;  %6415 = vmatpush1.bf16.msra.mxu1 %v13941_v40  ;;  %v13951_v21 = vld [vmem:[#allocation109_spill] sm:$0xff] }
0x103e   :  { %6375 = vmatprep.subr.bf16.mxu0 %v13942_v38  ;;  %6416 = vmatprep.subr.bf16.mxu1 %v13943_v0 }
0x1041   :  { %6376 = vmatpush1.bf16.msra.mxu0 %v13944_v10  ;;  %6417 = vmatpush1.bf16.msra.mxu1 %v13945_v52 }
0x1042   :  { %6377 = vmatprep.subr.bf16.mxu0 %v13946_v59  ;;  %6418 = vmatprep.subr.bf16.mxu1 %v13947_v1 }
0x1045   :  { %6378 = vmatpush1.bf16.msra.mxu0 %v13948_v22  ;;  %6419 = vmatpush1.bf16.msra.mxu1 %v13949_v20 }
0x1046   :  { %6429 = vmatprep.subr.bf16.mxu0 %v13950_v54  ;;  %6470 = vmatprep.subr.bf16.mxu1 %v13951_v21 }
0x109b   :  { %v6151_v40 = vpop.f32.mrb[136].mxu0  ;;  %v6192_v38 = vpop.f32.mrb[152].mxu1 }
0x109c   :  { %v6281_v0 = vadd.f32 %v6151_v40, %v13952_v60  ;;  %v6283_v10 = vadd.f32 %v6192_v38, %v13953_v37  ;;  %v6153_v57 = vpop.f32.mrb[137].mxu0  ;;  %v6194_v52 = vpop.f32.mrb[153].mxu1 }
0x109d   :  { %v6282_v59 = vadd.f32 %v6153_v57, %v13954_v30  ;;  %v6284_v1 = vadd.f32 %v6194_v52, %v13955_v18  ;;  %v6155_v14 = vpop.f32.mrb[138].mxu0  ;;  %v6196_v22 = vpop.f32.mrb[154].mxu1 }
0x109e   :  { %v6156_v31 = vpop.f32.mrb[139].mxu0  ;;  %v6197_v20 = vpop.f32.mrb[155].mxu1  ;;  %v7822_v35 = vmul.f32 -1.442695, %v6281_v0  ;;  %v7824_v54 = vmul.f32 -1.442695, %v6283_v10 }
0x109f   :  { %v7823_v24 = vmul.f32 -1.442695, %v6282_v59  ;;  %v7825_v21 = vmul.f32 -1.442695, %v6284_v1  ;;  %v13956_v20 = vld [vmem:[#allocation53_spill] sm:$0xff]  ;;  %v13957_v10 = vld [vmem:[#allocation54_spill] sm:$0xff] }
0x10a0   :  { %8390 = vpow2.f32 %v7822_v35  ;;  %v13959_v59 = vld [vmem:[#allocation52_spill] sm:$0xff] }
0x10a1   :  { %8392 = vpow2.f32 %v7824_v54 }
0x10a2   :  { %8394 = vpow2.f32 %v7823_v24 }
0x10a3   :  { %8396 = vpow2.f32 %v7825_v21  ;;  %v13958_v21 = vld [vmem:[#allocation51_spill] sm:$0xff] }
0x10aa   :  { %v8391_v60 = vpop.eup %8390 }
0x10ab   :  { %v8393_v37 = vpop.eup %8392  ;;  %v6295_v8 = vadd.f32 1.0, %v8391_v60 }
0x10ac   :  { %v8395_v40 = vpop.eup %8394  ;;  %v6307_v57 = vadd.f32 1.0, %v8393_v37 }
0x10ad   :  { %v8397_v38 = vpop.eup %8396  ;;  %v6296_v30 = vadd.f32 1.0, %v8395_v40  ;;  %8398 = vrcp.f32 %v6295_v8 }
0x10ae   :  { %v6308_v18 = vadd.f32 1.0, %v8397_v38  ;;  %8400 = vrcp.f32 %v6307_v57 }
0x10af   :  { %8402 = vrcp.f32 %v6296_v30 }
0x10b0   :  { %8404 = vrcp.f32 %v6308_v18 }
0x10b7   :  { %v8399_v57 = vpop.eup %8398 }
0x10b8   :  { %v8401_v30 = vpop.eup %8400 }
0x10db   :  { %v6233_v31 = vpop.f32.mrb[140].mxu0  ;;  %v6274_v14 = vpop.f32.mrb[156].mxu1 }
0x10dc   :  { %v6285_v0 = vadd.f32 %v6233_v31, %v13956_v20  ;;  %v6287_v35 = vadd.f32 %v6274_v14, %v13957_v10  ;;  %v6235_v54 = vpop.f32.mrb[141].mxu0  ;;  %v6276_v24 = vpop.f32.mrb[157].mxu1  ;;  %v6327_v10 = vmul.f32 %v8401_v30, %v11522_v26  ;;  %v13960_v30 = vld [vmem:[#allocation198_spill] sm:$0xff] }
0x10dd   :  { %v6286_v52 = vadd.f32 %v6235_v54, %v13958_v21  ;;  %v6288_v1 = vadd.f32 %v6276_v24, %v13959_v59  ;;  %v6237_v22 = vpop.f32.mrb[142].mxu0  ;;  %v6278_v60 = vpop.f32.mrb[158].mxu1 }
0x10de   :  { %8406 = vtanh.f32 %v6285_v0  ;;  %v7826_v37 = vmul.f32 -1.442695, %v6287_v35  ;;  %v6238_v8 = vpop.f32.mrb[143].mxu0  ;;  %v6279_v40 = vpop.f32.mrb[159].mxu1 }
0x10df   :  { %8408 = vtanh.f32 %v6286_v52  ;;  %v7827_v38 = vmul.f32 -1.442695, %v6288_v1  ;;  %v8403_v31 = vpop.eup %8402 }
0x10e0   :  { %8410 = vpow2.f32 %v7826_v37  ;;  %v8405_v14 = vpop.eup %8404 }
0x10e1   :  { %8412 = vpow2.f32 %v7827_v38  ;;  %v6328_v21 = vmul.f32 %v8405_v14, %v11524_v19  ;;  %v13962_v14 = vld [vmem:[#allocation200_spill] sm:$0xff] }
0x10e8   :  { %v8407_v20 = vpop.eup %8406 }
0x10e9   :  { %v8409_v18 = vpop.eup %8408  ;;  %v6329_v54 = vmul.f32 %v8407_v20, %v8399_v57  ;;  %v13963_v20 = vld [vmem:[#allocation201_spill] sm:$0xff] }
0x10ea   :  { %v8411_v24 = vpop.eup %8410  ;;  %v6330_v0 = vmul.f32 %v8409_v18, %v8403_v31  ;;  %v13961_v31 = vld [vmem:[#allocation199_spill] sm:$0xff]  ;;  %v13964_v18 = vld [vmem:[#allocation202_spill] sm:$0xff] }
0x10eb   :  { %v8413_v35 = vpop.eup %8412  ;;  %v11672_v59 = vadd.f32 %v6329_v54, %v6327_v10  ;;  %v6321_v52 = vadd.f32 1.0, %v8411_v24  ;;  %v13965_v10 = vld [vmem:[#allocation203_spill] sm:$0xff]  ;;  %v13966_v54 = vld [vmem:[#allocation204_spill] sm:$0xff]  ;;  %v13967_v24 = vld [vmem:[#allocation97_spill] sm:$0xff] }
0x10ec   :  { %v11674_v1 = vadd.f32 %v6330_v0, %v6328_v21  ;;  %v6322_v22 = vadd.f32 1.0, %v8413_v35  ;;  %v13968_v21 = vld [vmem:[#allocation126_spill] sm:$0xff]  ;;  %v13969_v0 = vld [vmem:[#allocation92_spill] sm:$0xff] }
0x10ed   :  { %8414 = vtanh.f32 %v11672_v59  ;;  %v13970_v35 = vld [vmem:[#allocation102_spill] sm:$0xff] }
0x10ee   :  { %8416 = vrcp.f32 %v6321_v52  ;;  %v13971_v52 = vld [vmem:[#allocation129_spill] sm:$0xff] }
0x10ef   :  { %8418 = vtanh.f32 %v11674_v1 }
0x10f0   :  { %8420 = vrcp.f32 %v6322_v22  ;;  %v13972_v22 = vld [vmem:[#allocation142_spill] sm:$0xff] }
0x10f7   :  { %v8415_v60 = vpop.eup %8414 }
0x10f8   :  { %v8417_v26 = vpop.eup %8416 }
0x10f9   :  { %v8419_v37 = vpop.eup %8418  ;;  %v6335_v40 = vmul.f32 %v8417_v26, %v8415_v60  ;;  %v13973_v60 = vld [vmem:[#allocation105_spill] sm:$0xff]  ;;  %v13974_v26 = vld [vmem:[#allocation130_spill] sm:$0xff] }
0x10fa   :  { %v8421_v8 = vpop.eup %8420 }
0x10fb   :  { %v6336_v19 = vmul.f32 %v8421_v8, %v8419_v37  ;;  %v11678_v57 = vpack.c.bf16 %v6335_v40, %v6335_v40  ;;  %v13975_v37 = vld [vmem:[#allocation143_spill] sm:$0xff]  ;;  %v13976_v8 = vld [vmem:[#allocation93_spill] sm:$0xff] }
0x10fc   :  { %v13977_v40 = vld [vmem:[#allocation145_spill] sm:$0xff] }
0x10fd   :  { %v6346_v38 = vpack.c.bf16 %v6336_v19, %v6336_v19  ;;  %v13978_v19 = vld [vmem:[#allocation85_spill] sm:$0xff] }
0x10ff   :  { %6379 = vmatprep.mubr.bf16.mxu0 %v6346_v38  ;;  %6420 = vmatprep.mubr.bf16.mxu1 %v6346_v38 }
0x1100   :  { %6380 = vmatmul.mubr.bf16.vlgmr.msra.gmra.mrb[144].mxu0 %v11678_v57  ;;  %6421 = vmatmul.mubr.bf16.vlgmr.msra.gmra.mrb[160].mxu1 %v11678_v57 }
0x1101   :  { %6430 = vmatpush1.bf16.msra.mxu0 %v13673_v45  ;;  %6471 = vmatpush1.bf16.msra.mxu1 %v13674_v33 }
0x1102   :  { %6461 = vmatprep.mubr.bf16.mxu0 %v6346_v38  ;;  %6502 = vmatprep.mubr.bf16.mxu1 %v6346_v38  ;;  %v13979_v38 = vld [vmem:[#allocation96_spill] sm:$0xff] }
0x1103   :  { %6431 = vmatprep.subr.bf16.mxu0 %v13675_v17  ;;  %6472 = vmatprep.subr.bf16.mxu1 %v13676_v50 }
0x1105   :  { %6432 = vmatpush1.bf16.msra.mxu0 %v13677_v27  ;;  %6473 = vmatpush1.bf16.msra.mxu1 %v13678_v55 }
0x1106   :  { %6433 = vmatprep.subr.bf16.mxu0 %v13679_v51  ;;  %6474 = vmatprep.subr.bf16.mxu1 %v13680_v2 }
0x1109   :  { %6434 = vmatpush1.bf16.msra.mxu0 %v13681_v42  ;;  %6475 = vmatpush1.bf16.msra.mxu1 %v13682_v28 }
0x110a   :  { %6435 = vmatprep.subr.bf16.mxu0 %v13683_v25  ;;  %6476 = vmatprep.subr.bf16.mxu1 %v13770_v47 }
0x110d   :  { %6436 = vmatpush1.bf16.msra.mxu0 %v13771_v13  ;;  %6477 = vmatpush1.bf16.msra.mxu1 %v13772_v29 }
0x110e   :  { %6437 = vmatprep.subr.bf16.mxu0 %v13773_v41  ;;  %6478 = vmatprep.subr.bf16.mxu1 %v13774_v39 }
0x1111   :  { %6438 = vmatpush1.bf16.msra.mxu0 %v13775_v4  ;;  %6479 = vmatpush1.bf16.msra.mxu1 %v13776_v9 }
0x1112   :  { %6439 = vmatprep.subr.bf16.mxu0 %v13777_v7  ;;  %6480 = vmatprep.subr.bf16.mxu1 %v13778_v36 }
0x1115   :  { %6440 = vmatpush1.bf16.msra.mxu0 %v13865_v5  ;;  %6481 = vmatpush1.bf16.msra.mxu1 %v13866_v16 }
0x1116   :  { %6441 = vmatprep.subr.bf16.mxu0 %v13867_v48  ;;  %6482 = vmatprep.subr.bf16.mxu1 %v13868_v12 }
0x1119   :  { %6442 = vmatpush1.bf16.msra.mxu0 %v13869_v3  ;;  %6483 = vmatpush1.bf16.msra.mxu1 %v13870_v63 }
0x111a   :  { %6443 = vmatprep.subr.bf16.mxu0 %v13785_v34  ;;  %6484 = vmatprep.subr.bf16.mxu1 %v13786_v32 }
0x111d   :  { %6444 = vmatpush1.bf16.msra.mxu0 %v13787_v44  ;;  %6485 = vmatpush1.bf16.msra.mxu1 %v13871_v58 }
0x111e   :  { %6445 = vmatprep.subr.bf16.mxu0 %v13872_v49  ;;  %6486 = vmatprep.subr.bf16.mxu1 %v13790_v56 }
0x1121   :  { %6446 = vmatpush1.bf16.msra.mxu0 %v13791_v23  ;;  %6487 = vmatpush1.bf16.msra.mxu1 %v13792_v62 }
0x1122   :  { %6447 = vmatprep.subr.bf16.mxu0 %v13793_v11  ;;  %6488 = vmatprep.subr.bf16.mxu1 %v13794_v53 }
0x1125   :  { %6448 = vmatpush1.bf16.msra.mxu0 %v13795_v6  ;;  %6489 = vmatpush1.bf16.msra.mxu1 %v13710_v61 }
0x1126   :  { %6449 = vmatprep.subr.bf16.mxu0 %v13711_v43  ;;  %6490 = vmatprep.subr.bf16.mxu1 %v13712_v15 }
0x1129   :  { %6450 = vmatpush1.bf16.msra.mxu0 %v13796_v46  ;;  %6491 = vmatpush1.bf16.msra.mxu1 %v13960_v30 }
0x112a   :  { %6451 = vmatprep.subr.bf16.mxu0 %v13961_v31  ;;  %6492 = vmatprep.subr.bf16.mxu1 %v13962_v14 }
0x112d   :  { %6452 = vmatpush1.bf16.msra.mxu0 %v13963_v20  ;;  %6493 = vmatpush1.bf16.msra.mxu1 %v13964_v18 }
0x112e   :  { %6453 = vmatprep.subr.bf16.mxu0 %v13965_v10  ;;  %6494 = vmatprep.subr.bf16.mxu1 %v13966_v54  ;;  %v14049_v54 = vld [vmem:[#allocation23_spill] sm:$0xff]  ;;  %v14050_v10 = vld [vmem:[#allocation24_spill] sm:$0xff] }
0x1131   :  { %6454 = vmatpush1.bf16.msra.mxu0 %v13967_v24  ;;  %6495 = vmatpush1.bf16.msra.mxu1 %v13968_v21  ;;  %v14048_v21 = vld [vmem:[#allocation34_spill] sm:$0xff] }
0x1132   :  { %6455 = vmatprep.subr.bf16.mxu0 %v13969_v0  ;;  %6496 = vmatprep.subr.bf16.mxu1 %v13970_v35  ;;  %v13980_v0 = vld [vmem:[#allocation106_spill] sm:$0xff] }
0x1133   :  { %v13981_v35 = vld [vmem:[#allocation146_spill] sm:$0xff] }
0x1135   :  { %6456 = vmatpush1.bf16.msra.mxu0 %v13971_v52  ;;  %6497 = vmatpush1.bf16.msra.mxu1 %v13972_v22  ;;  %v13982_v52 = vld [vmem:[#allocation148_spill] sm:$0xff]  ;;  %v14047_v22 = vld [vmem:[#allocation33_spill] sm:$0xff] }
0x1136   :  { %6457 = vmatprep.subr.bf16.mxu0 %v13973_v60  ;;  %6498 = vmatprep.subr.bf16.mxu1 %v13974_v26  ;;  %v13983_v26 = vld [vmem:[#allocation147_spill] sm:$0xff]  ;;  %v13992_v60 = vld [vmem:[#allocation108_spill] sm:$0xff] }
0x1139   :  { %6458 = vmatpush1.bf16.msra.mxu0 %v13975_v37  ;;  %6499 = vmatpush1.bf16.msra.mxu1 %v13976_v8  ;;  %v13984_v37 = vld [vmem:[#allocation149_spill] sm:$0xff]  ;;  %v13985_v8 = vld [vmem:[#allocation150_spill] sm:$0xff] }
0x113a   :  { %6459 = vmatprep.subr.bf16.mxu0 %v13977_v40  ;;  %6500 = vmatprep.subr.bf16.mxu1 %v13978_v19  ;;  %v13986_v40 = vld [vmem:[#allocation151_spill] sm:$0xff]  ;;  %v13987_v19 = vld [vmem:[#allocation152_spill] sm:$0xff] }
0x113d   :  { %6460 = vmatpush1.bf16.msra.mxu0 %v13979_v38  ;;  %6501 = vmatpush1.bf16.msra.mxu1 %v13980_v0  ;;  %v13988_v38 = vld [vmem:[#allocation180_spill] sm:$0xff]  ;;  %v13989_v0 = vld [vmem:[#allocation181_spill] sm:$0xff] }
0x113e   :  { %6577 = vmatprep.subr.bf16.mxu0 %v13981_v35  ;;  %6618 = vmatprep.subr.bf16.mxu1 %v13982_v52  ;;  %v13990_v35 = vld [vmem:[#allocation182_spill] sm:$0xff] }
0x113f   :  { %v13991_v52 = vld [vmem:[#allocation98_spill] sm:$0xff] }
0x1140   :  { %6462 = vmatmul.mubr.bf16.vlgmr.msra.gmra.mrb[148].mxu0 %v11678_v57  ;;  %6503 = vmatmul.mubr.bf16.vlgmr.msra.gmra.mrb[164].mxu1 %v11678_v57  ;;  %v13993_v57 = vld [vmem:[#allocation91_spill] sm:$0xff] }
0x1141   :  { %6578 = vmatpush1.bf16.msra.mxu0 %v13983_v26  ;;  %6619 = vmatpush1.bf16.msra.mxu1 %v13984_v37  ;;  %v13994_v26 = vld [vmem:[#allocation119_spill] sm:$0xff]  ;;  %v13995_v37 = vld [vmem:[#allocation112_spill] sm:$0xff] }
0x1142   :  { %6579 = vmatprep.subr.bf16.mxu0 %v13985_v8  ;;  %6620 = vmatprep.subr.bf16.mxu1 %v13986_v40  ;;  %v13996_v8 = vld [vmem:[#allocation133_spill] sm:$0xff]  ;;  %v13997_v40 = vld [vmem:[#allocation123_spill] sm:$0xff] }
0x1145   :  { %6580 = vmatpush1.bf16.msra.mxu0 %v13987_v19  ;;  %6621 = vmatpush1.bf16.msra.mxu1 %v13988_v38  ;;  %v13998_v19 = vld [vmem:[#allocation140_spill] sm:$0xff]  ;;  %v13999_v38 = vld [vmem:[#allocation153_spill] sm:$0xff] }
0x1146   :  { %6581 = vmatprep.subr.bf16.mxu0 %v13989_v0  ;;  %6622 = vmatprep.subr.bf16.mxu1 %v13990_v35  ;;  %v14000_v0 = vld [vmem:[#allocation154_spill] sm:$0xff]  ;;  %v14001_v35 = vld [vmem:[#allocation155_spill] sm:$0xff] }
0x1149   :  { %6582 = vmatpush1.bf16.msra.mxu0 %v13991_v52  ;;  %6623 = vmatpush1.bf16.msra.mxu1 %v13992_v60  ;;  %v14002_v52 = vld [vmem:[#allocation156_spill] sm:$0xff]  ;;  %v14003_v60 = vld [vmem:[#allocation157_spill] sm:$0xff] }
0x114a   :  { %6583 = vmatprep.subr.bf16.mxu0 %v13993_v57  ;;  %6624 = vmatprep.subr.bf16.mxu1 %v13994_v26  ;;  %v14004_v57 = vld [vmem:[#allocation158_spill] sm:$0xff]  ;;  %v14005_v26 = vld [vmem:[#allocation159_spill] sm:$0xff] }
0x114d   :  { %6584 = vmatpush1.bf16.msra.mxu0 %v13995_v37  ;;  %6625 = vmatpush1.bf16.msra.mxu1 %v13996_v8  ;;  %v14006_v37 = vld [vmem:[#allocation160_spill] sm:$0xff]  ;;  %v14007_v8 = vld [vmem:[#allocation161_spill] sm:$0xff] }
0x114e   :  { %6585 = vmatprep.subr.bf16.mxu0 %v13997_v40  ;;  %6626 = vmatprep.subr.bf16.mxu1 %v13998_v19  ;;  %v14008_v40 = vld [vmem:[#allocation169_spill] sm:$0xff]  ;;  %v14009_v19 = vld [vmem:[#allocation170_spill] sm:$0xff] }
0x1151   :  { %6586 = vmatpush1.bf16.msra.mxu0 %v13999_v38  ;;  %6627 = vmatpush1.bf16.msra.mxu1 %v14000_v0  ;;  %v14010_v38 = vld [vmem:[#allocation171_spill] sm:$0xff]  ;;  %v14011_v0 = vld [vmem:[#allocation174_spill] sm:$0xff] }
0x1152   :  { %6587 = vmatprep.subr.bf16.mxu0 %v14001_v35  ;;  %6628 = vmatprep.subr.bf16.mxu1 %v14002_v52  ;;  %v14012_v35 = vld [vmem:[#allocation175_spill] sm:$0xff]  ;;  %v14013_v52 = vld [vmem:[#allocation176_spill] sm:$0xff] }
0x1155   :  { %6588 = vmatpush1.bf16.msra.mxu0 %v14003_v60  ;;  %6629 = vmatpush1.bf16.msra.mxu1 %v14004_v57  ;;  %v14014_v60 = vld [vmem:[#allocation177_spill] sm:$0xff]  ;;  %v14015_v57 = vld [vmem:[#allocation178_spill] sm:$0xff] }
0x1156   :  { %6589 = vmatprep.subr.bf16.mxu0 %v14005_v26  ;;  %6630 = vmatprep.subr.bf16.mxu1 %v14006_v37  ;;  %v14016_v26 = vld [vmem:[#allocation179_spill] sm:$0xff] }
0x1157   :  { %v14017_v37 = vld [vmem:[#allocation183_spill] sm:$0xff] }
0x1159   :  { %6590 = vmatpush1.bf16.msra.mxu0 %v14007_v8  ;;  %6631 = vmatpush1.bf16.msra.mxu1 %v14008_v40  ;;  %v14018_v8 = vld [vmem:[#allocation100_spill] sm:$0xff]  ;;  %v14019_v40 = vld [vmem:[#allocation110_spill] sm:$0xff] }
0x115a   :  { %6591 = vmatprep.subr.bf16.mxu0 %v14009_v19  ;;  %6632 = vmatprep.subr.bf16.mxu1 %v14010_v38  ;;  %v14020_v19 = vld [vmem:[#allocation89_spill] sm:$0xff] }
0x115b   :  { %v14021_v38 = vld [vmem:[#allocation117_spill] sm:$0xff] }
0x115d   :  { %6592 = vmatpush1.bf16.msra.mxu0 %v14011_v0  ;;  %6633 = vmatpush1.bf16.msra.mxu1 %v14012_v35  ;;  %v14022_v0 = vld [vmem:[#allocation114_spill] sm:$0xff]  ;;  %v14023_v35 = vld [vmem:[#allocation135_spill] sm:$0xff] }
0x115e   :  { %6593 = vmatprep.subr.bf16.mxu0 %v14013_v52  ;;  %6634 = vmatprep.subr.bf16.mxu1 %v14014_v60  ;;  %v14024_v52 = vld [vmem:[#allocation121_spill] sm:$0xff]  ;;  %v14025_v60 = vld [vmem:[#allocation138_spill] sm:$0xff] }
0x1161   :  { %6594 = vmatpush1.bf16.msra.mxu0 %v14015_v57  ;;  %6635 = vmatpush1.bf16.msra.mxu1 %v14016_v26  ;;  %v14026_v57 = vld [vmem:[#allocation162_spill] sm:$0xff]  ;;  %v14027_v26 = vld [vmem:[#allocation163_spill] sm:$0xff] }
0x1162   :  { %6595 = vmatprep.subr.bf16.mxu0 %v14017_v37  ;;  %6636 = vmatprep.subr.bf16.mxu1 %v14018_v8  ;;  %v14028_v37 = vld [vmem:[#allocation164_spill] sm:$0xff]  ;;  %v14029_v8 = vld [vmem:[#allocation165_spill] sm:$0xff] }
0x1165   :  { %6596 = vmatpush1.bf16.msra.mxu0 %v14019_v40  ;;  %6637 = vmatpush1.bf16.msra.mxu1 %v14020_v19  ;;  %v14030_v40 = vld [vmem:[#allocation166_spill] sm:$0xff]  ;;  %v14031_v19 = vld [vmem:[#allocation167_spill] sm:$0xff] }
0x1166   :  { %6597 = vmatprep.subr.bf16.mxu0 %v14021_v38  ;;  %6638 = vmatprep.subr.bf16.mxu1 %v14022_v0  ;;  %v14032_v38 = vld [vmem:[#allocation168_spill] sm:$0xff] }
0x1167   :  { %v14033_v0 = vld [vmem:[#allocation172_spill] sm:$0xff] }
0x1169   :  { %6598 = vmatpush1.bf16.msra.mxu0 %v14023_v35  ;;  %6639 = vmatpush1.bf16.msra.mxu1 %v14024_v52  ;;  %v14034_v35 = vld [vmem:[#allocation88_spill] sm:$0xff]  ;;  %v14035_v52 = vld [vmem:[#allocation173_spill] sm:$0xff] }
0x116a   :  { %6599 = vmatprep.subr.bf16.mxu0 %v14025_v60  ;;  %6640 = vmatprep.subr.bf16.mxu1 %v14026_v57  ;;  %v14036_v60 = vld [vmem:[#allocation116_spill] sm:$0xff]  ;;  %v14037_v57 = vld [vmem:[#allocation101_spill] sm:$0xff] }
0x116d   :  { %6600 = vmatpush1.bf16.msra.mxu0 %v14027_v26  ;;  %6641 = vmatpush1.bf16.msra.mxu1 %v14028_v37  ;;  %v14038_v26 = vld [vmem:[#allocation111_spill] sm:$0xff]  ;;  %v14039_v37 = vld [vmem:[#allocation120_spill] sm:$0xff] }
0x116e   :  { %6601 = vmatprep.subr.bf16.mxu0 %v14029_v8  ;;  %6642 = vmatprep.subr.bf16.mxu1 %v14030_v40  ;;  %v14040_v8 = vld [vmem:[#allocation137_spill] sm:$0xff]  ;;  %v14041_v40 = vld [vmem:[#allocation115_spill] sm:$0xff] }
0x1171   :  { %6602 = vmatpush1.bf16.msra.mxu0 %v14031_v19  ;;  %6643 = vmatpush1.bf16.msra.mxu1 %v14032_v38  ;;  %v14042_v19 = vld [vmem:[#allocation136_spill] sm:$0xff]  ;;  %v14043_v38 = vld [vmem:[#allocation90_spill] sm:$0xff] }
0x1172   :  { %6603 = vmatprep.subr.bf16.mxu0 %v14033_v0  ;;  %6644 = vmatprep.subr.bf16.mxu1 %v14034_v35  ;;  %v14044_v0 = vld [vmem:[#allocation118_spill] sm:$0xff]  ;;  %v14045_v35 = vld [vmem:[#allocation99_spill] sm:$0xff] }
0x1175   :  { %6604 = vmatpush1.bf16.msra.mxu0 %v14035_v52  ;;  %6645 = vmatpush1.bf16.msra.mxu1 %v14036_v60  ;;  %v14046_v52 = vld [vmem:[#allocation109_spill] sm:$0xff] }
0x1176   :  { %6605 = vmatprep.subr.bf16.mxu0 %v14037_v57  ;;  %6646 = vmatprep.subr.bf16.mxu1 %v14038_v26 }
0x1179   :  { %6606 = vmatpush1.bf16.msra.mxu0 %v14039_v37  ;;  %6647 = vmatpush1.bf16.msra.mxu1 %v14040_v8 }
0x117a   :  { %6607 = vmatprep.subr.bf16.mxu0 %v14041_v40  ;;  %6648 = vmatprep.subr.bf16.mxu1 %v14042_v19 }
0x117d   :  { %6608 = vmatpush1.bf16.msra.mxu0 %v14043_v38  ;;  %6649 = vmatpush1.bf16.msra.mxu1 %v14044_v0 }
0x117e   :  { %6659 = vmatprep.subr.bf16.mxu0 %v14045_v35  ;;  %6700 = vmatprep.subr.bf16.mxu1 %v14046_v52 }
0x11d3   :  { %v6381_v60 = vpop.f32.mrb[144].mxu0  ;;  %v6422_v57 = vpop.f32.mrb[160].mxu1 }
0x11d4   :  { %v6511_v26 = vadd.f32 %v6381_v60, %v14047_v22  ;;  %v6513_v37 = vadd.f32 %v6422_v57, %v14048_v21  ;;  %v6383_v24 = vpop.f32.mrb[145].mxu0  ;;  %v6424_v8 = vpop.f32.mrb[161].mxu1 }
0x11d5   :  { %v6512_v40 = vadd.f32 %v6383_v24, %v14049_v54  ;;  %v6514_v19 = vadd.f32 %v6424_v8, %v14050_v10  ;;  %v6385_v18 = vpop.f32.mrb[146].mxu0  ;;  %v6426_v38 = vpop.f32.mrb[162].mxu1 }
0x11d6   :  { %v6386_v20 = vpop.f32.mrb[147].mxu0  ;;  %v6427_v0 = vpop.f32.mrb[163].mxu1  ;;  %v7828_v14 = vmul.f32 -1.442695, %v6511_v26  ;;  %v7830_v35 = vmul.f32 -1.442695, %v6513_v37 }
0x11d7   :  { %v7829_v31 = vmul.f32 -1.442695, %v6512_v40  ;;  %v7831_v52 = vmul.f32 -1.442695, %v6514_v19  ;;  %v14051_v0 = vld [vmem:[#allocation57_spill] sm:$0xff]  ;;  %v14052_v37 = vld [vmem:[#allocation58_spill] sm:$0xff] }
0x11d8   :  { %8422 = vpow2.f32 %v7828_v14  ;;  %v14054_v40 = vld [vmem:[#allocation48_spill] sm:$0xff] }
0x11d9   :  { %8424 = vpow2.f32 %v7830_v35 }
0x11da   :  { %8426 = vpow2.f32 %v7829_v31 }
0x11db   :  { %8428 = vpow2.f32 %v7831_v52  ;;  %v14053_v52 = vld [vmem:[#allocation47_spill] sm:$0xff] }
0x11e2   :  { %v8423_v22 = vpop.eup %8422 }
0x11e3   :  { %v8425_v21 = vpop.eup %8424  ;;  %v6525_v30 = vadd.f32 1.0, %v8423_v22 }
0x11e4   :  { %v8427_v60 = vpop.eup %8426  ;;  %v6537_v54 = vadd.f32 1.0, %v8425_v21 }
0x11e5   :  { %v8429_v57 = vpop.eup %8428  ;;  %v6526_v24 = vadd.f32 1.0, %v8427_v60  ;;  %8430 = vrcp.f32 %v6525_v30 }
0x11e6   :  { %v6538_v10 = vadd.f32 1.0, %v8429_v57  ;;  %8432 = vrcp.f32 %v6537_v54 }
0x11e7   :  { %8434 = vrcp.f32 %v6526_v24 }
0x11e8   :  { %8436 = vrcp.f32 %v6538_v10 }
0x11ef   :  { %v8431_v54 = vpop.eup %8430 }
0x11f0   :  { %v8433_v24 = vpop.eup %8432 }
0x1213   :  { %v6463_v20 = vpop.f32.mrb[148].mxu0  ;;  %v6504_v18 = vpop.f32.mrb[164].mxu1 }
0x1214   :  { %v6515_v26 = vadd.f32 %v6463_v20, %v14051_v0  ;;  %v6517_v14 = vadd.f32 %v6504_v18, %v14052_v37  ;;  %v6465_v35 = vpop.f32.mrb[149].mxu0  ;;  %v6506_v31 = vpop.f32.mrb[165].mxu1  ;;  %v6557_v37 = vmul.f32 %v8433_v24, %v11672_v59  ;;  %v14055_v24 = vld [vmem:[#allocation198_spill] sm:$0xff] }
0x1215   :  { %v6516_v8 = vadd.f32 %v6465_v35, %v14053_v52  ;;  %v6518_v19 = vadd.f32 %v6506_v31, %v14054_v40  ;;  %v6467_v38 = vpop.f32.mrb[150].mxu0  ;;  %v6508_v22 = vpop.f32.mrb[166].mxu1 }
0x1216   :  { %8438 = vtanh.f32 %v6515_v26  ;;  %v7832_v21 = vmul.f32 -1.442695, %v6517_v14  ;;  %v6468_v30 = vpop.f32.mrb[151].mxu0  ;;  %v6509_v60 = vpop.f32.mrb[167].mxu1 }
0x1217   :  { %8440 = vtanh.f32 %v6516_v8  ;;  %v7833_v57 = vmul.f32 -1.442695, %v6518_v19  ;;  %v8435_v20 = vpop.eup %8434 }
0x1218   :  { %8442 = vpow2.f32 %v7832_v21  ;;  %v8437_v18 = vpop.eup %8436 }
0x1219   :  { %8444 = vpow2.f32 %v7833_v57  ;;  %v6558_v52 = vmul.f32 %v8437_v18, %v11674_v1  ;;  %v14057_v18 = vld [vmem:[#allocation200_spill] sm:$0xff] }
0x1220   :  { %v8439_v0 = vpop.eup %8438 }
0x1221   :  { %v8441_v10 = vpop.eup %8440  ;;  %v6559_v35 = vmul.f32 %v8439_v0, %v8431_v54  ;;  %v14058_v0 = vld [vmem:[#allocation201_spill] sm:$0xff] }
0x1222   :  { %v8443_v31 = vpop.eup %8442  ;;  %v6560_v26 = vmul.f32 %v8441_v10, %v8435_v20  ;;  %v14056_v20 = vld [vmem:[#allocation199_spill] sm:$0xff]  ;;  %v14059_v10 = vld [vmem:[#allocation202_spill] sm:$0xff] }
0x1223   :  { %v8445_v14 = vpop.eup %8444  ;;  %v11822_v40 = vadd.f32 %v6559_v35, %v6557_v37  ;;  %v6551_v8 = vadd.f32 1.0, %v8443_v31  ;;  %v14060_v37 = vld [vmem:[#allocation203_spill] sm:$0xff]  ;;  %v14061_v35 = vld [vmem:[#allocation204_spill] sm:$0xff]  ;;  %v14062_v31 = vld [vmem:[#allocation97_spill] sm:$0xff] }
0x1224   :  { %v11824_v19 = vadd.f32 %v6560_v26, %v6558_v52  ;;  %v6552_v38 = vadd.f32 1.0, %v8445_v14  ;;  %v14063_v52 = vld [vmem:[#allocation126_spill] sm:$0xff]  ;;  %v14064_v26 = vld [vmem:[#allocation92_spill] sm:$0xff] }
0x1225   :  { %8446 = vtanh.f32 %v11822_v40  ;;  %v14065_v14 = vld [vmem:[#allocation102_spill] sm:$0xff] }
0x1226   :  { %8448 = vrcp.f32 %v6551_v8  ;;  %v14066_v8 = vld [vmem:[#allocation129_spill] sm:$0xff] }
0x1227   :  { %8450 = vtanh.f32 %v11824_v19 }
0x1228   :  { %8452 = vrcp.f32 %v6552_v38  ;;  %v14067_v38 = vld [vmem:[#allocation142_spill] sm:$0xff] }
0x122f   :  { %v8447_v22 = vpop.eup %8446 }
0x1230   :  { %v8449_v59 = vpop.eup %8448 }
0x1231   :  { %v8451_v21 = vpop.eup %8450  ;;  %v6565_v60 = vmul.f32 %v8449_v59, %v8447_v22  ;;  %v14068_v22 = vld [vmem:[#allocation105_spill] sm:$0xff]  ;;  %v14069_v59 = vld [vmem:[#allocation130_spill] sm:$0xff] }
0x1232   :  { %v8453_v30 = vpop.eup %8452 }
0x1233   :  { %v6566_v1 = vmul.f32 %v8453_v30, %v8451_v21  ;;  %v11828_v54 = vpack.c.bf16 %v6565_v60, %v6565_v60  ;;  %v14070_v21 = vld [vmem:[#allocation143_spill] sm:$0xff]  ;;  %v14071_v30 = vld [vmem:[#allocation93_spill] sm:$0xff] }
0x1234   :  { %v14072_v60 = vld [vmem:[#allocation145_spill] sm:$0xff] }
0x1235   :  { %v6576_v57 = vpack.c.bf16 %v6566_v1, %v6566_v1  ;;  %v14073_v1 = vld [vmem:[#allocation85_spill] sm:$0xff] }
0x1237   :  { %6609 = vmatprep.mubr.bf16.mxu0 %v6576_v57  ;;  %6650 = vmatprep.mubr.bf16.mxu1 %v6576_v57 }
0x1238   :  { %6610 = vmatmul.mubr.bf16.vlgmr.msra.gmra.mrb[152].mxu0 %v11828_v54  ;;  %6651 = vmatmul.mubr.bf16.vlgmr.msra.gmra.mrb[168].mxu1 %v11828_v54 }
0x1239   :  { %6660 = vmatpush1.bf16.msra.mxu0 %v13673_v45  ;;  %6701 = vmatpush1.bf16.msra.mxu1 %v13674_v33 }
0x123a   :  { %6691 = vmatprep.mubr.bf16.mxu0 %v6576_v57  ;;  %6732 = vmatprep.mubr.bf16.mxu1 %v6576_v57  ;;  %v14074_v57 = vld [vmem:[#allocation96_spill] sm:$0xff] }
0x123b   :  { %6661 = vmatprep.subr.bf16.mxu0 %v13675_v17  ;;  %6702 = vmatprep.subr.bf16.mxu1 %v13676_v50 }
0x123d   :  { %6662 = vmatpush1.bf16.msra.mxu0 %v13677_v27  ;;  %6703 = vmatpush1.bf16.msra.mxu1 %v13678_v55 }
0x123e   :  { %6663 = vmatprep.subr.bf16.mxu0 %v13679_v51  ;;  %6704 = vmatprep.subr.bf16.mxu1 %v13680_v2 }
0x1241   :  { %6664 = vmatpush1.bf16.msra.mxu0 %v13681_v42  ;;  %6705 = vmatpush1.bf16.msra.mxu1 %v13682_v28 }
0x1242   :  { %6665 = vmatprep.subr.bf16.mxu0 %v13683_v25  ;;  %6706 = vmatprep.subr.bf16.mxu1 %v13770_v47 }
0x1245   :  { %6666 = vmatpush1.bf16.msra.mxu0 %v13771_v13  ;;  %6707 = vmatpush1.bf16.msra.mxu1 %v13772_v29 }
0x1246   :  { %6667 = vmatprep.subr.bf16.mxu0 %v13773_v41  ;;  %6708 = vmatprep.subr.bf16.mxu1 %v13774_v39 }
0x1249   :  { %6668 = vmatpush1.bf16.msra.mxu0 %v13775_v4  ;;  %6709 = vmatpush1.bf16.msra.mxu1 %v13776_v9 }
0x124a   :  { %6669 = vmatprep.subr.bf16.mxu0 %v13777_v7  ;;  %6710 = vmatprep.subr.bf16.mxu1 %v13778_v36 }
0x124d   :  { %6670 = vmatpush1.bf16.msra.mxu0 %v13865_v5  ;;  %6711 = vmatpush1.bf16.msra.mxu1 %v13866_v16 }
0x124e   :  { %6671 = vmatprep.subr.bf16.mxu0 %v13867_v48  ;;  %6712 = vmatprep.subr.bf16.mxu1 %v13868_v12 }
0x1251   :  { %6672 = vmatpush1.bf16.msra.mxu0 %v13869_v3  ;;  %6713 = vmatpush1.bf16.msra.mxu1 %v13870_v63 }
0x1252   :  { %6673 = vmatprep.subr.bf16.mxu0 %v13785_v34  ;;  %6714 = vmatprep.subr.bf16.mxu1 %v13786_v32 }
0x1255   :  { %6674 = vmatpush1.bf16.msra.mxu0 %v13787_v44  ;;  %6715 = vmatpush1.bf16.msra.mxu1 %v13871_v58 }
0x1256   :  { %6675 = vmatprep.subr.bf16.mxu0 %v13872_v49  ;;  %6716 = vmatprep.subr.bf16.mxu1 %v13790_v56 }
0x1259   :  { %6676 = vmatpush1.bf16.msra.mxu0 %v13791_v23  ;;  %6717 = vmatpush1.bf16.msra.mxu1 %v13792_v62 }
0x125a   :  { %6677 = vmatprep.subr.bf16.mxu0 %v13793_v11  ;;  %6718 = vmatprep.subr.bf16.mxu1 %v13794_v53 }
0x125d   :  { %6678 = vmatpush1.bf16.msra.mxu0 %v13795_v6  ;;  %6719 = vmatpush1.bf16.msra.mxu1 %v13710_v61 }
0x125e   :  { %6679 = vmatprep.subr.bf16.mxu0 %v13711_v43  ;;  %6720 = vmatprep.subr.bf16.mxu1 %v13712_v15 }
0x1261   :  { %6680 = vmatpush1.bf16.msra.mxu0 %v13796_v46  ;;  %6721 = vmatpush1.bf16.msra.mxu1 %v14055_v24 }
0x1262   :  { %6681 = vmatprep.subr.bf16.mxu0 %v14056_v20  ;;  %6722 = vmatprep.subr.bf16.mxu1 %v14057_v18 }
0x1265   :  { %6682 = vmatpush1.bf16.msra.mxu0 %v14058_v0  ;;  %6723 = vmatpush1.bf16.msra.mxu1 %v14059_v10 }
0x1266   :  { %6683 = vmatprep.subr.bf16.mxu0 %v14060_v37  ;;  %6724 = vmatprep.subr.bf16.mxu1 %v14061_v35  ;;  %v14144_v35 = vld [vmem:[#allocation19_spill] sm:$0xff]  ;;  %v14145_v37 = vld [vmem:[#allocation20_spill] sm:$0xff] }
0x1269   :  { %6684 = vmatpush1.bf16.msra.mxu0 %v14062_v31  ;;  %6725 = vmatpush1.bf16.msra.mxu1 %v14063_v52  ;;  %v14143_v52 = vld [vmem:[#allocation38_spill] sm:$0xff] }
0x126a   :  { %6685 = vmatprep.subr.bf16.mxu0 %v14064_v26  ;;  %6726 = vmatprep.subr.bf16.mxu1 %v14065_v14  ;;  %v14075_v26 = vld [vmem:[#allocation106_spill] sm:$0xff] }
0x126b   :  { %v14076_v14 = vld [vmem:[#allocation146_spill] sm:$0xff] }
0x126d   :  { %6686 = vmatpush1.bf16.msra.mxu0 %v14066_v8  ;;  %6727 = vmatpush1.bf16.msra.mxu1 %v14067_v38  ;;  %v14077_v8 = vld [vmem:[#allocation148_spill] sm:$0xff]  ;;  %v14142_v38 = vld [vmem:[#allocation37_spill] sm:$0xff] }
0x126e   :  { %6687 = vmatprep.subr.bf16.mxu0 %v14068_v22  ;;  %6728 = vmatprep.subr.bf16.mxu1 %v14069_v59  ;;  %v14078_v59 = vld [vmem:[#allocation147_spill] sm:$0xff]  ;;  %v14087_v22 = vld [vmem:[#allocation108_spill] sm:$0xff] }
0x1271   :  { %6688 = vmatpush1.bf16.msra.mxu0 %v14070_v21  ;;  %6729 = vmatpush1.bf16.msra.mxu1 %v14071_v30  ;;  %v14079_v21 = vld [vmem:[#allocation149_spill] sm:$0xff]  ;;  %v14080_v30 = vld [vmem:[#allocation150_spill] sm:$0xff] }
0x1272   :  { %6689 = vmatprep.subr.bf16.mxu0 %v14072_v60  ;;  %6730 = vmatprep.subr.bf16.mxu1 %v14073_v1  ;;  %v14081_v60 = vld [vmem:[#allocation151_spill] sm:$0xff]  ;;  %v14082_v1 = vld [vmem:[#allocation152_spill] sm:$0xff] }
0x1275   :  { %6690 = vmatpush1.bf16.msra.mxu0 %v14074_v57  ;;  %6731 = vmatpush1.bf16.msra.mxu1 %v14075_v26  ;;  %v14083_v57 = vld [vmem:[#allocation180_spill] sm:$0xff]  ;;  %v14084_v26 = vld [vmem:[#allocation181_spill] sm:$0xff] }
0x1276   :  { %6803 = vmatprep.subr.bf16.mxu0 %v14076_v14  ;;  %6843 = vmatprep.subr.bf16.mxu1 %v14077_v8  ;;  %v14085_v14 = vld [vmem:[#allocation182_spill] sm:$0xff] }
0x1277   :  { %v14086_v8 = vld [vmem:[#allocation98_spill] sm:$0xff] }
0x1278   :  { %6692 = vmatmul.mubr.bf16.vlgmr.msra.gmra.mrb[156].mxu0 %v11828_v54  ;;  %6733 = vmatmul.mubr.bf16.vlgmr.msra.gmra.mrb[172].mxu1 %v11828_v54  ;;  %v14088_v54 = vld [vmem:[#allocation91_spill] sm:$0xff] }
0x1279   :  { %6804 = vmatpush1.bf16.msra.mxu0 %v14078_v59  ;;  %6844 = vmatpush1.bf16.msra.mxu1 %v14079_v21  ;;  %v14089_v59 = vld [vmem:[#allocation119_spill] sm:$0xff]  ;;  %v14090_v21 = vld [vmem:[#allocation112_spill] sm:$0xff] }
0x127a   :  { %6805 = vmatprep.subr.bf16.mxu0 %v14080_v30  ;;  %6845 = vmatprep.subr.bf16.mxu1 %v14081_v60  ;;  %v14091_v30 = vld [vmem:[#allocation133_spill] sm:$0xff]  ;;  %v14092_v60 = vld [vmem:[#allocation123_spill] sm:$0xff] }
0x127d   :  { %6806 = vmatpush1.bf16.msra.mxu0 %v14082_v1  ;;  %6846 = vmatpush1.bf16.msra.mxu1 %v14083_v57  ;;  %v14093_v1 = vld [vmem:[#allocation140_spill] sm:$0xff]  ;;  %v14094_v57 = vld [vmem:[#allocation153_spill] sm:$0xff] }
0x127e   :  { %6807 = vmatprep.subr.bf16.mxu0 %v14084_v26  ;;  %6847 = vmatprep.subr.bf16.mxu1 %v14085_v14  ;;  %v14095_v26 = vld [vmem:[#allocation154_spill] sm:$0xff]  ;;  %v14096_v14 = vld [vmem:[#allocation155_spill] sm:$0xff] }
0x1281   :  { %6808 = vmatpush1.bf16.msra.mxu0 %v14086_v8  ;;  %6848 = vmatpush1.bf16.msra.mxu1 %v14087_v22  ;;  %v14097_v8 = vld [vmem:[#allocation156_spill] sm:$0xff]  ;;  %v14098_v22 = vld [vmem:[#allocation157_spill] sm:$0xff] }
0x1282   :  { %6809 = vmatprep.subr.bf16.mxu0 %v14088_v54  ;;  %6849 = vmatprep.subr.bf16.mxu1 %v14089_v59  ;;  %v14099_v54 = vld [vmem:[#allocation158_spill] sm:$0xff]  ;;  %v14100_v59 = vld [vmem:[#allocation159_spill] sm:$0xff] }
0x1285   :  { %6810 = vmatpush1.bf16.msra.mxu0 %v14090_v21  ;;  %6850 = vmatpush1.bf16.msra.mxu1 %v14091_v30  ;;  %v14101_v21 = vld [vmem:[#allocation160_spill] sm:$0xff]  ;;  %v14102_v30 = vld [vmem:[#allocation161_spill] sm:$0xff] }
0x1286   :  { %6811 = vmatprep.subr.bf16.mxu0 %v14092_v60  ;;  %6851 = vmatprep.subr.bf16.mxu1 %v14093_v1  ;;  %v14103_v60 = vld [vmem:[#allocation169_spill] sm:$0xff]  ;;  %v14104_v1 = vld [vmem:[#allocation170_spill] sm:$0xff] }
0x1289   :  { %6812 = vmatpush1.bf16.msra.mxu0 %v14094_v57  ;;  %6852 = vmatpush1.bf16.msra.mxu1 %v14095_v26  ;;  %v14105_v57 = vld [vmem:[#allocation171_spill] sm:$0xff]  ;;  %v14106_v26 = vld [vmem:[#allocation174_spill] sm:$0xff] }
0x128a   :  { %6813 = vmatprep.subr.bf16.mxu0 %v14096_v14  ;;  %6853 = vmatprep.subr.bf16.mxu1 %v14097_v8  ;;  %v14107_v14 = vld [vmem:[#allocation175_spill] sm:$0xff]  ;;  %v14108_v8 = vld [vmem:[#allocation176_spill] sm:$0xff] }
0x128d   :  { %6814 = vmatpush1.bf16.msra.mxu0 %v14098_v22  ;;  %6854 = vmatpush1.bf16.msra.mxu1 %v14099_v54  ;;  %v14109_v22 = vld [vmem:[#allocation177_spill] sm:$0xff]  ;;  %v14110_v54 = vld [vmem:[#allocation178_spill] sm:$0xff] }
0x128e   :  { %6815 = vmatprep.subr.bf16.mxu0 %v14100_v59  ;;  %6855 = vmatprep.subr.bf16.mxu1 %v14101_v21  ;;  %v14111_v59 = vld [vmem:[#allocation179_spill] sm:$0xff] }
0x128f   :  { %v14112_v21 = vld [vmem:[#allocation183_spill] sm:$0xff] }
0x1291   :  { %6816 = vmatpush1.bf16.msra.mxu0 %v14102_v30  ;;  %6856 = vmatpush1.bf16.msra.mxu1 %v14103_v60  ;;  %v14113_v30 = vld [vmem:[#allocation100_spill] sm:$0xff]  ;;  %v14114_v60 = vld [vmem:[#allocation110_spill] sm:$0xff] }
0x1292   :  { %6817 = vmatprep.subr.bf16.mxu0 %v14104_v1  ;;  %6857 = vmatprep.subr.bf16.mxu1 %v14105_v57  ;;  %v14115_v1 = vld [vmem:[#allocation89_spill] sm:$0xff] }
0x1293   :  { %v14116_v57 = vld [vmem:[#allocation117_spill] sm:$0xff] }
0x1295   :  { %6818 = vmatpush1.bf16.msra.mxu0 %v14106_v26  ;;  %6858 = vmatpush1.bf16.msra.mxu1 %v14107_v14  ;;  %v14117_v26 = vld [vmem:[#allocation114_spill] sm:$0xff]  ;;  %v14118_v14 = vld [vmem:[#allocation135_spill] sm:$0xff] }
0x1296   :  { %6819 = vmatprep.subr.bf16.mxu0 %v14108_v8  ;;  %6859 = vmatprep.subr.bf16.mxu1 %v14109_v22  ;;  %v14119_v8 = vld [vmem:[#allocation121_spill] sm:$0xff]  ;;  %v14120_v22 = vld [vmem:[#allocation138_spill] sm:$0xff] }
0x1299   :  { %6820 = vmatpush1.bf16.msra.mxu0 %v14110_v54  ;;  %6860 = vmatpush1.bf16.msra.mxu1 %v14111_v59  ;;  %v14121_v54 = vld [vmem:[#allocation162_spill] sm:$0xff]  ;;  %v14122_v59 = vld [vmem:[#allocation163_spill] sm:$0xff] }
0x129a   :  { %6821 = vmatprep.subr.bf16.mxu0 %v14112_v21  ;;  %6861 = vmatprep.subr.bf16.mxu1 %v14113_v30  ;;  %v14123_v21 = vld [vmem:[#allocation164_spill] sm:$0xff]  ;;  %v14124_v30 = vld [vmem:[#allocation165_spill] sm:$0xff] }
0x129d   :  { %6822 = vmatpush1.bf16.msra.mxu0 %v14114_v60  ;;  %6862 = vmatpush1.bf16.msra.mxu1 %v14115_v1  ;;  %v14125_v60 = vld [vmem:[#allocation166_spill] sm:$0xff]  ;;  %v14126_v1 = vld [vmem:[#allocation167_spill] sm:$0xff] }
0x129e   :  { %6823 = vmatprep.subr.bf16.mxu0 %v14116_v57  ;;  %6863 = vmatprep.subr.bf16.mxu1 %v14117_v26  ;;  %v14127_v57 = vld [vmem:[#allocation168_spill] sm:$0xff] }
0x129f   :  { %v14128_v26 = vld [vmem:[#allocation172_spill] sm:$0xff] }
0x12a1   :  { %6824 = vmatpush1.bf16.msra.mxu0 %v14118_v14  ;;  %6864 = vmatpush1.bf16.msra.mxu1 %v14119_v8  ;;  %v14129_v14 = vld [vmem:[#allocation88_spill] sm:$0xff]  ;;  %v14130_v8 = vld [vmem:[#allocation173_spill] sm:$0xff] }
0x12a2   :  { %6825 = vmatprep.subr.bf16.mxu0 %v14120_v22  ;;  %6865 = vmatprep.subr.bf16.mxu1 %v14121_v54  ;;  %v14131_v22 = vld [vmem:[#allocation116_spill] sm:$0xff]  ;;  %v14132_v54 = vld [vmem:[#allocation101_spill] sm:$0xff] }
0x12a5   :  { %6826 = vmatpush1.bf16.msra.mxu0 %v14122_v59  ;;  %6866 = vmatpush1.bf16.msra.mxu1 %v14123_v21  ;;  %v14133_v59 = vld [vmem:[#allocation111_spill] sm:$0xff]  ;;  %v14134_v21 = vld [vmem:[#allocation120_spill] sm:$0xff] }
0x12a6   :  { %6827 = vmatprep.subr.bf16.mxu0 %v14124_v30  ;;  %6867 = vmatprep.subr.bf16.mxu1 %v14125_v60  ;;  %v14135_v30 = vld [vmem:[#allocation137_spill] sm:$0xff]  ;;  %v14136_v60 = vld [vmem:[#allocation115_spill] sm:$0xff] }
0x12a9   :  { %6828 = vmatpush1.bf16.msra.mxu0 %v14126_v1  ;;  %6868 = vmatpush1.bf16.msra.mxu1 %v14127_v57  ;;  %v14137_v1 = vld [vmem:[#allocation136_spill] sm:$0xff]  ;;  %v14138_v57 = vld [vmem:[#allocation90_spill] sm:$0xff] }
0x12aa   :  { %6829 = vmatprep.subr.bf16.mxu0 %v14128_v26  ;;  %6869 = vmatprep.subr.bf16.mxu1 %v14129_v14  ;;  %v14139_v26 = vld [vmem:[#allocation118_spill] sm:$0xff]  ;;  %v14140_v14 = vld [vmem:[#allocation99_spill] sm:$0xff] }
0x12ad   :  { %6830 = vmatpush1.bf16.msra.mxu0 %v14130_v8  ;;  %6870 = vmatpush1.bf16.msra.mxu1 %v14131_v22  ;;  %v14141_v8 = vld [vmem:[#allocation109_spill] sm:$0xff] }
0x12ae   :  { %6831 = vmatprep.subr.bf16.mxu0 %v14132_v54  ;;  %6871 = vmatprep.subr.bf16.mxu1 %v14133_v59 }
0x12b1   :  { %6832 = vmatpush1.bf16.msra.mxu0 %v14134_v21  ;;  %6872 = vmatpush1.bf16.msra.mxu1 %v14135_v30 }
0x12b2   :  { %6833 = vmatprep.subr.bf16.mxu0 %v14136_v60  ;;  %6873 = vmatprep.subr.bf16.mxu1 %v14137_v1 }
0x12b5   :  { %6834 = vmatpush1.bf16.msra.mxu0 %v14138_v57  ;;  %6874 = vmatpush1.bf16.msra.mxu1 %v14139_v26 }
0x12b6   :  { %6883 = vmatprep.subr.bf16.mxu0 %v14140_v14  ;;  %6923 = vmatprep.subr.bf16.mxu1 %v14141_v8 }
0x130b   :  { %v6611_v22 = vpop.f32.mrb[152].mxu0  ;;  %v6652_v54 = vpop.f32.mrb[168].mxu1 }
0x130c   :  { %v6741_v59 = vadd.f32 %v6611_v22, %v14142_v38  ;;  %v6743_v21 = vadd.f32 %v6652_v54, %v14143_v52  ;;  %v6613_v31 = vpop.f32.mrb[153].mxu0  ;;  %v6654_v30 = vpop.f32.mrb[169].mxu1 }
0x130d   :  { %v6742_v60 = vadd.f32 %v6613_v31, %v14144_v35  ;;  %v6744_v1 = vadd.f32 %v6654_v30, %v14145_v37  ;;  %v6615_v10 = vpop.f32.mrb[154].mxu0  ;;  %v6656_v57 = vpop.f32.mrb[170].mxu1  ;;  %v14147_v30 = vld [vmem:[#allocation62_spill] sm:$0xff] }
0x130e   :  { %v6616_v0 = vpop.f32.mrb[155].mxu0  ;;  %v6657_v26 = vpop.f32.mrb[171].mxu1  ;;  %v7834_v18 = vmul.f32 -1.442695, %v6741_v59  ;;  %v7836_v14 = vmul.f32 -1.442695, %v6743_v21 }
0x130f   :  { %v7835_v20 = vmul.f32 -1.442695, %v6742_v60  ;;  %v7837_v8 = vmul.f32 -1.442695, %v6744_v1  ;;  %v14146_v59 = vld [vmem:[#allocation61_spill] sm:$0xff]  ;;  %v14148_v1 = vld [vmem:[#allocation43_spill] sm:$0xff] }
0x1310   :  { %8454 = vpow2.f32 %v7834_v18  ;;  %v14149_v26 = vld [vmem:[#allocation44_spill] sm:$0xff] }
0x1311   :  { %8456 = vpow2.f32 %v7836_v14 }
0x1312   :  { %8458 = vpow2.f32 %v7835_v20 }
0x1313   :  { %8460 = vpow2.f32 %v7837_v8 }
0x131a   :  { %v8455_v38 = vpop.eup %8454 }
0x131b   :  { %v8457_v52 = vpop.eup %8456  ;;  %v6755_v24 = vadd.f32 1.0, %v8455_v38 }
0x131c   :  { %v8459_v22 = vpop.eup %8458  ;;  %v6767_v35 = vadd.f32 1.0, %v8457_v52 }
0x131d   :  { %v8461_v54 = vpop.eup %8460  ;;  %v6756_v31 = vadd.f32 1.0, %v8459_v22  ;;  %8462 = vrcp.f32 %v6755_v24 }
0x131e   :  { %v6768_v37 = vadd.f32 1.0, %v8461_v54  ;;  %8464 = vrcp.f32 %v6767_v35 }
0x131f   :  { %8466 = vrcp.f32 %v6756_v31 }
0x1320   :  { %8468 = vrcp.f32 %v6768_v37 }
0x1327   :  { %v8463_v35 = vpop.eup %8462 }
0x1328   :  { %v8465_v31 = vpop.eup %8464 }
0x134b   :  { %v6693_v0 = vpop.f32.mrb[156].mxu0  ;;  %v6734_v10 = vpop.f32.mrb[172].mxu1 }
0x134c   :  { %v6745_v21 = vadd.f32 %v6693_v0, %v14146_v59  ;;  %v6747_v18 = vadd.f32 %v6734_v10, %v14147_v30  ;;  %v6695_v60 = vpop.f32.mrb[157].mxu0  ;;  %v6736_v20 = vpop.f32.mrb[173].mxu1  ;;  %v6787_v30 = vmul.f32 %v8465_v31, %v11822_v40  ;;  %v8000_v31 = vld [vmem:[#allocation14 + $0x10] sm:$0xff]  }
0x134d   :  { %v6746_v57 = vadd.f32 %v6695_v60, %v14148_v1  ;;  %v6748_v14 = vadd.f32 %v6736_v20, %v14149_v26  ;;  %v6697_v8 = vpop.f32.mrb[158].mxu0  ;;  %v6738_v38 = vpop.f32.mrb[174].mxu1 }
0x134e   :  { %8470 = vtanh.f32 %v6745_v21  ;;  %v7838_v52 = vmul.f32 -1.442695, %v6747_v18  ;;  %v6698_v24 = vpop.f32.mrb[159].mxu0  ;;  %v6739_v22 = vpop.f32.mrb[175].mxu1 }
0x134f   :  { %8472 = vtanh.f32 %v6746_v57  ;;  %v7839_v54 = vmul.f32 -1.442695, %v6748_v14  ;;  %v8467_v0 = vpop.eup %8466 }
0x1350   :  { %8474 = vpow2.f32 %v7838_v52  ;;  %v8469_v10 = vpop.eup %8468 }
0x1351   :  { %8476 = vpow2.f32 %v7839_v54  ;;  %v6788_v1 = vmul.f32 %v8469_v10, %v11824_v19  ;;  %v8002_v10 = vld [vmem:[#allocation14 + $0x20] sm:$0xff]  }
0x1358   :  { %v8471_v59 = vpop.eup %8470 }
0x1359   :  { %v8473_v37 = vpop.eup %8472  ;;  %v6789_v60 = vmul.f32 %v8471_v59, %v8463_v35  ;;  %v8003_v59 = vld [vmem:[#allocation14 + $0x28] sm:$0xff]  }
0x135a   :  { %v8475_v20 = vpop.eup %8474  ;;  %v6790_v21 = vmul.f32 %v8473_v37, %v8467_v0  ;;  %v8001_v0 = vld [vmem:[#allocation14 + $0x18] sm:$0xff]  }
0x135b   :  { %v8477_v18 = vpop.eup %8476  ;;  %v11972_v26 = vadd.f32 %v6789_v60, %v6787_v30  ;;  %v6781_v57 = vadd.f32 1.0, %v8475_v20  ;;  %v14173_v60 = vld [vmem:[#allocation41_spill] sm:$0xff] }
0x135c   :  { %v6792_v14 = vadd.f32 %v6790_v21, %v6788_v1  ;;  %v6782_v8 = vadd.f32 1.0, %v8477_v18  ;;  %v14174_v1 = vld [vmem:[#allocation42_spill] sm:$0xff] }
0x135d   :  { %8478 = vtanh.f32 %v11972_v26 }
0x135e   :  { %8480 = vrcp.f32 %v6781_v57 }
0x135f   :  { %8482 = vtanh.f32 %v6792_v14 }
0x1360   :  { %8484 = vrcp.f32 %v6782_v8 }
0x1367   :  { %v8479_v38 = vpop.eup %8478 }
0x1368   :  { %v8481_v52 = vpop.eup %8480 }
0x1369   :  { %v8483_v24 = vpop.eup %8482  ;;  %v6795_v22 = vmul.f32 %v8481_v52, %v8479_v38 }
0x136a   :  { %v8485_v40 = vpop.eup %8484 }
0x136b   :  { %v6796_v54 = vmul.f32 %v8485_v40, %v8483_v24  ;;  %v11975_v19 = vpack.c.bf16 %v6795_v22, %v6795_v22 }
0x136d   :  { %v6802_v35 = vpack.c.bf16 %v6796_v54, %v6796_v54 }
0x136f   :  { %6835 = vmatprep.mubr.bf16.mxu0 %v6802_v35  ;;  %6875 = vmatprep.mubr.bf16.mxu1 %v6802_v35 }
0x1370   :  { %6836 = vmatmul.mubr.bf16.vlgmr.msra.gmra.mrb[160].mxu0 %v11975_v19  ;;  %6876 = vmatmul.mubr.bf16.vlgmr.msra.gmra.mrb[176].mxu1 %v11975_v19 }
0x1371   :  { %6884 = vmatpush1.bf16.msra.mxu0 %v13673_v45  ;;  %6924 = vmatpush1.bf16.msra.mxu1 %v13674_v33  ;;  %v14150_v45 = vld [vmem:[#allocation198_spill] sm:$0xff]  ;;  %v14151_v33 = vld [vmem:[#allocation199_spill] sm:$0xff] }
0x1372   :  { %6915 = vmatprep.mubr.bf16.mxu0 %v6802_v35  ;;  %6955 = vmatprep.mubr.bf16.mxu1 %v6802_v35 }
0x1373   :  { %6885 = vmatprep.subr.bf16.mxu0 %v13675_v17  ;;  %6925 = vmatprep.subr.bf16.mxu1 %v13676_v50  ;;  %v14152_v17 = vld [vmem:[#allocation200_spill] sm:$0xff]  ;;  %v14153_v50 = vld [vmem:[#allocation201_spill] sm:$0xff] }
0x1375   :  { %6886 = vmatpush1.bf16.msra.mxu0 %v13677_v27  ;;  %6926 = vmatpush1.bf16.msra.mxu1 %v13678_v55  ;;  %v14154_v27 = vld [vmem:[#allocation202_spill] sm:$0xff]  ;;  %v14155_v55 = vld [vmem:[#allocation203_spill] sm:$0xff] }
0x1376   :  { %6887 = vmatprep.subr.bf16.mxu0 %v13679_v51  ;;  %6927 = vmatprep.subr.bf16.mxu1 %v13680_v2  ;;  %v14156_v51 = vld [vmem:[#allocation204_spill] sm:$0xff]  ;;  %v14157_v2 = vld [vmem:[#allocation97_spill] sm:$0xff] }
0x1379   :  { %6888 = vmatpush1.bf16.msra.mxu0 %v13681_v42  ;;  %6928 = vmatpush1.bf16.msra.mxu1 %v13682_v28  ;;  %v14158_v42 = vld [vmem:[#allocation126_spill] sm:$0xff]  ;;  %v14159_v28 = vld [vmem:[#allocation92_spill] sm:$0xff] }
0x137a   :  { %6889 = vmatprep.subr.bf16.mxu0 %v13683_v25  ;;  %6929 = vmatprep.subr.bf16.mxu1 %v13770_v47  ;;  %v14160_v25 = vld [vmem:[#allocation102_spill] sm:$0xff] }
0x137b   :  { %v14164_v47 = vld [vmem:[#allocation130_spill] sm:$0xff] }
0x137d   :  { %6890 = vmatpush1.bf16.msra.mxu0 %v13771_v13  ;;  %6930 = vmatpush1.bf16.msra.mxu1 %v13772_v29  ;;  %v14165_v13 = vld [vmem:[#allocation143_spill] sm:$0xff]  ;;  %v14166_v29 = vld [vmem:[#allocation93_spill] sm:$0xff] }
0x137e   :  { %6891 = vmatprep.subr.bf16.mxu0 %v13773_v41  ;;  %6931 = vmatprep.subr.bf16.mxu1 %v13774_v39  ;;  %v14167_v41 = vld [vmem:[#allocation145_spill] sm:$0xff] }
0x137f   :  { %v14168_v39 = vld [vmem:[#allocation85_spill] sm:$0xff] }
0x1381   :  { %6892 = vmatpush1.bf16.msra.mxu0 %v13775_v4  ;;  %6932 = vmatpush1.bf16.msra.mxu1 %v13776_v9  ;;  %v14169_v4 = vld [vmem:[#allocation96_spill] sm:$0xff]  ;;  %v14170_v9 = vld [vmem:[#allocation106_spill] sm:$0xff] }
0x1382   :  { %6893 = vmatprep.subr.bf16.mxu0 %v13777_v7  ;;  %6933 = vmatprep.subr.bf16.mxu1 %v13778_v36  ;;  %v7982_v7 = vld [vmem:[%s12143_s7 + $0x40] sm:$0xff]   ;;  %v14171_v36 = vmov 0.0  }
0x1385   :  { %6894 = vmatpush1.bf16.msra.mxu0 %v13865_v5  ;;  %6934 = vmatpush1.bf16.msra.mxu1 %v13866_v16  ;;  %v7992_v5 = vld [vmem:[%s12143_s7 + $0x10] sm:$0xff]   ;;  %v7993_v16 = vld [vmem:[%s12143_s7 + $0x18] sm:$0xff]  }
0x1386   :  { %6895 = vmatprep.subr.bf16.mxu0 %v13867_v48  ;;  %6935 = vmatprep.subr.bf16.mxu1 %v13868_v12  ;;  %v7994_v48 = vld [vmem:[%s12143_s7 + $0x20] sm:$0xff]   ;;  %v7995_v12 = vld [vmem:[%s12143_s7 + $0x28] sm:$0xff]  }
0x1389   :  { %6896 = vmatpush1.bf16.msra.mxu0 %v13869_v3  ;;  %6936 = vmatpush1.bf16.msra.mxu1 %v13870_v63  ;;  %v7996_v3 = vld [vmem:[%s12143_s7 + $0x30] sm:$0xff]   ;;  %v7997_v63 = vld [vmem:[%s12143_s7 + $0x38] sm:$0xff]  }
0x138a   :  { %6897 = vmatprep.subr.bf16.mxu0 %v13785_v34  ;;  %6937 = vmatprep.subr.bf16.mxu1 %v13786_v32  ;;  %v7989_v34 = vld [vmem:[%s12143_s7 + $0x78] sm:$0xff]   ;;  %v14172_v32 = vld [vmem:[#allocation67_spill] sm:$0xff] }
0x138d   :  { %6898 = vmatpush1.bf16.msra.mxu0 %v13787_v44  ;;  %6938 = vmatpush1.bf16.msra.mxu1 %v13871_v58  ;;  %v7990_v44 = vld [vmem:[%s12143_s7] sm:$0xff]   ;;  %v7998_v58 = vld [vmem:[#allocation14] sm:$0xff]  }
0x138e   :  { %6899 = vmatprep.subr.bf16.mxu0 %v13872_v49  ;;  %6939 = vmatprep.subr.bf16.mxu1 %v13790_v56  ;;  %v7983_v56 = vld [vmem:[%s12143_s7 + $0x48] sm:$0xff]   ;;  %v7999_v49 = vld [vmem:[#allocation14 + $0x8] sm:$0xff]  }
0x1391   :  { %6900 = vmatpush1.bf16.msra.mxu0 %v13791_v23  ;;  %6940 = vmatpush1.bf16.msra.mxu1 %v13792_v62  ;;  %v7984_v23 = vld [vmem:[%s12143_s7 + $0x50] sm:$0xff]   ;;  %v7985_v62 = vld [vmem:[%s12143_s7 + $0x58] sm:$0xff]  }
0x1392   :  { %6901 = vmatprep.subr.bf16.mxu0 %v13793_v11  ;;  %6941 = vmatprep.subr.bf16.mxu1 %v13794_v53  ;;  %v7986_v11 = vld [vmem:[%s12143_s7 + $0x60] sm:$0xff]   ;;  %v7987_v53 = vld [vmem:[%s12143_s7 + $0x68] sm:$0xff]  }
0x1395   :  { %6902 = vmatpush1.bf16.msra.mxu0 %v13795_v6  ;;  %6942 = vmatpush1.bf16.msra.mxu1 %v13710_v61  ;;  %v14161_v61 = vld [vmem:[#allocation129_spill] sm:$0xff]  ;;  %v7988_v6 = vld [vmem:[%s12143_s7 + $0x70] sm:$0xff]  }
0x1396   :  { %6903 = vmatprep.subr.bf16.mxu0 %v13711_v43  ;;  %6943 = vmatprep.subr.bf16.mxu1 %v13712_v15  ;;  %v14162_v43 = vld [vmem:[#allocation142_spill] sm:$0xff]  ;;  %v14163_v15 = vld [vmem:[#allocation105_spill] sm:$0xff] }
0x1399   :  { %6904 = vmatpush1.bf16.msra.mxu0 %v13796_v46  ;;  %6944 = vmatpush1.bf16.msra.mxu1 %v14150_v45  ;;  %v7991_v46 = vld [vmem:[%s12143_s7 + $0x8] sm:$0xff]  }
0x139a   :  { %6905 = vmatprep.subr.bf16.mxu0 %v14151_v33  ;;  %6945 = vmatprep.subr.bf16.mxu1 %v14152_v17  ;;  %v14175_v17 = vld [vmem:[#allocation64_spill] sm:$0xff] }
0x139d   :  { %6906 = vmatpush1.bf16.msra.mxu0 %v14153_v50  ;;  %6946 = vmatpush1.bf16.msra.mxu1 %v14154_v27  ;;  %v14176_v27 = vld [vmem:[#allocation65_spill] sm:$0xff] }
0x139e   :  { %6907 = vmatprep.subr.bf16.mxu0 %v14155_v55  ;;  %6947 = vmatprep.subr.bf16.mxu1 %v14156_v51 }
0x13a1   :  { %6908 = vmatpush1.bf16.msra.mxu0 %v14157_v2  ;;  %6948 = vmatpush1.bf16.msra.mxu1 %v14158_v42 }
0x13a2   :  { %6909 = vmatprep.subr.bf16.mxu0 %v14159_v28  ;;  %6949 = vmatprep.subr.bf16.mxu1 %v14160_v25 }
0x13a5   :  { %6910 = vmatpush1.bf16.msra.mxu0 %v14161_v61  ;;  %6950 = vmatpush1.bf16.msra.mxu1 %v14162_v43 }
0x13a6   :  { %6911 = vmatprep.subr.bf16.mxu0 %v14163_v15  ;;  %6951 = vmatprep.subr.bf16.mxu1 %v14164_v47 }
0x13a9   :  { %6912 = vmatpush1.bf16.msra.mxu0 %v14165_v13  ;;  %6952 = vmatpush1.bf16.msra.mxu1 %v14166_v29 }
0x13aa   :  { %6913 = vmatprep.subr.bf16.mxu0 %v14167_v41  ;;  %6953 = vmatprep.subr.bf16.mxu1 %v14168_v39 }
0x13ad   :  { %6914 = vmatpush1.bf16.msra.mxu0 %v14169_v4  ;;  %6954 = vmatpush1.bf16.msra.mxu1 %v14170_v9 }
0x13ae   :  { %7896 = vmatprep.subr.bf16.mxu0 %v14171_v36  ;;  %7916 = vmatprep.subr.bf16.mxu1 %v14171_v36 }
0x13b0   :  { %6916 = vmatmul.mubr.bf16.vlgmr.msra.gmra.mrb[164].mxu0 %v11975_v19  ;;  %6956 = vmatmul.mubr.bf16.vlgmr.msra.gmra.mrb[180].mxu1 %v11975_v19 }
0x13b1   :  { %7897 = vmatpush3.bf16.msra.mxu0 %v7982_v7  ;;  %7912 = vmatprep.mubr.msk.bf16.mxu0 %vm8677_vm10, %v14171_v36 }
0x13b2   :  { %7898 = vmatprep.subr.bf16.mxu0 %v14171_v36  ;;  %7932 = vmatprep.mubr.msk.bf16.mxu1 %vm8677_vm10, %v14171_v36 }
0x13b3   :  { %7917 = vmatpush3.bf16.msra.mxu1 %v7990_v44 }
0x13b4   :  { %7918 = vmatprep.subr.bf16.mxu1 %v14171_v36 }
0x13b5   :  { %7899 = vmatpush3.bf16.msra.mxu0 %v7983_v56 }
0x13b6   :  { %7900 = vmatprep.subr.bf16.mxu0 %v14171_v36 }
0x13b7   :  { %7919 = vmatpush3.bf16.msra.mxu1 %v7991_v46  ;;  %v7859_v46 = vld [vmem:[%s12144_s8] ss:$0 sm:$0xff] }
0x13b8   :  { %7920 = vmatprep.subr.bf16.mxu1 %v14171_v36 }
0x13b9   :  { %7901 = vmatpush3.bf16.msra.mxu0 %v7984_v23 }
0x13ba   :  { %7902 = vmatprep.subr.bf16.mxu0 %v14171_v36 }
0x13bb   :  { %7921 = vmatpush3.bf16.msra.mxu1 %v7992_v5 }
0x13bc   :  { %7922 = vmatprep.subr.bf16.mxu1 %v14171_v36 }
0x13bd   :  { %7903 = vmatpush3.bf16.msra.mxu0 %v7985_v62 }
0x13be   :  { %7904 = vmatprep.subr.bf16.mxu0 %v14171_v36 }
0x13bf   :  { %7923 = vmatpush3.bf16.msra.mxu1 %v7993_v16 }
0x13c0   :  { %7924 = vmatprep.subr.bf16.mxu1 %v14171_v36 }
0x13c1   :  { %7905 = vmatpush3.bf16.msra.mxu0 %v7986_v11 }
0x13c2   :  { %7906 = vmatprep.subr.bf16.mxu0 %v14171_v36 }
0x13c3   :  { %7925 = vmatpush3.bf16.msra.mxu1 %v7994_v48 }
0x13c4   :  { %7926 = vmatprep.subr.bf16.mxu1 %v14171_v36 }
0x13c5   :  { %7907 = vmatpush3.bf16.msra.mxu0 %v7987_v53 }
0x13c6   :  { %7908 = vmatprep.subr.bf16.mxu0 %v14171_v36 }
0x13c7   :  { %7927 = vmatpush3.bf16.msra.mxu1 %v7995_v12 }
0x13c8   :  { %7928 = vmatprep.subr.bf16.mxu1 %v14171_v36 }
0x13c9   :  { %7909 = vmatpush3.bf16.msra.mxu0 %v7988_v6 }
0x13ca   :  { %7910 = vmatprep.subr.bf16.mxu0 %v14171_v36 }
0x13cb   :  { %7929 = vmatpush3.bf16.msra.mxu1 %v7996_v3 }
0x13cc   :  { %7930 = vmatprep.subr.bf16.mxu1 %v14171_v36 }
0x13cd   :  { %7911 = vmatpush3.bf16.msra.mxu0 %v7989_v34 }
0x13ce   :  { %7936 = vmatprep.subr.bf16.mxu0 %v14171_v36 }
0x13cf   :  { %7931 = vmatpush3.bf16.msra.mxu1 %v7997_v63 }
0x13d0   :  { %7913 = vmatmul.mubr.bf16.vlgmr.msra.gmra.mrb[168].mxu0 %v14172_v32  ;;  %v8004_v32 = vld [vmem:[#allocation14 + $0x30] sm:$0xff]  }
0x13d1   :  { %7952 = vmatprep.mubr.msk.bf16.mxu0 %vm8677_vm10, %v14171_v36  ;;  %7937 = vmatpush3.bf16.msra.mxu0 %v7998_v58 }
0x13d2   :  { %7938 = vmatprep.subr.bf16.mxu0 %v14171_v36 }
0x13d5   :  { %7939 = vmatpush3.bf16.msra.mxu0 %v7999_v49  ;;  %v7860_v49 = vld [vmem:[%s12146_s10] ss:$0 sm:$0xff] }
0x13d6   :  { %7940 = vmatprep.subr.bf16.mxu0 %v14171_v36 }
0x13d9   :  { %7941 = vmatpush3.bf16.msra.mxu0 %v8000_v31 }
0x13da   :  { %7942 = vmatprep.subr.bf16.mxu0 %v14171_v36 }
0x13dd   :  { %7943 = vmatpush3.bf16.msra.mxu0 %v8001_v0 }
0x13de   :  { %7944 = vmatprep.subr.bf16.mxu0 %v14171_v36 }
0x13e1   :  { %7945 = vmatpush3.bf16.msra.mxu0 %v8002_v10 }
0x13e2   :  { %7946 = vmatprep.subr.bf16.mxu0 %v14171_v36 }
0x13e5   :  { %7947 = vmatpush3.bf16.msra.mxu0 %v8003_v59 }
0x13e6   :  { %7948 = vmatprep.subr.bf16.mxu0 %v14171_v36 }
0x13e9   :  { %7949 = vmatpush3.bf16.msra.mxu0 %v8004_v32 }
0x13ea   :  { %7950 = vmatprep.subr.bf16.mxu0 %v14171_v36 }
0x1443   :  { %v6837_v37 = vpop.f32.mrb[160].mxu0  ;;  %v6877_v30 = vpop.f32.mrb[176].mxu1 }
0x1444   :  { %v6963_v20 = vadd.f32 %v6837_v37, %v14173_v60  ;;  %v6964_v21 = vadd.f32 %v6877_v30, %v14174_v1  ;;  %v6839_v18 = vpop.f32.mrb[161].mxu0  ;;  %v6879_v57 = vpop.f32.mrb[177].mxu1 }
0x1445   :  { %v6840_v14 = vpop.f32.mrb[162].mxu0  ;;  %v6880_v8 = vpop.f32.mrb[178].mxu1 }
0x1446   :  { %v6841_v38 = vpop.f32.mrb[163].mxu0  ;;  %v6881_v52 = vpop.f32.mrb[179].mxu1  ;;  %v7841_v24 = vmul.f32 -1.442695, %v6964_v21  ;;  %v7840_v40 = vmul.f32 -1.442695, %v6963_v20 }
0x1448   :  { %8486 = vpow2.f32 %v7841_v24 }
0x1449   :  { %8488 = vpow2.f32 %v7840_v40 }
0x1452   :  { %v8487_v22 = vpop.eup %8486 }
0x1453   :  { %v8489_v54 = vpop.eup %8488  ;;  %v6976_v35 = vadd.f32 1.0, %v8487_v22 }
0x1454   :  { %v6970_v19 = vadd.f32 1.0, %v8489_v54 }
0x1455   :  { %8490 = vrcp.f32 %v6976_v35 }
0x1456   :  { %8492 = vrcp.f32 %v6970_v19 }
0x145f   :  { %v8491_v15 = vpop.eup %8490 }
0x1460   :  { %v8493_v47 = vpop.eup %8492  ;;  %v6986_v29 = vmul.f32 %v8491_v15, %v11972_v26  ;;  %v8005_v26 = vld [vmem:[#allocation14 + $0x38] sm:$0xff]  }
0x1461   :  { %7951 = vmatpush3.bf16.msra.mxu0 %v8005_v26 }
0x1483   :  { %v6917_v45 = vpop.f32.mrb[164].mxu0  ;;  %v6957_v33 = vpop.f32.mrb[180].mxu1 }
0x1484   :  { %v6965_v50 = vadd.f32 %v6917_v45, %v14175_v17  ;;  %v6966_v55 = vadd.f32 %v6957_v33, %v14176_v27  ;;  %v6919_v51 = vpop.f32.mrb[165].mxu0  ;;  %v6959_v2 = vpop.f32.mrb[181].mxu1 }
0x1485   :  { %v6920_v42 = vpop.f32.mrb[166].mxu0  ;;  %v6960_v28 = vpop.f32.mrb[182].mxu1 }
0x1486   :  { %8494 = vtanh.f32 %v6965_v50  ;;  %v7842_v25 = vmul.f32 -1.442695, %v6966_v55  ;;  %v6921_v61 = vpop.f32.mrb[167].mxu0  ;;  %v6961_v43 = vpop.f32.mrb[183].mxu1 }
0x1488   :  { %8496 = vpow2.f32 %v7842_v25 }
0x1490   :  { %v8495_v13 = vpop.eup %8494 }
0x1491   :  { %v6987_v41 = vmul.f32 %v8495_v13, %v8493_v47 }
0x1492   :  { %v8497_v39 = vpop.eup %8496 }
0x1493   :  { %v6988_v4 = vadd.f32 %v6987_v41, %v6986_v29  ;;  %v6983_v9 = vadd.f32 1.0, %v8497_v39 }
0x1495   :  { %8498 = vtanh.f32 %v6988_v4 }
0x1496   :  { %8500 = vrcp.f32 %v6983_v9 }
0x149f   :  { %v8499_v7 = vpop.eup %8498 }
0x14a0   :  { %v8501_v56 = vpop.eup %8500 }
0x14a1   :  { %v6990_v23 = vmul.f32 %v8501_v56, %v8499_v7 }
0x14a3   :  { %v7106_v62 = vpop.f32.mrb[168].mxu0  ;;  %v6991_v11 = vpack.c.bf16 %v6990_v23, %v6990_v23 }
0x14a4   :  { %v7914_v53 = vpop.f32.mrb[169].mxu0 }
0x14a5   :  { %7933 = vmatmul.mubr.bf16.vlgmr.msra.gmra.mrb[184].mxu1 %v6991_v11  ;;  %v7109_v6 = vpop.f32.mrb[170].mxu0 }
0x14a6   :  { %v7915_v34 = vpop.f32.mrb[171].mxu0 }
0x1578   :  { %v7194_v44 = vpop.f32.mrb[184].mxu1 }
0x1579   :  { %v7195_v5 = vadd.f32 %v7194_v44, %v7106_v62  ;;  %v7934_v16 = vpop.f32.mrb[185].mxu1 }
0x157a   :  { %v7197_v48 = vpop.f32.mrb[186].mxu1 }
0x157b   :  { %v7207_v12 = vadd.f32 %v7859_v46, %v7195_v5  ;;  %v7935_v3 = vpop.f32.mrb[187].mxu1 }
0x157d   :  { %v7208_v63 = vmax.f32 %v7207_v12, 0.0 }
0x157f   :  { %v7209_v58 = vpack.c.bf16 %v7208_v63, %v7208_v63 }
0x1581   :  { %7953 = vmatmul.mubr.bf16.vlgmr.msra.gmra.mrb[172].mxu0 %v7209_v58 }
0x1654   :  { %v7315_v36 = vpop.f32.mrb[172].mxu0 }
0x1655   :  { %v7316_v31 = vadd.f32 %v7860_v49, %v7315_v36  ;;  %v7954_v0 = vpop.f32.mrb[173].mxu0 }
0x1656   :  { %v7318_v10 = vpop.f32.mrb[174].mxu0 }
0x1657   :  { %7321 = vst [vmem:[%s12147_s11] sm:$0xff] %v7316_v31  ;;  %v7955_v59 = vpop.f32.mrb[175].mxu0 }
0x1658   :  { %7326 = vsyncpa [#allocation5], 1 }
0x1659   :  { %7327 = vsyncpa [#allocation7], 1 }
0x165a   :  { %7328 = vsyncpa [#allocation10], 1 }
0x165b   :  { %7329 = vsyncpa [#allocation13], 1 }

</bundles_post_ra>
